<compile_context>
chip_gen: v7x
topology: tpu7x:2x2x1
jax: 0.10.0
libtpu: 0.0.40
codegen_flags: <defaults>
</compile_context>

<pallas_src>
import math
import jax
import jax.numpy as jnp
from jax.experimental import pallas as pl
from jax.experimental.pallas import tpu as pltpu


def _gelu(v):
    # TODO(synk): torch F.gelu defaults to the exact erf form; tanh-approx GELU kept
    # (EUP-friendly) -- small systematic numeric difference vs PyTorch.
    return jax.nn.gelu(v, approximate=True)


def make_fnf1d_kernel(N, Npad, modes, width, width_final, width_lfunc,
                      Bt, d_out, n_spec_layers, compute_dtype, spectral_dtype):
    f32 = jnp.float32
    cdt = compute_dtype
    sdt = spectral_dtype
    W = width
    BtW = Bt * W

    # ---- layout helpers built only from "safe" ops (static lane slices, unit-dim
    #      expand, sublane select, concatenation) -- no minor-dim reshapes. -------
    def split_lanes(x, c):
        # (R, Bt*c) -> (R, Bt, c)
        return jnp.concatenate(
            [x[:, b * c:(b + 1) * c][:, None, :] for b in range(Bt)], axis=1)

    def merge_lanes(x):
        # (R, Bt, c) -> (R, Bt*c)
        return jnp.concatenate([x[:, b, :] for b in range(Bt)], axis=1)

    def to_mode_batched(z):
        # z: (2m, Bt*W)  rows = [Re modes ; Im modes], lanes = (b, c)
        #   -> (modes, Bt, 2W) with lanes = [Re c | Im c]
        z3 = split_lanes(z, W)                                   # (2m, Bt, W)
        return jnp.concatenate([z3[:modes], z3[modes:]], axis=-1)

    def from_mode_batched(o3):
        # (modes, Bt, 2W) -> (2m, Bt*W) rows = [Re modes ; Im modes]
        oc3 = jnp.concatenate([o3[:, :, :W], o3[:, :, W:]], axis=0)   # (2m, Bt, W)
        return merge_lanes(oc3)

    def kernel(x_ref, f_ref, g_ref,
               w0_ref, b0_ref, cw_ref, cb_ref, w2_ref, wl_ref,
               m1_ref, bm1_ref, m2_ref, bm2_ref,
               a1_ref, ba1_ref, a2_ref, ba2_ref,
               out_ref, hp_ref):
        # fc0 (Linear over channels), block-diag over the batch tile -> output is
        # already in the (spatial, batch*channel) lane-dense layout.
        h = jnp.dot(x_ref[0], w0_ref[...], preferred_element_type=f32) + b0_ref[...]

        # F.pad(x, [0, nx // padding]) along the spatial axis via the VMEM scratch.
        # NOTE: pad rows are re-zeroed every step on purpose -- guarding with
        # pl.when(program_id == 0) is not megacore-safe (the second TensorCore
        # never runs step 0 under "parallel" grid splitting) and the store is tiny.
        hp_ref[0:N, :] = h
        if Npad > N:
            hp_ref[N:Npad, :] = jnp.zeros((Npad - N, BtW), f32)
        hp = hp_ref[...].astype(cdt)          # loop-carried activation in compute dtype

        Fs = f_ref[...]        # (2m, Npad)  [Re ; Im] of e^{-2pi i k n / Npad}
        Gs = g_ref[...]        # (Npad, 2m)  irfft bases (incl. 1/Npad and 2x factors)

        # Fourier layers:  hp = act( w(hp) + speconv(hp) )
        for l in range(n_spec_layers):
            # 1x1 Conv1d == block-diag channel matmul (single lane-dense matmul)
            y1 = jnp.dot(hp, cw_ref[l], preferred_element_type=f32) + cb_ref[l]
            # truncated rfft: real+imag rows in ONE stacked matmul
            z = jnp.dot(Fs, hp.astype(sdt), preferred_element_type=f32)       # (2m, BtW)
            # per-mode complex channel mix on the MXU (mode-batched matmul)
            zri = to_mode_batched(z).astype(sdt)                              # (m, Bt, 2W)
            o3 = jnp.einsum('mbi,mio->mbo', zri,
                            w2_ref[l * modes:(l + 1) * modes],
                            preferred_element_type=f32)                       # (m, Bt, 2W)
            # truncated irfft back to the padded grid (ONE stacked matmul)
            y2 = jnp.dot(Gs, from_mode_batched(o3).astype(sdt),
                         preferred_element_type=f32)                          # (Npad, BtW)
            hp = _gelu(y1 + y2).astype(cdt)

        # LinearFunctionals1d: rfft(norm="forward"), truncate, complex mix, mode sum.
        # The 1/Npad norm and the "2*sum(real) - real[mode 0]" coefficients are
        # folded into wl_ref on the host -> a plain sum over modes here.
        z = jnp.dot(Fs, hp.astype(sdt), preferred_element_type=f32)           # (2m, BtW)
        zri = to_mode_batched(z).astype(sdt)                                  # (m, Bt, 2W)
        o3 = jnp.einsum('mbi,mio->mbo', zri, wl_ref[...],
                        preferred_element_type=f32)                           # (m, Bt, wl)
        x_temp = jnp.sum(o3, axis=0)                                          # (Bt, wl)

        # mlpfunc0 first layer, then trapz commuted through the (linear) second layer:
        #   trapz(a @ m2 + bm2) = (trapz_weights . a) @ m2 + bm2*(Npad-1)/Npad
        # (bm2 pre-scaled on the host).  This removes the largest matmul of the kernel.
        a = _gelu(jnp.dot(hp, m1_ref[...], preferred_element_type=f32)
                  + bm1_ref[...])                                             # (Npad, Bt*wf)
        v = (jnp.sum(a, axis=0, keepdims=True)
             - 0.5 * (a[0:1, :] + a[Npad - 1:Npad, :])) * (1.0 / Npad)        # (1, Bt*wf)
        vb = split_lanes(v, width_final)[0]                                   # (Bt, wf)
        t = jnp.dot(vb, m2_ref[...], preferred_element_type=f32) + bm2_ref[...]  # (Bt, wl)

        # concat functionals + final MLP (tiny, kept in f32); (Bt, d_out) output block
        zf = jnp.concatenate([x_temp, t], axis=1)                             # (Bt, 2*wl)
        zf = _gelu(jnp.dot(zf, a1_ref[...], preferred_element_type=f32) + ba1_ref[...])
        out_ref[...] = jnp.dot(zf, a2_ref[...], preferred_element_type=f32) + ba2_ref[...]

    return kernel


def _tpu_kind():
    try:
        return jax.devices()[0].device_kind.lower()
    except Exception:
        return ""


def _choose_batch_tile(B, block_batch, width):
    kind = _tpu_kind()
    if block_batch is None:
        # v5e MXU is 128x128: Bt*width = 128 fills one tile (Bt=4 at width=32).
        # v6e / v7x MXU is 256x256: Bt=8 -> Bt*width = 256.
        is_v5e = ("v5 lite" in kind) or ("v5e" in kind) or ("v5lite" in kind)
        block_batch = 4 if is_v5e else 8
    Bt = max(1, min(block_batch, B))
    T = -(-B // Bt)
    # v7x has 2 TensorCores sharing the chip: keep the ("parallel",) grid even so
    # both get work; if batch grows, grow T (grid steps), not Bt.
    if (("v7" in kind) or ("tpu7" in kind)) and B > 1:
        if T == 1:
            Bt = -(-B // 2)
            T = -(-B // Bt)
        if T % 2 == 1:
            T += 1
    return Bt, T


def fnf1d_forward(x, params, *, modes, padding, block_batch=None,
                  compute_dtype=jnp.bfloat16, spectral_dtype=jnp.float32):
    """x: (batch, d_in, nx) -- same convention as the PyTorch module. Returns (batch, d_out)."""
    f32 = jnp.float32
    B, d_in, N = x.shape
    Npad = N + N // padding
    assert modes <= Npad // 2 + 1, "modes1 must not exceed Npad//2 + 1"

    width = params['w0'].shape[1]
    wl = params['lr'].shape[2]
    wf = params['m1'].shape[1]
    d_out = params['a2'].shape[1]
    L = params['swr'].shape[0]
    Cin = params['w0'].shape[0]                      # d_in + grid feature

    Bt, T = _choose_batch_tile(B, block_batch, width)
    Bpad = T * Bt

    # ---- glue: channels-last + grid feature, fold the batch tile into lanes -----
    xp = jnp.transpose(x, (0, 2, 1)).astype(f32)                      # (B, N, d_in)
    grid_feat = jnp.broadcast_to(
        jnp.linspace(0.0, 1.0, N, dtype=f32)[None, :, None], (B, N, 1))
    xp = jnp.concatenate([xp, grid_feat], axis=-1)                    # (B, N, Cin)
    assert xp.shape[-1] == Cin
    if Bpad > B:
        xp = jnp.concatenate([xp, jnp.zeros((Bpad - B, N, Cin), f32)], axis=0)
    # lane index = b*Cin + c
    x_lane = (xp.reshape(T, Bt, N, Cin).transpose(0, 2, 1, 3)
                .reshape(T, N, Bt * Cin).astype(compute_dtype))

    # ---- glue: stacked truncated DFT / inverse-DFT matrices on the padded domain --
    k = jnp.arange(modes, dtype=f32)[:, None]
    n = jnp.arange(Npad, dtype=f32)[None, :]
    ang = 2.0 * jnp.pi * k * n / Npad                                 # (modes, Npad)
    frm, fim = jnp.cos(ang), -jnp.sin(ang)
    idx = jnp.arange(modes)
    special = (idx == 0)
    if Npad % 2 == 0:
        special = special | (idx == Npad // 2)
    ck = jnp.where(special, 1.0, 2.0).astype(f32)
    grm = (jnp.cos(ang) * ck[:, None] / Npad).T                       # (Npad, modes)
    gim = (-jnp.sin(ang) * ck[:, None] / Npad).T
    f_stack = jnp.concatenate([frm, fim], axis=0).astype(spectral_dtype)   # (2m, Npad)
    g_stack = jnp.concatenate([grm, gim], axis=1).astype(spectral_dtype)   # (Npad, 2m)

    # ---- glue: replicate per-channel weights block-diagonally over the batch tile --
    def bdiag(w):
        eye = jnp.eye(Bt, dtype=f32)
        a, b = w.shape[-2], w.shape[-1]
        out = jnp.einsum('ij,...ab->...iajb', eye, w)
        return out.reshape(*w.shape[:-2], Bt * a, Bt * b)

    w0bd = bdiag(params['w0']).astype(compute_dtype)                  # (Bt*Cin, Bt*W)
    b0t = jnp.tile(params['b0'], (1, Bt))                             # (1, Bt*W)
    cwbd = bdiag(params['cw']).astype(compute_dtype)                  # (L, Bt*W, Bt*W)
    cbt = jnp.tile(params['cb'], (1, 1, Bt))                          # (L, 1, Bt*W)
    m1bd = bdiag(params['m1']).astype(compute_dtype)                  # (Bt*W, Bt*wf)
    bm1t = jnp.tile(params['bm1'], (1, Bt))                           # (1, Bt*wf)
    # trapz commuted through the linear m2 layer: plain (wf, wl) weight, bias
    # pre-scaled by sum(trapz weights) = (Npad-1)/Npad.
    m2p = params['m2'].astype(f32)                                    # (wf, wl)
    bm2s = params['bm2'].astype(f32) * ((Npad - 1.0) / Npad)          # (1, wl)

    # spectral complex-mix weights, real/imag stacked: [[wr, wi], [-wi, wr]]
    swr, swi = params['swr'], params['swi']                           # (L, m, W, W)
    w2 = jnp.concatenate(
        [jnp.concatenate([swr, swi], axis=-1),
         jnp.concatenate([-swi, swr], axis=-1)], axis=-2)             # (L, m, 2W, 2W)
    w2 = w2.reshape(L * modes, 2 * width, 2 * width).astype(spectral_dtype)
    # LinearFunctionals mix (real output only); 1/Npad forward norm AND the
    # "2*sum over modes - mode 0" coefficients folded in.
    coef = jnp.where(jnp.arange(modes) == 0, 1.0, 2.0).astype(f32)[:, None, None]
    wlm = (coef * jnp.concatenate([params['lr'], -params['li']], axis=1) / Npad
           ).astype(spectral_dtype)                                   # (m, 2W, wl)

    inputs = [x_lane, f_stack, g_stack,
              w0bd, b0t, cwbd, cbt, w2, wlm,
              m1bd, bm1t, m2p, bm2s,
              params['a1'], params['ba1'], params['a2'], params['ba2']]

    def full_spec(a):
        nd = a.ndim
        return pl.BlockSpec(a.shape, lambda t, _nd=nd: (0,) * _nd)

    in_specs = [pl.BlockSpec((1, N, Bt * Cin), lambda t: (t, 0, 0))]
    in_specs += [full_spec(a) for a in inputs[1:]]
    out_spec = pl.BlockSpec((Bt, d_out), lambda t: (t, 0))

    kernel = make_fnf1d_kernel(N, Npad, modes, width, wf, wl, Bt, d_out, L,
                               compute_dtype, spectral_dtype)

    # Advisory cost estimate so XLA schedules the host-side glue around the call.
    BtW = Bt * width
    macs = (N * (Bt * Cin) * BtW
            + L * (Npad * BtW * BtW
                   + 2 * (2 * modes) * Npad * BtW
                   + modes * Bt * (2 * width) * (2 * width))
            + (2 * modes) * Npad * BtW + modes * Bt * (2 * width) * wl
            + Npad * BtW * (Bt * wf)
            + Bt * wf * wl
            + Bt * (2 * wl) * (2 * wf) + Bt * (2 * wf) * d_out)
    trans = L * Npad * BtW + Npad * Bt * wf + Bt * 2 * wf
    bytes_accessed = int(sum(int(a.size) * a.dtype.itemsize for a in inputs)
                         + Bpad * d_out * 4)
    cost = pl.CostEstimate(flops=int(2 * macs * T),
                           transcendentals=int(trans * T),
                           bytes_accessed=bytes_accessed)

    out = pl.pallas_call(
        kernel,
        grid=(T,),
        in_specs=in_specs,
        out_specs=out_spec,
        out_shape=jax.ShapeDtypeStruct((Bpad, d_out), f32),
        scratch_shapes=[pltpu.VMEM((Npad, Bt * width), f32)],
        compiler_params=pltpu.CompilerParams(dimension_semantics=("parallel",)),
        cost_estimate=cost,
    )(*inputs)
    return out[:B]


def init_params(key, *, d_in, width, width_final, width_lfunc, d_out, modes,
                n_layers, get_grid=True):
    """Deterministic synthetic parameters matching the module's shapes."""
    L = n_layers - 1
    ks = iter(jax.random.split(key, 24))

    def unif(k, shape, bound):
        return jax.random.uniform(k, shape, jnp.float32, -bound, bound)

    din0 = d_in + (1 if get_grid else 0)
    p = {}
    b = 1.0 / math.sqrt(din0)
    p['w0'] = unif(next(ks), (din0, width), b)
    p['b0'] = unif(next(ks), (1, width), b)

    scale = 1.0 / (width * width)
    # SpectralConv1d complex weights, stored as (layer, modes, in, out)
    p['swr'] = scale * jax.random.uniform(next(ks), (L, modes, width, width), jnp.float32)
    p['swi'] = scale * jax.random.uniform(next(ks), (L, modes, width, width), jnp.float32)

    b = 1.0 / math.sqrt(width)
    p['cw'] = unif(next(ks), (L, width, width), b)          # 1x1 conv, (layer, in, out)
    p['cb'] = unif(next(ks), (L, 1, width), b)

    scale_l = 1.0 / (width * width_lfunc)
    p['lr'] = scale_l * jax.random.uniform(next(ks), (modes, width, width_lfunc), jnp.float32)
    p['li'] = scale_l * jax.random.uniform(next(ks), (modes, width, width_lfunc), jnp.float32)

    b = 1.0 / math.sqrt(width)
    p['m1'] = unif(next(ks), (width, width_final), b)
    p['bm1'] = unif(next(ks), (1, width_final), b)
    b = 1.0 / math.sqrt(width_final)
    p['m2'] = unif(next(ks), (width_final, width_lfunc), b)
    p['bm2'] = unif(next(ks), (1, width_lfunc), b)

    b = 1.0 / math.sqrt(2 * width_lfunc)
    p['a1'] = unif(next(ks), (2 * width_lfunc, 2 * width_final), b)
    p['ba1'] = unif(next(ks), (1, 2 * width_final), b)
    b = 1.0 / math.sqrt(2 * width_final)
    p['a2'] = unif(next(ks), (2 * width_final, d_out), b)
    p['ba2'] = unif(next(ks), (1, d_out), b)
    return p


if __name__ == "__main__":
    # Small shapes consistent with the module: (batch, d_in, nx)
    B, d_in, nx = 16, 1, 64
    modes1, width, width_final, d_out = 8, 32, 64, 3
    padding, n_layers = 8, 4
    width_lfunc = width  # width_lfunc=None -> width

    key = jax.random.PRNGKey(0)
    kx, kp = jax.random.split(key)
    x = jax.random.normal(kx, (B, d_in, nx), jnp.float32)
    params = init_params(kp, d_in=d_in, width=width, width_final=width_final,
                         width_lfunc=width_lfunc, d_out=d_out, modes=modes1,
                         n_layers=n_layers, get_grid=True)

    # block_batch=None -> generation-aware batch tile (Bt*width = 256 on v6e/v7x,
    # 128 on v5e); grid stays even so both v7x TensorCores get work.
    out = fnf1d_forward(x, params, modes=modes1, padding=padding, block_batch=None)
    out = jax.block_until_ready(out)
    assert out.shape == (B, d_out)
    assert bool(jnp.all(jnp.isfinite(out)))
    print("KERNEL_OK")
</pallas_src>

<mosaic_0001>
module attributes {stable_mosaic.version = 11 : i64} {
  func.func @kernel(%arg0: i32, %arg1: memref<1x64x16xbf16, #tpu.memory_space<vmem>>, %arg2: memref<16x72xf32, #tpu.memory_space<vmem>>, %arg3: memref<72x16xf32, #tpu.memory_space<vmem>>, %arg4: memref<16x256xbf16, #tpu.memory_space<vmem>>, %arg5: memref<1x256xf32, #tpu.memory_space<vmem>>, %arg6: memref<3x256x256xbf16, #tpu.memory_space<vmem>>, %arg7: memref<3x1x256xf32, #tpu.memory_space<vmem>>, %arg8: memref<24x64x64xf32, #tpu.memory_space<vmem>>, %arg9: memref<8x64x32xf32, #tpu.memory_space<vmem>>, %arg10: memref<256x512xbf16, #tpu.memory_space<vmem>>, %arg11: memref<1x512xf32, #tpu.memory_space<vmem>>, %arg12: memref<64x32xf32, #tpu.memory_space<vmem>>, %arg13: memref<1x32xf32, #tpu.memory_space<vmem>>, %arg14: memref<64x128xf32, #tpu.memory_space<vmem>>, %arg15: memref<1x128xf32, #tpu.memory_space<vmem>>, %arg16: memref<128x3xf32, #tpu.memory_space<vmem>>, %arg17: memref<1x3xf32, #tpu.memory_space<vmem>>, %arg18: memref<8x3xf32, #tpu.memory_space<vmem>>, %arg19: memref<72x256xf32, #tpu.memory_space<vmem>>) attributes {dimension_semantics = [#tpu.dimension_semantics<parallel>], iteration_bounds = array<i64: 2>, scalar_prefetch = 0 : i64, scratch_operands = 1 : i64, tpu.core_type = #tpu.core_type<tc>, window_params = [{transform_indices = @transform_0, window_bounds = array<i64: 1, 64, 16>}, {pipeline_mode = #tpu.pipeline_mode<synchronous>, transform_indices = @transform_1, window_bounds = array<i64: 16, 72>}, {pipeline_mode = #tpu.pipeline_mode<synchronous>, transform_indices = @transform_2, window_bounds = array<i64: 72, 16>}, {pipeline_mode = #tpu.pipeline_mode<synchronous>, transform_indices = @transform_3, window_bounds = array<i64: 16, 256>}, {pipeline_mode = #tpu.pipeline_mode<synchronous>, transform_indices = @transform_4, window_bounds = array<i64: 1, 256>}, {pipeline_mode = #tpu.pipeline_mode<synchronous>, transform_indices = @transform_5, window_bounds = array<i64: 3, 256, 256>}, {pipeline_mode = #tpu.pipeline_mode<synchronous>, transform_indices = @transform_6, window_bounds = array<i64: 3, 1, 256>}, {pipeline_mode = #tpu.pipeline_mode<synchronous>, transform_indices = @transform_7, window_bounds = array<i64: 24, 64, 64>}, {pipeline_mode = #tpu.pipeline_mode<synchronous>, transform_indices = @transform_8, window_bounds = array<i64: 8, 64, 32>}, {pipeline_mode = #tpu.pipeline_mode<synchronous>, transform_indices = @transform_9, window_bounds = array<i64: 256, 512>}, {pipeline_mode = #tpu.pipeline_mode<synchronous>, transform_indices = @transform_10, window_bounds = array<i64: 1, 512>}, {pipeline_mode = #tpu.pipeline_mode<synchronous>, transform_indices = @transform_11, window_bounds = array<i64: 64, 32>}, {pipeline_mode = #tpu.pipeline_mode<synchronous>, transform_indices = @transform_12, window_bounds = array<i64: 1, 32>}, {pipeline_mode = #tpu.pipeline_mode<synchronous>, transform_indices = @transform_13, window_bounds = array<i64: 64, 128>}, {pipeline_mode = #tpu.pipeline_mode<synchronous>, transform_indices = @transform_14, window_bounds = array<i64: 1, 128>}, {pipeline_mode = #tpu.pipeline_mode<synchronous>, transform_indices = @transform_15, window_bounds = array<i64: 128, 3>}, {pipeline_mode = #tpu.pipeline_mode<synchronous>, transform_indices = @transform_16, window_bounds = array<i64: 1, 3>}, {transform_indices = @transform_17, window_bounds = array<i64: 8, 3>}]} {
    %c0 = arith.constant 0 : index
    %c0_0 = arith.constant 0 : index
    %c0_1 = arith.constant 0 : index
    %0 = vector.load %arg1[%c0, %c0_0, %c0_1] : memref<1x64x16xbf16, #tpu.memory_space<vmem>>, vector<1x64x16xbf16>
    %1 = vector.shape_cast %0 : vector<1x64x16xbf16> to vector<64x16xbf16>
    %c0_2 = arith.constant 0 : index
    %c0_3 = arith.constant 0 : index
    %2 = vector.load %arg4[%c0_2, %c0_3] : memref<16x256xbf16, #tpu.memory_space<vmem>>, vector<16x256xbf16>
    %cst = arith.constant dense<0.000000e+00> : vector<64x256xf32>
    %3 = tpu.matmul %1, %2, %cst {dimension_numbers = #tpu.dot_dimension_numbers<[1], [0], [0], [1], [0, 0, 1, 1], [], []>} : vector<64x16xbf16>, vector<16x256xbf16>, vector<64x256xf32> -> vector<64x256xf32>
    %c0_4 = arith.constant 0 : index
    %c0_5 = arith.constant 0 : index
    %4 = vector.load %arg5[%c0_4, %c0_5] : memref<1x256xf32, #tpu.memory_space<vmem>>, vector<1x256xf32>
    %5 = vector.broadcast %4 : vector<1x256xf32> to vector<64x256xf32>
    %6 = arith.addf %3, %5 : vector<64x256xf32>
    %c0_6 = arith.constant 0 : index
    %c0_7 = arith.constant 0 : index
    %7 = vector.load %arg19[%c0_6, %c0_7] : memref<72x256xf32, #tpu.memory_space<vmem>>, vector<64x256xf32>
    tpu.vector_store %arg19[%c0_6, %c0_7], %6 {strides = array<i32>} : memref<72x256xf32, #tpu.memory_space<vmem>>, vector<64x256xf32>,
    %cst_8 = arith.constant 0.000000e+00 : f32
    %8 = vector.broadcast %cst_8 : f32 to vector<8x256xf32>
    %c64 = arith.constant 64 : index
    %c0_9 = arith.constant 0 : index
    %9 = vector.load %arg19[%c64, %c0_9] : memref<72x256xf32, #tpu.memory_space<vmem>>, vector<8x256xf32>
    tpu.vector_store %arg19[%c64, %c0_9], %8 {strides = array<i32>} : memref<72x256xf32, #tpu.memory_space<vmem>>, vector<8x256xf32>,
    %c0_10 = arith.constant 0 : index
    %c0_11 = arith.constant 0 : index
    %10 = vector.load %arg19[%c0_10, %c0_11] : memref<72x256xf32, #tpu.memory_space<vmem>>, vector<72x256xf32>
    %11 = arith.truncf %10 : vector<72x256xf32> to vector<72x256xbf16>
    %c0_12 = arith.constant 0 : index
    %c0_13 = arith.constant 0 : index
    %12 = vector.load %arg2[%c0_12, %c0_13] : memref<16x72xf32, #tpu.memory_space<vmem>>, vector<16x72xf32>
    %c0_14 = arith.constant 0 : index
    %c0_15 = arith.constant 0 : index
    %13 = vector.load %arg3[%c0_14, %c0_15] : memref<72x16xf32, #tpu.memory_space<vmem>>, vector<72x16xf32>
    %c0_16 = arith.constant 0 : index
    %c0_17 = arith.constant 0 : index
    %c0_18 = arith.constant 0 : index
    %14 = vector.load %arg6[%c0_16, %c0_17, %c0_18] : memref<3x256x256xbf16, #tpu.memory_space<vmem>>, vector<1x256x256xbf16>
    %15 = vector.shape_cast %14 : vector<1x256x256xbf16> to vector<256x256xbf16>
    %cst_19 = arith.constant dense<0.000000e+00> : vector<72x256xf32>
    %16 = tpu.matmul %11, %15, %cst_19 {dimension_numbers = #tpu.dot_dimension_numbers<[1], [0], [0], [1], [0, 0, 1, 1], [], []>} : vector<72x256xbf16>, vector<256x256xbf16>, vector<72x256xf32> -> vector<72x256xf32>
    %c0_20 = arith.constant 0 : index
    %c0_21 = arith.constant 0 : index
    %c0_22 = arith.constant 0 : index
    %17 = vector.load %arg7[%c0_20, %c0_21, %c0_22] : memref<3x1x256xf32, #tpu.memory_space<vmem>>, vector<1x1x256xf32>
    %18 = vector.shape_cast %17 : vector<1x1x256xf32> to vector<1x256xf32>
    %19 = vector.broadcast %18 : vector<1x256xf32> to vector<72x256xf32>
    %20 = arith.addf %16, %19 : vector<72x256xf32>
    %21 = arith.extf %11 : vector<72x256xbf16> to vector<72x256xf32>
    %cst_23 = arith.constant dense<0.000000e+00> : vector<16x256xf32>
    %22 = tpu.matmul %12, %21, %cst_23 {dimension_numbers = #tpu.dot_dimension_numbers<[1], [0], [0], [1], [0, 0, 1, 1], [], []>} : vector<16x72xf32>, vector<72x256xf32>, vector<16x256xf32> -> vector<16x256xf32>
    %23 = vector.extract_strided_slice %22 {offsets = [0, 0], sizes = [16, 32], strides = [1, 1]} : vector<16x256xf32> to vector<16x32xf32>
    %24 = vector.shape_cast %23 : vector<16x32xf32> to vector<16x1x32xf32>
    %25 = vector.extract_strided_slice %22 {offsets = [0, 32], sizes = [16, 32], strides = [1, 1]} : vector<16x256xf32> to vector<16x32xf32>
    %26 = vector.shape_cast %25 : vector<16x32xf32> to vector<16x1x32xf32>
    %27 = vector.extract_strided_slice %22 {offsets = [0, 64], sizes = [16, 32], strides = [1, 1]} : vector<16x256xf32> to vector<16x32xf32>
    %28 = vector.shape_cast %27 : vector<16x32xf32> to vector<16x1x32xf32>
    %29 = vector.extract_strided_slice %22 {offsets = [0, 96], sizes = [16, 32], strides = [1, 1]} : vector<16x256xf32> to vector<16x32xf32>
    %30 = vector.shape_cast %29 : vector<16x32xf32> to vector<16x1x32xf32>
    %31 = vector.extract_strided_slice %22 {offsets = [0, 128], sizes = [16, 32], strides = [1, 1]} : vector<16x256xf32> to vector<16x32xf32>
    %32 = vector.shape_cast %31 : vector<16x32xf32> to vector<16x1x32xf32>
    %33 = vector.extract_strided_slice %22 {offsets = [0, 160], sizes = [16, 32], strides = [1, 1]} : vector<16x256xf32> to vector<16x32xf32>
    %34 = vector.shape_cast %33 : vector<16x32xf32> to vector<16x1x32xf32>
    %35 = vector.extract_strided_slice %22 {offsets = [0, 192], sizes = [16, 32], strides = [1, 1]} : vector<16x256xf32> to vector<16x32xf32>
    %36 = vector.shape_cast %35 : vector<16x32xf32> to vector<16x1x32xf32>
    %37 = vector.extract_strided_slice %22 {offsets = [0, 224], sizes = [16, 32], strides = [1, 1]} : vector<16x256xf32> to vector<16x32xf32>
    %38 = vector.shape_cast %37 : vector<16x32xf32> to vector<16x1x32xf32>
    %39 = tpu.concatenate %24, %26, %28, %30, %32, %34, %36, %38 in 1 : vector<16x1x32xf32>, vector<16x1x32xf32>, vector<16x1x32xf32>, vector<16x1x32xf32>, vector<16x1x32xf32>, vector<16x1x32xf32>, vector<16x1x32xf32>, vector<16x1x32xf32> -> vector<16x8x32xf32>
    %40 = vector.extract_strided_slice %39 {offsets = [0, 0, 0], sizes = [8, 8, 32], strides = [1, 1, 1]} : vector<16x8x32xf32> to vector<8x8x32xf32>
    %41 = vector.extract_strided_slice %39 {offsets = [8, 0, 0], sizes = [8, 8, 32], strides = [1, 1, 1]} : vector<16x8x32xf32> to vector<8x8x32xf32>
    %42 = tpu.concatenate %40, %41 in 2 : vector<8x8x32xf32>, vector<8x8x32xf32> -> vector<8x8x64xf32>
    %c0_24 = arith.constant 0 : index
    %c0_25 = arith.constant 0 : index
    %c0_26 = arith.constant 0 : index
    %43 = vector.load %arg8[%c0_24, %c0_25, %c0_26] : memref<24x64x64xf32, #tpu.memory_space<vmem>>, vector<8x64x64xf32>
    "tpu.trace_start"() <{level = 10 : i32, message = "mbi,mio->mbo"}> : () -> ()
    %cst_27 = arith.constant dense<0.000000e+00> : vector<8x8x64xf32>
    %44 = tpu.matmul %42, %43, %cst_27 {dimension_numbers = #tpu.dot_dimension_numbers<[2], [1], [1], [2], [0, 0, 0, 1, 1, 2], [0], [0]>} : vector<8x8x64xf32>, vector<8x64x64xf32>, vector<8x8x64xf32> -> vector<8x8x64xf32>
    "tpu.trace_stop"() : () -> ()
    %45 = vector.extract_strided_slice %44 {offsets = [0, 0, 0], sizes = [8, 8, 32], strides = [1, 1, 1]} : vector<8x8x64xf32> to vector<8x8x32xf32>
    %46 = vector.extract_strided_slice %44 {offsets = [0, 0, 32], sizes = [8, 8, 32], strides = [1, 1, 1]} : vector<8x8x64xf32> to vector<8x8x32xf32>
    %47 = tpu.concatenate %45, %46 in 0 : vector<8x8x32xf32>, vector<8x8x32xf32> -> vector<16x8x32xf32>
    %48 = vector.extract_strided_slice %47 {offsets = [0, 0, 0], sizes = [16, 1, 32], strides = [1, 1, 1]} : vector<16x8x32xf32> to vector<16x1x32xf32>
    %49 = vector.shape_cast %48 : vector<16x1x32xf32> to vector<16x32xf32>
    %50 = vector.extract_strided_slice %47 {offsets = [0, 1, 0], sizes = [16, 1, 32], strides = [1, 1, 1]} : vector<16x8x32xf32> to vector<16x1x32xf32>
    %51 = vector.shape_cast %50 : vector<16x1x32xf32> to vector<16x32xf32>
    %52 = vector.extract_strided_slice %47 {offsets = [0, 2, 0], sizes = [16, 1, 32], strides = [1, 1, 1]} : vector<16x8x32xf32> to vector<16x1x32xf32>
    %53 = vector.shape_cast %52 : vector<16x1x32xf32> to vector<16x32xf32>
    %54 = vector.extract_strided_slice %47 {offsets = [0, 3, 0], sizes = [16, 1, 32], strides = [1, 1, 1]} : vector<16x8x32xf32> to vector<16x1x32xf32>
    %55 = vector.shape_cast %54 : vector<16x1x32xf32> to vector<16x32xf32>
    %56 = vector.extract_strided_slice %47 {offsets = [0, 4, 0], sizes = [16, 1, 32], strides = [1, 1, 1]} : vector<16x8x32xf32> to vector<16x1x32xf32>
    %57 = vector.shape_cast %56 : vector<16x1x32xf32> to vector<16x32xf32>
    %58 = vector.extract_strided_slice %47 {offsets = [0, 5, 0], sizes = [16, 1, 32], strides = [1, 1, 1]} : vector<16x8x32xf32> to vector<16x1x32xf32>
    %59 = vector.shape_cast %58 : vector<16x1x32xf32> to vector<16x32xf32>
    %60 = vector.extract_strided_slice %47 {offsets = [0, 6, 0], sizes = [16, 1, 32], strides = [1, 1, 1]} : vector<16x8x32xf32> to vector<16x1x32xf32>
    %61 = vector.shape_cast %60 : vector<16x1x32xf32> to vector<16x32xf32>
    %62 = vector.extract_strided_slice %47 {offsets = [0, 7, 0], sizes = [16, 1, 32], strides = [1, 1, 1]} : vector<16x8x32xf32> to vector<16x1x32xf32>
    %63 = vector.shape_cast %62 : vector<16x1x32xf32> to vector<16x32xf32>
    %64 = tpu.concatenate %49, %51, %53, %55, %57, %59, %61, %63 in 1 : vector<16x32xf32>, vector<16x32xf32>, vector<16x32xf32>, vector<16x32xf32>, vector<16x32xf32>, vector<16x32xf32>, vector<16x32xf32>, vector<16x32xf32> -> vector<16x256xf32>
    %cst_28 = arith.constant dense<0.000000e+00> : vector<72x256xf32>
    %65 = tpu.matmul %13, %64, %cst_28 {dimension_numbers = #tpu.dot_dimension_numbers<[1], [0], [0], [1], [0, 0, 1, 1], [], []>} : vector<72x16xf32>, vector<16x256xf32>, vector<72x256xf32> -> vector<72x256xf32>
    %66 = arith.addf %20, %65 : vector<72x256xf32>
    %67 = arith.mulf %66, %66 : vector<72x256xf32>
    %68 = arith.mulf %66, %67 : vector<72x256xf32>
    %cst_29 = arith.constant 4.471500e-02 : f32
    %69 = vector.broadcast %cst_29 : f32 to vector<72x256xf32>
    %70 = arith.mulf %69, %68 : vector<72x256xf32>
    %71 = arith.addf %66, %70 : vector<72x256xf32>
    %cst_30 = arith.constant 0.797884583 : f32
    %72 = vector.broadcast %cst_30 : f32 to vector<72x256xf32>
    %73 = arith.mulf %72, %71 : vector<72x256xf32>
    %74 = math.tanh %73 : vector<72x256xf32>
    %cst_31 = arith.constant 1.000000e+00 : f32
    %75 = vector.broadcast %cst_31 : f32 to vector<72x256xf32>
    %76 = arith.addf %75, %74 : vector<72x256xf32>
    %cst_32 = arith.constant 5.000000e-01 : f32
    %77 = vector.broadcast %cst_32 : f32 to vector<72x256xf32>
    %78 = arith.mulf %77, %76 : vector<72x256xf32>
    %79 = arith.mulf %66, %78 : vector<72x256xf32>
    %80 = arith.truncf %79 : vector<72x256xf32> to vector<72x256xbf16>
    %c1 = arith.constant 1 : index
    %c0_33 = arith.constant 0 : index
    %c0_34 = arith.constant 0 : index
    %81 = vector.load %arg6[%c1, %c0_33, %c0_34] : memref<3x256x256xbf16, #tpu.memory_space<vmem>>, vector<1x256x256xbf16>
    %82 = vector.shape_cast %81 : vector<1x256x256xbf16> to vector<256x256xbf16>
    %cst_35 = arith.constant dense<0.000000e+00> : vector<72x256xf32>
    %83 = tpu.matmul %80, %82, %cst_35 {dimension_numbers = #tpu.dot_dimension_numbers<[1], [0], [0], [1], [0, 0, 1, 1], [], []>} : vector<72x256xbf16>, vector<256x256xbf16>, vector<72x256xf32> -> vector<72x256xf32>
    %c1_36 = arith.constant 1 : index
    %c0_37 = arith.constant 0 : index
    %c0_38 = arith.constant 0 : index
    %84 = vector.load %arg7[%c1_36, %c0_37, %c0_38] : memref<3x1x256xf32, #tpu.memory_space<vmem>>, vector<1x1x256xf32>
    %85 = vector.shape_cast %84 : vector<1x1x256xf32> to vector<1x256xf32>
    %86 = vector.broadcast %85 : vector<1x256xf32> to vector<72x256xf32>
    %87 = arith.addf %83, %86 : vector<72x256xf32>
    %88 = arith.extf %80 : vector<72x256xbf16> to vector<72x256xf32>
    %cst_39 = arith.constant dense<0.000000e+00> : vector<16x256xf32>
    %89 = tpu.matmul %12, %88, %cst_39 {dimension_numbers = #tpu.dot_dimension_numbers<[1], [0], [0], [1], [0, 0, 1, 1], [], []>} : vector<16x72xf32>, vector<72x256xf32>, vector<16x256xf32> -> vector<16x256xf32>
    %90 = vector.extract_strided_slice %89 {offsets = [0, 0], sizes = [16, 32], strides = [1, 1]} : vector<16x256xf32> to vector<16x32xf32>
    %91 = vector.shape_cast %90 : vector<16x32xf32> to vector<16x1x32xf32>
    %92 = vector.extract_strided_slice %89 {offsets = [0, 32], sizes = [16, 32], strides = [1, 1]} : vector<16x256xf32> to vector<16x32xf32>
    %93 = vector.shape_cast %92 : vector<16x32xf32> to vector<16x1x32xf32>
    %94 = vector.extract_strided_slice %89 {offsets = [0, 64], sizes = [16, 32], strides = [1, 1]} : vector<16x256xf32> to vector<16x32xf32>
    %95 = vector.shape_cast %94 : vector<16x32xf32> to vector<16x1x32xf32>
    %96 = vector.extract_strided_slice %89 {offsets = [0, 96], sizes = [16, 32], strides = [1, 1]} : vector<16x256xf32> to vector<16x32xf32>
    %97 = vector.shape_cast %96 : vector<16x32xf32> to vector<16x1x32xf32>
    %98 = vector.extract_strided_slice %89 {offsets = [0, 128], sizes = [16, 32], strides = [1, 1]} : vector<16x256xf32> to vector<16x32xf32>
    %99 = vector.shape_cast %98 : vector<16x32xf32> to vector<16x1x32xf32>
    %100 = vector.extract_strided_slice %89 {offsets = [0, 160], sizes = [16, 32], strides = [1, 1]} : vector<16x256xf32> to vector<16x32xf32>
    %101 = vector.shape_cast %100 : vector<16x32xf32> to vector<16x1x32xf32>
    %102 = vector.extract_strided_slice %89 {offsets = [0, 192], sizes = [16, 32], strides = [1, 1]} : vector<16x256xf32> to vector<16x32xf32>
    %103 = vector.shape_cast %102 : vector<16x32xf32> to vector<16x1x32xf32>
    %104 = vector.extract_strided_slice %89 {offsets = [0, 224], sizes = [16, 32], strides = [1, 1]} : vector<16x256xf32> to vector<16x32xf32>
    %105 = vector.shape_cast %104 : vector<16x32xf32> to vector<16x1x32xf32>
    %106 = tpu.concatenate %91, %93, %95, %97, %99, %101, %103, %105 in 1 : vector<16x1x32xf32>, vector<16x1x32xf32>, vector<16x1x32xf32>, vector<16x1x32xf32>, vector<16x1x32xf32>, vector<16x1x32xf32>, vector<16x1x32xf32>, vector<16x1x32xf32> -> vector<16x8x32xf32>
    %107 = vector.extract_strided_slice %106 {offsets = [0, 0, 0], sizes = [8, 8, 32], strides = [1, 1, 1]} : vector<16x8x32xf32> to vector<8x8x32xf32>
    %108 = vector.extract_strided_slice %106 {offsets = [8, 0, 0], sizes = [8, 8, 32], strides = [1, 1, 1]} : vector<16x8x32xf32> to vector<8x8x32xf32>
    %109 = tpu.concatenate %107, %108 in 2 : vector<8x8x32xf32>, vector<8x8x32xf32> -> vector<8x8x64xf32>
    %c8 = arith.constant 8 : index
    %c0_40 = arith.constant 0 : index
    %c0_41 = arith.constant 0 : index
    %110 = vector.load %arg8[%c8, %c0_40, %c0_41] : memref<24x64x64xf32, #tpu.memory_space<vmem>>, vector<8x64x64xf32>
    "tpu.trace_start"() <{level = 10 : i32, message = "mbi,mio->mbo"}> : () -> ()
    %cst_42 = arith.constant dense<0.000000e+00> : vector<8x8x64xf32>
    %111 = tpu.matmul %109, %110, %cst_42 {dimension_numbers = #tpu.dot_dimension_numbers<[2], [1], [1], [2], [0, 0, 0, 1, 1, 2], [0], [0]>} : vector<8x8x64xf32>, vector<8x64x64xf32>, vector<8x8x64xf32> -> vector<8x8x64xf32>
    "tpu.trace_stop"() : () -> ()
    %112 = vector.extract_strided_slice %111 {offsets = [0, 0, 0], sizes = [8, 8, 32], strides = [1, 1, 1]} : vector<8x8x64xf32> to vector<8x8x32xf32>
    %113 = vector.extract_strided_slice %111 {offsets = [0, 0, 32], sizes = [8, 8, 32], strides = [1, 1, 1]} : vector<8x8x64xf32> to vector<8x8x32xf32>
    %114 = tpu.concatenate %112, %113 in 0 : vector<8x8x32xf32>, vector<8x8x32xf32> -> vector<16x8x32xf32>
    %115 = vector.extract_strided_slice %114 {offsets = [0, 0, 0], sizes = [16, 1, 32], strides = [1, 1, 1]} : vector<16x8x32xf32> to vector<16x1x32xf32>
    %116 = vector.shape_cast %115 : vector<16x1x32xf32> to vector<16x32xf32>
    %117 = vector.extract_strided_slice %114 {offsets = [0, 1, 0], sizes = [16, 1, 32], strides = [1, 1, 1]} : vector<16x8x32xf32> to vector<16x1x32xf32>
    %118 = vector.shape_cast %117 : vector<16x1x32xf32> to vector<16x32xf32>
    %119 = vector.extract_strided_slice %114 {offsets = [0, 2, 0], sizes = [16, 1, 32], strides = [1, 1, 1]} : vector<16x8x32xf32> to vector<16x1x32xf32>
    %120 = vector.shape_cast %119 : vector<16x1x32xf32> to vector<16x32xf32>
    %121 = vector.extract_strided_slice %114 {offsets = [0, 3, 0], sizes = [16, 1, 32], strides = [1, 1, 1]} : vector<16x8x32xf32> to vector<16x1x32xf32>
    %122 = vector.shape_cast %121 : vector<16x1x32xf32> to vector<16x32xf32>
    %123 = vector.extract_strided_slice %114 {offsets = [0, 4, 0], sizes = [16, 1, 32], strides = [1, 1, 1]} : vector<16x8x32xf32> to vector<16x1x32xf32>
    %124 = vector.shape_cast %123 : vector<16x1x32xf32> to vector<16x32xf32>
    %125 = vector.extract_strided_slice %114 {offsets = [0, 5, 0], sizes = [16, 1, 32], strides = [1, 1, 1]} : vector<16x8x32xf32> to vector<16x1x32xf32>
    %126 = vector.shape_cast %125 : vector<16x1x32xf32> to vector<16x32xf32>
    %127 = vector.extract_strided_slice %114 {offsets = [0, 6, 0], sizes = [16, 1, 32], strides = [1, 1, 1]} : vector<16x8x32xf32> to vector<16x1x32xf32>
    %128 = vector.shape_cast %127 : vector<16x1x32xf32> to vector<16x32xf32>
    %129 = vector.extract_strided_slice %114 {offsets = [0, 7, 0], sizes = [16, 1, 32], strides = [1, 1, 1]} : vector<16x8x32xf32> to vector<16x1x32xf32>
    %130 = vector.shape_cast %129 : vector<16x1x32xf32> to vector<16x32xf32>
    %131 = tpu.concatenate %116, %118, %120, %122, %124, %126, %128, %130 in 1 : vector<16x32xf32>, vector<16x32xf32>, vector<16x32xf32>, vector<16x32xf32>, vector<16x32xf32>, vector<16x32xf32>, vector<16x32xf32>, vector<16x32xf32> -> vector<16x256xf32>
    %cst_43 = arith.constant dense<0.000000e+00> : vector<72x256xf32>
    %132 = tpu.matmul %13, %131, %cst_43 {dimension_numbers = #tpu.dot_dimension_numbers<[1], [0], [0], [1], [0, 0, 1, 1], [], []>} : vector<72x16xf32>, vector<16x256xf32>, vector<72x256xf32> -> vector<72x256xf32>
    %133 = arith.addf %87, %132 : vector<72x256xf32>
    %134 = arith.mulf %133, %133 : vector<72x256xf32>
    %135 = arith.mulf %133, %134 : vector<72x256xf32>
    %cst_44 = arith.constant 4.471500e-02 : f32
    %136 = vector.broadcast %cst_44 : f32 to vector<72x256xf32>
    %137 = arith.mulf %136, %135 : vector<72x256xf32>
    %138 = arith.addf %133, %137 : vector<72x256xf32>
    %cst_45 = arith.constant 0.797884583 : f32
    %139 = vector.broadcast %cst_45 : f32 to vector<72x256xf32>
    %140 = arith.mulf %139, %138 : vector<72x256xf32>
    %141 = math.tanh %140 : vector<72x256xf32>
    %cst_46 = arith.constant 1.000000e+00 : f32
    %142 = vector.broadcast %cst_46 : f32 to vector<72x256xf32>
    %143 = arith.addf %142, %141 : vector<72x256xf32>
    %cst_47 = arith.constant 5.000000e-01 : f32
    %144 = vector.broadcast %cst_47 : f32 to vector<72x256xf32>
    %145 = arith.mulf %144, %143 : vector<72x256xf32>
    %146 = arith.mulf %133, %145 : vector<72x256xf32>
    %147 = arith.truncf %146 : vector<72x256xf32> to vector<72x256xbf16>
    %c2 = arith.constant 2 : index
    %c0_48 = arith.constant 0 : index
    %c0_49 = arith.constant 0 : index
    %148 = vector.load %arg6[%c2, %c0_48, %c0_49] : memref<3x256x256xbf16, #tpu.memory_space<vmem>>, vector<1x256x256xbf16>
    %149 = vector.shape_cast %148 : vector<1x256x256xbf16> to vector<256x256xbf16>
    %cst_50 = arith.constant dense<0.000000e+00> : vector<72x256xf32>
    %150 = tpu.matmul %147, %149, %cst_50 {dimension_numbers = #tpu.dot_dimension_numbers<[1], [0], [0], [1], [0, 0, 1, 1], [], []>} : vector<72x256xbf16>, vector<256x256xbf16>, vector<72x256xf32> -> vector<72x256xf32>
    %c2_51 = arith.constant 2 : index
    %c0_52 = arith.constant 0 : index
    %c0_53 = arith.constant 0 : index
    %151 = vector.load %arg7[%c2_51, %c0_52, %c0_53] : memref<3x1x256xf32, #tpu.memory_space<vmem>>, vector<1x1x256xf32>
    %152 = vector.shape_cast %151 : vector<1x1x256xf32> to vector<1x256xf32>
    %153 = vector.broadcast %152 : vector<1x256xf32> to vector<72x256xf32>
    %154 = arith.addf %150, %153 : vector<72x256xf32>
    %155 = arith.extf %147 : vector<72x256xbf16> to vector<72x256xf32>
    %cst_54 = arith.constant dense<0.000000e+00> : vector<16x256xf32>
    %156 = tpu.matmul %12, %155, %cst_54 {dimension_numbers = #tpu.dot_dimension_numbers<[1], [0], [0], [1], [0, 0, 1, 1], [], []>} : vector<16x72xf32>, vector<72x256xf32>, vector<16x256xf32> -> vector<16x256xf32>
    %157 = vector.extract_strided_slice %156 {offsets = [0, 0], sizes = [16, 32], strides = [1, 1]} : vector<16x256xf32> to vector<16x32xf32>
    %158 = vector.shape_cast %157 : vector<16x32xf32> to vector<16x1x32xf32>
    %159 = vector.extract_strided_slice %156 {offsets = [0, 32], sizes = [16, 32], strides = [1, 1]} : vector<16x256xf32> to vector<16x32xf32>
    %160 = vector.shape_cast %159 : vector<16x32xf32> to vector<16x1x32xf32>
    %161 = vector.extract_strided_slice %156 {offsets = [0, 64], sizes = [16, 32], strides = [1, 1]} : vector<16x256xf32> to vector<16x32xf32>
    %162 = vector.shape_cast %161 : vector<16x32xf32> to vector<16x1x32xf32>
    %163 = vector.extract_strided_slice %156 {offsets = [0, 96], sizes = [16, 32], strides = [1, 1]} : vector<16x256xf32> to vector<16x32xf32>
    %164 = vector.shape_cast %163 : vector<16x32xf32> to vector<16x1x32xf32>
    %165 = vector.extract_strided_slice %156 {offsets = [0, 128], sizes = [16, 32], strides = [1, 1]} : vector<16x256xf32> to vector<16x32xf32>
    %166 = vector.shape_cast %165 : vector<16x32xf32> to vector<16x1x32xf32>
    %167 = vector.extract_strided_slice %156 {offsets = [0, 160], sizes = [16, 32], strides = [1, 1]} : vector<16x256xf32> to vector<16x32xf32>
    %168 = vector.shape_cast %167 : vector<16x32xf32> to vector<16x1x32xf32>
    %169 = vector.extract_strided_slice %156 {offsets = [0, 192], sizes = [16, 32], strides = [1, 1]} : vector<16x256xf32> to vector<16x32xf32>
    %170 = vector.shape_cast %169 : vector<16x32xf32> to vector<16x1x32xf32>
    %171 = vector.extract_strided_slice %156 {offsets = [0, 224], sizes = [16, 32], strides = [1, 1]} : vector<16x256xf32> to vector<16x32xf32>
    %172 = vector.shape_cast %171 : vector<16x32xf32> to vector<16x1x32xf32>
    %173 = tpu.concatenate %158, %160, %162, %164, %166, %168, %170, %172 in 1 : vector<16x1x32xf32>, vector<16x1x32xf32>, vector<16x1x32xf32>, vector<16x1x32xf32>, vector<16x1x32xf32>, vector<16x1x32xf32>, vector<16x1x32xf32>, vector<16x1x32xf32> -> vector<16x8x32xf32>
    %174 = vector.extract_strided_slice %173 {offsets = [0, 0, 0], sizes = [8, 8, 32], strides = [1, 1, 1]} : vector<16x8x32xf32> to vector<8x8x32xf32>
    %175 = vector.extract_strided_slice %173 {offsets = [8, 0, 0], sizes = [8, 8, 32], strides = [1, 1, 1]} : vector<16x8x32xf32> to vector<8x8x32xf32>
    %176 = tpu.concatenate %174, %175 in 2 : vector<8x8x32xf32>, vector<8x8x32xf32> -> vector<8x8x64xf32>
    %c16 = arith.constant 16 : index
    %c0_55 = arith.constant 0 : index
    %c0_56 = arith.constant 0 : index
    %177 = vector.load %arg8[%c16, %c0_55, %c0_56] : memref<24x64x64xf32, #tpu.memory_space<vmem>>, vector<8x64x64xf32>
    "tpu.trace_start"() <{level = 10 : i32, message = "mbi,mio->mbo"}> : () -> ()
    %cst_57 = arith.constant dense<0.000000e+00> : vector<8x8x64xf32>
    %178 = tpu.matmul %176, %177, %cst_57 {dimension_numbers = #tpu.dot_dimension_numbers<[2], [1], [1], [2], [0, 0, 0, 1, 1, 2], [0], [0]>} : vector<8x8x64xf32>, vector<8x64x64xf32>, vector<8x8x64xf32> -> vector<8x8x64xf32>
    "tpu.trace_stop"() : () -> ()
    %179 = vector.extract_strided_slice %178 {offsets = [0, 0, 0], sizes = [8, 8, 32], strides = [1, 1, 1]} : vector<8x8x64xf32> to vector<8x8x32xf32>
    %180 = vector.extract_strided_slice %178 {offsets = [0, 0, 32], sizes = [8, 8, 32], strides = [1, 1, 1]} : vector<8x8x64xf32> to vector<8x8x32xf32>
    %181 = tpu.concatenate %179, %180 in 0 : vector<8x8x32xf32>, vector<8x8x32xf32> -> vector<16x8x32xf32>
    %182 = vector.extract_strided_slice %181 {offsets = [0, 0, 0], sizes = [16, 1, 32], strides = [1, 1, 1]} : vector<16x8x32xf32> to vector<16x1x32xf32>
    %183 = vector.shape_cast %182 : vector<16x1x32xf32> to vector<16x32xf32>
    %184 = vector.extract_strided_slice %181 {offsets = [0, 1, 0], sizes = [16, 1, 32], strides = [1, 1, 1]} : vector<16x8x32xf32> to vector<16x1x32xf32>
    %185 = vector.shape_cast %184 : vector<16x1x32xf32> to vector<16x32xf32>
    %186 = vector.extract_strided_slice %181 {offsets = [0, 2, 0], sizes = [16, 1, 32], strides = [1, 1, 1]} : vector<16x8x32xf32> to vector<16x1x32xf32>
    %187 = vector.shape_cast %186 : vector<16x1x32xf32> to vector<16x32xf32>
    %188 = vector.extract_strided_slice %181 {offsets = [0, 3, 0], sizes = [16, 1, 32], strides = [1, 1, 1]} : vector<16x8x32xf32> to vector<16x1x32xf32>
    %189 = vector.shape_cast %188 : vector<16x1x32xf32> to vector<16x32xf32>
    %190 = vector.extract_strided_slice %181 {offsets = [0, 4, 0], sizes = [16, 1, 32], strides = [1, 1, 1]} : vector<16x8x32xf32> to vector<16x1x32xf32>
    %191 = vector.shape_cast %190 : vector<16x1x32xf32> to vector<16x32xf32>
    %192 = vector.extract_strided_slice %181 {offsets = [0, 5, 0], sizes = [16, 1, 32], strides = [1, 1, 1]} : vector<16x8x32xf32> to vector<16x1x32xf32>
    %193 = vector.shape_cast %192 : vector<16x1x32xf32> to vector<16x32xf32>
    %194 = vector.extract_strided_slice %181 {offsets = [0, 6, 0], sizes = [16, 1, 32], strides = [1, 1, 1]} : vector<16x8x32xf32> to vector<16x1x32xf32>
    %195 = vector.shape_cast %194 : vector<16x1x32xf32> to vector<16x32xf32>
    %196 = vector.extract_strided_slice %181 {offsets = [0, 7, 0], sizes = [16, 1, 32], strides = [1, 1, 1]} : vector<16x8x32xf32> to vector<16x1x32xf32>
    %197 = vector.shape_cast %196 : vector<16x1x32xf32> to vector<16x32xf32>
    %198 = tpu.concatenate %183, %185, %187, %189, %191, %193, %195, %197 in 1 : vector<16x32xf32>, vector<16x32xf32>, vector<16x32xf32>, vector<16x32xf32>, vector<16x32xf32>, vector<16x32xf32>, vector<16x32xf32>, vector<16x32xf32> -> vector<16x256xf32>
    %cst_58 = arith.constant dense<0.000000e+00> : vector<72x256xf32>
    %199 = tpu.matmul %13, %198, %cst_58 {dimension_numbers = #tpu.dot_dimension_numbers<[1], [0], [0], [1], [0, 0, 1, 1], [], []>} : vector<72x16xf32>, vector<16x256xf32>, vector<72x256xf32> -> vector<72x256xf32>
    %200 = arith.addf %154, %199 : vector<72x256xf32>
    %201 = arith.mulf %200, %200 : vector<72x256xf32>
    %202 = arith.mulf %200, %201 : vector<72x256xf32>
    %cst_59 = arith.constant 4.471500e-02 : f32
    %203 = vector.broadcast %cst_59 : f32 to vector<72x256xf32>
    %204 = arith.mulf %203, %202 : vector<72x256xf32>
    %205 = arith.addf %200, %204 : vector<72x256xf32>
    %cst_60 = arith.constant 0.797884583 : f32
    %206 = vector.broadcast %cst_60 : f32 to vector<72x256xf32>
    %207 = arith.mulf %206, %205 : vector<72x256xf32>
    %208 = math.tanh %207 : vector<72x256xf32>
    %cst_61 = arith.constant 1.000000e+00 : f32
    %209 = vector.broadcast %cst_61 : f32 to vector<72x256xf32>
    %210 = arith.addf %209, %208 : vector<72x256xf32>
    %cst_62 = arith.constant 5.000000e-01 : f32
    %211 = vector.broadcast %cst_62 : f32 to vector<72x256xf32>
    %212 = arith.mulf %211, %210 : vector<72x256xf32>
    %213 = arith.mulf %200, %212 : vector<72x256xf32>
    %214 = arith.truncf %213 : vector<72x256xf32> to vector<72x256xbf16>
    %215 = arith.extf %214 : vector<72x256xbf16> to vector<72x256xf32>
    %cst_63 = arith.constant dense<0.000000e+00> : vector<16x256xf32>
    %216 = tpu.matmul %12, %215, %cst_63 {dimension_numbers = #tpu.dot_dimension_numbers<[1], [0], [0], [1], [0, 0, 1, 1], [], []>} : vector<16x72xf32>, vector<72x256xf32>, vector<16x256xf32> -> vector<16x256xf32>
    %217 = vector.extract_strided_slice %216 {offsets = [0, 0], sizes = [16, 32], strides = [1, 1]} : vector<16x256xf32> to vector<16x32xf32>
    %218 = vector.shape_cast %217 : vector<16x32xf32> to vector<16x1x32xf32>
    %219 = vector.extract_strided_slice %216 {offsets = [0, 32], sizes = [16, 32], strides = [1, 1]} : vector<16x256xf32> to vector<16x32xf32>
    %220 = vector.shape_cast %219 : vector<16x32xf32> to vector<16x1x32xf32>
    %221 = vector.extract_strided_slice %216 {offsets = [0, 64], sizes = [16, 32], strides = [1, 1]} : vector<16x256xf32> to vector<16x32xf32>
    %222 = vector.shape_cast %221 : vector<16x32xf32> to vector<16x1x32xf32>
    %223 = vector.extract_strided_slice %216 {offsets = [0, 96], sizes = [16, 32], strides = [1, 1]} : vector<16x256xf32> to vector<16x32xf32>
    %224 = vector.shape_cast %223 : vector<16x32xf32> to vector<16x1x32xf32>
    %225 = vector.extract_strided_slice %216 {offsets = [0, 128], sizes = [16, 32], strides = [1, 1]} : vector<16x256xf32> to vector<16x32xf32>
    %226 = vector.shape_cast %225 : vector<16x32xf32> to vector<16x1x32xf32>
    %227 = vector.extract_strided_slice %216 {offsets = [0, 160], sizes = [16, 32], strides = [1, 1]} : vector<16x256xf32> to vector<16x32xf32>
    %228 = vector.shape_cast %227 : vector<16x32xf32> to vector<16x1x32xf32>
    %229 = vector.extract_strided_slice %216 {offsets = [0, 192], sizes = [16, 32], strides = [1, 1]} : vector<16x256xf32> to vector<16x32xf32>
    %230 = vector.shape_cast %229 : vector<16x32xf32> to vector<16x1x32xf32>
    %231 = vector.extract_strided_slice %216 {offsets = [0, 224], sizes = [16, 32], strides = [1, 1]} : vector<16x256xf32> to vector<16x32xf32>
    %232 = vector.shape_cast %231 : vector<16x32xf32> to vector<16x1x32xf32>
    %233 = tpu.concatenate %218, %220, %222, %224, %226, %228, %230, %232 in 1 : vector<16x1x32xf32>, vector<16x1x32xf32>, vector<16x1x32xf32>, vector<16x1x32xf32>, vector<16x1x32xf32>, vector<16x1x32xf32>, vector<16x1x32xf32>, vector<16x1x32xf32> -> vector<16x8x32xf32>
    %234 = vector.extract_strided_slice %233 {offsets = [0, 0, 0], sizes = [8, 8, 32], strides = [1, 1, 1]} : vector<16x8x32xf32> to vector<8x8x32xf32>
    %235 = vector.extract_strided_slice %233 {offsets = [8, 0, 0], sizes = [8, 8, 32], strides = [1, 1, 1]} : vector<16x8x32xf32> to vector<8x8x32xf32>
    %236 = tpu.concatenate %234, %235 in 2 : vector<8x8x32xf32>, vector<8x8x32xf32> -> vector<8x8x64xf32>
    %c0_64 = arith.constant 0 : index
    %c0_65 = arith.constant 0 : index
    %c0_66 = arith.constant 0 : index
    %237 = vector.load %arg9[%c0_64, %c0_65, %c0_66] : memref<8x64x32xf32, #tpu.memory_space<vmem>>, vector<8x64x32xf32>
    "tpu.trace_start"() <{level = 10 : i32, message = "mbi,mio->mbo"}> : () -> ()
    %cst_67 = arith.constant dense<0.000000e+00> : vector<8x8x32xf32>
    %238 = tpu.matmul %236, %237, %cst_67 {dimension_numbers = #tpu.dot_dimension_numbers<[2], [1], [1], [2], [0, 0, 0, 1, 1, 2], [0], [0]>} : vector<8x8x64xf32>, vector<8x64x32xf32>, vector<8x8x32xf32> -> vector<8x8x32xf32>
    "tpu.trace_stop"() : () -> ()
    %cst_68 = arith.constant dense<0.000000e+00> : vector<8x32xf32>
    %239 = vector.multi_reduction <add>, %238, %cst_68 [0] : vector<8x8x32xf32> to vector<8x32xf32>
    %c0_69 = arith.constant 0 : index
    %c0_70 = arith.constant 0 : index
    %240 = vector.load %arg10[%c0_69, %c0_70] : memref<256x512xbf16, #tpu.memory_space<vmem>>, vector<256x512xbf16>
    %cst_71 = arith.constant dense<0.000000e+00> : vector<72x512xf32>
    %241 = tpu.matmul %214, %240, %cst_71 {dimension_numbers = #tpu.dot_dimension_numbers<[1], [0], [0], [1], [0, 0, 1, 1], [], []>} : vector<72x256xbf16>, vector<256x512xbf16>, vector<72x512xf32> -> vector<72x512xf32>
    %c0_72 = arith.constant 0 : index
    %c0_73 = arith.constant 0 : index
    %242 = vector.load %arg11[%c0_72, %c0_73] : memref<1x512xf32, #tpu.memory_space<vmem>>, vector<1x512xf32>
    %243 = vector.broadcast %242 : vector<1x512xf32> to vector<72x512xf32>
    %244 = arith.addf %241, %243 : vector<72x512xf32>
    %245 = arith.mulf %244, %244 : vector<72x512xf32>
    %246 = arith.mulf %244, %245 : vector<72x512xf32>
    %cst_74 = arith.constant 4.471500e-02 : f32
    %247 = vector.broadcast %cst_74 : f32 to vector<72x512xf32>
    %248 = arith.mulf %247, %246 : vector<72x512xf32>
    %249 = arith.addf %244, %248 : vector<72x512xf32>
    %cst_75 = arith.constant 0.797884583 : f32
    %250 = vector.broadcast %cst_75 : f32 to vector<72x512xf32>
    %251 = arith.mulf %250, %249 : vector<72x512xf32>
    %252 = math.tanh %251 : vector<72x512xf32>
    %cst_76 = arith.constant 1.000000e+00 : f32
    %253 = vector.broadcast %cst_76 : f32 to vector<72x512xf32>
    %254 = arith.addf %253, %252 : vector<72x512xf32>
    %cst_77 = arith.constant 5.000000e-01 : f32
    %255 = vector.broadcast %cst_77 : f32 to vector<72x512xf32>
    %256 = arith.mulf %255, %254 : vector<72x512xf32>
    %257 = arith.mulf %244, %256 : vector<72x512xf32>
    %cst_78 = arith.constant dense<0.000000e+00> : vector<512xf32>
    %258 = vector.multi_reduction <add>, %257, %cst_78 [0] : vector<72x512xf32> to vector<512xf32>
    %259 = vector.shape_cast %258 : vector<512xf32> to vector<1x512xf32>
    %260 = vector.extract_strided_slice %257 {offsets = [0, 0], sizes = [1, 512], strides = [1, 1]} : vector<72x512xf32> to vector<1x512xf32>
    %261 = vector.extract_strided_slice %257 {offsets = [71, 0], sizes = [1, 512], strides = [1, 1]} : vector<72x512xf32> to vector<1x512xf32>
    %262 = arith.addf %260, %261 : vector<1x512xf32>
    %cst_79 = arith.constant 5.000000e-01 : f32
    %263 = vector.broadcast %cst_79 : f32 to vector<1x512xf32>
    %264 = arith.mulf %263, %262 : vector<1x512xf32>
    %265 = arith.subf %259, %264 : vector<1x512xf32>
    %cst_80 = arith.constant 0.013888889 : f32
    %266 = vector.broadcast %cst_80 : f32 to vector<1x512xf32>
    %267 = arith.mulf %265, %266 : vector<1x512xf32>
    %268 = vector.extract_strided_slice %267 {offsets = [0, 0], sizes = [1, 64], strides = [1, 1]} : vector<1x512xf32> to vector<1x64xf32>
    %269 = vector.shape_cast %268 : vector<1x64xf32> to vector<1x1x64xf32>
    %270 = vector.extract_strided_slice %267 {offsets = [0, 64], sizes = [1, 64], strides = [1, 1]} : vector<1x512xf32> to vector<1x64xf32>
    %271 = vector.shape_cast %270 : vector<1x64xf32> to vector<1x1x64xf32>
    %272 = vector.extract_strided_slice %267 {offsets = [0, 128], sizes = [1, 64], strides = [1, 1]} : vector<1x512xf32> to vector<1x64xf32>
    %273 = vector.shape_cast %272 : vector<1x64xf32> to vector<1x1x64xf32>
    %274 = vector.extract_strided_slice %267 {offsets = [0, 192], sizes = [1, 64], strides = [1, 1]} : vector<1x512xf32> to vector<1x64xf32>
    %275 = vector.shape_cast %274 : vector<1x64xf32> to vector<1x1x64xf32>
    %276 = vector.extract_strided_slice %267 {offsets = [0, 256], sizes = [1, 64], strides = [1, 1]} : vector<1x512xf32> to vector<1x64xf32>
    %277 = vector.shape_cast %276 : vector<1x64xf32> to vector<1x1x64xf32>
    %278 = vector.extract_strided_slice %267 {offsets = [0, 320], sizes = [1, 64], strides = [1, 1]} : vector<1x512xf32> to vector<1x64xf32>
    %279 = vector.shape_cast %278 : vector<1x64xf32> to vector<1x1x64xf32>
    %280 = vector.extract_strided_slice %267 {offsets = [0, 384], sizes = [1, 64], strides = [1, 1]} : vector<1x512xf32> to vector<1x64xf32>
    %281 = vector.shape_cast %280 : vector<1x64xf32> to vector<1x1x64xf32>
    %282 = vector.extract_strided_slice %267 {offsets = [0, 448], sizes = [1, 64], strides = [1, 1]} : vector<1x512xf32> to vector<1x64xf32>
    %283 = vector.shape_cast %282 : vector<1x64xf32> to vector<1x1x64xf32>
    %284 = tpu.concatenate %269, %271, %273, %275, %277, %279, %281, %283 in 1 : vector<1x1x64xf32>, vector<1x1x64xf32>, vector<1x1x64xf32>, vector<1x1x64xf32>, vector<1x1x64xf32>, vector<1x1x64xf32>, vector<1x1x64xf32>, vector<1x1x64xf32> -> vector<1x8x64xf32>
    %285 = vector.shape_cast %284 : vector<1x8x64xf32> to vector<8x64xf32>
    %c0_81 = arith.constant 0 : index
    %c0_82 = arith.constant 0 : index
    %286 = vector.load %arg12[%c0_81, %c0_82] : memref<64x32xf32, #tpu.memory_space<vmem>>, vector<64x32xf32>
    %cst_83 = arith.constant dense<0.000000e+00> : vector<8x32xf32>
    %287 = tpu.matmul %285, %286, %cst_83 {dimension_numbers = #tpu.dot_dimension_numbers<[1], [0], [0], [1], [0, 0, 1, 1], [], []>} : vector<8x64xf32>, vector<64x32xf32>, vector<8x32xf32> -> vector<8x32xf32>
    %c0_84 = arith.constant 0 : index
    %c0_85 = arith.constant 0 : index
    %288 = vector.load %arg13[%c0_84, %c0_85] : memref<1x32xf32, #tpu.memory_space<vmem>>, vector<1x32xf32>
    %289 = vector.broadcast %288 : vector<1x32xf32> to vector<8x32xf32>
    %290 = arith.addf %287, %289 : vector<8x32xf32>
    %291 = tpu.concatenate %239, %290 in 1 : vector<8x32xf32>, vector<8x32xf32> -> vector<8x64xf32>
    %c0_86 = arith.constant 0 : index
    %c0_87 = arith.constant 0 : index
    %292 = vector.load %arg14[%c0_86, %c0_87] : memref<64x128xf32, #tpu.memory_space<vmem>>, vector<64x128xf32>
    %cst_88 = arith.constant dense<0.000000e+00> : vector<8x128xf32>
    %293 = tpu.matmul %291, %292, %cst_88 {dimension_numbers = #tpu.dot_dimension_numbers<[1], [0], [0], [1], [0, 0, 1, 1], [], []>} : vector<8x64xf32>, vector<64x128xf32>, vector<8x128xf32> -> vector<8x128xf32>
    %c0_89 = arith.constant 0 : index
    %c0_90 = arith.constant 0 : index
    %294 = vector.load %arg15[%c0_89, %c0_90] : memref<1x128xf32, #tpu.memory_space<vmem>>, vector<1x128xf32>
    %295 = vector.broadcast %294 : vector<1x128xf32> to vector<8x128xf32>
    %296 = arith.addf %293, %295 : vector<8x128xf32>
    %297 = arith.mulf %296, %296 : vector<8x128xf32>
    %298 = arith.mulf %296, %297 : vector<8x128xf32>
    %cst_91 = arith.constant 4.471500e-02 : f32
    %299 = vector.broadcast %cst_91 : f32 to vector<8x128xf32>
    %300 = arith.mulf %299, %298 : vector<8x128xf32>
    %301 = arith.addf %296, %300 : vector<8x128xf32>
    %cst_92 = arith.constant 0.797884583 : f32
    %302 = vector.broadcast %cst_92 : f32 to vector<8x128xf32>
    %303 = arith.mulf %302, %301 : vector<8x128xf32>
    %304 = math.tanh %303 : vector<8x128xf32>
    %cst_93 = arith.constant 1.000000e+00 : f32
    %305 = vector.broadcast %cst_93 : f32 to vector<8x128xf32>
    %306 = arith.addf %305, %304 : vector<8x128xf32>
    %cst_94 = arith.constant 5.000000e-01 : f32
    %307 = vector.broadcast %cst_94 : f32 to vector<8x128xf32>
    %308 = arith.mulf %307, %306 : vector<8x128xf32>
    %309 = arith.mulf %296, %308 : vector<8x128xf32>
    %c0_95 = arith.constant 0 : index
    %c0_96 = arith.constant 0 : index
    %310 = vector.load %arg16[%c0_95, %c0_96] : memref<128x3xf32, #tpu.memory_space<vmem>>, vector<128x3xf32>
    %cst_97 = arith.constant dense<0.000000e+00> : vector<8x3xf32>
    %311 = tpu.matmul %309, %310, %cst_97 {dimension_numbers = #tpu.dot_dimension_numbers<[1], [0], [0], [1], [0, 0, 1, 1], [], []>} : vector<8x128xf32>, vector<128x3xf32>, vector<8x3xf32> -> vector<8x3xf32>
    %c0_98 = arith.constant 0 : index
    %c0_99 = arith.constant 0 : index
    %312 = vector.load %arg17[%c0_98, %c0_99] : memref<1x3xf32, #tpu.memory_space<vmem>>, vector<1x3xf32>
    %313 = vector.broadcast %312 : vector<1x3xf32> to vector<8x3xf32>
    %314 = arith.addf %311, %313 : vector<8x3xf32>
    %c0_100 = arith.constant 0 : index
    %c0_101 = arith.constant 0 : index
    %315 = vector.load %arg18[%c0_100, %c0_101] : memref<8x3xf32, #tpu.memory_space<vmem>>, vector<8x3xf32>
    tpu.vector_store %arg18[%c0_100, %c0_101], %314 {strides = array<i32>} : memref<8x3xf32, #tpu.memory_space<vmem>>, vector<8x3xf32>,
    return
  }
  func.func @transform_0(%arg0: i32) -> (i32, i32, i32) {
    %c0_i32 = arith.constant 0 : i32
    %c0_i32_0 = arith.constant 0 : i32
    %c0_i32_1 = arith.constant 0 : i32
    return %arg0, %c0_i32, %c0_i32_0 : i32, i32, i32
  }
  func.func @transform_1(%arg0: i32) -> (i32, i32) {
    %c0_i32 = arith.constant 0 : i32
    %c0_i32_0 = arith.constant 0 : i32
    %c0_i32_1 = arith.constant 0 : i32
    return %c0_i32, %c0_i32_0 : i32, i32
  }
  func.func @transform_2(%arg0: i32) -> (i32, i32) {
    %c0_i32 = arith.constant 0 : i32
    %c0_i32_0 = arith.constant 0 : i32
    %c0_i32_1 = arith.constant 0 : i32
    return %c0_i32, %c0_i32_0 : i32, i32
  }
  func.func @transform_3(%arg0: i32) -> (i32, i32) {
    %c0_i32 = arith.constant 0 : i32
    %c0_i32_0 = arith.constant 0 : i32
    %c0_i32_1 = arith.constant 0 : i32
    return %c0_i32, %c0_i32_0 : i32, i32
  }
  func.func @transform_4(%arg0: i32) -> (i32, i32) {
    %c0_i32 = arith.constant 0 : i32
    %c0_i32_0 = arith.constant 0 : i32
    %c0_i32_1 = arith.constant 0 : i32
    return %c0_i32, %c0_i32_0 : i32, i32
  }
  func.func @transform_5(%arg0: i32) -> (i32, i32, i32) {
    %c0_i32 = arith.constant 0 : i32
    %c0_i32_0 = arith.constant 0 : i32
    %c0_i32_1 = arith.constant 0 : i32
    %c0_i32_2 = arith.constant 0 : i32
    return %c0_i32, %c0_i32_0, %c0_i32_1 : i32, i32, i32
  }
  func.func @transform_6(%arg0: i32) -> (i32, i32, i32) {
    %c0_i32 = arith.constant 0 : i32
    %c0_i32_0 = arith.constant 0 : i32
    %c0_i32_1 = arith.constant 0 : i32
    %c0_i32_2 = arith.constant 0 : i32
    return %c0_i32, %c0_i32_0, %c0_i32_1 : i32, i32, i32
  }
  func.func @transform_7(%arg0: i32) -> (i32, i32, i32) {
    %c0_i32 = arith.constant 0 : i32
    %c0_i32_0 = arith.constant 0 : i32
    %c0_i32_1 = arith.constant 0 : i32
    %c0_i32_2 = arith.constant 0 : i32
    return %c0_i32, %c0_i32_0, %c0_i32_1 : i32, i32, i32
  }
  func.func @transform_8(%arg0: i32) -> (i32, i32, i32) {
    %c0_i32 = arith.constant 0 : i32
    %c0_i32_0 = arith.constant 0 : i32
    %c0_i32_1 = arith.constant 0 : i32
    %c0_i32_2 = arith.constant 0 : i32
    return %c0_i32, %c0_i32_0, %c0_i32_1 : i32, i32, i32
  }
  func.func @transform_9(%arg0: i32) -> (i32, i32) {
    %c0_i32 = arith.constant 0 : i32
    %c0_i32_0 = arith.constant 0 : i32
    %c0_i32_1 = arith.constant 0 : i32
    return %c0_i32, %c0_i32_0 : i32, i32
  }
  func.func @transform_10(%arg0: i32) -> (i32, i32) {
    %c0_i32 = arith.constant 0 : i32
    %c0_i32_0 = arith.constant 0 : i32
    %c0_i32_1 = arith.constant 0 : i32
    return %c0_i32, %c0_i32_0 : i32, i32
  }
  func.func @transform_11(%arg0: i32) -> (i32, i32) {
    %c0_i32 = arith.constant 0 : i32
    %c0_i32_0 = arith.constant 0 : i32
    %c0_i32_1 = arith.constant 0 : i32
    return %c0_i32, %c0_i32_0 : i32, i32
  }
  func.func @transform_12(%arg0: i32) -> (i32, i32) {
    %c0_i32 = arith.constant 0 : i32
    %c0_i32_0 = arith.constant 0 : i32
    %c0_i32_1 = arith.constant 0 : i32
    return %c0_i32, %c0_i32_0 : i32, i32
  }
  func.func @transform_13(%arg0: i32) -> (i32, i32) {
    %c0_i32 = arith.constant 0 : i32
    %c0_i32_0 = arith.constant 0 : i32
    %c0_i32_1 = arith.constant 0 : i32
    return %c0_i32, %c0_i32_0 : i32, i32
  }
  func.func @transform_14(%arg0: i32) -> (i32, i32) {
    %c0_i32 = arith.constant 0 : i32
    %c0_i32_0 = arith.constant 0 : i32
    %c0_i32_1 = arith.constant 0 : i32
    return %c0_i32, %c0_i32_0 : i32, i32
  }
  func.func @transform_15(%arg0: i32) -> (i32, i32) {
    %c0_i32 = arith.constant 0 : i32
    %c0_i32_0 = arith.constant 0 : i32
    %c0_i32_1 = arith.constant 0 : i32
    return %c0_i32, %c0_i32_0 : i32, i32
  }
  func.func @transform_16(%arg0: i32) -> (i32, i32) {
    %c0_i32 = arith.constant 0 : i32
    %c0_i32_0 = arith.constant 0 : i32
    %c0_i32_1 = arith.constant 0 : i32
    return %c0_i32, %c0_i32_0 : i32, i32
  }
  func.func @transform_17(%arg0: i32) -> (i32, i32) {
    %c0_i32 = arith.constant 0 : i32
    %c0_i32_0 = arith.constant 0 : i32
    return %arg0, %c0_i32 : i32, i32
  }
}

</mosaic_0001>

<bundles_post_ra>
// kernel: tpu_custom_call.1
= control target key start
LH: loop header
LB: loop body
LE: loop exit
PB: predicated region body
PF: predicated region fallthrough
CT: control target
= control target key end

     0   :  { %s18896_s0 = inlined_call_operand.vmem [shape: bf16[2,64,16], index: 0, kind: input, shape index: {}]   ;;  %s18897_s1 = inlined_call_operand.vmem [shape: f32[16,72], index: 1, kind: input, shape index: {}]   ;;  %s18898_s2 = inlined_call_operand.vmem [shape: f32[72,16], index: 2, kind: input, shape index: {}]   ;;  %s18899_s3 = inlined_call_operand.vmem [shape: bf16[16,256], index: 3, kind: input, shape index: {}]   ;;  %s18900_s4 = inlined_call_operand.vmem [shape: f32[1,256], index: 4, kind: input, shape index: {}]   ;;  %s18901_s5 = inlined_call_operand.vmem [shape: bf16[3,256,256], index: 5, kind: input, shape index: {}]   ;;  %s18902_s6 = inlined_call_operand.vmem [shape: f32[3,1,256], index: 6, kind: input, shape index: {}]   ;;  %s18903_s7 = inlined_call_operand.hbm [shape: f32[24,64,64], index: 7, kind: input, shape index: {}]   ;;  %s18904_s8 = inlined_call_operand.vmem [shape: f32[8,64,32], index: 8, kind: input, shape index: {}]   ;;  %s18905_s9 = inlined_call_operand.hbm [shape: bf16[256,512], index: 9, kind: input, shape index: {}]   ;;  %s18906_s10 = inlined_call_operand.vmem [shape: f32[1,512], index: 10, kind: input, shape index: {}]   ;;  %s18907_s11 = inlined_call_operand.vmem [shape: f32[64,32], index: 11, kind: input, shape index: {}]   ;;  %s18908_s12 = inlined_call_operand.vmem [shape: f32[1,32], index: 12, kind: input, shape index: {}]   ;;  %s18909_s13 = inlined_call_operand.vmem [shape: f32[64,128], index: 13, kind: input, shape index: {}]   ;;  %s18910_s14 = inlined_call_operand.vmem [shape: f32[1,128], index: 14, kind: input, shape index: {}]   ;;  %s18911_s15 = inlined_call_operand.vmem [shape: f32[128,3], index: 15, kind: input, shape index: {}]   ;;  %s18912_s16 = inlined_call_operand.vmem [shape: f32[1,3], index: 16, kind: input, shape index: {}]   ;;  %s18913_s17 = inlined_call_operand.vmem [shape: f32[16,3], index: 17, kind: output, shape index: {}]  }
   0x1   :  { %18943 = sst [smem:[#allocation32_spill]] %s18896_s0 }
   0x2   :  { %18944 = sst [smem:[#allocation33_spill]] %s18897_s1 }
   0x3   :  { %18945 = sst [smem:[#allocation34_spill]] %s18913_s17 }
   0x4   :  { %22 = vsyncpa [#allocation4], 0 }
   0x5   :  { %23 = vsyncpa [#allocation6], 0  ;;  %s13723_s24 = smov 0  }
   0x6 LB: > { %18946 = sst [smem:[#allocation9_spill]] %s13617_s24  ;;  %s13619_s25 = smov [#allocation3]   ;;  %s13617_s24 = sphi %s13723_s24, %s29_s24  }
   0x7   : > { %s452_s26 = sshll.u32 %s13619_s25, 4  ;;  %s13729_s27 = sadd.s32 4294967295, %s13617_s24   ;;  %s453_s26 = int_to_ptr.vmem [resolvable:$true] %s452_s26 }
   0x8   : > { %p11070_p0 = scmp.ge.s32.totalorder %s13617_s24, 1  ;;  %p422_p1 = scmp.lt.s32.totalorder %s13617_s24, 3 }
   0x9   : > { %p18915_p3 = scmp.eq.s32.totalorder %s13729_s27, 0  ;;  %s13620_s29 = smov [#allocation5]  }
   0xa   : > { %p13733_p2 = pnand %p11070_p0, %p422_p1  ;;  %s468_s0 = sshll.u32 %s13620_s29, 4  ;;  %s13746_s0 = int_to_ptr.vmem [resolvable:$true] %s468_s0 }
   0xb   : > { %s13547_s1 = scalar_lea.hbm %s18903_s7, 24576 }
   0xc   : > { %s18947_s28 = scalar_select %p13733_p2, 1, 0 }
   0xd   : > { %p12911_p4 = pneg %p13733_p2  ;;  %p13548_p6 = scmp.ne.s32.totalorder %s18903_s7, %s13547_s1 }
   0xe   : > { %p13554_p10 = scmp.lt.u32.totalorder %s13547_s1, %s18903_s7 }
   0xf   : > { %p13742_p5 = pnand %p18915_p3, %p12911_p4 }
  0x11   : > { %p13549_p7 = pneg %p13742_p5 }
  0x13   : > { %p13550_p8 = pnand %p13549_p7, %p13548_p6 }
  0x15   : > { %p13551_p9 = pneg %p13550_p8 }
  0x17   : > { %p13556_p11 = pnand %p13554_p10, %p13551_p9 }
  0x19   : > { %13559 = shalt.err (!%p13556_p11)
}
  0x1a   : > { %s13560_s25 = scalar_lea.vmem %s453_s26, 24576  ;;  %p13568_p1 = scmp.lt.s32.totalorder %s453_s26, %s453_s26 }
  0x1b   : > { %p13561_p12 = scmp.ne.s32.totalorder %s453_s26, %s13560_s25  ;;  %p13569_p4 = scmp.lt.s32.totalorder %s13560_s25, %s13560_s25 }
  0x1d   : > { %p13563_p13 = pnand %p13561_p12, %p13549_p7  ;;  %p13570_p3 = por %p13569_p4, %p13568_p1 }
  0x1f   : > { %p13564_p0 = pneg %p13563_p13 }
  0x21   : > { %p13571_p2 = pnand %p13570_p3, %p13564_p0 }
  0x23   : > { %13574 = shalt.err (!%p13571_p2)
}
  0x24   : > { %s13621_s29 = smov 128   ;;  %s13622_s18 = smov 8  }
  0x25   : > { %12914 = dma.hbm_to_vmem [thread:$0]  (!%p13742_p5), %s18903_s7, 24576, %s453_s26, [#allocation4], %s13621_s29, %s13621_s29, %s13622_s18  }
  0x26   : > { %s13575_s22 = scalar_lea.hbm %s18905_s9, 8192 }
  0x27   : > { %p13576_p6 = scmp.ne.s32.totalorder %s18905_s9, %s13575_s22  ;;  %p13582_p8 = scmp.lt.u32.totalorder %s13575_s22, %s18905_s9 }
  0x29   : > { %p13578_p2 = pnand %p13576_p6, %p13549_p7 }
  0x2b   : > { %p13579_p3 = pneg %p13578_p2 }
  0x2d   : > { %p13584_p9 = pnand %p13582_p8, %p13579_p3 }
  0x2f   : > { %13587 = shalt.err (!%p13584_p9)
}
  0x30   : > { %s13588_s26 = scalar_lea.vmem %s13746_s0, 8192  ;;  %p13596_p13 = scmp.lt.s32.totalorder %s13746_s0, %s13746_s0 }
  0x31   : > { %p13589_p10 = scmp.ne.s32.totalorder %s13746_s0, %s13588_s26  ;;  %p13597_p0 = scmp.lt.s32.totalorder %s13588_s26, %s13588_s26 }
  0x33   : > { %p13591_p11 = pnand %p13589_p10, %p13549_p7  ;;  %p13598_p1 = por %p13597_p0, %p13596_p13 }
  0x35   : > { %p13592_p12 = pneg %p13591_p11 }
  0x37   : > { %p13599_p4 = pnand %p13598_p1, %p13592_p12 }
  0x39   : > { %13602 = shalt.err (!%p13599_p4)
}
  0x3a   : > { %s13623_s17 = smov 256   ;;  %s13624_s24 = smov 16  }
  0x3b   : > { %12917 = dma.hbm_to_vmem [thread:$0]  (!%p13742_p5), %s18905_s9, 8192, %s13746_s0, [#allocation6], %s13623_s17, %s13623_s17, %s13624_s24  }
  0x3c   : > { %p18949_p6 = scmp.ne.s32.totalorder %s18947_s28, 0 }
  0x3e   : > { %513 = sbr.rel (%p18949_p6) target bundleno = 6243 (0x1863), region = 88 }
  0x45   : > { %p18950_p7 = scmp.eq.s32.totalorder %s13729_s27, 0 }
  0x47   : > { %13608 = dma.done.wait (%p18950_p7), [#allocation4], 24576   ;;  %p18951_p2 = pmov %p18950_p7 }
  0x49   : > { %13610 = vsyncadd (%p18951_p2), [#allocation4], 4294942720  ;;  %p18952_p3 = pmov %p18951_p2 }
  0x4a   : > { %p18953_p8 = pmov %p18951_p2 }
  0x4b   : > { %13612 = dma.done.wait (%p18952_p3), [#allocation6], 8192  }
  0x4c   : > { %13614 = vsyncadd (%p18953_p8), [#allocation6], 4294959104  ;;  %p568_p9 = scmp.lt.s32.totalorder %s13729_s27, 1  ;;  %v13625_v0 = vmov 0   ;;  %s18954_s19 = sld [smem:[#allocation32_spill]]  ;;  %vm18932_vm0 = vcmask 130048   ;;  %v590_v41 = vlaneseq }
  0x4d   : > { %675 = vmatprep.mubr.bf16.mxu1 %v13625_v0  ;;  %v13094_v1 = vld [vmem:[%s18899_s3 + $0x4] ss:$8 sps:$4 sm:$0xff]   ;;  %v13096_v2 = vld [vmem:[%s18899_s3] ss:$8 sps:$4 sm:$0xff]   ;;  %v13106_v6 = vld [vmem:[%s18901_s5 + $0x14] ss:$8 sps:$4 sm:$0xff]  }
  0x4e   : > { %s19399_s27 = smov (!%p568_p9, %s13729_s27), 1  ;;  %643 = vmatprep.subr.bf16.mxu1 %v13094_v1  ;;  %v13101_v4 = vld [vmem:[%s18901_s5] ss:$8 sps:$4 sm:$0xff]   ;;  %v13103_v5 = vld [vmem:[%s18901_s5 + $0x4] ss:$8 sps:$4 sm:$0xff]   ;;  %v18920_v39 = vmov 0.0|0.0  }
  0x4f   : > { %s11390_s28 = sshll.u32 %s19399_s27, 5  ;;  %644 = vmatpush1.bf16.msra.mxu1 %v13096_v2  ;;  %v13104_v7 = vld [vmem:[%s18901_s5 + $0x10] ss:$8 sps:$4 sm:$0xff]   ;;  %v13109_v9 = vld [vmem:[%s18901_s5 + $0x24] ss:$8 sps:$4 sm:$0xff]   ;;  %v18918_v40 = vmov 0.0  }
  0x50   : > { %977 = vmatprep.subr.bf16.mxu1 %v13103_v5  ;;  %v13107_v10 = vld [vmem:[%s18901_s5 + $0x20] ss:$8 sps:$4 sm:$0xff]   ;;  %v13112_v11 = vld [vmem:[%s18901_s5 + $0x34] ss:$8 sps:$4 sm:$0xff]   ;;  %v13110_v12 = vld [vmem:[%s18901_s5 + $0x30] ss:$8 sps:$4 sm:$0xff]   ;;  %1147 = vmatprep.mubr.f32.mxu0 %v18918_v40 }
  0x51   : > { %v13115_v14 = vld [vmem:[%s18901_s5 + $0x44] ss:$8 sps:$4 sm:$0xff]   ;;  %v13113_v15 = vld [vmem:[%s18901_s5 + $0x40] ss:$8 sps:$4 sm:$0xff]   ;;  %v13118_v16 = vld [vmem:[%s18901_s5 + $0x54] ss:$8 sps:$4 sm:$0xff]  }
  0x52   : > { %s13813_s1 = scalar_lea.vmem %s18954_s19, %s11390_s28  ;;  %v13116_v17 = vld [vmem:[%s18901_s5 + $0x50] ss:$8 sps:$4 sm:$0xff]   ;;  %v13121_v19 = vld [vmem:[%s18901_s5 + $0x64] ss:$8 sps:$4 sm:$0xff]   ;;  %v13119_v20 = vld [vmem:[%s18901_s5 + $0x60] ss:$8 sps:$4 sm:$0xff]  }
  0x53   : > { %v13097_v3 = vld [vmem:[%s13813_s1] sm:$0xff]   ;;  %v13098_v8 = vld [vmem:[%s13813_s1 + $0x8] sm:$0xff]   ;;  %v13099_v13 = vld [vmem:[%s13813_s1 + $0x10] sm:$0xff]   ;;  %v13927_v42 = vshrl.u32 %v590_v41, 7  ;;  %s18957_s19 = sld [smem:[#allocation33_spill]]  ;;  %vm18931_vm1 = vcmask 588800  }
  0x54   : > { %11086 = vmatmul.mubr.msk.bf16.vlgmr.msra.gmra.mrb[0].mxu1 %vm18932_vm0, %v13097_v3  ;;  %v13100_v18 = vld [vmem:[%s13813_s1 + $0x18] sm:$0xff]   ;;  %v13127_v23 = vld [vmem:[%s18901_s5 + $0x84] ss:$8 sps:$4 sm:$0xff]   ;;  %v13125_v24 = vld [vmem:[%s18901_s5 + $0x80] ss:$8 sps:$4 sm:$0xff]   ;;  %s13629_s22 = smov 64  }
  0x55   : > { %685 = vmatprep.mubr.bf16.mxu1 %v13625_v0  ;;  %978 = vmatpush1.bf16.msra.mxu1 %v13101_v4  ;;  %v13124_v21 = vld [vmem:[%s18901_s5 + $0x74] ss:$8 sps:$4 sm:$0xff]   ;;  %v13122_v22 = vld [vmem:[%s18901_s5 + $0x70] ss:$8 sps:$4 sm:$0xff]   ;;  %v13133_v27 = vld [vmem:[%s18901_s5 + $0xa4] ss:$8 sps:$4 sm:$0xff]  }
  0x56   : > { %979 = vmatprep.subr.bf16.mxu1 %v13106_v6  ;;  %v13130_v25 = vld [vmem:[%s18901_s5 + $0x94] ss:$8 sps:$4 sm:$0xff]   ;;  %v13128_v26 = vld [vmem:[%s18901_s5 + $0x90] ss:$8 sps:$4 sm:$0xff]   ;;  %v13131_v28 = vld [vmem:[%s18901_s5 + $0xa0] ss:$8 sps:$4 sm:$0xff]  }
  0x57   : > { %v13136_v29 = vld [vmem:[%s18901_s5 + $0xb4] ss:$8 sps:$4 sm:$0xff]   ;;  %v13134_v30 = vld [vmem:[%s18901_s5 + $0xb0] ss:$8 sps:$4 sm:$0xff]   ;;  %v13139_v31 = vld [vmem:[%s18901_s5 + $0xc4] ss:$8 sps:$4 sm:$0xff]  }
  0x58   : > { %v13137_v32 = vld [vmem:[%s18901_s5 + $0xc0] ss:$8 sps:$4 sm:$0xff]   ;;  %v13142_v33 = vld [vmem:[%s18901_s5 + $0xd4] ss:$8 sps:$4 sm:$0xff]   ;;  %v13140_v34 = vld [vmem:[%s18901_s5 + $0xd0] ss:$8 sps:$4 sm:$0xff]  }
  0x59   : > { %980 = vmatpush1.bf16.msra.mxu1 %v13104_v7  ;;  %v13145_v35 = vld [vmem:[%s18901_s5 + $0xe4] ss:$8 sps:$4 sm:$0xff]   ;;  %v13143_v36 = vld [vmem:[%s18901_s5 + $0xe0] ss:$8 sps:$4 sm:$0xff]   ;;  %v13148_v37 = vld [vmem:[%s18901_s5 + $0xf4] ss:$8 sps:$4 sm:$0xff]  }
  0x5a   : > { %981 = vmatprep.subr.bf16.mxu1 %v13109_v9  ;;  %v13146_v38 = vld [vmem:[%s18901_s5 + $0xf0] ss:$8 sps:$4 sm:$0xff]   ;;  %18955 = vst [vmem:[#allocation10_spill] sm:$0xff] %v13927_v42  ;;  %v13930_v43 = vsub.s32 0, %v13927_v42  ;;  %v588_v44 = vld [vmem:[%s18900_s4] sm:$0x3] }
  0x5b   : > { %v13936_v45 = vsub.s32 1, %v13927_v42  ;;  %s13630_s23 = smov 96   ;;  %s13631_s25 = smov 32   ;;  %vm13632_vm2 = vmmov 0   ;;  %vm1808_vm3 = vcmask 1040384   ;;  %vm18938_vm4 = vcmask 1041408  }
  0x5c   : > { %11087 = vmatmul.mubr.msk.bf16.gmra.mrb[4].mxu1 %vm18932_vm0, %v13098_v8  ;;  %v593_v46 = vrot.slane %v588_v44, %v13930_v43  ;;  %vm18937_vm5 = vcmask 1042432   ;;  %vm18936_vm6 = vcmask 1043456   ;;  %vm18929_vm7 = vcmask 1044480   ;;  %s11079_s29 = sshll.u32 %s19399_s27, 3  ;;  %s19396_s0 = sld [smem:[#allocation34_spill]] }
  0x5d   : > { %695 = vmatprep.mubr.bf16.mxu1 %v13625_v0  ;;  %982 = vmatpush1.bf16.msra.mxu1 %v13107_v10  ;;  %18956 = vst [vmem:[#allocation11_spill] sm:$0xff] %v13936_v45  ;;  %v597_v48 = vrot.slane %v588_v44, %v13936_v45  ;;  %vm18928_vm8 = vcmask 1045504   ;;  %vm18927_vm9 = vcmask 1046528   ;;  %vm1959_vm10 = vcmask 261120  }
  0x5e   : > { %983 = vmatprep.subr.bf16.mxu1 %v13112_v11  ;;  %vm2032_vm11 = vcmask 523264   ;;  %vm2642_vm12 = vcmask 1041409   ;;  %vm2645_vm13 = vcmask 1042434   ;;  %vm2648_vm14 = vcmask 1043459  }
  0x5f   : > { %vm2651_vm15 = vcmask 1044484  }
  0x61   : > { %984 = vmatpush1.bf16.msra.mxu1 %v13110_v12 }
  0x62   : > { %985 = vmatprep.subr.bf16.mxu1 %v13115_v14  ;;  %s576_s30 = scalar_lea.vmem %s19396_s0, %s11079_s29 }
  0x64   : > { %11088 = vmatmul.mubr.msk.bf16.gmra.mrb[8].mxu1 %vm18932_vm0, %v13099_v13 }
  0x65   : > { %705 = vmatprep.mubr.bf16.mxu1 %v13625_v0  ;;  %986 = vmatpush1.bf16.msra.mxu1 %v13113_v15 }
  0x66   : > { %987 = vmatprep.subr.bf16.mxu1 %v13118_v16 }
  0x69   : > { %988 = vmatpush1.bf16.msra.mxu1 %v13116_v17 }
  0x6a   : > { %989 = vmatprep.subr.bf16.mxu1 %v13121_v19 }
  0x6c   : > { %11089 = vmatmul.mubr.msk.bf16.gmra.mrb[12].mxu1 %vm18932_vm0, %v13100_v18 }
  0x6d   : > { %990 = vmatpush1.bf16.msra.mxu1 %v13119_v20 }
  0x6e   : > { %991 = vmatprep.subr.bf16.mxu1 %v13124_v21 }
  0x71   : > { %992 = vmatpush1.bf16.msra.mxu1 %v13122_v22 }
  0x72   : > { %993 = vmatprep.subr.bf16.mxu1 %v13127_v23 }
  0x75   : > { %994 = vmatpush1.bf16.msra.mxu1 %v13125_v24  ;;  %v1074_v24 = vunpack.c.l.bf16 %v18920_v39 }
  0x76   : > { %995 = vmatprep.subr.bf16.mxu1 %v13130_v25  ;;  %v762_v25 = vld [vmem:[%s18957_s19] sm:$0xff] }
  0x79   : > { %996 = vmatpush1.bf16.msra.mxu1 %v13128_v26  ;;  %v763_v26 = vld [vmem:[%s18957_s19 + $0x8] sm:$0xff] }
  0x7a   : > { %997 = vmatprep.subr.bf16.mxu1 %v13133_v27 }
  0x7d   : > { %998 = vmatpush1.bf16.msra.mxu1 %v13131_v28 }
  0x7e   : > { %999 = vmatprep.subr.bf16.mxu1 %v13136_v29 }
  0x81   : > { %1000 = vmatpush1.bf16.msra.mxu1 %v13134_v30 }
  0x82   : > { %1001 = vmatprep.subr.bf16.mxu1 %v13139_v31 }
  0x85   : > { %1002 = vmatpush1.bf16.msra.mxu1 %v13137_v32 }
  0x86   : > { %1003 = vmatprep.subr.bf16.mxu1 %v13142_v33 }
  0x89   : > { %1004 = vmatpush1.bf16.msra.mxu1 %v13140_v34 }
  0x8a   : > { %1005 = vmatprep.subr.bf16.mxu1 %v13145_v35 }
  0x8d   : > { %1006 = vmatpush1.bf16.msra.mxu1 %v13143_v36 }
  0x8e   : > { %1007 = vmatprep.subr.bf16.mxu1 %v13148_v37  ;;  %v13628_v37 = vmov 1966171168  }
  0x91   : > { %1008 = vmatpush1.bf16.msra.mxu1 %v13146_v38  ;;  %v1164_v38 = vunpack.c.l.s4 %v13628_v37 }
  0x92   : > { %12459 = vmatprep.subr.bf16.mxu1 %v18920_v39 }
 0x127   : > { %v677_v47 = vpop.f32.mrb[0].mxu1 }
 0x128   : > { %v679_v49 = vpop.f32.mrb[1].mxu1  ;;  %v678_v51 = vadd.f32 %v677_v47, %v593_v46 }
 0x129   : > { %v681_v50 = vpop.f32.mrb[2].mxu1  ;;  %v680_v54 = vadd.f32 %v679_v49, %v597_v48 }
 0x12a   : > { %v682_v52 = vadd.f32 %v681_v50, %v593_v46  ;;  %v683_v53 = vpop.f32.mrb[3].mxu1 }
 0x12b   : > { %v684_v55 = vadd.f32 %v683_v53, %v597_v48 }
 0x12c   : > { %v752_v56 = vpack.c.bf16 %v682_v52, %v678_v51 }
 0x12d   : > { %v753_v57 = vpack.c.bf16 %v684_v55, %v680_v54 }
 0x12f   : > { %v687_v58 = vpop.f32.mrb[4].mxu1  ;;  %1009 = vmatprep.mubr.bf16.mxu1 %v753_v57  ;;  %12396 = vmatprep.subr.bf16.mxu0 %v753_v57 }
 0x130   : > { %v689_v59 = vpop.f32.mrb[5].mxu1  ;;  %1010 = vmatmul.mubr.bf16.vlgmr.msra.gmra.mrb[16].mxu1 %v752_v56  ;;  %12398 = vmatpush1.bf16.msra.mxu0 %v752_v56  ;;  %v688_v61 = vadd.f32 %v687_v58, %v593_v46 }
 0x131   : > { %v691_v60 = vpop.f32.mrb[6].mxu1  ;;  %v690_v0 = vadd.f32 %v689_v59, %v597_v48 }
 0x132   : > { %v692_v62 = vadd.f32 %v691_v60, %v593_v46  ;;  %v693_v63 = vpop.f32.mrb[7].mxu1 }
 0x133   : > { %v694_v1 = vadd.f32 %v693_v63, %v597_v48 }
 0x134   : > { %v754_v2 = vpack.c.bf16 %v692_v62, %v688_v61 }
 0x135   : > { %v755_v3 = vpack.c.bf16 %v694_v1, %v690_v0 }
 0x137   : > { %v697_v4 = vpop.f32.mrb[8].mxu1  ;;  %1019 = vmatprep.mubr.bf16.mxu1 %v755_v3  ;;  %12400 = vmatprep.subr.bf16.mxu0 %v755_v3 }
 0x138   : > { %v699_v5 = vpop.f32.mrb[9].mxu1  ;;  %1020 = vmatmul.mubr.bf16.gmra.mrb[20].mxu1 %v754_v2  ;;  %12402 = vmatpush1.bf16.msra.mxu0 %v754_v2  ;;  %v698_v7 = vadd.f32 %v697_v4, %v593_v46 }
 0x139   : > { %v701_v6 = vpop.f32.mrb[10].mxu1  ;;  %v700_v10 = vadd.f32 %v699_v5, %v597_v48 }
 0x13a   : > { %v702_v8 = vadd.f32 %v701_v6, %v593_v46  ;;  %v703_v9 = vpop.f32.mrb[11].mxu1 }
 0x13b   : > { %v704_v11 = vadd.f32 %v703_v9, %v597_v48 }
 0x13c   : > { %v756_v12 = vpack.c.bf16 %v702_v8, %v698_v7 }
 0x13d   : > { %v757_v13 = vpack.c.bf16 %v704_v11, %v700_v10 }
 0x13f   : > { %v707_v14 = vpop.f32.mrb[12].mxu1  ;;  %1029 = vmatprep.mubr.bf16.mxu1 %v757_v13  ;;  %12404 = vmatprep.subr.bf16.mxu0 %v757_v13 }
 0x140   : > { %v709_v15 = vpop.f32.mrb[13].mxu1  ;;  %1030 = vmatmul.mubr.bf16.gmra.mrb[24].mxu1 %v756_v12  ;;  %12406 = vmatpush1.bf16.msra.mxu0 %v756_v12  ;;  %v708_v17 = vadd.f32 %v707_v14, %v593_v46 }
 0x141   : > { %v711_v16 = vpop.f32.mrb[14].mxu1  ;;  %v710_v20 = vadd.f32 %v709_v15, %v597_v48 }
 0x142   : > { %v712_v18 = vadd.f32 %v711_v16, %v593_v46  ;;  %v713_v19 = vpop.f32.mrb[15].mxu1  ;;  %v1165_v46 = vunpack.c.0.s8 %v1164_v38 }
 0x143   : > { %v714_v21 = vadd.f32 %v713_v19, %v597_v48 }
 0x144   : > { %v758_v22 = vpack.c.bf16 %v712_v18, %v708_v17  ;;  %v13982_v49 = vsub.s32 %v1165_v46, %v13927_v42 }
 0x145   : > { %v759_v23 = vpack.c.bf16 %v714_v21, %v710_v20 }
 0x147   : > { %1039 = vmatprep.mubr.bf16.mxu1 %v759_v23  ;;  %12408 = vmatprep.subr.bf16.mxu0 %v759_v23 }
 0x148   : > { %1040 = vmatmul.mubr.bf16.gmra.mrb[28].mxu1 %v758_v22  ;;  %12410 = vmatpush1.bf16.msra.mxu0 %v758_v22 }
 0x149   : > { %1099 = vmatprep.subr.mxu0 %v1074_v24  ;;  %1049 = vmatprep.mubr.bf16.mxu1 %v18920_v39 }
 0x14c   : > { %1100 = vmatpush1.msra.mxu0 %v1074_v24 }
 0x14d   : > { %11122 = vmatmul.mubr.msk.f32.vlgmr.msra.gmra.mrb[0].mxu0 %vm18931_vm1, %v762_v25  ;;  %12411 = vmatprep.subr.bf16.mxu0 %v18920_v39 }
 0x14e   : > { %1153 = vmatprep.mubr.f32.mxu0 %v18918_v40 }
 0x150   : > { %1050 = vmatmul.mubr.bf16.gmra.mrb[32].mxu1 %v18920_v39 }
 0x151   : > { %11123 = vmatmul.mubr.msk.f32.gmra.mrb[2].mxu0 %vm18931_vm1, %v763_v26 }
 0x203   : > { %v13953_v27 = vpop.f32.mrb[16].mxu1 }
 0x204   : > { %18958 = vst [vmem:[#allocation12_spill] sm:$0xff] %v13953_v27  ;;  %v13955_v28 = vpop.f32.mrb[17].mxu1 }
 0x205   : > { %18959 = vst [vmem:[#allocation13_spill] sm:$0xff] %v13955_v28  ;;  %v13957_v29 = vpop.f32.mrb[18].mxu1 }
 0x206   : > { %18960 = vst [vmem:[#allocation14_spill] sm:$0xff] %v13957_v29  ;;  %v13959_v30 = vpop.f32.mrb[19].mxu1 }
 0x207   : > { %18961 = vst [vmem:[#allocation15_spill] sm:$0xff] %v13959_v30 }
 0x20b   : > { %v13961_v31 = vpop.f32.mrb[20].mxu1 }
 0x20c   : > { %18962 = vst [vmem:[#allocation16_spill] sm:$0xff] %v13961_v31  ;;  %v13963_v32 = vpop.f32.mrb[21].mxu1 }
 0x20d   : > { %18963 = vst [vmem:[#allocation17_spill] sm:$0xff] %v13963_v32  ;;  %v13965_v33 = vpop.f32.mrb[22].mxu1 }
 0x20e   : > { %18964 = vst [vmem:[#allocation18_spill] sm:$0xff] %v13965_v33  ;;  %v13967_v34 = vpop.f32.mrb[23].mxu1 }
 0x20f   : > { %18965 = vst [vmem:[#allocation19_spill] sm:$0xff] %v13967_v34 }
 0x213   : > { %v13969_v35 = vpop.f32.mrb[24].mxu1 }
 0x214   : > { %18966 = vst [vmem:[#allocation20_spill] sm:$0xff] %v13969_v35  ;;  %v13971_v36 = vpop.f32.mrb[25].mxu1 }
 0x215   : > { %18967 = vst [vmem:[#allocation21_spill] sm:$0xff] %v13971_v36  ;;  %v13973_v41 = vpop.f32.mrb[26].mxu1 }
 0x216   : > { %18968 = vst [vmem:[#allocation22_spill] sm:$0xff] %v13973_v41  ;;  %v13975_v44 = vpop.f32.mrb[27].mxu1 }
 0x217   : > { %18969 = vst [vmem:[#allocation23_spill] sm:$0xff] %v13975_v44  ;;  %v1974_v44 = vld [vmem:[#allocation3 + $0x30] sm:$0xff] }
 0x21b   : > { %v13977_v47 = vpop.f32.mrb[28].mxu1 }
 0x21c   : > { %18970 = vst [vmem:[#allocation24_spill] sm:$0xff] %v13977_v47  ;;  %v13979_v48 = vpop.f32.mrb[29].mxu1  ;;  %v1973_v47 = vld [vmem:[#allocation3 + $0x28] sm:$0xff] }
 0x21d   : > { %18971 = vst [vmem:[#allocation25_spill] sm:$0xff] %v13979_v48  ;;  %v13984_v50 = vpop.f32.mrb[30].mxu1  ;;  %v1972_v48 = vld [vmem:[#allocation3 + $0x20] sm:$0xff] }
 0x21e   : > { %18972 = vst [vmem:[#allocation26_spill] sm:$0xff] %v13984_v50  ;;  %v13986_v51 = vpop.f32.mrb[31].mxu1 }
 0x21f   : > { %18973 = vst [vmem:[#allocation27_spill] sm:$0xff] %v13986_v51  ;;  %v18975_v51 = vmov 0.0|0.0  }
 0x220   : > { %v13988_v52 = vpop.f32.mrb[0].mxu0 }
 0x221   : > { %v1169_v53 = vrot.slane %v13988_v52, %v13982_v49  ;;  %v13992_v54 = vpop.f32.mrb[1].mxu0 }
 0x222   : > { %v1285_v55 = vrot.slane %v13992_v54, %v13982_v49 }
 0x223   : > { %v13997_v56 = vrot.slane %v1169_v53, %v13982_v49  ;;  %v1177_v61 = vcombine.high %v1169_v53, %v1169_v53 }
 0x224   : > { %v1155_v57 = vpop.f32.mrb[2].mxu0  ;;  %v1301_v58 = vrot.slane %v1285_v55, %v13982_v49  ;;  %v1293_v2 = vcombine.high %v1285_v55, %v1285_v55 }
 0x225   : > { %v1379_v59 = vrot.slane %v13997_v56, %v13930_v43  ;;  %v14002_v60 = vpop.f32.mrb[3].mxu0  ;;  %v14013_v63 = vrot.slane %v1177_v61, %v13982_v49  ;;  %v14023_v1 = vcombine.high %v13997_v56, %v13997_v56  ;;  %v1218_v5 = vrot.slane %v1155_v57, %v13982_v49 }
 0x226   : > { %v14007_v62 = vrot.slane %v1301_v58, %v13930_v43  ;;  %v14032_v4 = vrot.slane %v1293_v2, %v13982_v49  ;;  %v1323_v6 = vcombine.high %v1301_v58, %v1301_v58  ;;  %v1334_v11 = vrot.slane %v14002_v60, %v13982_v49 }
 0x227   : > { %1488 = vrot.lane.b32.xlu1 %v1379_v59, %s13629_s22  ;;  %1440 = vrot.lane.b32.xlu0 %v1379_v59, %s13630_s23  ;;  %v1383_v0 = vrot.slane %v14013_v63, %v13930_v43  ;;  %v1387_v3 = vrot.slane %v14023_v1, %v13930_v43  ;;  %v14046_v8 = vrot.slane %v1218_v5, %v13982_v49 }
 0x228   : > { %v14039_v7 = vrot.slane %v14032_v4, %v13930_v43  ;;  %v14049_v9 = vrot.slane %v1323_v6, %v13930_v43  ;;  %v1226_v12 = vcombine.high %v1218_v5, %v1218_v5  ;;  %v1350_v13 = vrot.slane %v1334_v11, %v13982_v49 }
 0x229   : > { %v1411_v10 = vrot.slane %v14046_v8, %v13930_v43  ;;  %v1211_v16 = vcombine.high %v1155_v57, %v1155_v57  ;;  %v14083_v19 = vcombine.high %v14046_v8, %v14046_v8  ;;  %v1342_v21 = vcombine.high %v1334_v11, %v1334_v11 }
 0x22a   : > { %v14066_v14 = vrot.slane %v1226_v12, %v13982_v49  ;;  %v14069_v15 = vrot.slane %v1350_v13, %v13930_v43  ;;  %v1327_v26 = vcombine.high %v14002_v60, %v14002_v60  ;;  %v1372_v37 = vcombine.high %v1350_v13, %v1350_v13 }
 0x22b   : > { %1536 = vrot.lane.b32.xlu0 %v1379_v59, %s13631_s25  ;;  %1664 = vrot.lane.b32.xlu1 %v14007_v62, %s13630_s23  ;;  %v1225_v18 = vrot.slane %v1211_v16, %v13982_v49  ;;  %v1419_v22 = vrot.slane %v14083_v19, %v13930_v43  ;;  %v1364_v23 = vrot.slane %v1342_v21, %v13982_v49 }
 0x22c   : > { %v1415_v17 = vrot.slane %v14066_v14, %v13930_v43  ;;  %v1341_v38 = vrot.slane %v1327_v26, %v13982_v49  ;;  %v14112_v46 = vrot.slane %v1372_v37, %v13930_v43  ;;  %v14121_v55 = vcombine.high %v14066_v14, %v14066_v14 }
 0x22d   : > { %v14088_v20 = vrot.slane %v1225_v18, %v13982_v49  ;;  %v14100_v25 = vrot.slane %v1364_v23, %v13930_v43  ;;  %v1227_v57 = vcombine.high %v1225_v18, %v1225_v18  ;;  %v1374_v5 = vcombine.high %v1364_v23, %v1364_v23 }
 0x22e   : > { %v1357_v53 = vrot.slane %v1341_v38, %v13982_v49  ;;  %v1423_v58 = vrot.slane %v14121_v55, %v13930_v43 }
 0x22f   : > { %1760 = vrot.lane.b32.xlu0 %v14007_v62, %s13631_s25  ;;  %1712 = vrot.lane.b32.xlu1 %v14007_v62, %s13629_s22  ;;  %v1427_v24 = vrot.slane %v14088_v20, %v13930_v43  ;;  %v14136_v60 = vrot.slane %v1227_v57, %v13982_v49 }
 0x230   : > { %v14130_v59 = vrot.slane %v1357_v53, %v13930_v43 }
 0x231   : > { %v1431_v61 = vrot.slane %v14136_v60, %v13930_v43  ;;  %v14171_v12 = vcombine.high %v14136_v60, %v14136_v60 }
 0x233   : > { %1490 = vrot.lane.b32.xlu0 %v1383_v0, %s13629_s22  ;;  %1442 = vrot.lane.b32.xlu1 %v1383_v0, %s13630_s23  ;;  %v1439_v13 = vrot.slane %v14171_v12, %v13930_v43 }
 0x237   : > { %1444 = vrot.lane.b32.xlu0 %v1387_v3, %s13630_s23  ;;  %1538 = vrot.lane.b32.xlu1 %v1383_v0, %s13631_s25  ;;  %v14148_v0 = vcombine.high %v14088_v20, %v14088_v20 }
 0x239   : > { %v1435_v2 = vrot.slane %v14148_v0, %v13930_v43 }
 0x23b   : > { %1540 = vrot.lane.b32.xlu0 %v1387_v3, %s13631_s25  ;;  %1492 = vrot.lane.b32.xlu1 %v1387_v3, %s13629_s22  ;;  %v1343_v3 = vcombine.high %v1341_v38, %v1341_v38 }
 0x23d   : > { %v1371_v6 = vrot.slane %v1343_v3, %v13982_v49  ;;  %v1968_v3 = vld [vmem:[#allocation3] sm:$0xff] }
 0x23f   : > { %1714 = vrot.lane.b32.xlu0 %v14039_v7, %s13629_s22  ;;  %1666 = vrot.lane.b32.xlu1 %v14039_v7, %s13630_s23  ;;  %v14167_v11 = vrot.slane %v1371_v6, %v13930_v43  ;;  %v1375_v16 = vcombine.high %v1371_v6, %v1371_v6 }
 0x241   : > { %v14183_v18 = vrot.slane %v1375_v16, %v13930_v43  ;;  %v1162_v16 = vcombine.high %v13988_v52, %v13988_v52 }
 0x243   : > { %1716 = vrot.lane.b32.xlu0 %v14049_v9, %s13629_s22  ;;  %1762 = vrot.lane.b32.xlu1 %v14039_v7, %s13631_s25  ;;  %v14244_v52 = vrot.slane %v1162_v16, %v13982_v49 }
 0x245   : > { %v14258_v16 = vrot.slane %v14244_v52, %v13982_v49 }
 0x247   : > { %1668 = vrot.lane.b32.xlu1 %v14049_v9, %s13630_s23  ;;  %1456 = vrot.lane.b32.xlu0 %v1411_v10, %s13630_s23 }
 0x24b   : > { %1552 = vrot.lane.b32.xlu1 %v1411_v10, %s13631_s25  ;;  %1504 = vrot.lane.b32.xlu0 %v1411_v10, %s13629_s22  ;;  %v14160_v10 = vrot.slane %v1374_v5, %v13930_v43  ;;  %v1969_v5 = vld [vmem:[#allocation3 + $0x8] sm:$0xff] }
 0x24c   : > { %v12412_v6 = vpack.c.bf16 %v1969_v5, %v1968_v3  ;;  %v1970_v3 = vld [vmem:[#allocation3 + $0x10] sm:$0xff]  ;;  %v1971_v5 = vld [vmem:[#allocation3 + $0x18] sm:$0xff] }
 0x24e   : > { %12413 = vmatpush3.bf16.msra.mxu0 %v12412_v6 }
 0x24f   : > { %1728 = vrot.lane.b32.xlu0 %v14069_v15, %s13629_s22  ;;  %1680 = vrot.lane.b32.xlu1 %v14069_v15, %s13630_s23 }
 0x250   : > { %12414 = vmatprep.subr.bf16.mxu0 %v18975_v51 }
 0x253   : > { %1458 = vrot.lane.b32.xlu0 %v1415_v17, %s13630_s23  ;;  %1776 = vrot.lane.b32.xlu1 %v14069_v15, %s13631_s25 }
 0x257   : > { %1554 = vrot.lane.b32.xlu0 %v1415_v17, %s13631_s25  ;;  %1506 = vrot.lane.b32.xlu1 %v1415_v17, %s13629_s22  ;;  %v1373_v17 = vcombine.high %v1357_v53, %v1357_v53 }
 0x259   : > { %v14194_v23 = vrot.slane %v1373_v17, %v13930_v43  ;;  %v1325_v17 = vcombine.high %v14032_v4, %v14032_v4 }
 0x25b   : > { %1460 = vrot.lane.b32.xlu0 %v1419_v22, %s13630_s23  ;;  %1508 = vrot.lane.b32.xlu1 %v1419_v22, %s13629_s22  ;;  %v14251_v50 = vrot.slane %v1325_v17, %v13930_v43 }
 0x25f   : > { %1556 = vrot.lane.b32.xlu0 %v1419_v22, %s13631_s25  ;;  %1512 = vrot.lane.b32.xlu1 %v1427_v24, %s13629_s22 }
 0x263   : > { %1464 = vrot.lane.b32.xlu0 %v1427_v24, %s13630_s23  ;;  %1682 = vrot.lane.b32.xlu1 %v14100_v25, %s13630_s23 }
 0x267   : > { %1560 = vrot.lane.b32.xlu0 %v1427_v24, %s13631_s25  ;;  %1778 = vrot.lane.b32.xlu1 %v14100_v25, %s13631_s25 }
 0x26b   : > { %1730 = vrot.lane.b32.xlu0 %v14100_v25, %s13629_s22  ;;  %1684 = vrot.lane.b32.xlu1 %v14112_v46, %s13630_s23 }
 0x26f   : > { %1732 = vrot.lane.b32.xlu0 %v14112_v46, %s13629_s22  ;;  %1780 = vrot.lane.b32.xlu1 %v14112_v46, %s13631_s25 }
 0x273   : > { %1462 = vrot.lane.b32.xlu0 %v1423_v58, %s13630_s23  ;;  %1688 = vrot.lane.b32.xlu1 %v14130_v59, %s13630_s23 }
 0x277   : > { %1558 = vrot.lane.b32.xlu0 %v1423_v58, %s13631_s25  ;;  %1736 = vrot.lane.b32.xlu1 %v14130_v59, %s13629_s22 }
 0x27b   : > { %1466 = vrot.lane.b32.xlu0 %v1431_v61, %s13630_s23  ;;  %1784 = vrot.lane.b32.xlu1 %v14130_v59, %s13631_s25 }
 0x27f   : > { %1562 = vrot.lane.b32.xlu0 %v1431_v61, %s13631_s25  ;;  %1510 = vrot.lane.b32.xlu1 %v1423_v58, %s13629_s22 }
 0x283   : > { %1468 = vrot.lane.b32.xlu0 %v1435_v2, %s13630_s23  ;;  %1514 = vrot.lane.b32.xlu1 %v1431_v61, %s13629_s22 }
 0x287   : > { %1564 = vrot.lane.b32.xlu0 %v1435_v2, %s13631_s25  ;;  %1516 = vrot.lane.b32.xlu1 %v1435_v2, %s13629_s22  ;;  %v14225_v2 = vcombine.high %v14013_v63, %v14013_v63 }
 0x289   : > { %18974 = vst [vmem:[#allocation28_spill] sm:$0xff] %v14225_v2  ;;  %v14238_v42 = vrot.slane %v14225_v2, %v13930_v43 }
 0x28b   : > { %1734 = vrot.lane.b32.xlu0 %v14160_v10, %s13629_s22  ;;  %1686 = vrot.lane.b32.xlu1 %v14160_v10, %s13630_s23 }
 0x28f   : > { %1782 = vrot.lane.b32.xlu1 %v14160_v10, %s13631_s25  ;;  %1690 = vrot.lane.b32.xlu0 %v14167_v11, %s13630_s23 }
 0x293   : > { %1518 = vrot.lane.b32.xlu1 %v1439_v13, %s13629_s22  ;;  %1738 = vrot.lane.b32.xlu0 %v14167_v11, %s13629_s22 }
 0x297   : > { %1786 = vrot.lane.b32.xlu0 %v14167_v11, %s13631_s25  ;;  %1694 = vrot.lane.b32.xlu1 %v14183_v18, %s13630_s23 }
 0x299   : > { %v14189_v21 = vpop.permute.xlu1 %1488  ;;  %v14191_v22 = vpop.permute.xlu0 %1440 }
 0x29b   : > { %1692 = vrot.lane.b32.xlu0 %v14194_v23, %s13630_s23  ;;  %1742 = vrot.lane.b32.xlu1 %v14183_v18, %s13629_s22 }
 0x29d   : > { %v14200_v24 = vpop.permute.xlu0 %1536  ;;  %v14202_v26 = vpop.permute.xlu1 %1664 }
 0x29f   : > { %1740 = vrot.lane.b32.xlu0 %v14194_v23, %s13629_s22  ;;  %1790 = vrot.lane.b32.xlu1 %v14183_v18, %s13631_s25 }
 0x2a1   : > { %v14208_v37 = vpop.permute.xlu0 %1760  ;;  %v14210_v38 = vpop.permute.xlu1 %1712 }
 0x2a3   : > { %1788 = vrot.lane.b32.xlu0 %v14194_v23, %s13631_s25 }
 0x2a5   : > { %v14214_v53 = vpop.permute.xlu0 %1490  ;;  %v14216_v57 = vpop.permute.xlu1 %1442 }
 0x2a7   : > { %1470 = vrot.lane.b32.xlu0 %v1439_v13, %s13630_s23 }
 0x2a9   : > { %v14219_v58 = vpop.permute.xlu0 %1444  ;;  %v14221_v61 = vpop.permute.xlu1 %1538 }
 0x2ab   : > { %1566 = vrot.lane.b32.xlu0 %v1439_v13, %s13631_s25  ;;  %v12415_v13 = vpack.c.bf16 %v1971_v5, %v1970_v3  ;;  %v12418_v3 = vpack.c.bf16 %v1973_v47, %v1972_v48  ;;  %v1975_v5 = vld [vmem:[#allocation3 + $0x38] sm:$0xff]  ;;  %v14271_v47 = vrot.slane %v14258_v16, %v13930_v43 }
 0x2ac   : > { %v12421_v17 = vpack.c.bf16 %v1975_v5, %v1974_v44  ;;  %v18977_v44 = vmov 0.0  }
 0x2ad   : > { %v14232_v40 = vpop.permute.xlu0 %1540  ;;  %v14234_v39 = vpop.permute.xlu1 %1492  ;;  %12416 = vmatpush3.bf16.msra.mxu0 %v12415_v13  ;;  %11730 = vmatprep.mubr.msk.f32.mxu0 %vm13632_vm2, %v18977_v44 }
 0x2ae   : > { %12417 = vmatprep.subr.bf16.mxu0 %v18975_v51  ;;  %11806 = vmatprep.mubr.msk.f32.mxu1 %vm13632_vm2, %v18977_v44 }
 0x2af   : > { %1494 = vrot.lane.b32.xlu0 %v14238_v42, %s13629_s22 }
 0x2b1   : > { %v14246_v4 = vpop.permute.xlu0 %1714  ;;  %v14248_v6 = vpop.permute.xlu1 %1666  ;;  %12419 = vmatpush3.bf16.msra.mxu0 %v12418_v3 }
 0x2b2   : > { %12420 = vmatprep.subr.bf16.mxu0 %v18975_v51 }
 0x2b3   : > { %1670 = vrot.lane.b32.xlu0 %v14251_v50, %s13630_s23 }
 0x2b5   : > { %v14260_v41 = vpop.permute.xlu0 %1716  ;;  %v14262_v36 = vpop.permute.xlu1 %1762  ;;  %12422 = vmatpush3.bf16.msra.mxu0 %v12421_v17 }
 0x2b6   : > { %18976 = vst [vmem:[#allocation29_spill] sm:$0xff] %v14260_v41  ;;  %12423 = vmatprep.subr.bf16.mxu0 %v18975_v51 }
 0x2b7   : > { %1766 = vrot.lane.b32.xlu0 %v14251_v50, %s13631_s25 }
 0x2b9   : > { %v14267_v13 = vpop.permute.xlu1 %1668  ;;  %v1457_v35 = vpop.permute.xlu0 %1456 }
 0x2ba   : > { %v1817_v48 = vsel %vm1808_vm3, %v14046_v8, %v1457_v35 }
 0x2bb   : > { %1448 = vrot.lane.b32.xlu0 %v14271_v47, %s13630_s23 }
 0x2bd   : > { %v1553_v3 = vpop.permute.xlu1 %1552  ;;  %v1505_v5 = vpop.permute.xlu0 %1504 }
 0x2be   : > { %v1834_v17 = vsel %vm18938_vm4, %v1817_v48, %v1505_v5 }
 0x2bf   : > { %v1851_v34 = vsel %vm18937_vm5, %v1834_v17, %v1553_v3  ;;  %1496 = vrot.lane.b32.xlu0 %v14271_v47, %s13629_s22 }
 0x2c0   : > { %v1868_v33 = vsel %vm18936_vm6, %v1851_v34, %v14069_v15 }
 0x2c1   : > { %v1729_v32 = vpop.permute.xlu0 %1728  ;;  %v1681_v31 = vpop.permute.xlu1 %1680 }
 0x2c2   : > { %v1885_v30 = vsel %vm18929_vm7, %v1868_v33, %v1681_v31 }
 0x2c3   : > { %v1902_v48 = vsel %vm18928_vm8, %v1885_v30, %v1729_v32 }
 0x2c5   : > { %v1459_v35 = vpop.permute.xlu0 %1458  ;;  %v1777_v8 = vpop.permute.xlu1 %1776 }
 0x2c6   : > { %v1919_v5 = vsel %vm18927_vm9, %v1902_v48, %v1777_v8  ;;  %v1818_v30 = vsel %vm1808_vm3, %v14066_v14, %v1459_v35 }
 0x2c7   : > { %1935 = vrot.lane.b32.xlu1 %v1919_v5, %s13631_s25 }
 0x2c9   : > { %v1555_v3 = vpop.permute.xlu0 %1554  ;;  %v1507_v17 = vpop.permute.xlu1 %1506 }
 0x2ca   : > { %v1835_v48 = vsel %vm18938_vm4, %v1818_v30, %v1507_v17  ;;  %v2001_v30 = vld [vmem:[#allocation3 + $0x108] sm:$0xff] }
 0x2cb   : > { %1764 = vrot.lane.b32.xlu1 %v14049_v9, %s13631_s25  ;;  %v1852_v5 = vsel %vm18937_vm5, %v1835_v48, %v1555_v3  ;;  %v1178_v3 = vcombine.high %v14244_v52, %v14244_v52 }
 0x2cd   : > { %v1461_v34 = vpop.permute.xlu0 %1460  ;;  %v1509_v15 = vpop.permute.xlu1 %1508  ;;  %v14326_v52 = vrot.slane %v1178_v3, %v13982_v49  ;;  %v2004_v3 = vld [vmem:[#allocation3 + $0x120] sm:$0xff] }
 0x2ce   : > { %v1819_v29 = vsel %vm1808_vm3, %v14083_v19, %v1461_v34  ;;  %v1278_v19 = vcombine.high %v13992_v54, %v13992_v54 }
 0x2cf   : > { %1446 = vrot.lane.b32.xlu1 %v14238_v42, %s13630_s23  ;;  %v1836_v45 = vsel %vm18938_vm4, %v1819_v29, %v1509_v15 }
 0x2d0   : > { %v1292_v54 = vrot.slane %v1278_v19, %v13982_v49  ;;  %v2005_v19 = vld [vmem:[#allocation3 + $0x128] sm:$0xff] }
 0x2d1   : > { %v1557_v31 = vpop.permute.xlu0 %1556  ;;  %v14296_v33 = vpop.permute.xlu1 %1512 }
 0x2d2   : > { %v1853_v14 = vsel %vm18937_vm5, %v1836_v45, %v1557_v31  ;;  %v2000_v31 = vld [vmem:[#allocation3 + $0x100] sm:$0xff] }
 0x2d3   : > { %1542 = vrot.lane.b32.xlu1 %v14238_v42, %s13631_s25  ;;  %v1869_v42 = vsel %vm18936_vm6, %v1852_v5, %v14100_v25  ;;  %v1870_v29 = vsel %vm18936_vm6, %v1853_v14, %v14112_v46  ;;  %v2003_v46 = vld [vmem:[#allocation3 + $0x118] sm:$0xff]  ;;  %v14335_v14 = vrot.slane %v1292_v54, %v13982_v49 }
 0x2d5   : > { %v14302_v32 = vpop.permute.xlu0 %1464  ;;  %v1683_v8 = vpop.permute.xlu1 %1682 }
 0x2d6   : > { %v1886_v35 = vsel %vm18929_vm7, %v1869_v42, %v1683_v8  ;;  %v12460_v8 = vpack.c.bf16 %v2001_v30, %v2000_v31 }
 0x2d8   : > { %12461 = vmatpush3.bf16.msra.mxu1 %v12460_v8 }
 0x2d9   : > { %v14308_v28 = vpop.permute.xlu0 %1560  ;;  %v1779_v27 = vpop.permute.xlu1 %1778  ;;  %12462 = vmatprep.subr.bf16.mxu1 %v18975_v51 }
 0x2dd   : > { %v1731_v2 = vpop.permute.xlu0 %1730  ;;  %v1685_v41 = vpop.permute.xlu1 %1684 }
 0x2de   : > { %v1903_v17 = vsel %vm18928_vm8, %v1886_v35, %v1731_v2  ;;  %v1887_v45 = vsel %vm18929_vm7, %v1870_v29, %v1685_v41  ;;  %v2002_v41 = vld [vmem:[#allocation3 + $0x110] sm:$0xff]  ;;  %v1399_v35 = vrot.slane %v14326_v52, %v13930_v43  ;;  %v12466_v29 = vpack.c.bf16 %v2005_v19, %v2004_v3 }
 0x2df   : > { %v1920_v34 = vsel %vm18927_vm9, %v1903_v17, %v1779_v27  ;;  %v12463_v42 = vpack.c.bf16 %v2003_v46, %v2002_v41 }
 0x2e0   : > { %1937 = vrot.lane.b32.xlu1 %v1920_v34, %s13631_s25 }
 0x2e1   : > { %v1733_v25 = vpop.permute.xlu0 %1732  ;;  %v1781_v15 = vpop.permute.xlu1 %1780  ;;  %12464 = vmatpush3.bf16.msra.mxu1 %v12463_v42  ;;  %v14367_v42 = vcombine.high %v14258_v16, %v14258_v16 }
 0x2e2   : > { %v1904_v2 = vsel %vm18928_vm8, %v1887_v45, %v1733_v25  ;;  %v1294_v45 = vcombine.high %v1292_v54, %v1292_v54  ;;  %v14345_v25 = vrot.slane %v14335_v14, %v13930_v43  ;;  %12465 = vmatprep.subr.bf16.mxu1 %v18975_v51  ;;  %v1821_v54 = vsel %vm1808_vm3, %v14088_v20, %v14302_v32 }
 0x2e3   : > { %v1921_v27 = vsel %vm18927_vm9, %v1904_v2, %v1781_v15  ;;  %v2006_v15 = vld [vmem:[#allocation3 + $0x130] sm:$0xff] }
 0x2e4   : > { %1939 = vrot.lane.b32.xlu0 %v1921_v27, %s13631_s25  ;;  %1718 = vrot.lane.b32.xlu1 %v14251_v50, %s13629_s22  ;;  %v14352_v8 = vrot.slane %v1294_v45, %v13982_v49 }
 0x2e5   : > { %v1463_v48 = vpop.permute.xlu0 %1462  ;;  %v1689_v5 = vpop.permute.xlu1 %1688  ;;  %12467 = vmatpush3.bf16.msra.mxu1 %v12466_v29  ;;  %v1403_v29 = vrot.slane %v14367_v42, %v13930_v43 }
 0x2e6   : > { %12468 = vmatprep.subr.bf16.mxu1 %v18975_v51  ;;  %v14363_v46 = vrot.slane %v14352_v8, %v13930_v43  ;;  %v1820_v19 = vsel %vm1808_vm3, %v14121_v55, %v1463_v48 }
 0x2e8   : > { %1544 = vrot.lane.b32.xlu0 %v14271_v47, %s13631_s25  ;;  %1450 = vrot.lane.b32.xlu1 %v1399_v35, %s13630_s23  ;;  %v2007_v47 = vld [vmem:[#allocation3 + $0x138] sm:$0xff] }
 0x2e9   : > { %v1559_v17 = vpop.permute.xlu0 %1558  ;;  %v1737_v34 = vpop.permute.xlu1 %1736  ;;  %v12469_v2 = vpack.c.bf16 %v2007_v47, %v2006_v15 }
 0x2eb   : > { %12470 = vmatpush3.bf16.msra.mxu1 %v12469_v2 }
 0x2ec   : > { %1672 = vrot.lane.b32.xlu0 %v14345_v25, %s13630_s23  ;;  %1498 = vrot.lane.b32.xlu1 %v1399_v35, %s13629_s22 }
 0x2ed   : > { %v1467_v31 = vpop.permute.xlu0 %1466  ;;  %v1785_v30 = vpop.permute.xlu1 %1784  ;;  %12483 = vmatprep.subr.bf16.mxu1 %v18975_v51 }
 0x2f0   : > { %1720 = vrot.lane.b32.xlu0 %v14345_v25, %s13629_s22  ;;  %1546 = vrot.lane.b32.xlu1 %v1399_v35, %s13631_s25  ;;  %v1838_v35 = vsel %vm18938_vm4, %v1821_v54, %v14296_v33 }
 0x2f1   : > { %v1563_v27 = vpop.permute.xlu0 %1562  ;;  %v1511_v41 = vpop.permute.xlu1 %1510  ;;  %v1855_v20 = vsel %vm18937_vm5, %v1838_v35, %v14308_v28 }
 0x2f2   : > { %v1837_v45 = vsel %vm18938_vm4, %v1820_v19, %v1511_v41  ;;  %v1872_v33 = vsel %vm18936_vm6, %v1855_v20, %v14130_v59  ;;  %v1324_v20 = vcombine.high %v14335_v14, %v14335_v14 }
 0x2f3   : > { %v1889_v28 = vsel %vm18929_vm7, %v1872_v33, %v1689_v5  ;;  %v1854_v55 = vsel %vm18937_vm5, %v1837_v45, %v1559_v17 }
 0x2f4   : > { %1768 = vrot.lane.b32.xlu0 %v14345_v25, %s13631_s25  ;;  %1674 = vrot.lane.b32.xlu1 %v14363_v46, %s13630_s23  ;;  %v1906_v2 = vsel %vm18928_vm8, %v1889_v28, %v1737_v34  ;;  %v1871_v54 = vsel %vm18936_vm6, %v1854_v55, %v14160_v10  ;;  %v14412_v33 = vrot.slane %v1324_v20, %v13930_v43 }
 0x2f5   : > { %v1469_v32 = vpop.permute.xlu0 %1468  ;;  %v1515_v3 = vpop.permute.xlu1 %1514  ;;  %v1923_v48 = vsel %vm18927_vm9, %v1906_v2, %v1785_v30  ;;  %v14402_v30 = vcombine.high %v14326_v52, %v14326_v52  ;;  %v1822_v28 = vsel %vm1808_vm3, %v14136_v60, %v1467_v31 }
 0x2f6   : > { %v1839_v14 = vsel %vm18938_vm4, %v1822_v28, %v1515_v3 }
 0x2f7   : > { %v1407_v45 = vrot.slane %v14402_v30, %v13930_v43  ;;  %v1856_v55 = vsel %vm18937_vm5, %v1839_v14, %v1563_v27 }
 0x2f8   : > { %1452 = vrot.lane.b32.xlu0 %v1403_v29, %s13630_s23  ;;  %1722 = vrot.lane.b32.xlu1 %v14363_v46, %s13629_s22  ;;  %v1873_v60 = vsel %vm18936_vm6, %v1856_v55, %v14167_v11  ;;  %v1809_v55 = vsel %vm1808_vm3, %v13997_v56, %v14191_v22 }
 0x2f9   : > { %v1565_v15 = vpop.permute.xlu0 %1564  ;;  %v1517_v47 = vpop.permute.xlu1 %1516 }
 0x2fc   : > { %1943 = vrot.lane.b32.xlu0 %v1923_v48, %s13631_s25  ;;  %1770 = vrot.lane.b32.xlu1 %v14363_v46, %s13631_s25 }
 0x2fd   : > { %v1735_v59 = vpop.permute.xlu0 %1734  ;;  %v1687_v41 = vpop.permute.xlu1 %1686 }
 0x2fe   : > { %v1888_v5 = vsel %vm18929_vm7, %v1871_v54, %v1687_v41 }
 0x2ff   : > { %v1905_v17 = vsel %vm18928_vm8, %v1888_v5, %v1735_v59 }
 0x300   : > { %1500 = vrot.lane.b32.xlu0 %v1403_v29, %s13629_s22 }
 0x301   : > { %v1783_v35 = vpop.permute.xlu1 %1782  ;;  %v1691_v34 = vpop.permute.xlu0 %1690 }
 0x302   : > { %v1922_v19 = vsel %vm18927_vm9, %v1905_v17, %v1783_v35  ;;  %v1890_v54 = vsel %vm18929_vm7, %v1873_v60, %v1691_v34 }
 0x303   : > { %1941 = vrot.lane.b32.xlu1 %v1922_v19, %s13631_s25 }
 0x304   : > { %1548 = vrot.lane.b32.xlu0 %v1403_v29, %s13631_s25  ;;  %v1823_v29 = vsel %vm1808_vm3, %v14148_v0, %v1469_v32  ;;  %v1326_v32 = vcombine.high %v14352_v8, %v14352_v8 }
 0x305   : > { %v1739_v10 = vpop.permute.xlu0 %1738  ;;  %v1840_v48 = vsel %vm18938_vm4, %v1823_v29, %v1517_v47  ;;  %v1519_v31 = vpop.permute.xlu1 %1518 }
 0x306   : > { %v1857_v3 = vsel %vm18937_vm5, %v1840_v48, %v1565_v15  ;;  %v1907_v0 = vsel %vm18928_vm8, %v1890_v54, %v1739_v10  ;;  %v14444_v34 = vrot.slane %v1326_v32, %v13930_v43  ;;  %v1826_v48 = vsel %vm18938_vm4, %v1809_v55, %v14189_v21  ;;  %v1981_v32 = vld [vmem:[#allocation3 + $0x68] sm:$0xff]  ;;  %v1987_v55 = vld [vmem:[#allocation3 + $0x98] sm:$0xff] }
 0x307   : > { %1454 = vrot.lane.b32.xlu1 %v1407_v45, %s13630_s23  ;;  %v1874_v11 = vsel %vm18936_vm6, %v1857_v3, %v14194_v23  ;;  %v1977_v3 = vld [vmem:[#allocation3 + $0x48] sm:$0xff] }
 0x308   : > { %1676 = vrot.lane.b32.xlu0 %v14412_v33, %s13630_s23 }
 0x309   : > { %v1787_v2 = vpop.permute.xlu0 %1786  ;;  %v1695_v41 = vpop.permute.xlu1 %1694 }
 0x30a   : > { %v1924_v47 = vsel %vm18927_vm9, %v1907_v0, %v1787_v2  ;;  %v1978_v0 = vld [vmem:[#allocation3 + $0x50] sm:$0xff] }
 0x30b   : > { %1502 = vrot.lane.b32.xlu1 %v1407_v45, %s13629_s22 }
 0x30c   : > { %1724 = vrot.lane.b32.xlu0 %v14412_v33, %s13629_s22 }
 0x30d   : > { %v1693_v59 = vpop.permute.xlu0 %1692  ;;  %v1743_v20 = vpop.permute.xlu1 %1742 }
 0x30e   : > { %v1891_v15 = vsel %vm18929_vm7, %v1874_v11, %v1693_v59  ;;  %v1982_v11 = vld [vmem:[#allocation3 + $0x70] sm:$0xff] }
 0x30f   : > { %1550 = vrot.lane.b32.xlu1 %v1407_v45, %s13631_s25 }
 0x310   : > { %1772 = vrot.lane.b32.xlu0 %v14412_v33, %s13631_s25 }
 0x311   : > { %v1741_v27 = vpop.permute.xlu0 %1740  ;;  %v1791_v2 = vpop.permute.xlu1 %1790 }
 0x312   : > { %v1908_v5 = vsel %vm18928_vm8, %v1891_v15, %v1741_v27  ;;  %v1983_v15 = vld [vmem:[#allocation3 + $0x78] sm:$0xff] }
 0x313   : > { %1945 = vrot.lane.b32.xlu1 %v1924_v47, %s13631_s25 }
 0x315   : > { %v1789_v35 = vpop.permute.xlu0 %1788 }
 0x316   : > { %v1925_v17 = vsel %vm18927_vm9, %v1908_v5, %v1789_v35  ;;  %v12433_v5 = vpack.c.bf16 %v1983_v15, %v1982_v11  ;;  %v1810_v35 = vsel %vm1808_vm3, %v14013_v63, %v14216_v57  ;;  %v1995_v15 = vld [vmem:[#allocation3 + $0xd8] sm:$0xff] }
 0x317   : > { %1947 = vrot.lane.b32.xlu0 %v1925_v17, %s13631_s25  ;;  %1678 = vrot.lane.b32.xlu1 %v14444_v34, %s13630_s23 }
 0x319   : > { %v1471_v8 = vpop.permute.xlu0 %1470 }
 0x31a   : > { %v1824_v23 = vsel %vm1808_vm3, %v14171_v12, %v1471_v8 }
 0x31b   : > { %1726 = vrot.lane.b32.xlu1 %v14444_v34, %s13629_s22  ;;  %v1841_v19 = vsel %vm18938_vm4, %v1824_v23, %v1519_v31  ;;  %v1976_v31 = vld [vmem:[#allocation3 + $0x40] sm:$0xff]  ;;  %v1827_v23 = vsel %vm18938_vm4, %v1810_v35, %v14214_v53 }
 0x31c   : > { %v12424_v56 = vpack.c.bf16 %v1977_v3, %v1976_v31 }
 0x31d   : > { %v1567_v10 = vpop.permute.xlu0 %1566 }
 0x31e   : > { %v1858_v45 = vsel %vm18937_vm5, %v1841_v19, %v1567_v10 }
 0x31f   : > { %v1875_v28 = vsel %vm18936_vm6, %v1858_v45, %v14183_v18  ;;  %1774 = vrot.lane.b32.xlu1 %v14444_v34, %s13631_s25  ;;  %v1843_v18 = vsel %vm18937_vm5, %v1826_v48, %v14200_v24  ;;  %v1979_v24 = vld [vmem:[#allocation3 + $0x58] sm:$0xff]  ;;  %v1984_v45 = vld [vmem:[#allocation3 + $0x80] sm:$0xff] }
 0x320   : > { %v1892_v14 = vsel %vm18929_vm7, %v1875_v28, %v1695_v41  ;;  %v1860_v59 = vsel %vm18936_vm6, %v1843_v18, %v14007_v62  ;;  %v1985_v28 = vld [vmem:[#allocation3 + $0x88] sm:$0xff] }
 0x321   : > { %v1909_v12 = vsel %vm18928_vm8, %v1892_v14, %v1743_v20  ;;  %v1877_v60 = vsel %vm18929_vm7, %v1860_v59, %v14202_v26  ;;  %v14479_v27 = vpop.permute.xlu0 %1494  ;;  %v12427_v26 = vpack.c.bf16 %v1979_v24, %v1978_v0  ;;  %v1844_v20 = vsel %vm18937_vm5, %v1827_v23, %v14221_v61  ;;  %v1989_v59 = vld [vmem:[#allocation3 + $0xa8] sm:$0xff] }
 0x322   : > { %v1926_v29 = vsel %vm18927_vm9, %v1909_v12, %v1791_v2  ;;  %v1894_v54 = vsel %vm18928_vm8, %v1877_v60, %v14210_v38  ;;  %v1980_v38 = vld [vmem:[#allocation3 + $0x60] sm:$0xff]  ;;  %v1861_v10 = vsel %vm18936_vm6, %v1844_v20, %v14039_v7  ;;  %v12436_v53 = vpack.c.bf16 %v1985_v28, %v1984_v45  ;;  %v18979_v28 = vld [vmem:[#allocation28_spill] sm:$0xff] }
 0x323   : > { %1949 = vrot.lane.b32.xlu1 %v1926_v29, %s13631_s25  ;;  %v1911_v21 = vsel %vm18927_vm9, %v1894_v54, %v14208_v37  ;;  %v12430_v37 = vpack.c.bf16 %v1981_v32, %v1980_v38  ;;  %v1878_v63 = vsel %vm18929_vm7, %v1861_v10, %v14248_v6  ;;  %v1986_v29 = vld [vmem:[#allocation3 + $0x90] sm:$0xff]  ;;  %v1996_v10 = vld [vmem:[#allocation3 + $0xe0] sm:$0xff] }
 0x324   : > { %v1895_v14 = vsel %vm18928_vm8, %v1878_v63, %v14246_v4  ;;  %v12439_v6 = vpack.c.bf16 %v1987_v55, %v1986_v29  ;;  %v1811_v4 = vsel %vm1808_vm3, %v14023_v1, %v14219_v58  ;;  %v1990_v1 = vld [vmem:[#allocation3 + $0xb0] sm:$0xff]  ;;  %v1991_v58 = vld [vmem:[#allocation3 + $0xb8] sm:$0xff]  ;;  %v1997_v63 = vld [vmem:[#allocation3 + $0xe8] sm:$0xff] }
 0x325   : > { %v14486_v47 = vpop.permute.xlu0 %1670  ;;  %v1912_v2 = vsel %vm18927_vm9, %v1895_v14, %v14262_v36  ;;  %v1988_v36 = vld [vmem:[#allocation3 + $0xa0] sm:$0xff]  ;;  %v1828_v60 = vsel %vm18938_vm4, %v1811_v4, %v14234_v39  ;;  %v1999_v29 = vld [vmem:[#allocation3 + $0xf8] sm:$0xff] }
 0x326   : > { %v12442_v31 = vpack.c.bf16 %v1989_v59, %v1988_v36  ;;  %v1845_v3 = vsel %vm18937_vm5, %v1828_v60, %v14232_v40  ;;  %v1992_v40 = vld [vmem:[#allocation3 + $0xc0] sm:$0xff] }
 0x327   : > { %v2016_v55 = vld [vmem:[#allocation3 + $0x180] sm:$0xff] }
 0x329   : > { %v14493_v17 = vpop.permute.xlu0 %1766 }
 0x32d   : > { %v1449_v19 = vpop.permute.xlu0 %1448 }
 0x32e   : > { %v1813_v23 = vsel %vm1808_vm3, %v14258_v16, %v1449_v19 }
 0x331   : > { %v1497_v12 = vpop.permute.xlu0 %1496 }
 0x332   : > { %v1830_v45 = vsel %vm18938_vm4, %v1813_v23, %v1497_v12  ;;  %v2013_v23 = vld [vmem:[#allocation3 + $0x168] sm:$0xff] }
 0x339   : > { %v1936_v22 = vpop.permute.xlu1 %1935 }
 0x33a   : > { %v1960_v62 = vsel %vm1959_vm10, %v1911_v21, %v1936_v22  ;;  %v1862_v21 = vsel %vm18936_vm6, %v1845_v3, %v14049_v9  ;;  %v12445_v22 = vpack.c.bf16 %v1991_v58, %v1990_v1  ;;  %v2019_v3 = vld [vmem:[#allocation3 + $0x198] sm:$0xff]  ;;  %v2008_v58 = vld [vmem:[#allocation3 + $0x140] sm:$0xff] }
 0x33b   : > { %11731 = vmatmul.mubr.msk.f32.vlgmr.msra.gmra.mrb[4].mxu0 %vm2032_vm11, %v1960_v62  ;;  %v1879_v39 = vsel %vm18929_vm7, %v1862_v21, %v14267_v13  ;;  %v1993_v62 = vld [vmem:[#allocation3 + $0xc8] sm:$0xff]  ;;  %v1994_v13 = vld [vmem:[#allocation3 + $0xd0] sm:$0xff] }
 0x33c   : > { %12425 = vmatpush3.bf16.msra.mxu0 %v12424_v56  ;;  %11749 = vmatprep.mubr.msk.f32.mxu0 %vm13632_vm2, %v18977_v44  ;;  %v12448_v32 = vpack.c.bf16 %v1993_v62, %v1992_v40  ;;  %v12451_v35 = vpack.c.bf16 %v1995_v15, %v1994_v13  ;;  %v2009_v21 = vld [vmem:[#allocation3 + $0x148] sm:$0xff]  ;;  %v2022_v13 = vld [vmem:[#allocation3 + $0x1b0] sm:$0xff]  ;;  %v2023_v15 = vld [vmem:[#allocation3 + $0x1b8] sm:$0xff] }
 0x33d   : > { %12426 = vmatprep.subr.bf16.mxu0 %v18975_v51  ;;  %v1765_v41 = vpop.permute.xlu1 %1764  ;;  %v2021_v40 = vld [vmem:[#allocation3 + $0x1a8] sm:$0xff] }
 0x340   : > { %12428 = vmatpush3.bf16.msra.mxu0 %v12427_v26  ;;  %v18978_v26 = vld [vmem:[#allocation29_spill] sm:$0xff] }
 0x341   : > { %12429 = vmatprep.subr.bf16.mxu0 %v18975_v51  ;;  %v14495_v8 = vpop.permute.xlu1 %1446  ;;  %v1896_v38 = vsel %vm18928_vm8, %v1879_v39, %v18978_v26 }
 0x342   : > { %v1812_v14 = vsel %vm1808_vm3, %v18979_v28, %v14495_v8 }
 0x343   : > { %v1829_v16 = vsel %vm18938_vm4, %v1812_v14, %v14479_v27  ;;  %v2014_v14 = vld [vmem:[#allocation3 + $0x170] sm:$0xff] }
 0x344   : > { %12431 = vmatpush3.bf16.msra.mxu0 %v12430_v37  ;;  %v1913_v37 = vsel %vm18927_vm9, %v1896_v38, %v1765_v41  ;;  %v2010_v38 = vld [vmem:[#allocation3 + $0x150] sm:$0xff] }
 0x345   : > { %12432 = vmatprep.subr.bf16.mxu0 %v18975_v51  ;;  %v14506_v57 = vpop.permute.xlu1 %1542 }
 0x346   : > { %v1846_v12 = vsel %vm18937_vm5, %v1829_v16, %v14506_v57  ;;  %v2018_v57 = vld [vmem:[#allocation3 + $0x190] sm:$0xff] }
 0x347   : > { %v1863_v59 = vsel %vm18936_vm6, %v1846_v12, %v14251_v50  ;;  %v12487_v50 = vpack.c.bf16 %v2019_v3, %v2018_v57 }
 0x348   : > { %12434 = vmatpush3.bf16.msra.mxu0 %v12433_v5 }
 0x349   : > { %12435 = vmatprep.subr.bf16.mxu0 %v18975_v51 }
 0x352   : > { %v1938_v61 = vpop.permute.xlu1 %1937 }
 0x353   : > { %v1961_v7 = vsel %vm1959_vm10, %v1912_v2, %v1938_v61  ;;  %v12454_v2 = vpack.c.bf16 %v1997_v63, %v1996_v10  ;;  %v1998_v61 = vld [vmem:[#allocation3 + $0xf0] sm:$0xff] }
 0x354   : > { %11750 = vmatmul.mubr.msk.f32.vlgmr.msra.gmra.mrb[6].mxu0 %vm2032_vm11, %v1961_v7  ;;  %v2017_v7 = vld [vmem:[#allocation3 + $0x188] sm:$0xff]  ;;  %v12457_v27 = vpack.c.bf16 %v1999_v29, %v1998_v61 }
 0x355   : > { %12437 = vmatpush3.bf16.msra.mxu0 %v12436_v53  ;;  %11768 = vmatprep.mubr.msk.f32.mxu0 %vm13632_vm2, %v18977_v44  ;;  %v12484_v36 = vpack.c.bf16 %v2017_v7, %v2016_v55  ;;  %v2025_v7 = vld [vmem:[#allocation3 + $0x1c8] sm:$0xff] }
 0x356   : > { %v1940_v48 = vpop.permute.xlu0 %1939  ;;  %v14519_v18 = vpop.permute.xlu1 %1718  ;;  %12438 = vmatprep.subr.bf16.mxu0 %v18975_v51 }
 0x357   : > { %v1962_v5 = vsel %vm1959_vm10, %v1913_v37, %v1940_v48 }
 0x359   : > { %12440 = vmatpush3.bf16.msra.mxu0 %v12439_v6 }
 0x35a   : > { %v1545_v54 = vpop.permute.xlu0 %1544  ;;  %v14526_v56 = vpop.permute.xlu1 %1450  ;;  %12441 = vmatprep.subr.bf16.mxu0 %v18975_v51 }
 0x35b   : > { %v1847_v53 = vsel %vm18937_vm5, %v1830_v45, %v1545_v54  ;;  %v1880_v54 = vsel %vm18929_vm7, %v1863_v59, %v14486_v47  ;;  %v12472_v47 = vpack.c.bf16 %v2009_v21, %v2008_v58  ;;  %v1814_v45 = vsel %vm1808_vm3, %v14326_v52, %v14526_v56  ;;  %v2024_v56 = vld [vmem:[#allocation3 + $0x1c0] sm:$0xff] }
 0x35c   : > { %v1864_v8 = vsel %vm18936_vm6, %v1847_v53, %v14345_v25  ;;  %v2015_v53 = vld [vmem:[#allocation3 + $0x178] sm:$0xff] }
 0x35d   : > { %12443 = vmatpush3.bf16.msra.mxu0 %v12442_v31  ;;  %v12481_v29 = vpack.c.bf16 %v2015_v53, %v2014_v14 }
 0x35e   : > { %v1673_v0 = vpop.permute.xlu0 %1672  ;;  %v14533_v24 = vpop.permute.xlu1 %1498  ;;  %12444 = vmatprep.subr.bf16.mxu0 %v18975_v51 }
 0x35f   : > { %v1881_v4 = vsel %vm18929_vm7, %v1864_v8, %v1673_v0  ;;  %v2020_v0 = vld [vmem:[#allocation3 + $0x1a0] sm:$0xff] }
 0x360   : > { %v12490_v37 = vpack.c.bf16 %v2021_v40, %v2020_v0 }
 0x361   : > { %12446 = vmatpush3.bf16.msra.mxu0 %v12445_v22  ;;  %v1897_v22 = vsel %vm18928_vm8, %v1880_v54, %v14519_v18  ;;  %v2029_v54 = vld [vmem:[#allocation3 + $0x1e8] sm:$0xff] }
 0x362   : > { %v1721_v9 = vpop.permute.xlu0 %1720  ;;  %v14539_v11 = vpop.permute.xlu1 %1546  ;;  %12447 = vmatprep.subr.bf16.mxu0 %v18975_v51  ;;  %v1914_v62 = vsel %vm18927_vm9, %v1897_v22, %v14493_v17  ;;  %v2030_v22 = vld [vmem:[#allocation3 + $0x1f0] sm:$0xff] }
 0x363   : > { %v1898_v48 = vsel %vm18928_vm8, %v1881_v4, %v1721_v9 }
 0x364   : > { %11769 = vmatmul.mubr.msk.f32.vlgmr.msra.gmra.mrb[8].mxu0 %vm2032_vm11, %v1962_v5 }
 0x365   : > { %12449 = vmatpush3.bf16.msra.mxu0 %v12448_v32  ;;  %11787 = vmatprep.mubr.msk.f32.mxu0 %vm13632_vm2, %v18977_v44  ;;  %v2011_v32 = vld [vmem:[#allocation3 + $0x158] sm:$0xff] }
 0x366   : > { %v1769_v41 = vpop.permute.xlu0 %1768  ;;  %v14548_v20 = vpop.permute.xlu1 %1674  ;;  %12450 = vmatprep.subr.bf16.mxu0 %v18975_v51  ;;  %v12475_v5 = vpack.c.bf16 %v2011_v32, %v2010_v38 }
 0x367   : > { %v1915_v60 = vsel %vm18927_vm9, %v1898_v48, %v1769_v41  ;;  %v12493_v41 = vpack.c.bf16 %v2023_v15, %v2022_v13 }
 0x369   : > { %12452 = vmatpush3.bf16.msra.mxu0 %v12451_v35  ;;  %v2012_v35 = vld [vmem:[#allocation3 + $0x160] sm:$0xff] }
 0x36a   : > { %v14558_v19 = vpop.permute.xlu0 %1452  ;;  %12453 = vmatprep.subr.bf16.mxu0 %v18975_v51  ;;  %v14565_v6 = vpop.permute.xlu1 %1722  ;;  %v12478_v63 = vpack.c.bf16 %v2013_v23, %v2012_v35 }
 0x36b   : > { %v1815_v55 = vsel %vm1808_vm3, %v14367_v42, %v14558_v19  ;;  %v12496_v42 = vpack.c.bf16 %v2025_v7, %v2024_v56 }
 0x36d   : > { %12455 = vmatpush3.bf16.msra.mxu0 %v12454_v2  ;;  %v1831_v2 = vsel %vm18938_vm4, %v1814_v45, %v14533_v24 }
 0x36e   : > { %v1944_v31 = vpop.permute.xlu0 %1943  ;;  %12456 = vmatprep.subr.bf16.mxu0 %v18975_v51  ;;  %v14577_v1 = vpop.permute.xlu1 %1770  ;;  %v1848_v61 = vsel %vm18937_vm5, %v1831_v2, %v14539_v11 }
 0x36f   : > { %v1964_v25 = vsel %vm1959_vm10, %v1915_v60, %v1944_v31  ;;  %v1865_v12 = vsel %vm18936_vm6, %v1848_v61, %v14363_v46  ;;  %v2026_v46 = vld [vmem:[#allocation3 + $0x1d0] sm:$0xff] }
 0x370   : > { %11807 = vmatmul.mubr.msk.f32.vlgmr.msra.gmra.mrb[36].mxu1 %vm2032_vm11, %v1964_v25  ;;  %v1882_v11 = vsel %vm18929_vm7, %v1865_v12, %v14548_v20 }
 0x371   : > { %12458 = vmatpush3.bf16.msra.mxu0 %v12457_v27  ;;  %12485 = vmatpush3.bf16.msra.mxu1 %v12484_v36  ;;  %v1899_v4 = vsel %vm18928_vm8, %v1882_v11, %v14565_v6  ;;  %v2027_v36 = vld [vmem:[#allocation3 + $0x1d8] sm:$0xff] }
 0x372   : > { %v1501_v39 = vpop.permute.xlu0 %1500  ;;  %12471 = vmatprep.subr.bf16.mxu0 %v18975_v51  ;;  %12486 = vmatprep.subr.bf16.mxu1 %v18975_v51  ;;  %v1916_v19 = vsel %vm18927_vm9, %v1899_v4, %v14577_v1  ;;  %v12499_v31 = vpack.c.bf16 %v2027_v36, %v2026_v46 }
 0x373   : > { %11844 = vmatprep.mubr.msk.f32.mxu1 %vm13632_vm2, %v18977_v44  ;;  %v1832_v24 = vsel %vm18938_vm4, %v1815_v55, %v1501_v39  ;;  %v2031_v39 = vld [vmem:[#allocation3 + $0x1f8] sm:$0xff] }
 0x375   : > { %v1942_v26 = vpop.permute.xlu1 %1941  ;;  %12488 = vmatpush3.bf16.msra.mxu1 %v12487_v50 }
 0x376   : > { %v1963_v18 = vsel %vm1959_vm10, %v1914_v62, %v1942_v26  ;;  %v1549_v9 = vpop.permute.xlu0 %1548  ;;  %12489 = vmatprep.subr.bf16.mxu1 %v18975_v51 }
 0x377   : > { %11788 = vmatmul.mubr.msk.f32.vlgmr.msra.gmra.mrb[10].mxu0 %vm2032_vm11, %v1963_v18  ;;  %v1849_v8 = vsel %vm18937_vm5, %v1832_v24, %v1549_v9  ;;  %v14644_v9 = vpop.f32.mrb[32].mxu1 }
 0x378   : > { %12473 = vmatpush3.bf16.msra.mxu0 %v12472_v47  ;;  %11825 = vmatprep.mubr.msk.f32.mxu0 %vm13632_vm2, %v18977_v44  ;;  %v1866_v59 = vsel %vm18936_vm6, %v1849_v8, %v14412_v33  ;;  %v2028_v33 = vld [vmem:[#allocation3 + $0x1e0] sm:$0xff]  ;;  %v12505_v47 = vpack.c.bf16 %v2031_v39, %v2030_v22  ;;  %v14646_v13 = vpop.f32.mrb[33].mxu1 }
 0x379   : > { %v1455_v17 = vpop.permute.xlu1 %1454  ;;  %12474 = vmatprep.subr.bf16.mxu0 %v18975_v51  ;;  %12491 = vmatpush3.bf16.msra.mxu1 %v12490_v37  ;;  %v12502_v58 = vpack.c.bf16 %v2029_v54, %v2028_v33  ;;  %v1055_v15 = vpop.f32.mrb[34].mxu1 }
 0x37a   : > { %v1677_v10 = vpop.permute.xlu0 %1676  ;;  %12492 = vmatprep.subr.bf16.mxu1 %v18975_v51  ;;  %v1816_v21 = vsel %vm1808_vm3, %v14402_v30, %v1455_v17 }
 0x37b   : > { %v1883_v60 = vsel %vm18929_vm7, %v1866_v59, %v1677_v10 }
 0x37c   : > { %12476 = vmatpush3.bf16.msra.mxu0 %v12475_v5 }
 0x37d   : > { %v1503_v28 = vpop.permute.xlu1 %1502  ;;  %12477 = vmatprep.subr.bf16.mxu0 %v18975_v51  ;;  %12494 = vmatpush3.bf16.msra.mxu1 %v12493_v41 }
 0x37e   : > { %v1725_v16 = vpop.permute.xlu0 %1724  ;;  %v1833_v0 = vsel %vm18938_vm4, %v1816_v21, %v1503_v28 }
 0x37f   : > { %v1900_v6 = vsel %vm18928_vm8, %v1883_v60, %v1725_v16 }
 0x380   : > { %12479 = vmatpush3.bf16.msra.mxu0 %v12478_v63 }
 0x381   : > { %v1551_v52 = vpop.permute.xlu1 %1550  ;;  %12480 = vmatprep.subr.bf16.mxu0 %v18975_v51 }
 0x382   : > { %v1773_v48 = vpop.permute.xlu0 %1772  ;;  %v1850_v40 = vsel %vm18937_vm5, %v1833_v0, %v1551_v52 }
 0x383   : > { %v1917_v57 = vsel %vm18927_vm9, %v1900_v6, %v1773_v48  ;;  %v1867_v26 = vsel %vm18936_vm6, %v1850_v40, %v14444_v34  ;;  %v1056_v34 = vpop.f32.mrb[35].mxu1 }
 0x384   : > { %12482 = vmatpush3.bf16.msra.mxu0 %v12481_v29 }
 0x385   : > { %v1946_v27 = vpop.permute.xlu1 %1945  ;;  %12495 = vmatprep.subr.bf16.mxu0 %v18975_v51 }
 0x386   : > { %v1965_v20 = vsel %vm1959_vm10, %v1916_v19, %v1946_v27 }
 0x387   : > { %11826 = vmatmul.mubr.msk.f32.vlgmr.msra.gmra.mrb[12].mxu0 %vm2032_vm11, %v1965_v20 }
 0x388   : > { %12497 = vmatpush3.bf16.msra.mxu0 %v12496_v42  ;;  %11863 = vmatprep.mubr.msk.f32.mxu0 %vm13632_vm2, %v18977_v44 }
 0x389   : > { %v1948_v3 = vpop.permute.xlu0 %1947  ;;  %v1679_v25 = vpop.permute.xlu1 %1678  ;;  %12498 = vmatprep.subr.bf16.mxu0 %v18975_v51 }
 0x38a   : > { %v1966_v1 = vsel %vm1959_vm10, %v1917_v57, %v1948_v3  ;;  %v1884_v38 = vsel %vm18929_vm7, %v1867_v26, %v1679_v25  ;;  %vm18930_vm7 = vcmask 1047559  }
 0x38b   : > { %11845 = vmatmul.mubr.msk.f32.vlgmr.msra.gmra.mrb[38].mxu1 %vm2032_vm11, %v1966_v1 }
 0x38c   : > { %12500 = vmatpush3.bf16.msra.mxu0 %v12499_v31  ;;  %3016 = vmatprep.mubr.f32.mxu1 %v18977_v44 }
 0x38d   : > { %v1727_v50 = vpop.permute.xlu1 %1726  ;;  %12501 = vmatprep.subr.bf16.mxu0 %v18975_v51 }
 0x38e   : > { %v1901_v30 = vsel %vm18928_vm8, %v1884_v38, %v1727_v50  ;;  %vm18935_vm8 = vcmask 1046534  }
 0x390   : > { %12503 = vmatpush3.bf16.msra.mxu0 %v12502_v58 }
 0x391   : > { %v1775_v62 = vpop.permute.xlu1 %1774  ;;  %12504 = vmatprep.subr.bf16.mxu0 %v18975_v51 }
 0x392   : > { %v1918_v32 = vsel %vm18927_vm9, %v1901_v30, %v1775_v62  ;;  %vm2654_vm9 = vcmask 1045509  }
 0x394   : > { %12506 = vmatpush3.bf16.msra.mxu0 %v12505_v47 }
 0x395   : > { %v1950_v37 = vpop.permute.xlu1 %1949 }
 0x396   : > { %v1967_v18 = vsel %vm1959_vm10, %v1918_v32, %v1950_v37 }
 0x397   : > { %11864 = vmatmul.mubr.msk.f32.vlgmr.msra.gmra.mrb[14].mxu0 %vm2032_vm11, %v1967_v18 }
 0x398   : > { %3630 = vmatprep.mubr.f32.mxu0 %v18977_v44 }
 0x40e   : > { %v2102_v5 = vpop.f32.mrb[4].mxu0 }
 0x40f   : > { %v11732_v17 = vpop.f32.mrb[5].mxu0  ;;  %v2678_v35 = vrot.slane %v2102_v5, 1  ;;  %v2712_v23 = vrot.slane %v2102_v5, 2  ;;  %v2746_v41 = vrot.slane %v2102_v5, 3  ;;  %v2780_v10 = vrot.slane %v2102_v5, 4 }
 0x410   : > { %v2810_v63 = vrot.slane %v2102_v5, 5  ;;  %v2844_v45 = vrot.slane %v2102_v5, 6  ;;  %v2878_v28 = vrot.slane %v2102_v5, 7 }
 0x427   : > { %v2175_v14 = vpop.f32.mrb[6].mxu0 }
 0x428   : > { %v2641_v53 = vrot.slane %v2175_v14, 7  ;;  %v2713_v2 = vrot.slane %v2175_v14, 1  ;;  %v2747_v61 = vrot.slane %v2175_v14, 2  ;;  %v2781_v16 = vrot.slane %v2175_v14, 3  ;;  %v11751_v29 = vpop.f32.mrb[7].mxu0 }
 0x429   : > { %v2811_v55 = vrot.slane %v2175_v14, 4  ;;  %v2845_v52 = vrot.slane %v2175_v14, 5  ;;  %v2879_v56 = vrot.slane %v2175_v14, 6  ;;  %v12944_v7 = vpack.i.bf16 %v2175_v14, %v2102_v5 }
 0x42a   : > { %v2679_v12 = vsel %vm2642_vm12, %v2175_v14, %v2678_v35  ;;  %v2714_v24 = vsel %vm2642_vm12, %v2713_v2, %v2712_v23  ;;  %v2748_v11 = vsel %vm2642_vm12, %v2747_v61, %v2746_v41  ;;  %v2782_v8 = vsel %vm2642_vm12, %v2781_v16, %v2780_v10 }
 0x42b   : > { %12945 = vrot.lane.b32.xlu0 %v12944_v7, %s13630_s23  ;;  %v2812_v4 = vsel %vm2642_vm12, %v2811_v55, %v2810_v63  ;;  %v2846_v42 = vsel %vm2642_vm12, %v2845_v52, %v2844_v45  ;;  %v2880_v19 = vsel %vm2642_vm12, %v2879_v56, %v2878_v28  ;;  %v2643_v48 = vsel %vm2642_vm12, %v2641_v53, %v2102_v5 }
 0x437   : > { %v2248_v27 = vpop.f32.mrb[8].mxu0 }
 0x438   : > { %v2644_v46 = vrot.slane %v2248_v27, 6  ;;  %v2783_v36 = vrot.slane %v2248_v27, 2  ;;  %v11770_v59 = vpop.f32.mrb[9].mxu0  ;;  %v2813_v20 = vrot.slane %v2248_v27, 3  ;;  %v2680_v60 = vrot.slane %v2248_v27, 7 }
 0x439   : > { %v2847_v6 = vrot.slane %v2248_v27, 4  ;;  %v2715_v31 = vsel %vm2645_vm13, %v2248_v27, %v2714_v24  ;;  %v2881_v57 = vrot.slane %v2248_v27, 5  ;;  %v2749_v3 = vrot.slane %v2248_v27, 1 }
 0x43a   : > { %v2814_v25 = vsel %vm2645_vm13, %v2813_v20, %v2812_v4  ;;  %v2681_v33 = vsel %vm2645_vm13, %v2680_v60, %v2679_v12  ;;  %v2784_v54 = vsel %vm2645_vm13, %v2783_v36, %v2782_v8  ;;  %v2646_v1 = vsel %vm2645_vm13, %v2644_v46, %v2643_v48 }
 0x43b   : > { %v2848_v58 = vsel %vm2645_vm13, %v2847_v6, %v2846_v42  ;;  %v2882_v21 = vsel %vm2645_vm13, %v2881_v57, %v2880_v19  ;;  %v2750_v50 = vsel %vm2645_vm13, %v2749_v3, %v2748_v11 }
 0x443   : > { %v2394_v22 = vpop.f32.mrb[36].mxu1 }
 0x444   : > { %v11808_v39 = vpop.f32.mrb[37].mxu1  ;;  %v2817_v0 = vrot.slane %v2394_v22, 1  ;;  %v2684_v40 = vrot.slane %v2394_v22, 5  ;;  %v2851_v62 = vrot.slane %v2394_v22, 2  ;;  %v2718_v26 = vrot.slane %v2394_v22, 6 }
 0x445   : > { %v2885_v38 = vrot.slane %v2394_v22, 3  ;;  %v2752_v30 = vrot.slane %v2394_v22, 7  ;;  %v2650_v7 = vrot.slane %v2394_v22, 4 }
 0x44a   : > { %v2321_v47 = vpop.f32.mrb[10].mxu0 }
 0x44b   : > { %v11789_v32 = vpop.f32.mrb[11].mxu0  ;;  %v12949_v37 = vpack.i.bf16 %v2321_v47, %v2248_v27  ;;  %v2815_v18 = vrot.slane %v2321_v47, 2  ;;  %v2682_v15 = vrot.slane %v2321_v47, 6  ;;  %v2849_v34 = vrot.slane %v2321_v47, 3 }
 0x44c   : > { %v2716_v5 = vrot.slane %v2321_v47, 7  ;;  %v2883_v17 = vrot.slane %v2321_v47, 4  ;;  %v2751_v35 = vsel %vm2648_vm14, %v2321_v47, %v2750_v50  ;;  %v2785_v23 = vrot.slane %v2321_v47, 1 }
 0x44d   : > { %12950 = vrot.lane.b32.xlu1 %v12949_v37, %s13630_s23  ;;  %v2816_v41 = vsel %vm2648_vm14, %v2815_v18, %v2814_v25  ;;  %v2683_v10 = vsel %vm2648_vm14, %v2682_v15, %v2681_v33  ;;  %v2850_v63 = vsel %vm2648_vm14, %v2849_v34, %v2848_v58  ;;  %v2753_v45 = vsel %vm2651_vm15, %v2752_v30, %v2751_v35 }
 0x44e   : > { %v2818_v28 = vsel %vm2651_vm15, %v2817_v0, %v2816_v41  ;;  %v2685_v14 = vsel %vm2651_vm15, %v2684_v40, %v2683_v10  ;;  %v2852_v53 = vsel %vm2651_vm15, %v2851_v62, %v2850_v63  ;;  %v2717_v2 = vsel %vm2648_vm14, %v2716_v5, %v2715_v31 }
 0x44f   : > { %v2719_v61 = vsel %vm2651_vm15, %v2718_v26, %v2717_v2  ;;  %v2884_v16 = vsel %vm2648_vm14, %v2883_v17, %v2882_v21  ;;  %v2786_v29 = vsel %vm2648_vm14, %v2785_v23, %v2784_v54  ;;  %v2647_v55 = vrot.slane %v2321_v47, 5 }
 0x450   : > { %v2886_v52 = vsel %vm2651_vm15, %v2885_v38, %v2884_v16  ;;  %v2787_v56 = vsel %vm2651_vm15, %v2394_v22, %v2786_v29 }
 0x451   : > { %v2649_v12 = vsel %vm2648_vm14, %v2647_v55, %v2646_v1 }
 0x452   : > { %v2652_v24 = vsel %vm2651_vm15, %v2650_v7, %v2649_v12 }
 0x45a   : > { %v2467_v11 = vpop.f32.mrb[12].mxu0 }
 0x45b   : > { %v11827_v8 = vpop.f32.mrb[13].mxu0  ;;  %v12954_v4 = vpack.i.bf16 %v2467_v11, %v2394_v22  ;;  %v2819_v42 = vsel %vm2654_vm9, %v2467_v11, %v2818_v28  ;;  %v2686_v19 = vrot.slane %v2467_v11, 4  ;;  %v2853_v48 = vrot.slane %v2467_v11, 1 }
 0x45c   : > { %v2720_v27 = vrot.slane %v2467_v11, 5  ;;  %v2887_v46 = vrot.slane %v2467_v11, 2  ;;  %v2754_v36 = vrot.slane %v2467_v11, 6  ;;  %v2788_v59 = vrot.slane %v2467_v11, 7 }
 0x45d   : > { %12955 = vrot.lane.b32.xlu0 %v12954_v4, %s13630_s23  ;;  %v2687_v20 = vsel %vm2654_vm9, %v2686_v19, %v2685_v14  ;;  %v2854_v60 = vsel %vm2654_vm9, %v2853_v48, %v2852_v53  ;;  %v2653_v6 = vrot.slane %v2467_v11, 3 }
 0x45e   : > { %v2540_v31 = vpop.f32.mrb[38].mxu1  ;;  %v2721_v57 = vsel %vm2654_vm9, %v2720_v27, %v2719_v61  ;;  %v2888_v3 = vsel %vm2654_vm9, %v2887_v46, %v2886_v52  ;;  %v2755_v25 = vsel %vm2654_vm9, %v2754_v36, %v2753_v45  ;;  %v2789_v33 = vsel %vm2654_vm9, %v2788_v59, %v2787_v56 }
 0x45f   : > { %v11846_v54 = vpop.f32.mrb[39].mxu1  ;;  %v2820_v1 = vrot.slane %v2540_v31, 7  ;;  %v2688_v58 = vrot.slane %v2540_v31, 3  ;;  %v2855_v21 = vsel %vm18935_vm8, %v2540_v31, %v2854_v60  ;;  %v2722_v50 = vrot.slane %v2540_v31, 4 }
 0x460   : > { %v2889_v22 = vrot.slane %v2540_v31, 1  ;;  %v2756_v39 = vrot.slane %v2540_v31, 5  ;;  %v2790_v0 = vrot.slane %v2540_v31, 6  ;;  %v2655_v40 = vsel %vm2654_vm9, %v2653_v6, %v2652_v24 }
 0x461   : > { %v2821_v47 = vsel %vm18935_vm8, %v2820_v1, %v2819_v42  ;;  %v2689_v62 = vsel %vm18935_vm8, %v2688_v58, %v2687_v20  ;;  %v2723_v26 = vsel %vm18935_vm8, %v2722_v50, %v2721_v57  ;;  %v2656_v38 = vrot.slane %v2540_v31, 2 }
 0x462   : > { %v2890_v30 = vsel %vm18935_vm8, %v2889_v22, %v2888_v3  ;;  %v2757_v32 = vsel %vm18935_vm8, %v2756_v39, %v2755_v25  ;;  %v2791_v37 = vsel %vm18935_vm8, %v2790_v0, %v2789_v33 }
 0x463   : > { %v2658_v18 = vsel %vm18935_vm8, %v2656_v38, %v2655_v40 }
 0x46a   : > { %v2613_v15 = vpop.f32.mrb[14].mxu0 }
 0x46b   : > { %v11865_v34 = vpop.f32.mrb[15].mxu0  ;;  %v12959_v5 = vpack.i.bf16 %v2613_v15, %v2540_v31  ;;  %v2822_v17 = vrot.slane %v2613_v15, 6  ;;  %v2690_v35 = vrot.slane %v2613_v15, 2  ;;  %v2856_v23 = vrot.slane %v2613_v15, 7 }
 0x46c   : > { %v2724_v41 = vrot.slane %v2613_v15, 3  ;;  %v14700_v10 = vsel %vm18930_vm7, %v2613_v15, %v2890_v30  ;;  %v2758_v63 = vrot.slane %v2613_v15, 4  ;;  %v2792_v45 = vrot.slane %v2613_v15, 5 }
 0x46d   : > { %12960 = vrot.lane.b32.xlu1 %v12959_v5, %s13630_s23  ;;  %v14704_v28 = vsel %vm18930_vm7, %v2822_v17, %v2821_v47  ;;  %v14707_v14 = vsel %vm18930_vm7, %v2690_v35, %v2689_v62  ;;  %v14710_v53 = vsel %vm18930_vm7, %v2856_v23, %v2855_v21  ;;  %v2659_v2 = vrot.slane %v2613_v15, 1 }
 0x46e   : > { %v14713_v61 = vsel %vm18930_vm7, %v2724_v41, %v2723_v26  ;;  %v14716_v16 = vsel %vm18930_vm7, %v2758_v63, %v2757_v32  ;;  %v14719_v29 = vsel %vm18930_vm7, %v2792_v45, %v2791_v37 }
 0x46f   : > { %v14722_v55 = vsel %vm18930_vm7, %v2659_v2, %v2658_v18 }
 0x49d   : > { %v12946_v52 = vpop.permute.xlu0 %12945 }
 0x49e   : > { %v12947_v56 = vunpack.i.l.bf16 %v12946_v52  ;;  %v12948_v7 = vunpack.i.h.bf16 %v12946_v52 }
 0x4a0   : > { %v2794_v12 = vrot.slane %v12947_v56, 4  ;;  %v2795_v24 = vrot.slane %v12948_v7, 3  ;;  %v2662_v11 = vrot.slane %v12948_v7, 7  ;;  %v2824_v57 = vrot.slane %v12947_v56, 5 }
 0x4a1   : > { %v2825_v3 = vrot.slane %v12948_v7, 4  ;;  %v2692_v25 = vrot.slane %v12947_v56, 1  ;;  %v2858_v33 = vrot.slane %v12947_v56, 6  ;;  %v2859_v54 = vrot.slane %v12948_v7, 5 }
 0x4a2   : > { %v2796_v8 = vsel %vm2642_vm12, %v2795_v24, %v2794_v12  ;;  %v2663_v4 = vsel %vm2642_vm12, %v2662_v11, %v12947_v56  ;;  %v2726_v1 = vrot.slane %v12947_v56, 2  ;;  %v2727_v58 = vrot.slane %v12948_v7, 1 }
 0x4a3   : > { %v2892_v50 = vrot.slane %v12947_v56, 7  ;;  %v2893_v22 = vrot.slane %v12948_v7, 6  ;;  %v2760_v39 = vrot.slane %v12947_v56, 3  ;;  %v2761_v0 = vrot.slane %v12948_v7, 2 }
 0x4a4   : > { %v2826_v40 = vsel %vm2642_vm12, %v2825_v3, %v2824_v57  ;;  %v2693_v30 = vsel %vm2642_vm12, %v12948_v7, %v2692_v25  ;;  %v2860_v32 = vsel %vm2642_vm12, %v2859_v54, %v2858_v33  ;;  %v2728_v18 = vsel %vm2642_vm12, %v2727_v58, %v2726_v1 }
 0x4a5   : > { %v2894_v15 = vsel %vm2642_vm12, %v2893_v22, %v2892_v50  ;;  %v2762_v34 = vsel %vm2642_vm12, %v2761_v0, %v2760_v39 }
 0x4bf   : > { %v12951_v42 = vpop.permute.xlu1 %12950 }
 0x4c0   : > { %v12952_v19 = vunpack.i.l.bf16 %v12951_v42  ;;  %v14726_v48 = vunpack.i.h.bf16 %v12951_v42 }
 0x4c2   : > { %v2797_v27 = vrot.slane %v12952_v19, 2  ;;  %v2799_v46 = vrot.slane %v14726_v48, 1  ;;  %v2664_v36 = vrot.slane %v12952_v19, 6  ;;  %v2666_v59 = vrot.slane %v14726_v48, 5 }
 0x4c3   : > { %v2827_v47 = vrot.slane %v12952_v19, 3  ;;  %v2694_v62 = vrot.slane %v12952_v19, 7  ;;  %v2861_v37 = vrot.slane %v12952_v19, 4  ;;  %v2829_v5 = vrot.slane %v14726_v48, 2 }
 0x4c4   : > { %v2798_v20 = vsel %vm2645_vm13, %v2797_v27, %v2796_v8  ;;  %v2665_v6 = vsel %vm2645_vm13, %v2664_v36, %v2663_v4  ;;  %v2696_v17 = vrot.slane %v14726_v48, 6  ;;  %v2863_v35 = vrot.slane %v14726_v48, 3 }
 0x4c5   : > { %v2800_v60 = vsel %vm2648_vm14, %v2799_v46, %v2798_v20  ;;  %v2667_v31 = vsel %vm2648_vm14, %v2666_v59, %v2665_v6  ;;  %v2729_v23 = vsel %vm2645_vm13, %v12952_v19, %v2728_v18  ;;  %v2828_v41 = vsel %vm2645_vm13, %v2827_v47, %v2826_v40 }
 0x4c6   : > { %v2695_v63 = vsel %vm2645_vm13, %v2694_v62, %v2693_v30  ;;  %v2730_v45 = vrot.slane %v14726_v48, 7  ;;  %v2895_v2 = vrot.slane %v12952_v19, 5  ;;  %v2763_v52 = vrot.slane %v12952_v19, 1 }
 0x4c7   : > { %v2862_v11 = vsel %vm2645_vm13, %v2861_v37, %v2860_v32  ;;  %v2897_v8 = vrot.slane %v14726_v48, 4  ;;  %v2830_v19 = vsel %vm2648_vm14, %v2829_v5, %v2828_v41  ;;  %v2697_v59 = vsel %vm2648_vm14, %v2696_v17, %v2695_v63 }
 0x4c8   : > { %v2864_v6 = vsel %vm2648_vm14, %v2863_v35, %v2862_v11  ;;  %v2731_v57 = vsel %vm2648_vm14, %v2730_v45, %v2729_v23  ;;  %v2896_v3 = vsel %vm2645_vm13, %v2895_v2, %v2894_v15  ;;  %v2764_v25 = vsel %vm2645_vm13, %v2763_v52, %v2762_v34 }
 0x4c9   : > { %v2898_v47 = vsel %vm2648_vm14, %v2897_v8, %v2896_v3  ;;  %v2765_v30 = vsel %vm2648_vm14, %v14726_v48, %v2764_v25 }
 0x4cf   : > { %v12956_v21 = vpop.permute.xlu0 %12955 }
 0x4d0   : > { %v14735_v26 = vunpack.i.h.bf16 %v12956_v21  ;;  %v12957_v38 = vunpack.i.l.bf16 %v12956_v21 }
 0x4d2   : > { %v2801_v56 = vsel %vm2651_vm15, %v12957_v38, %v2800_v60  ;;  %v2802_v7 = vrot.slane %v14735_v26, 7  ;;  %v2668_v12 = vrot.slane %v12957_v38, 4  ;;  %v2831_v24 = vrot.slane %v12957_v38, 1 }
 0x4d3   : > { %v2670_v4 = vrot.slane %v14735_v26, 3  ;;  %v2698_v42 = vrot.slane %v12957_v38, 5  ;;  %v2865_v27 = vrot.slane %v12957_v38, 2  ;;  %v2732_v20 = vrot.slane %v12957_v38, 6 }
 0x4d4   : > { %v14755_v46 = vsel %vm2654_vm9, %v2802_v7, %v2801_v56  ;;  %v2669_v36 = vsel %vm2651_vm15, %v2668_v12, %v2667_v31  ;;  %v2832_v33 = vsel %vm2651_vm15, %v2831_v24, %v2830_v19  ;;  %v2700_v54 = vrot.slane %v14735_v26, 4 }
 0x4d5   : > { %v2671_v60 = vsel %vm2654_vm9, %v2670_v4, %v2669_v36  ;;  %v2867_v31 = vrot.slane %v14735_v26, 1  ;;  %v2734_v1 = vrot.slane %v14735_v26, 5  ;;  %v2699_v58 = vsel %vm2651_vm15, %v2698_v42, %v2697_v59 }
 0x4d6   : > { %v2866_v21 = vsel %vm2651_vm15, %v2865_v27, %v2864_v6  ;;  %v2899_v50 = vrot.slane %v12957_v38, 3  ;;  %v2766_v22 = vrot.slane %v12957_v38, 7  ;;  %v2733_v39 = vsel %vm2651_vm15, %v2732_v20, %v2731_v57 }
 0x4d7   : > { %v2833_v40 = vsel %vm2654_vm9, %v14735_v26, %v2832_v33  ;;  %v2901_v62 = vrot.slane %v14735_v26, 2  ;;  %v2701_v18 = vsel %vm2654_vm9, %v2700_v54, %v2699_v58  ;;  %v2868_v15 = vsel %vm2654_vm9, %v2867_v31, %v2866_v21 }
 0x4d8   : > { %v2735_v38 = vsel %vm2654_vm9, %v2734_v1, %v2733_v39  ;;  %v2900_v34 = vsel %vm2651_vm15, %v2899_v50, %v2898_v47  ;;  %v2767_v5 = vsel %vm2651_vm15, %v2766_v22, %v2765_v30  ;;  %v2768_v17 = vrot.slane %v14735_v26, 6 }
 0x4d9   : > { %v2902_v27 = vsel %vm2654_vm9, %v2901_v62, %v2900_v34 }
 0x4da   : > { %v2769_v36 = vsel %vm2654_vm9, %v2768_v17, %v2767_v5 }
 0x4df   : > { %v12961_v0 = vpop.permute.xlu1 %12960 }
 0x4e0   : > { %v12963_v32 = vunpack.i.h.bf16 %v12961_v0  ;;  %v12962_v37 = vunpack.i.l.bf16 %v12961_v0 }
 0x4e2   : > { %v2834_v35 = vrot.slane %v12962_v37, 7  ;;  %v2836_v23 = vrot.slane %v12963_v32, 6  ;;  %v2702_v41 = vrot.slane %v12962_v37, 3  ;;  %v2704_v63 = vrot.slane %v12963_v32, 2 }
 0x4e3   : > { %v2869_v48 = vsel %vm18935_vm8, %v12962_v37, %v2868_v15  ;;  %v2870_v45 = vrot.slane %v12963_v32, 7  ;;  %v2736_v2 = vrot.slane %v12962_v37, 4  ;;  %v2738_v52 = vrot.slane %v12963_v32, 3 }
 0x4e4   : > { %v2835_v56 = vsel %vm18935_vm8, %v2834_v35, %v2833_v40  ;;  %v2703_v7 = vsel %vm18935_vm8, %v2702_v41, %v2701_v18  ;;  %v2903_v12 = vrot.slane %v12962_v37, 1  ;;  %v2770_v24 = vrot.slane %v12962_v37, 5 }
 0x4e5   : > { %v2837_v11 = vsel %vm18930_vm7, %v2836_v23, %v2835_v56  ;;  %v2705_v8 = vsel %vm18930_vm7, %v2704_v63, %v2703_v7  ;;  %v2737_v26 = vsel %vm18935_vm8, %v2736_v2, %v2735_v38  ;;  %v2871_v19 = vsel %vm18930_vm7, %v2870_v45, %v2869_v48 }
 0x4e6   : > { %v12964_v4 = vpack.i.bf16 %v2837_v11, %v14704_v28  ;;  %v12969_v42 = vpack.i.bf16 %v2705_v8, %v14707_v14  ;;  %v2739_v59 = vsel %vm18930_vm7, %v2738_v52, %v2737_v26  ;;  %v2904_v20 = vsel %vm18935_vm8, %v2903_v12, %v2902_v27  ;;  %v13151_v11 = vld [vmem:[%s18901_s5 + $0x104] ss:$8 sps:$4 sm:$0xff]   ;;  %v13149_v26 = vld [vmem:[%s18901_s5 + $0x100] ss:$8 sps:$4 sm:$0xff]   ;;  %v13152_v27 = vld [vmem:[%s18901_s5 + $0x110] ss:$8 sps:$4 sm:$0xff]  }
 0x4e7   : > { %v2772_v6 = vrot.slane %v12963_v32, 4  ;;  %v2771_v57 = vsel %vm18935_vm8, %v2770_v24, %v2769_v36  ;;  %v2804_v28 = vrot.slane %v12962_v37, 6  ;;  %v2806_v3 = vrot.slane %v12963_v32, 5  ;;  %v764_v8 = vld [vmem:[%s18898_s2] sm:$0xff] }
 0x4e8   : > { %12965 = vrot.lane.b32.xlu0 %v12964_v4, %s13631_s25  ;;  %12970 = vrot.lane.b32.xlu1 %v12969_v42, %s13631_s25  ;;  %v2672_v14 = vrot.slane %v12962_v37, 2  ;;  %v2674_v25 = vrot.slane %v12963_v32, 1  ;;  %v12974_v33 = vpack.i.bf16 %v2871_v19, %v14710_v53  ;;  %v12984_v54 = vpack.i.bf16 %v2739_v59, %v14713_v61  ;;  %v13154_v4 = vld [vmem:[%s18901_s5 + $0x114] ss:$8 sps:$4 sm:$0xff]   ;;  %v765_v42 = vld [vmem:[%s18898_s2 + $0x8] sm:$0xff] }
 0x4e9   : > { %v2805_v31 = vsel %vm18935_vm8, %v2804_v28, %v14755_v46  ;;  %v2905_v58 = vsel %vm18930_vm7, %v12963_v32, %v2904_v20  ;;  %v2773_v21 = vsel %vm18930_vm7, %v2772_v6, %v2771_v57  ;;  %v13157_v36 = vld [vmem:[%s18901_s5 + $0x124] ss:$8 sps:$4 sm:$0xff]   ;;  %v766_v19 = vld [vmem:[%s18898_s2 + $0x10] sm:$0xff]  ;;  %v13155_v59 = vld [vmem:[%s18901_s5 + $0x120] ss:$8 sps:$4 sm:$0xff]  }
 0x4ea   : > { %v2673_v1 = vsel %vm18935_vm8, %v2672_v14, %v2671_v60  ;;  %v2807_v50 = vsel %vm18930_vm7, %v2806_v3, %v2805_v31  ;;  %v12979_v53 = vpack.i.bf16 %v2905_v58, %v14700_v10  ;;  %v12989_v61 = vpack.i.bf16 %v2773_v21, %v14716_v16  ;;  %v13160_v20 = vld [vmem:[%s18901_s5 + $0x134] ss:$8 sps:$4 sm:$0xff]   ;;  %v13158_v57 = vld [vmem:[%s18901_s5 + $0x130] ss:$8 sps:$4 sm:$0xff]   ;;  %v13163_v28 = vld [vmem:[%s18901_s5 + $0x144] ss:$8 sps:$4 sm:$0xff]  }
 0x4eb   : > { %v2675_v22 = vsel %vm18930_vm7, %v2674_v25, %v2673_v1  ;;  %vm18933_vm7 = vcmask 785408   ;;  %v767_v6 = vld [vmem:[%s18898_s2 + $0x18] sm:$0xff]  ;;  %v768_v3 = vld [vmem:[%s18898_s2 + $0x20] sm:$0xff]  ;;  %v770_v1 = vld [vmem:[%s18898_s2 + $0x30] sm:$0xff] }
 0x4ec   : > { %12975 = vrot.lane.b32.xlu0 %v12974_v33, %s13629_s22  ;;  %12985 = vrot.lane.b32.xlu1 %v12984_v54, %s13629_s22  ;;  %v13161_v14 = vld [vmem:[%s18901_s5 + $0x140] ss:$8 sps:$4 sm:$0xff]   ;;  %v13166_v25 = vld [vmem:[%s18901_s5 + $0x154] ss:$8 sps:$4 sm:$0xff]  }
 0x4ed   : > { %v769_v33 = vld [vmem:[%s18898_s2 + $0x28] sm:$0xff]  ;;  %v13164_v54 = vld [vmem:[%s18901_s5 + $0x150] ss:$8 sps:$4 sm:$0xff]  }
 0x4ee   : > { %v13169_v31 = vld [vmem:[%s18901_s5 + $0x164] ss:$8 sps:$4 sm:$0xff]   ;;  %v13167_v58 = vld [vmem:[%s18901_s5 + $0x160] ss:$8 sps:$4 sm:$0xff]   ;;  %v771_v21 = vld [vmem:[%s18898_s2 + $0x38] sm:$0xff] }
 0x4f0   : > { %12980 = vrot.lane.b32.xlu0 %v12979_v53, %s13630_s23  ;;  %12990 = vrot.lane.b32.xlu1 %v12989_v61, %s13630_s23  ;;  %v13170_v53 = vld [vmem:[%s18901_s5 + $0x170] ss:$8 sps:$4 sm:$0xff]   ;;  %v13175_v61 = vld [vmem:[%s18901_s5 + $0x184] ss:$8 sps:$4 sm:$0xff]  }
 0x55a   : > { %v12966_v46 = vpop.permute.xlu0 %12965  ;;  %v12971_v60 = vpop.permute.xlu1 %12970 }
 0x55b   : > { %v12968_v39 = vunpack.i.h.bf16 %v12966_v46  ;;  %v12967_v0 = vunpack.i.l.bf16 %v12966_v46  ;;  %v12973_v40 = vunpack.i.h.bf16 %v12971_v60  ;;  %v12972_v47 = vunpack.i.l.bf16 %v12971_v60  ;;  %v13173_v46 = vld [vmem:[%s18901_s5 + $0x180] ss:$8 sps:$4 sm:$0xff]   ;;  %v13178_v60 = vld [vmem:[%s18901_s5 + $0x194] ss:$8 sps:$4 sm:$0xff]  }
 0x55d   : > { %v2920_v10 = vsel %vm1959_vm10, %v2807_v50, %v12968_v39  ;;  %v2919_v16 = vsel %vm1959_vm10, %v14719_v29, %v12967_v0  ;;  %v2913_v38 = vsel %vm1959_vm10, %v2675_v22, %v12973_v40  ;;  %v2912_v34 = vsel %vm1959_vm10, %v14722_v55, %v12972_v47  ;;  %v772_v50 = vld [vmem:[%s18898_s2 + $0x40] sm:$0xff]  ;;  %v13172_v22 = vld [vmem:[%s18901_s5 + $0x174] ss:$8 sps:$4 sm:$0xff]   ;;  %v13176_v39 = vld [vmem:[%s18901_s5 + $0x190] ss:$8 sps:$4 sm:$0xff]  }
 0x55e   : > { %v12976_v62 = vpop.permute.xlu0 %12975  ;;  %v12986_v30 = vpop.permute.xlu1 %12985  ;;  %v13181_v0 = vld [vmem:[%s18901_s5 + $0x1a4] ss:$8 sps:$4 sm:$0xff]   ;;  %v13179_v40 = vld [vmem:[%s18901_s5 + $0x1a0] ss:$8 sps:$4 sm:$0xff]   ;;  %v13184_v47 = vld [vmem:[%s18901_s5 + $0x1b4] ss:$8 sps:$4 sm:$0xff]  }
 0x55f   : > { %v12978_v32 = vunpack.i.h.bf16 %v12976_v62  ;;  %v12977_v37 = vunpack.i.l.bf16 %v12976_v62  ;;  %v12988_v18 = vunpack.i.h.bf16 %v12986_v30  ;;  %v12987_v15 = vunpack.i.l.bf16 %v12986_v30  ;;  %v13182_v62 = vld [vmem:[%s18901_s5 + $0x1b0] ss:$8 sps:$4 sm:$0xff]   ;;  %v13185_v30 = vld [vmem:[%s18901_s5 + $0x1c0] ss:$8 sps:$4 sm:$0xff]  }
 0x561   : > { %v2914_v48 = vsel %vm2032_vm11, %v2912_v34, %v12987_v15  ;;  %v2915_v45 = vsel %vm2032_vm11, %v2913_v38, %v12988_v18  ;;  %v2921_v2 = vsel %vm2032_vm11, %v2919_v16, %v12977_v37  ;;  %v2922_v52 = vsel %vm2032_vm11, %v2920_v10, %v12978_v32  ;;  %v13187_v32 = vld [vmem:[%s18901_s5 + $0x1c4] ss:$8 sps:$4 sm:$0xff]   ;;  %v13188_v37 = vld [vmem:[%s18901_s5 + $0x1d0] ss:$8 sps:$4 sm:$0xff]   ;;  %v13190_v18 = vld [vmem:[%s18901_s5 + $0x1d4] ss:$8 sps:$4 sm:$0xff]  }
 0x562   : > { %v12981_v5 = vpop.permute.xlu0 %12980  ;;  %v12991_v17 = vpop.permute.xlu1 %12990  ;;  %v13191_v15 = vld [vmem:[%s18901_s5 + $0x1e0] ss:$8 sps:$4 sm:$0xff]   ;;  %v13193_v10 = vld [vmem:[%s18901_s5 + $0x1e4] ss:$8 sps:$4 sm:$0xff]   ;;  %v13196_v16 = vld [vmem:[%s18901_s5 + $0x1f4] ss:$8 sps:$4 sm:$0xff]  }
 0x563   : > { %v12983_v35 = vunpack.i.h.bf16 %v12981_v5  ;;  %v12982_v23 = vunpack.i.l.bf16 %v12981_v5  ;;  %v12993_v41 = vunpack.i.h.bf16 %v12991_v17  ;;  %v12992_v63 = vunpack.i.l.bf16 %v12991_v17  ;;  %v13194_v38 = vld [vmem:[%s18901_s5 + $0x1f0] ss:$8 sps:$4 sm:$0xff]   ;;  %v805_v34 = vld [vmem:[%s18902_s6] sm:$0x3]  ;;  %v18980_v17 = vld [vmem:[#allocation11_spill] sm:$0xff] }
 0x564   : > { %v14974_v5 = vrot.slane %v805_v34, %v13930_v43 }
 0x565   : > { %v2917_v29 = vsel %vm18933_vm7, %v2914_v48, %v12992_v63  ;;  %v2918_v56 = vsel %vm18933_vm7, %v2915_v45, %v12993_v41  ;;  %v2923_v55 = vsel %vm18933_vm7, %v2921_v2, %v12982_v23  ;;  %v2924_v7 = vsel %vm18933_vm7, %v2922_v52, %v12983_v35  ;;  %v18981_v23 = vld [vmem:[#allocation12_spill] sm:$0xff]  ;;  %v18982_v63 = vld [vmem:[#allocation13_spill] sm:$0xff] }
 0x566   : > { %v12507_v12 = vpack.c.bf16 %v2924_v7, %v2923_v55  ;;  %v12509_v24 = vpack.c.bf16 %v2918_v56, %v2917_v29  ;;  %v14977_v35 = vrot.slane %v805_v34, %v18980_v17  ;;  %v1012_v41 = vadd.f32 %v18981_v23, %v14974_v5  ;;  %v18983_v56 = vld [vmem:[#allocation14_spill] sm:$0xff] }
 0x567   : > { %v1016_v55 = vadd.f32 %v18983_v56, %v14974_v5  ;;  %vm19019_vm7 = vcmask 1046528  }
 0x568   : > { %12508 = vmatprep.subr.bf16.mxu1 %v12507_v12  ;;  %v1014_v48 = vadd.f32 %v18982_v63, %v14977_v35  ;;  %v18984_v12 = vld [vmem:[#allocation15_spill] sm:$0xff] }
 0x569   : > { %12510 = vmatpush1.bf16.msra.mxu1 %v12509_v24  ;;  %v1018_v24 = vadd.f32 %v18984_v12, %v14977_v35 }
 0x56a   : > { %3467 = vmatprep.subr.bf16.mxu1 %v13151_v11 }
 0x56c   : > { %11132 = vmatmul.mubr.msk.f32.vlgmr.msra.gmra.mrb[40].mxu1 %vm18932_vm0, %v764_v8 }
 0x56d   : > { %3022 = vmatprep.mubr.f32.mxu1 %v18977_v44  ;;  %3468 = vmatpush1.bf16.msra.mxu1 %v13149_v26 }
 0x56e   : > { %3469 = vmatprep.subr.bf16.mxu1 %v13154_v4 }
 0x570   : > { %11133 = vmatmul.mubr.msk.f32.gmra.mrb[42].mxu1 %vm18932_vm0, %v765_v42 }
 0x571   : > { %3028 = vmatprep.mubr.f32.mxu1 %v18977_v44  ;;  %3470 = vmatpush1.bf16.msra.mxu1 %v13152_v27  ;;  %v18985_v27 = vld [vmem:[#allocation16_spill] sm:$0xff] }
 0x572   : > { %3471 = vmatprep.subr.bf16.mxu1 %v13157_v36  ;;  %v1022_v36 = vadd.f32 %v18985_v27, %v14974_v5 }
 0x574   : > { %11134 = vmatmul.mubr.msk.f32.gmra.mrb[44].mxu1 %vm18932_vm0, %v766_v19 }
 0x575   : > { %3034 = vmatprep.mubr.f32.mxu1 %v18977_v44  ;;  %3472 = vmatpush1.bf16.msra.mxu1 %v13155_v59 }
 0x576   : > { %3473 = vmatprep.subr.bf16.mxu1 %v13160_v20  ;;  %v18986_v20 = vld [vmem:[#allocation17_spill] sm:$0xff] }
 0x578   : > { %11135 = vmatmul.mubr.msk.f32.gmra.mrb[46].mxu1 %vm18932_vm0, %v767_v6  ;;  %v1024_v6 = vadd.f32 %v18986_v20, %v14977_v35 }
 0x579   : > { %3040 = vmatprep.mubr.f32.mxu1 %v18977_v44  ;;  %3474 = vmatpush1.bf16.msra.mxu1 %v13158_v57  ;;  %v18987_v57 = vld [vmem:[#allocation18_spill] sm:$0xff] }
 0x57a   : > { %3475 = vmatprep.subr.bf16.mxu1 %v13163_v28  ;;  %v1026_v28 = vadd.f32 %v18987_v57, %v14974_v5 }
 0x57c   : > { %11136 = vmatmul.mubr.msk.f32.gmra.mrb[48].mxu1 %vm18932_vm0, %v768_v3 }
 0x57d   : > { %3046 = vmatprep.mubr.f32.mxu1 %v18977_v44  ;;  %3476 = vmatpush1.bf16.msra.mxu1 %v13161_v14 }
 0x57e   : > { %3477 = vmatprep.subr.bf16.mxu1 %v13166_v25  ;;  %v18988_v25 = vld [vmem:[#allocation19_spill] sm:$0xff] }
 0x580   : > { %11137 = vmatmul.mubr.msk.f32.gmra.mrb[50].mxu1 %vm18932_vm0, %v769_v33  ;;  %v1028_v33 = vadd.f32 %v18988_v25, %v14977_v35 }
 0x581   : > { %3052 = vmatprep.mubr.f32.mxu1 %v18977_v44  ;;  %3478 = vmatpush1.bf16.msra.mxu1 %v13164_v54  ;;  %v18989_v54 = vld [vmem:[#allocation20_spill] sm:$0xff] }
 0x582   : > { %3479 = vmatprep.subr.bf16.mxu1 %v13169_v31  ;;  %v1032_v31 = vadd.f32 %v18989_v54, %v14974_v5  ;;  %v15067_v54 = vadd.f32 %v14644_v9, %v14974_v5 }
 0x584   : > { %11138 = vmatmul.mubr.msk.f32.gmra.mrb[52].mxu1 %vm18932_vm0, %v770_v1 }
 0x585   : > { %3058 = vmatprep.mubr.f32.mxu1 %v18977_v44  ;;  %3480 = vmatpush1.bf16.msra.mxu1 %v13167_v58 }
 0x586   : > { %3481 = vmatprep.subr.bf16.mxu1 %v13172_v22 }
 0x588   : > { %11139 = vmatmul.mubr.msk.f32.gmra.mrb[54].mxu1 %vm18932_vm0, %v771_v21 }
 0x589   : > { %3064 = vmatprep.mubr.f32.mxu1 %v18977_v44  ;;  %3482 = vmatpush1.bf16.msra.mxu1 %v13170_v53 }
 0x58a   : > { %3483 = vmatprep.subr.bf16.mxu1 %v13175_v61 }
 0x58c   : > { %11140 = vmatmul.mubr.msk.f32.gmra.mrb[56].mxu1 %vm18932_vm0, %v772_v50  ;;  %v18990_v50 = vld [vmem:[#allocation21_spill] sm:$0xff]  ;;  %vm19018_vm0 = vcmask 1045504  }
 0x58d   : > { %3484 = vmatpush1.bf16.msra.mxu1 %v13173_v46  ;;  %v1034_v22 = vadd.f32 %v18990_v50, %v14977_v35 }
 0x58e   : > { %3485 = vmatprep.subr.bf16.mxu1 %v13178_v60 }
 0x591   : > { %3486 = vmatpush1.bf16.msra.mxu1 %v13176_v39  ;;  %v18991_v39 = vld [vmem:[#allocation22_spill] sm:$0xff] }
 0x592   : > { %3487 = vmatprep.subr.bf16.mxu1 %v13181_v0  ;;  %v1036_v0 = vadd.f32 %v18991_v39, %v14974_v5 }
 0x595   : > { %3488 = vmatpush1.bf16.msra.mxu1 %v13179_v40  ;;  %v18992_v40 = vld [vmem:[#allocation23_spill] sm:$0xff] }
 0x596   : > { %3489 = vmatprep.subr.bf16.mxu1 %v13184_v47  ;;  %v1038_v47 = vadd.f32 %v18992_v40, %v14977_v35 }
 0x599   : > { %3490 = vmatpush1.bf16.msra.mxu1 %v13182_v62 }
 0x59a   : > { %3491 = vmatprep.subr.bf16.mxu1 %v13187_v32 }
 0x59d   : > { %3492 = vmatpush1.bf16.msra.mxu1 %v13185_v30 }
 0x59e   : > { %3493 = vmatprep.subr.bf16.mxu1 %v13190_v18 }
 0x5a1   : > { %3494 = vmatpush1.bf16.msra.mxu1 %v13188_v37 }
 0x5a2   : > { %3495 = vmatprep.subr.bf16.mxu1 %v13193_v10  ;;  %v18993_v10 = vld [vmem:[#allocation24_spill] sm:$0xff] }
 0x5a5   : > { %3496 = vmatpush1.bf16.msra.mxu1 %v13191_v15 }
 0x5a6   : > { %3497 = vmatprep.subr.bf16.mxu1 %v13196_v16  ;;  %v15033_v16 = vadd.f32 %v18993_v10, %v14974_v5 }
 0x5a9   : > { %3498 = vmatpush1.bf16.msra.mxu1 %v13194_v38  ;;  %v18994_v38 = vld [vmem:[#allocation25_spill] sm:$0xff] }
 0x5aa   : > { %12575 = vmatprep.subr.bf16.mxu1 %v18975_v51  ;;  %v15037_v34 = vadd.f32 %v18994_v38, %v14977_v35 }
 0x63f   : > { %v3018_v45 = vpop.f32.mrb[40].mxu1 }
 0x640   : > { %v14983_v2 = vadd.f32 %v3018_v45, %v1012_v41  ;;  %v3020_v52 = vpop.f32.mrb[41].mxu1 }
 0x641   : > { %v14985_v29 = vadd.f32 %v3020_v52, %v1014_v48 }
 0x642   : > { %v3089_v7 = vmul.f32 %v14983_v2, %v14983_v2 }
 0x643   : > { %v3090_v11 = vmul.f32 %v14985_v29, %v14985_v29  ;;  %v3024_v8 = vpop.f32.mrb[42].mxu1 }
 0x644   : > { %v3107_v26 = vmul.f32 %v3089_v7, %v14983_v2  ;;  %v14996_v4 = vadd.f32 %v3024_v8, %v1016_v55  ;;  %v3026_v42 = vpop.f32.mrb[43].mxu1  ;;  %v18995_v55 = vld [vmem:[#allocation26_spill] sm:$0xff] }
 0x645   : > { %v3108_v19 = vmul.f32 %v3090_v11, %v14985_v29  ;;  %v15001_v59 = vadd.f32 %v3026_v42, %v1018_v24  ;;  %v15047_v7 = vadd.f32 %v18995_v55, %v14974_v5 }
 0x646   : > { %v3125_v3 = vmul.f32 0.044715, %v3107_v26  ;;  %v3091_v14 = vmul.f32 %v14996_v4, %v14996_v4 }
 0x647   : > { %v3126_v1 = vmul.f32 0.044715, %v3108_v19  ;;  %v3092_v58 = vmul.f32 %v15001_v59, %v15001_v59  ;;  %v3030_v21 = vpop.f32.mrb[44].mxu1 }
 0x648   : > { %v3143_v53 = vadd.f32 %v3125_v3, %v14983_v2  ;;  %v3109_v61 = vmul.f32 %v3091_v14, %v14996_v4  ;;  %v15019_v46 = vadd.f32 %v3030_v21, %v1022_v36  ;;  %v3032_v60 = vpop.f32.mrb[45].mxu1  ;;  %v18996_v36 = vld [vmem:[#allocation27_spill] sm:$0xff] }
 0x649   : > { %v3110_v62 = vmul.f32 %v3092_v58, %v15001_v59  ;;  %v15026_v30 = vadd.f32 %v3032_v60, %v1024_v6  ;;  %v3144_v37 = vadd.f32 %v3126_v1, %v14985_v29  ;;  %v15057_v19 = vadd.f32 %v18996_v36, %v14977_v35 }
 0x64a   : > { %v3161_v32 = vmul.f32 0.7978846, %v3143_v53  ;;  %v3127_v18 = vmul.f32 0.044715, %v3109_v61  ;;  %v3093_v15 = vmul.f32 %v15019_v46, %v15019_v46 }
 0x64b   : > { %v3128_v23 = vmul.f32 0.044715, %v3110_v62  ;;  %v3094_v41 = vmul.f32 %v15026_v30, %v15026_v30  ;;  %v3036_v63 = vpop.f32.mrb[46].mxu1  ;;  %v3162_v8 = vmul.f32 0.7978846, %v3144_v37 }
 0x64c   : > { %13341 = vtanh.f32 %v3161_v32  ;;  %v3145_v48 = vadd.f32 %v3127_v18, %v14996_v4  ;;  %v3111_v45 = vmul.f32 %v3093_v15, %v15019_v46  ;;  %v15043_v52 = vadd.f32 %v3036_v63, %v1026_v28  ;;  %v3038_v56 = vpop.f32.mrb[47].mxu1 }
 0x64d   : > { %v3146_v12 = vadd.f32 %v3128_v23, %v15001_v59  ;;  %v3112_v24 = vmul.f32 %v3094_v41, %v15026_v30  ;;  %v15051_v11 = vadd.f32 %v3038_v56, %v1028_v33 }
 0x64e   : > { %v3163_v26 = vmul.f32 0.7978846, %v3145_v48  ;;  %v3129_v42 = vmul.f32 0.044715, %v3111_v45  ;;  %v3095_v27 = vmul.f32 %v15043_v52, %v15043_v52 }
 0x64f   : > { %v3164_v20 = vmul.f32 0.7978846, %v3146_v12  ;;  %v3130_v6 = vmul.f32 0.044715, %v3112_v24  ;;  %v3096_v57 = vmul.f32 %v15051_v11, %v15051_v11  ;;  %v3042_v28 = vpop.f32.mrb[48].mxu1 }
 0x650   : > { %13343 = vtanh.f32 %v3163_v26  ;;  %v3147_v3 = vadd.f32 %v3129_v42, %v15019_v46  ;;  %v3113_v14 = vmul.f32 %v3095_v27, %v15043_v52  ;;  %v15063_v25 = vadd.f32 %v3042_v28, %v1032_v31  ;;  %v3044_v33 = vpop.f32.mrb[49].mxu1 }
 0x651   : > { %v3148_v1 = vadd.f32 %v3130_v6, %v15026_v30  ;;  %v3114_v58 = vmul.f32 %v3096_v57, %v15051_v11  ;;  %v15071_v21 = vadd.f32 %v3044_v33, %v1034_v22  ;;  %13345 = vtanh.f32 %v3162_v8 }
 0x652   : > { %v3165_v50 = vmul.f32 0.7978846, %v3147_v3  ;;  %v3131_v53 = vmul.f32 0.044715, %v3113_v14  ;;  %v3097_v61 = vmul.f32 %v15063_v25, %v15063_v25  ;;  %v15077_v31 = vadd.f32 %v14646_v13, %v14977_v35 }
 0x653   : > { %v3166_v60 = vmul.f32 0.7978846, %v3148_v1  ;;  %v3132_v39 = vmul.f32 0.044715, %v3114_v58  ;;  %v3098_v9 = vmul.f32 %v15071_v21, %v15071_v21  ;;  %v3048_v5 = vpop.f32.mrb[50].mxu1  ;;  %13347 = vtanh.f32 %v3164_v20 }
 0x654   : > { %v3149_v22 = vadd.f32 %v3131_v53, %v15043_v52  ;;  %v3115_v40 = vmul.f32 %v3097_v61, %v15063_v25  ;;  %v15083_v62 = vadd.f32 %v3048_v5, %v1036_v0  ;;  %v3050_v32 = vpop.f32.mrb[51].mxu1  ;;  %13349 = vtanh.f32 %v3165_v50 }
 0x655   : > { %v3150_v37 = vadd.f32 %v3132_v39, %v15051_v11  ;;  %v3116_v13 = vmul.f32 %v3098_v9, %v15071_v21  ;;  %v15087_v35 = vadd.f32 %v3050_v32, %v1038_v47  ;;  %13351 = vtanh.f32 %v3166_v60 }
 0x656   : > { %v13342_v18 = vpop.eup %13341  ;;  %v3167_v15 = vmul.f32 0.7978846, %v3149_v22  ;;  %v3133_v10 = vmul.f32 0.044715, %v3115_v40  ;;  %v3099_v38 = vmul.f32 %v15083_v62, %v15083_v62 }
 0x657   : > { %v3197_v23 = vadd.f32 1.0, %v13342_v18  ;;  %v3168_v41 = vmul.f32 0.7978846, %v3150_v37  ;;  %v3134_v63 = vmul.f32 0.044715, %v3116_v13  ;;  %v3100_v0 = vmul.f32 %v15087_v35, %v15087_v35  ;;  %v3054_v48 = vpop.f32.mrb[52].mxu1 }
 0x658   : > { %13353 = vtanh.f32 %v3167_v15  ;;  %v3151_v45 = vadd.f32 %v3133_v10, %v15063_v25  ;;  %v3117_v47 = vmul.f32 %v3099_v38, %v15083_v62  ;;  %v15096_v56 = vadd.f32 %v3054_v48, %v15033_v16  ;;  %v3056_v55 = vpop.f32.mrb[53].mxu1 }
 0x659   : > { %v3215_v12 = vmul.f32 0.5, %v3197_v23  ;;  %13355 = vtanh.f32 %v3168_v41  ;;  %v3152_v24 = vadd.f32 %v3134_v63, %v15071_v21  ;;  %v3118_v8 = vmul.f32 %v3100_v0, %v15087_v35 }
 0x65a   : > { %v13344_v26 = vpop.eup %13343  ;;  %v3169_v42 = vmul.f32 0.7978846, %v3151_v45  ;;  %v3135_v27 = vmul.f32 0.044715, %v3117_v47  ;;  %v3101_v36 = vmul.f32 %v15096_v56, %v15096_v56  ;;  %v15103_v20 = vadd.f32 %v3056_v55, %v15037_v34 }
 0x65b   : > { %v3233_v6 = vmul.f32 %v3215_v12, %v14983_v2  ;;  %v3199_v16 = vadd.f32 1.0, %v13344_v26  ;;  %v3170_v57 = vmul.f32 0.7978846, %v3152_v24  ;;  %v3136_v28 = vmul.f32 0.044715, %v3118_v8  ;;  %v3060_v3 = vpop.f32.mrb[54].mxu1  ;;  %v13346_v14 = vpop.eup %13345 }
 0x65c   : > { %13357 = vtanh.f32 %v3169_v42  ;;  %v3153_v33 = vadd.f32 %v3135_v27, %v15083_v62  ;;  %v3119_v1 = vmul.f32 %v3101_v36, %v15096_v56  ;;  %v3102_v58 = vmul.f32 %v15103_v20, %v15103_v20  ;;  %v3062_v50 = vpop.f32.mrb[55].mxu1 }
 0x65d   : > { %v3217_v53 = vmul.f32 0.5, %v3199_v16  ;;  %13359 = vtanh.f32 %v3170_v57  ;;  %v3154_v34 = vadd.f32 %v3136_v28, %v15087_v35  ;;  %v15112_v2 = vadd.f32 %v3060_v3, %v15047_v7  ;;  %v13348_v61 = vpop.eup %13347 }
 0x65e   : > { %v3171_v60 = vmul.f32 0.7978846, %v3153_v33  ;;  %v3137_v39 = vmul.f32 0.044715, %v3119_v1  ;;  %v3120_v9 = vmul.f32 %v3102_v58, %v15103_v20  ;;  %v15116_v5 = vadd.f32 %v3062_v50, %v15057_v19  ;;  %v13350_v22 = vpop.eup %13349 }
 0x65f   : > { %v3235_v40 = vmul.f32 %v3217_v53, %v14996_v4  ;;  %v3172_v32 = vmul.f32 0.7978846, %v3154_v34  ;;  %v3103_v37 = vmul.f32 %v15112_v2, %v15112_v2  ;;  %v3066_v13 = vpop.f32.mrb[56].mxu1  ;;  %v3198_v18 = vadd.f32 1.0, %v13346_v14  ;;  %v13352_v15 = vpop.eup %13351 }
 0x660   : > { %13361 = vtanh.f32 %v3171_v60  ;;  %v3155_v7 = vadd.f32 %v3137_v39, %v15096_v56  ;;  %v3138_v10 = vmul.f32 0.044715, %v3120_v9  ;;  %v3104_v38 = vmul.f32 %v15116_v5, %v15116_v5  ;;  %v3068_v23 = vpop.f32.mrb[57].mxu1 }
 0x661   : > { %v3251_v19 = vpack.c.bf16 %v3235_v40, %v3233_v6  ;;  %13363 = vtanh.f32 %v3172_v32  ;;  %v3121_v41 = vmul.f32 %v3103_v37, %v15112_v2  ;;  %v15126_v4 = vadd.f32 %v3066_v13, %v15067_v54 }
 0x662   : > { %v13354_v63 = vpop.eup %13353  ;;  %v3173_v0 = vmul.f32 0.7978846, %v3155_v7  ;;  %v3156_v48 = vadd.f32 %v3138_v10, %v15103_v20  ;;  %v3122_v45 = vmul.f32 %v3104_v38, %v15116_v5  ;;  %v15131_v47 = vadd.f32 %v3068_v23, %v15077_v31 }
 0x663   : > { %v13356_v55 = vpop.eup %13355  ;;  %v3139_v12 = vmul.f32 0.044715, %v3121_v41  ;;  %v3105_v24 = vmul.f32 %v15126_v4, %v15126_v4  ;;  %v3200_v8 = vadd.f32 1.0, %v13348_v61  ;;  %v3216_v26 = vmul.f32 0.5, %v3198_v18 }
 0x664   : > { %13365 = vtanh.f32 %v3173_v0  ;;  %v3174_v42 = vmul.f32 0.7978846, %v3156_v48  ;;  %v3140_v54 = vmul.f32 0.044715, %v3122_v45  ;;  %v3106_v27 = vmul.f32 %v15131_v47, %v15131_v47 }
 0x665   : > { %v3157_v36 = vadd.f32 %v3139_v12, %v15112_v2  ;;  %v3123_v6 = vmul.f32 %v3105_v24, %v15126_v4  ;;  %v3218_v16 = vmul.f32 0.5, %v3200_v8  ;;  %v3234_v31 = vmul.f32 %v3216_v26, %v14985_v29 }
 0x666   : > { %v13358_v57 = vpop.eup %13357  ;;  %13367 = vtanh.f32 %v3174_v42  ;;  %v3158_v28 = vadd.f32 %v3140_v54, %v15116_v5  ;;  %v3124_v3 = vmul.f32 %v3106_v27, %v15131_v47  ;;  %v3202_v14 = vadd.f32 1.0, %v13352_v15 }
 0x667   : > { %v13360_v33 = vpop.eup %13359  ;;  %v3175_v1 = vmul.f32 0.7978846, %v3157_v36  ;;  %v3141_v58 = vmul.f32 0.044715, %v3123_v6  ;;  %v3236_v50 = vmul.f32 %v3218_v16, %v15001_v59  ;;  %v3204_v53 = vadd.f32 1.0, %v13356_v55 }
 0x668   : > { %v3176_v34 = vmul.f32 0.7978846, %v3158_v28  ;;  %v3142_v61 = vmul.f32 0.044715, %v3124_v3  ;;  %v3220_v60 = vmul.f32 0.5, %v3202_v14  ;;  %v3201_v39 = vadd.f32 1.0, %v13350_v22 }
 0x669   : > { %13369 = vtanh.f32 %v3175_v1  ;;  %v3159_v29 = vadd.f32 %v3141_v58, %v15126_v4  ;;  %v3252_v9 = vpack.c.bf16 %v3236_v50, %v3234_v31  ;;  %v3222_v40 = vmul.f32 0.5, %v3204_v53 }
 0x66a   : > { %v13362_v32 = vpop.eup %13361  ;;  %13371 = vtanh.f32 %v3176_v34  ;;  %v3160_v37 = vadd.f32 %v3142_v61, %v15131_v47  ;;  %v3238_v13 = vmul.f32 %v3220_v60, %v15026_v30  ;;  %v3203_v18 = vadd.f32 1.0, %v13354_v63 }
 0x66b   : > { %v13364_v15 = vpop.eup %13363  ;;  %v3177_v7 = vmul.f32 0.7978846, %v3159_v29  ;;  %3499 = vmatprep.mubr.bf16.mxu1 %v3252_v9  ;;  %12512 = vmatprep.subr.bf16.mxu0 %v3252_v9  ;;  %v3240_v59 = vmul.f32 %v3222_v40, %v15051_v11  ;;  %v3219_v10 = vmul.f32 0.5, %v3201_v39  ;;  %v3206_v22 = vadd.f32 1.0, %v13360_v33 }
 0x66c   : > { %v3178_v38 = vmul.f32 0.7978846, %v3160_v37  ;;  %3500 = vmatmul.mubr.bf16.vlgmr.msra.gmra.mrb[60].mxu1 %v3251_v19  ;;  %12514 = vmatpush1.bf16.msra.mxu0 %v3251_v19  ;;  %v3221_v23 = vmul.f32 0.5, %v3203_v18  ;;  %v3208_v41 = vadd.f32 1.0, %v13364_v15  ;;  %v3205_v0 = vadd.f32 1.0, %v13358_v57 }
 0x66d   : > { %13373 = vtanh.f32 %v3177_v7  ;;  %v3254_v48 = vpack.c.bf16 %v3240_v59, %v3238_v13  ;;  %v3237_v45 = vmul.f32 %v3219_v10, %v15019_v46  ;;  %v3224_v30 = vmul.f32 0.5, %v3206_v22 }
 0x66e   : > { %v13366_v63 = vpop.eup %13365  ;;  %13375 = vtanh.f32 %v3178_v38  ;;  %v3239_v55 = vmul.f32 %v3221_v23, %v15043_v52  ;;  %v3226_v12 = vmul.f32 0.5, %v3208_v41  ;;  %v3207_v24 = vadd.f32 1.0, %v13362_v32 }
 0x66f   : > { %3509 = vmatprep.mubr.bf16.mxu1 %v3254_v48  ;;  %12516 = vmatprep.subr.bf16.mxu0 %v3254_v48  ;;  %v3242_v11 = vmul.f32 %v3224_v30, %v15071_v21  ;;  %v3223_v8 = vmul.f32 0.5, %v3205_v0  ;;  %v3209_v27 = vadd.f32 1.0, %v13366_v63 }
 0x670   : > { %v13368_v19 = vpop.eup %13367  ;;  %v3253_v26 = vpack.c.bf16 %v3239_v55, %v3237_v45  ;;  %v3244_v42 = vmul.f32 %v3226_v12, %v15087_v35  ;;  %v3225_v54 = vmul.f32 0.5, %v3207_v24 }
 0x671   : > { %v3210_v36 = vadd.f32 1.0, %v13368_v19  ;;  %v3241_v6 = vmul.f32 %v3223_v8, %v15063_v25  ;;  %v3227_v28 = vmul.f32 0.5, %v3209_v27 }
 0x672   : > { %12518 = vmatpush1.bf16.msra.mxu0 %v3253_v26  ;;  %v3256_v46 = vpack.c.bf16 %v3244_v42, %v3242_v11  ;;  %v3243_v52 = vmul.f32 %v3225_v54, %v15083_v62 }
 0x673   : > { %v13370_v16 = vpop.eup %13369  ;;  %v3228_v14 = vmul.f32 0.5, %v3210_v36  ;;  %v3245_v25 = vmul.f32 %v3227_v28, %v15096_v56 }
 0x674   : > { %v13372_v31 = vpop.eup %13371  ;;  %3510 = vmatmul.mubr.bf16.gmra.mrb[64].mxu1 %v3253_v26  ;;  %12520 = vmatprep.subr.bf16.mxu0 %v3256_v46  ;;  %v3255_v57 = vpack.c.bf16 %v3243_v52, %v3241_v6  ;;  %v3211_v21 = vadd.f32 1.0, %v13370_v16 }
 0x675   : > { %3519 = vmatprep.mubr.bf16.mxu1 %v3256_v46  ;;  %v3212_v3 = vadd.f32 1.0, %v13372_v31  ;;  %v3246_v53 = vmul.f32 %v3228_v14, %v15103_v20  ;;  %v13523_v20 = vld [vmem:[%s18957_s19] sm:$0xff] }
 0x676   : > { %12522 = vmatpush1.bf16.msra.mxu0 %v3255_v57  ;;  %v3229_v35 = vmul.f32 0.5, %v3211_v21 }
 0x677   : > { %v13374_v33 = vpop.eup %13373  ;;  %v3230_v1 = vmul.f32 0.5, %v3212_v3 }
 0x678   : > { %v13376_v58 = vpop.eup %13375  ;;  %v3213_v50 = vadd.f32 1.0, %v13374_v33  ;;  %v3247_v62 = vmul.f32 %v3229_v35, %v15112_v2 }
 0x679   : > { %v3248_v34 = vmul.f32 %v3230_v1, %v15116_v5  ;;  %v3214_v61 = vadd.f32 1.0, %v13376_v58  ;;  %v13524_v5 = vld [vmem:[%s18957_s19 + $0x8] sm:$0xff] }
 0x67a   : > { %v3231_v60 = vmul.f32 0.5, %v3213_v50  ;;  %v3257_v39 = vpack.c.bf16 %v3247_v62, %v3245_v25 }
 0x67b   : > { %v3258_v29 = vpack.c.bf16 %v3248_v34, %v3246_v53  ;;  %v3232_v9 = vmul.f32 0.5, %v3214_v61 }
 0x67c   : > { %v3249_v40 = vmul.f32 %v3231_v60, %v15126_v4  ;;  %3520 = vmatmul.mubr.bf16.gmra.mrb[68].mxu1 %v3255_v57 }
 0x67d   : > { %3529 = vmatprep.mubr.bf16.mxu1 %v3258_v29  ;;  %12524 = vmatprep.subr.bf16.mxu0 %v3258_v29  ;;  %v3250_v32 = vmul.f32 %v3232_v9, %v15131_v47 }
 0x67e   : > { %v3259_v37 = vpack.c.bf16 %v3249_v40, %v3249_v40  ;;  %12526 = vmatpush1.bf16.msra.mxu0 %v3257_v39 }
 0x67f   : > { %v3260_v56 = vpack.c.bf16 %v3250_v32, %v3250_v32 }
 0x680   : > { %v3564_v13 = vunpack.c.l.bf16 %v3259_v37 }
 0x681   : > { %v3565_v2 = vunpack.c.l.bf16 %v3260_v56 }
 0x683   : > { %3582 = vmatprep.subr.mxu0 %v3565_v2 }
 0x684   : > { %3530 = vmatmul.mubr.bf16.gmra.mrb[72].mxu1 %v3257_v39  ;;  %3583 = vmatpush1.msra.mxu0 %v3564_v13 }
 0x685   : > { %3539 = vmatprep.mubr.bf16.mxu1 %v3260_v56  ;;  %11206 = vmatmul.mubr.msk.f32.vlgmr.msra.gmra.mrb[16].mxu0 %vm18931_vm1, %v13523_v20 }
 0x686   : > { %3636 = vmatprep.mubr.f32.mxu0 %v18977_v44  ;;  %12527 = vmatprep.subr.bf16.mxu0 %v18975_v51 }
 0x689   : > { %11207 = vmatmul.mubr.msk.f32.gmra.mrb[18].mxu0 %vm18931_vm1, %v13524_v5  ;;  %vm19017_vm1 = vcmask 1044480  }
 0x68a   : > { %11882 = vmatprep.mubr.msk.f32.mxu0 %vm13632_vm2, %v18977_v44 }
 0x68c   : > { %3540 = vmatmul.mubr.bf16.gmra.mrb[76].mxu1 %v3259_v37 }
 0x68d   : > { %11958 = vmatprep.mubr.msk.f32.mxu1 %vm13632_vm2, %v18977_v44 }
 0x73f   : > { %v15173_v4 = vpop.f32.mrb[60].mxu1 }
 0x740   : > { %18997 = vst [vmem:[#allocation29_spill] sm:$0xff] %v15173_v4  ;;  %v15175_v47 = vpop.f32.mrb[61].mxu1 }
 0x741   : > { %18998 = vst [vmem:[#allocation28_spill] sm:$0xff] %v15175_v47  ;;  %v15177_v18 = vpop.f32.mrb[62].mxu1 }
 0x742   : > { %18999 = vst [vmem:[#allocation12_spill] sm:$0xff] %v15177_v18  ;;  %v15179_v15 = vpop.f32.mrb[63].mxu1 }
 0x743   : > { %19000 = vst [vmem:[#allocation13_spill] sm:$0xff] %v15179_v15 }
 0x747   : > { %v15181_v7 = vpop.f32.mrb[64].mxu1 }
 0x748   : > { %19001 = vst [vmem:[#allocation14_spill] sm:$0xff] %v15181_v7  ;;  %v15183_v59 = vpop.f32.mrb[65].mxu1 }
 0x749   : > { %19002 = vst [vmem:[#allocation15_spill] sm:$0xff] %v15183_v59  ;;  %v15185_v10 = vpop.f32.mrb[66].mxu1 }
 0x74a   : > { %19003 = vst [vmem:[#allocation16_spill] sm:$0xff] %v15185_v10  ;;  %v15187_v22 = vpop.f32.mrb[67].mxu1 }
 0x74b   : > { %19004 = vst [vmem:[#allocation17_spill] sm:$0xff] %v15187_v22 }
 0x74f   : > { %v15189_v38 = vpop.f32.mrb[68].mxu1 }
 0x750   : > { %19005 = vst [vmem:[#allocation18_spill] sm:$0xff] %v15189_v38  ;;  %v15191_v23 = vpop.f32.mrb[69].mxu1 }
 0x751   : > { %19006 = vst [vmem:[#allocation19_spill] sm:$0xff] %v15191_v23  ;;  %v15193_v41 = vpop.f32.mrb[70].mxu1 }
 0x752   : > { %19007 = vst [vmem:[#allocation20_spill] sm:$0xff] %v15193_v41  ;;  %v15195_v0 = vpop.f32.mrb[71].mxu1  ;;  %v4450_v41 = vld [vmem:[#allocation3 + $0x230] sm:$0xff] }
 0x753   : > { %19008 = vst [vmem:[#allocation21_spill] sm:$0xff] %v15195_v0  ;;  %v4449_v0 = vld [vmem:[#allocation3 + $0x228] sm:$0xff] }
 0x757   : > { %v15197_v48 = vpop.f32.mrb[72].mxu1 }
 0x758   : > { %19009 = vst [vmem:[#allocation22_spill] sm:$0xff] %v15197_v48  ;;  %v15199_v45 = vpop.f32.mrb[73].mxu1  ;;  %v15201_v30 = vpop.f32.mrb[16].mxu0  ;;  %v4448_v48 = vld [vmem:[#allocation3 + $0x220] sm:$0xff] }
 0x759   : > { %19010 = vst [vmem:[#allocation23_spill] sm:$0xff] %v15199_v45  ;;  %v15203_v63 = vpop.f32.mrb[74].mxu1  ;;  %v3652_v55 = vrot.slane %v15201_v30, %v13982_v49  ;;  %v15207_v12 = vpop.f32.mrb[17].mxu0  ;;  %v4446_v45 = vld [vmem:[#allocation3 + $0x210] sm:$0xff] }
 0x75a   : > { %19011 = vst [vmem:[#allocation24_spill] sm:$0xff] %v15203_v63  ;;  %v15209_v24 = vpop.f32.mrb[75].mxu1  ;;  %v3768_v8 = vrot.slane %v15207_v12, %v13982_v49 }
 0x75b   : > { %19012 = vst [vmem:[#allocation25_spill] sm:$0xff] %v15209_v24  ;;  %v15212_v11 = vrot.slane %v3652_v55, %v13982_v49  ;;  %v3660_v52 = vcombine.high %v3652_v55, %v3652_v55 }
 0x75c   : > { %v3638_v19 = vpop.f32.mrb[18].mxu0  ;;  %v3784_v54 = vrot.slane %v3768_v8, %v13982_v49  ;;  %v3776_v28 = vcombine.high %v3768_v8, %v3768_v8 }
 0x75d   : > { %v15216_v26 = vpop.f32.mrb[19].mxu0  ;;  %v3862_v27 = vrot.slane %v15212_v11, %v13930_v43  ;;  %v15234_v31 = vrot.slane %v3660_v52, %v13982_v49  ;;  %v15242_v57 = vcombine.high %v15212_v11, %v15212_v11  ;;  %v3701_v35 = vrot.slane %v3638_v19, %v13982_v49 }
 0x75e   : > { %v15228_v16 = vrot.slane %v3784_v54, %v13930_v43  ;;  %v15253_v14 = vrot.slane %v3776_v28, %v13982_v49  ;;  %v3806_v33 = vcombine.high %v3784_v54, %v3784_v54  ;;  %v3817_v62 = vrot.slane %v15216_v26, %v13982_v49 }
 0x75f   : > { %v15218_v42 = vpop.f32.mrb[76].mxu1  ;;  %3971 = vrot.lane.b32.xlu1 %v3862_v27, %s13629_s22  ;;  %3923 = vrot.lane.b32.xlu0 %v3862_v27, %s13630_s23  ;;  %v3866_v21 = vrot.slane %v15234_v31, %v13930_v43  ;;  %v3870_v3 = vrot.slane %v15242_v57, %v13930_v43  ;;  %v15267_v58 = vrot.slane %v3701_v35, %v13982_v49 }
 0x760   : > { %19013 = vst [vmem:[#allocation26_spill] sm:$0xff] %v15218_v42  ;;  %v15223_v36 = vpop.f32.mrb[77].mxu1  ;;  %v15260_v1 = vrot.slane %v15253_v14, %v13930_v43  ;;  %v15270_v50 = vrot.slane %v3806_v33, %v13930_v43  ;;  %v3709_v53 = vcombine.high %v3701_v35, %v3701_v35  ;;  %v3833_v34 = vrot.slane %v3817_v62, %v13982_v49 }
 0x761   : > { %19014 = vst [vmem:[#allocation27_spill] sm:$0xff] %v15223_v36  ;;  %v3545_v46 = vpop.f32.mrb[78].mxu1  ;;  %v3894_v25 = vrot.slane %v15267_v58, %v13930_v43  ;;  %v3694_v39 = vcombine.high %v3638_v19, %v3638_v19  ;;  %v15304_v40 = vcombine.high %v15267_v58, %v15267_v58  ;;  %v3825_v37 = vcombine.high %v3817_v62, %v3817_v62 }
 0x762   : > { %v3546_v6 = vpop.f32.mrb[79].mxu1  ;;  %v15287_v61 = vrot.slane %v3709_v53, %v13982_v49  ;;  %v15290_v60 = vrot.slane %v3833_v34, %v13930_v43  ;;  %v3810_v5 = vcombine.high %v15216_v26, %v15216_v26  ;;  %v3855_v55 = vcombine.high %v3833_v34, %v3833_v34 }
 0x763   : > { %4019 = vrot.lane.b32.xlu0 %v3862_v27, %s13631_s25  ;;  %4147 = vrot.lane.b32.xlu1 %v15228_v16, %s13630_s23  ;;  %v3708_v9 = vrot.slane %v3694_v39, %v13982_v49  ;;  %v3902_v56 = vrot.slane %v15304_v40, %v13930_v43  ;;  %v3847_v2 = vrot.slane %v3825_v37, %v13982_v49 }
 0x764   : > { %v3898_v29 = vrot.slane %v15287_v61, %v13930_v43  ;;  %v3824_v8 = vrot.slane %v3810_v5, %v13982_v49  ;;  %v15333_v19 = vrot.slane %v3855_v55, %v13930_v43  ;;  %v15342_v26 = vcombine.high %v15287_v61, %v15287_v61 }
 0x765   : > { %v15309_v32 = vrot.slane %v3708_v9, %v13982_v49  ;;  %v15321_v20 = vrot.slane %v3847_v2, %v13930_v43  ;;  %v3710_v27 = vcombine.high %v3708_v9, %v3708_v9  ;;  %v3857_v33 = vcombine.high %v3847_v2, %v3847_v2 }
 0x766   : > { %v3840_v54 = vrot.slane %v3824_v8, %v13982_v49  ;;  %v3906_v46 = vrot.slane %v15342_v26, %v13930_v43  ;;  %v3826_v35 = vcombine.high %v3824_v8, %v3824_v8  ;;  %v3808_v36 = vcombine.high %v15253_v14, %v15253_v14 }
 0x767   : > { %4243 = vrot.lane.b32.xlu0 %v15228_v16, %s13631_s25  ;;  %4195 = vrot.lane.b32.xlu1 %v15228_v16, %s13629_s22  ;;  %v3910_v13 = vrot.slane %v15309_v32, %v13930_v43  ;;  %v15357_v52 = vrot.slane %v3710_v27, %v13982_v49  ;;  %v15369_v28 = vcombine.high %v15309_v32, %v15309_v32 }
 0x768   : > { %v15351_v6 = vrot.slane %v3840_v54, %v13930_v43  ;;  %v15381_v62 = vrot.slane %v3857_v33, %v13930_v43  ;;  %v3856_v9 = vcombine.high %v3840_v54, %v3840_v54  ;;  %v4444_v33 = vld [vmem:[#allocation3 + $0x200] sm:$0xff] }
 0x769   : > { %v15392_v34 = vcombine.high %v15357_v52, %v15357_v52 }
 0x76b   : > { %3973 = vrot.lane.b32.xlu0 %v3866_v21, %s13629_s22  ;;  %3925 = vrot.lane.b32.xlu1 %v3866_v21, %s13630_s23  ;;  %v3922_v39 = vrot.slane %v15392_v34, %v13930_v43 }
 0x76f   : > { %3927 = vrot.lane.b32.xlu0 %v3870_v3, %s13630_s23  ;;  %4021 = vrot.lane.b32.xlu1 %v3866_v21, %s13631_s25  ;;  %v3914_v21 = vrot.slane %v15357_v52, %v13930_v43 }
 0x773   : > { %4023 = vrot.lane.b32.xlu0 %v3870_v3, %s13631_s25  ;;  %3975 = vrot.lane.b32.xlu1 %v3870_v3, %s13629_s22  ;;  %v3918_v3 = vrot.slane %v15369_v28, %v13930_v43 }
 0x777   : > { %4197 = vrot.lane.b32.xlu0 %v15260_v1, %s13629_s22  ;;  %4149 = vrot.lane.b32.xlu1 %v15260_v1, %s13630_s23 }
 0x77b   : > { %4199 = vrot.lane.b32.xlu0 %v15270_v50, %s13629_s22  ;;  %4245 = vrot.lane.b32.xlu1 %v15260_v1, %s13631_s25 }
 0x77f   : > { %4151 = vrot.lane.b32.xlu1 %v15270_v50, %s13630_s23  ;;  %3939 = vrot.lane.b32.xlu0 %v3894_v25, %s13630_s23 }
 0x783   : > { %3987 = vrot.lane.b32.xlu1 %v3894_v25, %s13629_s22  ;;  %4035 = vrot.lane.b32.xlu0 %v3894_v25, %s13631_s25  ;;  %v3854_v25 = vrot.slane %v3826_v35, %v13982_v49  ;;  %v15446_v35 = vcombine.high %v15234_v31, %v15234_v31 }
 0x785   : > { %v15388_v53 = vrot.slane %v3854_v25, %v13930_v43  ;;  %19015 = vst [vmem:[#allocation30_spill] sm:$0xff] %v15446_v35  ;;  %v3874_v63 = vrot.slane %v15446_v35, %v13930_v43 }
 0x787   : > { %4211 = vrot.lane.b32.xlu0 %v15290_v60, %s13629_s22  ;;  %4163 = vrot.lane.b32.xlu1 %v15290_v60, %s13630_s23 }
 0x78b   : > { %3941 = vrot.lane.b32.xlu0 %v3898_v29, %s13630_s23  ;;  %4259 = vrot.lane.b32.xlu1 %v15290_v60, %s13631_s25 }
 0x78f   : > { %4037 = vrot.lane.b32.xlu0 %v3898_v29, %s13631_s25  ;;  %3989 = vrot.lane.b32.xlu1 %v3898_v29, %s13629_s22  ;;  %v3858_v29 = vcombine.high %v3854_v25, %v3854_v25  ;;  %v4445_v25 = vld [vmem:[#allocation3 + $0x208] sm:$0xff] }
 0x791   : > { %v15404_v37 = vrot.slane %v3858_v29, %v13930_v43  ;;  %v12528_v29 = vpack.c.bf16 %v4445_v25, %v4444_v33  ;;  %v4447_v33 = vld [vmem:[#allocation3 + $0x218] sm:$0xff] }
 0x793   : > { %3943 = vrot.lane.b32.xlu0 %v3902_v56, %s13630_s23  ;;  %3991 = vrot.lane.b32.xlu1 %v3902_v56, %s13629_s22 }
 0x794   : > { %12529 = vmatpush3.bf16.msra.mxu0 %v12528_v29  ;;  %v15469_v29 = vrot.slane %v3808_v36, %v13930_v43 }
 0x795   : > { %12530 = vmatprep.subr.bf16.mxu0 %v18975_v51 }
 0x797   : > { %4039 = vrot.lane.b32.xlu0 %v3902_v56, %s13631_s25  ;;  %3995 = vrot.lane.b32.xlu1 %v3910_v13, %s13629_s22 }
 0x79b   : > { %3947 = vrot.lane.b32.xlu0 %v3910_v13, %s13630_s23  ;;  %4165 = vrot.lane.b32.xlu1 %v15321_v20, %s13630_s23 }
 0x79f   : > { %4043 = vrot.lane.b32.xlu0 %v3910_v13, %s13631_s25  ;;  %4261 = vrot.lane.b32.xlu1 %v15321_v20, %s13631_s25  ;;  %v15415_v13 = vrot.slane %v3856_v9, %v13930_v43  ;;  %v3645_v9 = vcombine.high %v15201_v30, %v15201_v30 }
 0x7a1   : > { %v15462_v25 = vrot.slane %v3645_v9, %v13982_v49 }
 0x7a3   : > { %4213 = vrot.lane.b32.xlu0 %v15321_v20, %s13629_s22  ;;  %4167 = vrot.lane.b32.xlu1 %v15333_v19, %s13630_s23  ;;  %v15476_v9 = vrot.slane %v15462_v25, %v13982_v49 }
 0x7a7   : > { %4215 = vrot.lane.b32.xlu0 %v15333_v19, %s13629_s22  ;;  %4263 = vrot.lane.b32.xlu1 %v15333_v19, %s13631_s25 }
 0x7ab   : > { %3945 = vrot.lane.b32.xlu0 %v3906_v46, %s13630_s23  ;;  %4171 = vrot.lane.b32.xlu1 %v15351_v6, %s13630_s23 }
 0x7af   : > { %4041 = vrot.lane.b32.xlu0 %v3906_v46, %s13631_s25  ;;  %4219 = vrot.lane.b32.xlu1 %v15351_v6, %s13629_s22 }
 0x7b3   : > { %3949 = vrot.lane.b32.xlu0 %v3914_v21, %s13630_s23  ;;  %4267 = vrot.lane.b32.xlu1 %v15351_v6, %s13631_s25 }
 0x7b7   : > { %4045 = vrot.lane.b32.xlu0 %v3914_v21, %s13631_s25  ;;  %3993 = vrot.lane.b32.xlu1 %v3906_v46, %s13629_s22 }
 0x7bb   : > { %3951 = vrot.lane.b32.xlu0 %v3918_v3, %s13630_s23  ;;  %3997 = vrot.lane.b32.xlu1 %v3914_v21, %s13629_s22 }
 0x7bf   : > { %4047 = vrot.lane.b32.xlu0 %v3918_v3, %s13631_s25  ;;  %3999 = vrot.lane.b32.xlu1 %v3918_v3, %s13629_s22 }
 0x7c3   : > { %4217 = vrot.lane.b32.xlu0 %v15381_v62, %s13629_s22  ;;  %4169 = vrot.lane.b32.xlu1 %v15381_v62, %s13630_s23 }
 0x7c7   : > { %4265 = vrot.lane.b32.xlu1 %v15381_v62, %s13631_s25  ;;  %4173 = vrot.lane.b32.xlu0 %v15388_v53, %s13630_s23 }
 0x7cb   : > { %4001 = vrot.lane.b32.xlu1 %v3922_v39, %s13629_s22  ;;  %4221 = vrot.lane.b32.xlu0 %v15388_v53, %s13629_s22 }
 0x7cf   : > { %4269 = vrot.lane.b32.xlu0 %v15388_v53, %s13631_s25  ;;  %4177 = vrot.lane.b32.xlu1 %v15404_v37, %s13630_s23 }
 0x7d1   : > { %v15410_v56 = vpop.permute.xlu1 %3971  ;;  %v15412_v2 = vpop.permute.xlu0 %3923 }
 0x7d3   : > { %4175 = vrot.lane.b32.xlu0 %v15415_v13, %s13630_s23  ;;  %4225 = vrot.lane.b32.xlu1 %v15404_v37, %s13629_s22 }
 0x7d5   : > { %v15421_v5 = vpop.permute.xlu0 %4019  ;;  %v15423_v55 = vpop.permute.xlu1 %4147 }
 0x7d7   : > { %4223 = vrot.lane.b32.xlu0 %v15415_v13, %s13629_s22  ;;  %4273 = vrot.lane.b32.xlu1 %v15404_v37, %s13631_s25 }
 0x7d9   : > { %v15429_v8 = vpop.permute.xlu0 %4243  ;;  %v15431_v54 = vpop.permute.xlu1 %4195 }
 0x7db   : > { %4271 = vrot.lane.b32.xlu0 %v15415_v13, %s13631_s25 }
 0x7dd   : > { %v15435_v27 = vpop.permute.xlu0 %3973  ;;  %v15437_v46 = vpop.permute.xlu1 %3925 }
 0x7df   : > { %3953 = vrot.lane.b32.xlu0 %v3922_v39, %s13630_s23 }
 0x7e1   : > { %v15440_v21 = vpop.permute.xlu0 %3927  ;;  %v15442_v3 = vpop.permute.xlu1 %4021 }
 0x7e3   : > { %4049 = vrot.lane.b32.xlu0 %v3922_v39, %s13631_s25  ;;  %v12531_v39 = vpack.c.bf16 %v4447_v33, %v4446_v45  ;;  %v12534_v45 = vpack.c.bf16 %v4449_v0, %v4448_v48  ;;  %v4451_v33 = vld [vmem:[#allocation3 + $0x238] sm:$0xff]  ;;  %v15489_v0 = vrot.slane %v15476_v9, %v13930_v43 }
 0x7e4   : > { %v12537_v36 = vpack.c.bf16 %v4451_v33, %v4450_v41 }
 0x7e5   : > { %v15453_v42 = vpop.permute.xlu0 %4023  ;;  %v15455_v24 = vpop.permute.xlu1 %3975  ;;  %12532 = vmatpush3.bf16.msra.mxu0 %v12531_v39 }
 0x7e6   : > { %12533 = vmatprep.subr.bf16.mxu0 %v18975_v51 }
 0x7e7   : > { %3977 = vrot.lane.b32.xlu0 %v3874_v63, %s13629_s22 }
 0x7e9   : > { %v15464_v30 = vpop.permute.xlu0 %4197  ;;  %v15466_v14 = vpop.permute.xlu1 %4149  ;;  %12535 = vmatpush3.bf16.msra.mxu0 %v12534_v45 }
 0x7ea   : > { %12536 = vmatprep.subr.bf16.mxu0 %v18975_v51 }
 0x7eb   : > { %4153 = vrot.lane.b32.xlu0 %v15469_v29, %s13630_s23 }
 0x7ed   : > { %v15478_v23 = vpop.permute.xlu0 %4199  ;;  %v15480_v38 = vpop.permute.xlu1 %4245  ;;  %12538 = vmatpush3.bf16.msra.mxu0 %v12537_v36 }
 0x7ee   : > { %19016 = vst [vmem:[#allocation31_spill] sm:$0xff] %v15478_v23  ;;  %12539 = vmatprep.subr.bf16.mxu0 %v18975_v51 }
 0x7ef   : > { %4249 = vrot.lane.b32.xlu0 %v15469_v29, %s13631_s25 }
 0x7f1   : > { %v15485_v39 = vpop.permute.xlu1 %4151  ;;  %v3940_v22 = vpop.permute.xlu0 %3939 }
 0x7f2   : > { %v4299_v41 = vsel %vm1808_vm3, %v15267_v58, %v3940_v22 }
 0x7f3   : > { %3931 = vrot.lane.b32.xlu0 %v15489_v0, %s13630_s23 }
 0x7f5   : > { %v3988_v48 = vpop.permute.xlu1 %3987  ;;  %v4036_v45 = vpop.permute.xlu0 %4035 }
 0x7f6   : > { %v4315_v33 = vsel %vm18938_vm4, %v4299_v41, %v3988_v48 }
 0x7f7   : > { %v4331_v10 = vsel %vm18937_vm5, %v4315_v33, %v4036_v45  ;;  %3979 = vrot.lane.b32.xlu0 %v15489_v0, %s13629_s22 }
 0x7f8   : > { %v4347_v36 = vsel %vm18936_vm6, %v4331_v10, %v15290_v60 }
 0x7f9   : > { %v4212_v59 = vpop.permute.xlu0 %4211  ;;  %v4164_v7 = vpop.permute.xlu1 %4163 }
 0x7fa   : > { %v4363_v15 = vsel %vm19017_vm1, %v4347_v36, %v4164_v7 }
 0x7fb   : > { %v4379_v22 = vsel %vm19018_vm0, %v4363_v15, %v4212_v59  ;;  %vm19020_vm0 = vmmov %vm19017_vm1  ;;  %vm19021_vm1 = vcmask 1045504  }
 0x7fc   : > { %vm19022_vm8 = vmmov %vm19020_vm0 }
 0x7fd   : > { %v3942_v18 = vpop.permute.xlu0 %3941  ;;  %v4260_v47 = vpop.permute.xlu1 %4259 }
 0x7fe   : > { %v4395_v58 = vsel %vm19019_vm7, %v4379_v22, %v4260_v47  ;;  %v4300_v15 = vsel %vm1808_vm3, %v15287_v61, %v3942_v18 }
 0x7ff   : > { %4411 = vrot.lane.b32.xlu1 %v4395_v58, %s13631_s25 }
 0x801   : > { %v4038_v41 = vpop.permute.xlu0 %4037  ;;  %v3990_v48 = vpop.permute.xlu1 %3989 }
 0x802   : > { %v4316_v59 = vsel %vm18938_vm4, %v4300_v15, %v3990_v48  ;;  %v4476_v15 = vld [vmem:[#allocation3 + $0x300] sm:$0xff] }
 0x803   : > { %4247 = vrot.lane.b32.xlu1 %v15270_v50, %s13631_s25  ;;  %v4332_v36 = vsel %vm18937_vm5, %v4316_v59, %v4038_v41  ;;  %v3661_v41 = vcombine.high %v15462_v25, %v15462_v25 }
 0x805   : > { %v3944_v45 = vpop.permute.xlu0 %3943  ;;  %v3992_v33 = vpop.permute.xlu1 %3991  ;;  %v15538_v25 = vrot.slane %v3661_v41, %v13982_v49  ;;  %v4480_v41 = vld [vmem:[#allocation3 + $0x320] sm:$0xff] }
 0x806   : > { %v4301_v22 = vsel %vm1808_vm3, %v15304_v40, %v3944_v45  ;;  %v3761_v40 = vcombine.high %v15207_v12, %v15207_v12 }
 0x807   : > { %3929 = vrot.lane.b32.xlu1 %v3874_v63, %s13630_s23  ;;  %v4317_v17 = vsel %vm18938_vm4, %v4301_v22, %v3992_v33 }
 0x808   : > { %v3775_v12 = vrot.slane %v3761_v40, %v13982_v49  ;;  %v4481_v40 = vld [vmem:[#allocation3 + $0x328] sm:$0xff] }
 0x809   : > { %v4040_v10 = vpop.permute.xlu0 %4039  ;;  %v15509_v60 = vpop.permute.xlu1 %3995 }
 0x80a   : > { %v4333_v18 = vsel %vm18937_vm5, %v4317_v17, %v4040_v10 }
 0x80b   : > { %4025 = vrot.lane.b32.xlu1 %v3874_v63, %s13631_s25  ;;  %v4348_v63 = vsel %vm18936_vm6, %v4332_v36, %v15321_v20  ;;  %v4349_v33 = vsel %vm18936_vm6, %v4333_v18, %v15333_v19  ;;  %v4479_v19 = vld [vmem:[#allocation3 + $0x318] sm:$0xff]  ;;  %v15547_v18 = vrot.slane %v3775_v12, %v13982_v49 }
 0x80d   : > { %v15514_v47 = vpop.permute.xlu0 %3947  ;;  %v4166_v7 = vpop.permute.xlu1 %4165 }
 0x80e   : > { %v4364_v61 = vsel %vm19020_vm0, %v4348_v63, %v4166_v7  ;;  %v4477_v7 = vld [vmem:[#allocation3 + $0x308] sm:$0xff]  ;;  %vm19023_vm0 = vmmov %vm19021_vm1 }
 0x80f   : > { %v12576_v59 = vpack.c.bf16 %v4477_v7, %v4476_v15 }
 0x811   : > { %v15520_v58 = vpop.permute.xlu0 %4043  ;;  %v4262_v4 = vpop.permute.xlu1 %4261  ;;  %12577 = vmatpush3.bf16.msra.mxu1 %v12576_v59 }
 0x812   : > { %12578 = vmatprep.subr.bf16.mxu1 %v18975_v51 }
 0x815   : > { %v4214_v35 = vpop.permute.xlu0 %4213  ;;  %v4168_v23 = vpop.permute.xlu1 %4167 }
 0x816   : > { %v4380_v48 = vsel %vm19021_vm1, %v4364_v61, %v4214_v35  ;;  %v4365_v17 = vsel %vm19022_vm8, %v4349_v33, %v4168_v23  ;;  %vm19024_vm1 = vmmov %vm19019_vm7  ;;  %v4478_v23 = vld [vmem:[#allocation3 + $0x310] sm:$0xff]  ;;  %v3882_v61 = vrot.slane %v15538_v25, %v13930_v43  ;;  %v12582_v33 = vpack.c.bf16 %v4481_v40, %v4480_v41 }
 0x817   : > { %v4396_v45 = vsel %vm19019_vm7, %v4380_v48, %v4262_v4  ;;  %v12579_v63 = vpack.c.bf16 %v4479_v19, %v4478_v23  ;;  %vm19025_vm7 = vmmov %vm19023_vm0 }
 0x818   : > { %4413 = vrot.lane.b32.xlu1 %v4396_v45, %s13631_s25 }
 0x819   : > { %v4216_v20 = vpop.permute.xlu0 %4215  ;;  %v4264_v10 = vpop.permute.xlu1 %4263  ;;  %12580 = vmatpush3.bf16.msra.mxu1 %v12579_v63  ;;  %v15579_v63 = vcombine.high %v15476_v9, %v15476_v9 }
 0x81a   : > { %v4381_v35 = vsel %vm19023_vm0, %v4365_v17, %v4216_v20  ;;  %v3777_v17 = vcombine.high %v3775_v12, %v3775_v12  ;;  %v15557_v20 = vrot.slane %v15547_v18, %v13930_v43  ;;  %12581 = vmatprep.subr.bf16.mxu1 %v18975_v51  ;;  %v4303_v12 = vsel %vm1808_vm3, %v15309_v32, %v15514_v47  ;;  %vm19026_vm0 = vmmov %vm19024_vm1 }
 0x81b   : > { %v4397_v4 = vsel %vm19024_vm1, %v4381_v35, %v4264_v10  ;;  %v4482_v10 = vld [vmem:[#allocation3 + $0x330] sm:$0xff]  ;;  %vm19027_vm1 = vmmov %vm19022_vm8 }
 0x81c   : > { %4415 = vrot.lane.b32.xlu0 %v4397_v4, %s13631_s25  ;;  %4201 = vrot.lane.b32.xlu1 %v15469_v29, %s13629_s22  ;;  %v15564_v59 = vrot.slane %v3777_v17, %v13982_v49 }
 0x81d   : > { %v3946_v36 = vpop.permute.xlu0 %3945  ;;  %v4172_v22 = vpop.permute.xlu1 %4171  ;;  %12583 = vmatpush3.bf16.msra.mxu1 %v12582_v33  ;;  %v3886_v33 = vrot.slane %v15579_v63, %v13930_v43 }
 0x81e   : > { %12584 = vmatprep.subr.bf16.mxu1 %v18975_v51  ;;  %v15575_v19 = vrot.slane %v15564_v59, %v13930_v43  ;;  %v4302_v40 = vsel %vm1808_vm3, %v15342_v26, %v3946_v36 }
 0x820   : > { %4027 = vrot.lane.b32.xlu0 %v15489_v0, %s13631_s25  ;;  %3933 = vrot.lane.b32.xlu1 %v3882_v61, %s13630_s23  ;;  %v4483_v0 = vld [vmem:[#allocation3 + $0x338] sm:$0xff] }
 0x821   : > { %v4042_v48 = vpop.permute.xlu0 %4041  ;;  %v4220_v45 = vpop.permute.xlu1 %4219  ;;  %v12585_v35 = vpack.c.bf16 %v4483_v0, %v4482_v10 }
 0x823   : > { %12586 = vmatpush3.bf16.msra.mxu1 %v12585_v35 }
 0x824   : > { %4155 = vrot.lane.b32.xlu0 %v15557_v20, %s13630_s23  ;;  %3981 = vrot.lane.b32.xlu1 %v3882_v61, %s13629_s22 }
 0x825   : > { %v3950_v15 = vpop.permute.xlu0 %3949  ;;  %v4268_v7 = vpop.permute.xlu1 %4267  ;;  %12599 = vmatprep.subr.bf16.mxu1 %v18975_v51 }
 0x828   : > { %4203 = vrot.lane.b32.xlu0 %v15557_v20, %s13629_s22  ;;  %4029 = vrot.lane.b32.xlu1 %v3882_v61, %s13631_s25  ;;  %v4319_v61 = vsel %vm18938_vm4, %v4303_v12, %v15509_v60 }
 0x829   : > { %v4046_v4 = vpop.permute.xlu0 %4045  ;;  %v3994_v23 = vpop.permute.xlu1 %3993  ;;  %v4335_v32 = vsel %vm18937_vm5, %v4319_v61, %v15520_v58 }
 0x82a   : > { %v4318_v17 = vsel %vm18938_vm4, %v4302_v40, %v3994_v23  ;;  %v4351_v60 = vsel %vm18936_vm6, %v4335_v32, %v15351_v6  ;;  %v3807_v32 = vcombine.high %v15547_v18, %v15547_v18 }
 0x82b   : > { %v4367_v58 = vsel %vm19022_vm8, %v4351_v60, %v4172_v22  ;;  %v4334_v26 = vsel %vm18937_vm5, %v4318_v17, %v4042_v48  ;;  %vm19028_vm8 = vmmov %vm19025_vm7 }
 0x82c   : > { %4251 = vrot.lane.b32.xlu0 %v15557_v20, %s13631_s25  ;;  %4157 = vrot.lane.b32.xlu1 %v15575_v19, %s13630_s23  ;;  %v4383_v35 = vsel %vm19025_vm7, %v4367_v58, %v4220_v45  ;;  %v4350_v12 = vsel %vm18936_vm6, %v4334_v26, %v15381_v62  ;;  %vm19029_vm7 = vmmov %vm19026_vm0  ;;  %v15624_v60 = vrot.slane %v3807_v32, %v13930_v43 }
 0x82d   : > { %v3952_v47 = vpop.permute.xlu0 %3951  ;;  %v3998_v41 = vpop.permute.xlu1 %3997  ;;  %v4399_v36 = vsel %vm19026_vm0, %v4383_v35, %v4268_v7  ;;  %v15614_v7 = vcombine.high %v15538_v25, %v15538_v25  ;;  %v4304_v58 = vsel %vm1808_vm3, %v15357_v52, %v3950_v15  ;;  %vm19030_vm0 = vmmov %vm19027_vm1 }
 0x82e   : > { %v4320_v18 = vsel %vm18938_vm4, %v4304_v58, %v3998_v41 }
 0x82f   : > { %v3890_v17 = vrot.slane %v15614_v7, %v13930_v43  ;;  %v4336_v26 = vsel %vm18937_vm5, %v4320_v18, %v4046_v4 }
 0x830   : > { %3935 = vrot.lane.b32.xlu0 %v3886_v33, %s13630_s23  ;;  %4205 = vrot.lane.b32.xlu1 %v15575_v19, %s13629_s22  ;;  %v4352_v52 = vsel %vm18936_vm6, %v4336_v26, %v15388_v53  ;;  %v4291_v26 = vsel %vm1808_vm3, %v15212_v11, %v15412_v2 }
 0x831   : > { %v4048_v10 = vpop.permute.xlu0 %4047  ;;  %v4000_v0 = vpop.permute.xlu1 %3999 }
 0x834   : > { %4419 = vrot.lane.b32.xlu0 %v4399_v36, %s13631_s25  ;;  %4253 = vrot.lane.b32.xlu1 %v15575_v19, %s13631_s25 }
 0x835   : > { %v4218_v6 = vpop.permute.xlu0 %4217  ;;  %v4170_v23 = vpop.permute.xlu1 %4169 }
 0x836   : > { %v4366_v22 = vsel %vm19027_vm1, %v4350_v12, %v4170_v23  ;;  %vm19031_vm1 = vmmov %vm19028_vm8 }
 0x837   : > { %v4382_v45 = vsel %vm19028_vm8, %v4366_v22, %v4218_v6  ;;  %vm19032_vm8 = vmmov %vm19029_vm7 }
 0x838   : > { %3983 = vrot.lane.b32.xlu0 %v3886_v33, %s13629_s22 }
 0x839   : > { %v4266_v61 = vpop.permute.xlu1 %4265  ;;  %v4174_v48 = vpop.permute.xlu0 %4173 }
 0x83a   : > { %v4398_v40 = vsel %vm19029_vm7, %v4382_v45, %v4266_v61  ;;  %v4368_v12 = vsel %vm19030_vm0, %v4352_v52, %v4174_v48  ;;  %vm19033_vm7 = vmmov %vm19030_vm0 }
 0x83b   : > { %4417 = vrot.lane.b32.xlu1 %v4398_v40, %s13631_s25  ;;  %vm19034_vm0 = vmmov %vm19031_vm1 }
 0x83c   : > { %4031 = vrot.lane.b32.xlu0 %v3886_v33, %s13631_s25  ;;  %v4305_v33 = vsel %vm1808_vm3, %v15369_v28, %v3952_v47  ;;  %v3809_v47 = vcombine.high %v15564_v59, %v15564_v59 }
 0x83d   : > { %v4222_v62 = vpop.permute.xlu0 %4221  ;;  %v4321_v36 = vsel %vm18938_vm4, %v4305_v33, %v4000_v0  ;;  %v4002_v15 = vpop.permute.xlu1 %4001 }
 0x83e   : > { %v4337_v41 = vsel %vm18937_vm5, %v4321_v36, %v4048_v10  ;;  %v4384_v28 = vsel %vm19031_vm1, %v4368_v12, %v4222_v62  ;;  %v15656_v61 = vrot.slane %v3809_v47, %v13930_v43  ;;  %vm19035_vm1 = vmmov %vm19032_vm8  ;;  %v4307_v36 = vsel %vm18938_vm4, %v4291_v26, %v15410_v56  ;;  %v4454_v56 = vld [vmem:[#allocation3 + $0x250] sm:$0xff]  ;;  %v4463_v26 = vld [vmem:[#allocation3 + $0x298] sm:$0xff] }
 0x83f   : > { %3937 = vrot.lane.b32.xlu1 %v3890_v17, %s13630_s23  ;;  %v4353_v53 = vsel %vm18936_vm6, %v4337_v41, %v15415_v13  ;;  %v4453_v41 = vld [vmem:[#allocation3 + $0x248] sm:$0xff] }
 0x840   : > { %4159 = vrot.lane.b32.xlu0 %v15624_v60, %s13630_s23 }
 0x841   : > { %v4270_v35 = vpop.permute.xlu0 %4269  ;;  %v4178_v23 = vpop.permute.xlu1 %4177 }
 0x842   : > { %v4400_v0 = vsel %vm19032_vm8, %v4384_v28, %v4270_v35  ;;  %vm19036_vm8 = vmmov %vm19033_vm7 }
 0x843   : > { %3985 = vrot.lane.b32.xlu1 %v3890_v17, %s13629_s22 }
 0x844   : > { %4207 = vrot.lane.b32.xlu0 %v15624_v60, %s13629_s22 }
 0x845   : > { %v4176_v6 = vpop.permute.xlu0 %4175  ;;  %v4226_v32 = vpop.permute.xlu1 %4225 }
 0x846   : > { %v4369_v10 = vsel %vm19033_vm7, %v4353_v53, %v4176_v6  ;;  %vm19037_vm7 = vmmov %vm19034_vm0  ;;  %v4458_v53 = vld [vmem:[#allocation3 + $0x270] sm:$0xff] }
 0x847   : > { %4033 = vrot.lane.b32.xlu1 %v3890_v17, %s13631_s25 }
 0x848   : > { %4255 = vrot.lane.b32.xlu0 %v15624_v60, %s13631_s25 }
 0x849   : > { %v4224_v4 = vpop.permute.xlu0 %4223  ;;  %v4274_v35 = vpop.permute.xlu1 %4273 }
 0x84a   : > { %v4385_v22 = vsel %vm19034_vm0, %v4369_v10, %v4224_v4  ;;  %vm19038_vm0 = vmmov %vm19035_vm1  ;;  %v4455_v4 = vld [vmem:[#allocation3 + $0x258] sm:$0xff] }
 0x84b   : > { %4421 = vrot.lane.b32.xlu1 %v4400_v0, %s13631_s25  ;;  %v4459_v10 = vld [vmem:[#allocation3 + $0x278] sm:$0xff] }
 0x84d   : > { %v4272_v45 = vpop.permute.xlu0 %4271 }
 0x84e   : > { %v4401_v48 = vsel %vm19035_vm1, %v4385_v22, %v4272_v45  ;;  %vm19039_vm1 = vmmov %vm19036_vm8  ;;  %v12549_v22 = vpack.c.bf16 %v4459_v10, %v4458_v53  ;;  %v4292_v45 = vsel %vm1808_vm3, %v15234_v31, %v15437_v46  ;;  %v4471_v10 = vld [vmem:[#allocation3 + $0x2d8] sm:$0xff] }
 0x84f   : > { %4423 = vrot.lane.b32.xlu0 %v4401_v48, %s13631_s25  ;;  %4161 = vrot.lane.b32.xlu1 %v15656_v61, %s13630_s23 }
 0x851   : > { %v3954_v59 = vpop.permute.xlu0 %3953 }
 0x852   : > { %v4306_v13 = vsel %vm1808_vm3, %v15392_v34, %v3954_v59 }
 0x853   : > { %4209 = vrot.lane.b32.xlu1 %v15656_v61, %s13629_s22  ;;  %v4322_v40 = vsel %vm18938_vm4, %v4306_v13, %v4002_v15  ;;  %v4452_v15 = vld [vmem:[#allocation3 + $0x240] sm:$0xff]  ;;  %v4308_v13 = vsel %vm18938_vm4, %v4292_v45, %v15435_v27 }
 0x854   : > { %v12540_v28 = vpack.c.bf16 %v4453_v41, %v4452_v15 }
 0x855   : > { %v4050_v62 = vpop.permute.xlu0 %4049 }
 0x856   : > { %v4338_v17 = vsel %vm18937_vm5, %v4322_v40, %v4050_v62 }
 0x857   : > { %v4354_v58 = vsel %vm18936_vm6, %v4338_v17, %v15404_v37  ;;  %4257 = vrot.lane.b32.xlu1 %v15656_v61, %s13631_s25  ;;  %v4323_v37 = vsel %vm18937_vm5, %v4307_v36, %v15421_v5  ;;  %v4460_v17 = vld [vmem:[#allocation3 + $0x280] sm:$0xff] }
 0x858   : > { %v4370_v18 = vsel %vm19036_vm8, %v4354_v58, %v4178_v23  ;;  %v4339_v6 = vsel %vm18936_vm6, %v4323_v37, %v15228_v16  ;;  %vm19040_vm8 = vmmov %vm19037_vm7  ;;  %v12543_v16 = vpack.c.bf16 %v4455_v4, %v4454_v56  ;;  %v4461_v58 = vld [vmem:[#allocation3 + $0x288] sm:$0xff] }
 0x859   : > { %v4386_v34 = vsel %vm19037_vm7, %v4370_v18, %v4226_v32  ;;  %v4355_v52 = vsel %vm19039_vm1, %v4339_v6, %v15423_v55  ;;  %vm19041_vm7 = vmmov %vm19038_vm0  ;;  %v15691_v47 = vpop.permute.xlu0 %3977  ;;  %v4456_v55 = vld [vmem:[#allocation3 + $0x260] sm:$0xff]  ;;  %v4324_v32 = vsel %vm18937_vm5, %v4308_v13, %v15442_v3  ;;  %v12552_v27 = vpack.c.bf16 %v4461_v58, %v4460_v17  ;;  %v4465_v6 = vld [vmem:[#allocation3 + $0x2a8] sm:$0xff] }
 0x85a   : > { %v4402_v33 = vsel %vm19038_vm0, %v4386_v34, %v4274_v35  ;;  %v4371_v12 = vsel %vm19040_vm8, %v4355_v52, %v15431_v54  ;;  %v4457_v54 = vld [vmem:[#allocation3 + $0x268] sm:$0xff]  ;;  %v4340_v62 = vsel %vm18936_vm6, %v4324_v32, %v15260_v1  ;;  %vm19042_vm0 = vmmov %vm19039_vm1  ;;  %v19049_v58 = vld [vmem:[#allocation30_spill] sm:$0xff] }
 0x85b   : > { %4425 = vrot.lane.b32.xlu1 %v4402_v33, %s13631_s25  ;;  %v4387_v11 = vsel %vm19041_vm7, %v4371_v12, %v15429_v8  ;;  %v12546_v8 = vpack.c.bf16 %v4457_v54, %v4456_v55  ;;  %v4356_v31 = vsel %vm19042_vm0, %v4340_v62, %v15466_v14  ;;  %vm19043_vm1 = vmmov %vm19040_vm8  ;;  %v4462_v33 = vld [vmem:[#allocation3 + $0x290] sm:$0xff]  ;;  %v4472_v62 = vld [vmem:[#allocation3 + $0x2e0] sm:$0xff] }
 0x85c   : > { %v4372_v18 = vsel %vm19043_vm1, %v4356_v31, %v15464_v30  ;;  %vm19044_vm8 = vmmov %vm19041_vm7  ;;  %v12555_v14 = vpack.c.bf16 %v4463_v26, %v4462_v33  ;;  %v4293_v30 = vsel %vm1808_vm3, %v15242_v57, %v15440_v21  ;;  %v4466_v57 = vld [vmem:[#allocation3 + $0x2b0] sm:$0xff]  ;;  %v4467_v21 = vld [vmem:[#allocation3 + $0x2b8] sm:$0xff] }
 0x85d   : > { %v15698_v0 = vpop.permute.xlu0 %4153  ;;  %v4388_v35 = vsel %vm19044_vm8, %v4372_v18, %v15480_v38  ;;  %v4464_v38 = vld [vmem:[#allocation3 + $0x2a0] sm:$0xff]  ;;  %v4309_v52 = vsel %vm18938_vm4, %v4293_v30, %v15455_v24  ;;  %vm19045_vm7 = vmmov %vm19042_vm0  ;;  %v4473_v31 = vld [vmem:[#allocation3 + $0x2e8] sm:$0xff] }
 0x85e   : > { %v12558_v15 = vpack.c.bf16 %v4465_v6, %v4464_v38  ;;  %v4325_v41 = vsel %vm18937_vm5, %v4309_v52, %v15453_v42  ;;  %v4468_v42 = vld [vmem:[#allocation3 + $0x2c0] sm:$0xff]  ;;  %vm19047_vm0 = vmmov %vm19043_vm1  ;;  %v4475_v33 = vld [vmem:[#allocation3 + $0x2f8] sm:$0xff] }
 0x85f   : > { %vm19048_vm1 = vmmov %vm19044_vm8  ;;  %v4492_v26 = vld [vmem:[#allocation3 + $0x380] sm:$0xff] }
 0x860   : > { %vm19050_vm8 = vmmov %vm19045_vm7 }
 0x861   : > { %v15705_v48 = vpop.permute.xlu0 %4249 }
 0x865   : > { %v3932_v40 = vpop.permute.xlu0 %3931 }
 0x866   : > { %v4295_v13 = vsel %vm1808_vm3, %v15476_v9, %v3932_v40 }
 0x869   : > { %v3980_v34 = vpop.permute.xlu0 %3979 }
 0x86a   : > { %v4311_v17 = vsel %vm18938_vm4, %v4295_v13, %v3980_v34  ;;  %v4489_v13 = vld [vmem:[#allocation3 + $0x368] sm:$0xff] }
 0x871   : > { %v4412_v2 = vpop.permute.xlu1 %4411 }
 0x872   : > { %v4435_v5 = vsel %vm1959_vm10, %v4387_v11, %v4412_v2  ;;  %v4341_v11 = vsel %vm18936_vm6, %v4325_v41, %v15270_v50  ;;  %v12561_v2 = vpack.c.bf16 %v4467_v21, %v4466_v57  ;;  %v4495_v41 = vld [vmem:[#allocation3 + $0x398] sm:$0xff]  ;;  %v4484_v21 = vld [vmem:[#allocation3 + $0x340] sm:$0xff] }
 0x873   : > { %11883 = vmatmul.mubr.msk.f32.vlgmr.msra.gmra.mrb[20].mxu0 %vm2032_vm11, %v4435_v5  ;;  %v4357_v24 = vsel %vm19045_vm7, %v4341_v11, %v15485_v39  ;;  %v4469_v5 = vld [vmem:[#allocation3 + $0x2c8] sm:$0xff]  ;;  %v4470_v39 = vld [vmem:[#allocation3 + $0x2d0] sm:$0xff]  ;;  %vm19051_vm7 = vmmov %vm19047_vm0 }
 0x874   : > { %12541 = vmatpush3.bf16.msra.mxu0 %v12540_v28  ;;  %11901 = vmatprep.mubr.msk.f32.mxu0 %vm13632_vm2, %v18977_v44  ;;  %v12564_v54 = vpack.c.bf16 %v4469_v5, %v4468_v42  ;;  %v12567_v45 = vpack.c.bf16 %v4471_v10, %v4470_v39  ;;  %v4485_v11 = vld [vmem:[#allocation3 + $0x348] sm:$0xff]  ;;  %v4498_v39 = vld [vmem:[#allocation3 + $0x3b0] sm:$0xff]  ;;  %v4499_v10 = vld [vmem:[#allocation3 + $0x3b8] sm:$0xff] }
 0x875   : > { %12542 = vmatprep.subr.bf16.mxu0 %v18975_v51  ;;  %v4248_v23 = vpop.permute.xlu1 %4247  ;;  %v4497_v42 = vld [vmem:[#allocation3 + $0x3a8] sm:$0xff] }
 0x878   : > { %12544 = vmatpush3.bf16.msra.mxu0 %v12543_v16  ;;  %v19046_v16 = vld [vmem:[#allocation31_spill] sm:$0xff] }
 0x879   : > { %12545 = vmatprep.subr.bf16.mxu0 %v18975_v51  ;;  %v15707_v59 = vpop.permute.xlu1 %3929  ;;  %v4373_v55 = vsel %vm19047_vm0, %v4357_v24, %v19046_v16  ;;  %vm19052_vm0 = vmmov %vm19048_vm1 }
 0x87a   : > { %v4294_v18 = vsel %vm1808_vm3, %v19049_v58, %v15707_v59 }
 0x87b   : > { %v4310_v9 = vsel %vm18938_vm4, %v4294_v18, %v15691_v47  ;;  %v4490_v18 = vld [vmem:[#allocation3 + $0x370] sm:$0xff] }
 0x87c   : > { %12547 = vmatpush3.bf16.msra.mxu0 %v12546_v8  ;;  %v4389_v8 = vsel %vm19048_vm1, %v4373_v55, %v4248_v23  ;;  %vm19053_vm1 = vmmov %vm19050_vm8  ;;  %v4486_v55 = vld [vmem:[#allocation3 + $0x350] sm:$0xff] }
 0x87d   : > { %12548 = vmatprep.subr.bf16.mxu0 %v18975_v51  ;;  %v15718_v46 = vpop.permute.xlu1 %4025 }
 0x87e   : > { %v4326_v34 = vsel %vm18937_vm5, %v4310_v9, %v15718_v46  ;;  %v4494_v46 = vld [vmem:[#allocation3 + $0x390] sm:$0xff] }
 0x87f   : > { %v4342_v6 = vsel %vm18936_vm6, %v4326_v34, %v15469_v29  ;;  %v12603_v29 = vpack.c.bf16 %v4495_v41, %v4494_v46 }
 0x880   : > { %12550 = vmatpush3.bf16.msra.mxu0 %v12549_v22 }
 0x881   : > { %12551 = vmatprep.subr.bf16.mxu0 %v18975_v51 }
 0x88a   : > { %v4414_v3 = vpop.permute.xlu1 %4413 }
 0x88b   : > { %v4436_v1 = vsel %vm1959_vm10, %v4388_v35, %v4414_v3  ;;  %v12570_v35 = vpack.c.bf16 %v4473_v31, %v4472_v62  ;;  %v4474_v3 = vld [vmem:[#allocation3 + $0x2f0] sm:$0xff] }
 0x88c   : > { %11902 = vmatmul.mubr.msk.f32.vlgmr.msra.gmra.mrb[22].mxu0 %vm2032_vm11, %v4436_v1  ;;  %v4493_v1 = vld [vmem:[#allocation3 + $0x388] sm:$0xff]  ;;  %v12573_v47 = vpack.c.bf16 %v4475_v33, %v4474_v3 }
 0x88d   : > { %12553 = vmatpush3.bf16.msra.mxu0 %v12552_v27  ;;  %11920 = vmatprep.mubr.msk.f32.mxu0 %vm13632_vm2, %v18977_v44  ;;  %v12600_v38 = vpack.c.bf16 %v4493_v1, %v4492_v26  ;;  %v4501_v1 = vld [vmem:[#allocation3 + $0x3c8] sm:$0xff] }
 0x88e   : > { %v4416_v36 = vpop.permute.xlu0 %4415  ;;  %v15731_v37 = vpop.permute.xlu1 %4201  ;;  %12554 = vmatprep.subr.bf16.mxu0 %v18975_v51 }
 0x88f   : > { %v4437_v22 = vsel %vm1959_vm10, %v4389_v8, %v4416_v36 }
 0x891   : > { %12556 = vmatpush3.bf16.msra.mxu0 %v12555_v14 }
 0x892   : > { %v4028_v12 = vpop.permute.xlu0 %4027  ;;  %v15738_v28 = vpop.permute.xlu1 %3933  ;;  %12557 = vmatprep.subr.bf16.mxu0 %v18975_v51 }
 0x893   : > { %v4327_v27 = vsel %vm18937_vm5, %v4311_v17, %v4028_v12  ;;  %v4358_v12 = vsel %vm19053_vm1, %v4342_v6, %v15698_v0  ;;  %v12588_v0 = vpack.c.bf16 %v4485_v11, %v4484_v21  ;;  %v4296_v17 = vsel %vm1808_vm3, %v15538_v25, %v15738_v28  ;;  %v4500_v28 = vld [vmem:[#allocation3 + $0x3c0] sm:$0xff] }
 0x894   : > { %v4343_v59 = vsel %vm18936_vm6, %v4327_v27, %v15557_v20  ;;  %v4491_v27 = vld [vmem:[#allocation3 + $0x378] sm:$0xff] }
 0x895   : > { %12559 = vmatpush3.bf16.msra.mxu0 %v12558_v15  ;;  %v12597_v33 = vpack.c.bf16 %v4491_v27, %v4490_v18 }
 0x896   : > { %v4156_v56 = vpop.permute.xlu0 %4155  ;;  %v15745_v4 = vpop.permute.xlu1 %3981  ;;  %12560 = vmatprep.subr.bf16.mxu0 %v18975_v51 }
 0x897   : > { %v4359_v30 = vsel %vm19050_vm8, %v4343_v59, %v4156_v56  ;;  %vm19054_vm8 = vmmov %vm19051_vm7  ;;  %v4496_v56 = vld [vmem:[#allocation3 + $0x3a0] sm:$0xff] }
 0x898   : > { %v12606_v8 = vpack.c.bf16 %v4497_v42, %v4496_v56 }
 0x899   : > { %12562 = vmatpush3.bf16.msra.mxu0 %v12561_v2  ;;  %v4374_v2 = vsel %vm19054_vm8, %v4358_v12, %v15731_v37  ;;  %v4505_v12 = vld [vmem:[#allocation3 + $0x3e8] sm:$0xff] }
 0x89a   : > { %v4204_v50 = vpop.permute.xlu0 %4203  ;;  %v15751_v53 = vpop.permute.xlu1 %4029  ;;  %12563 = vmatprep.subr.bf16.mxu0 %v18975_v51 }
 0x89b   : > { %v4375_v36 = vsel %vm19051_vm7, %v4359_v30, %v4204_v50  ;;  %vm19055_vm7 = vmmov %vm19052_vm0 }
 0x89c   : > { %11921 = vmatmul.mubr.msk.f32.vlgmr.msra.gmra.mrb[24].mxu0 %vm2032_vm11, %v4437_v22  ;;  %v4390_v5 = vsel %vm19055_vm7, %v4374_v2, %v15705_v48  ;;  %v4506_v2 = vld [vmem:[#allocation3 + $0x3f0] sm:$0xff] }
 0x89d   : > { %12565 = vmatpush3.bf16.msra.mxu0 %v12564_v54  ;;  %11939 = vmatprep.mubr.msk.f32.mxu0 %vm13632_vm2, %v18977_v44  ;;  %v4487_v54 = vld [vmem:[#allocation3 + $0x358] sm:$0xff] }
 0x89e   : > { %v4252_v23 = vpop.permute.xlu0 %4251  ;;  %v15760_v32 = vpop.permute.xlu1 %4157  ;;  %12566 = vmatprep.subr.bf16.mxu0 %v18975_v51  ;;  %v12591_v22 = vpack.c.bf16 %v4487_v54, %v4486_v55 }
 0x89f   : > { %v4391_v52 = vsel %vm19052_vm0, %v4375_v36, %v4252_v23  ;;  %v12609_v23 = vpack.c.bf16 %v4499_v10, %v4498_v39  ;;  %vm19056_vm0 = vmmov %vm19053_vm1 }
 0x8a0   : > { %vm19057_vm1 = vmmov %vm19054_vm8 }
 0x8a1   : > { %12568 = vmatpush3.bf16.msra.mxu0 %v12567_v45  ;;  %v4488_v45 = vld [vmem:[#allocation3 + $0x360] sm:$0xff]  ;;  %vm19058_vm8 = vmmov %vm19055_vm7 }
 0x8a2   : > { %v15770_v40 = vpop.permute.xlu0 %3935  ;;  %12569 = vmatprep.subr.bf16.mxu0 %v18975_v51  ;;  %v15777_v14 = vpop.permute.xlu1 %4205  ;;  %v12594_v31 = vpack.c.bf16 %v4489_v13, %v4488_v45  ;;  %vm19059_vm7 = vmmov %vm19056_vm0 }
 0x8a3   : > { %v4297_v26 = vsel %vm1808_vm3, %v15579_v63, %v15770_v40  ;;  %v12612_v63 = vpack.c.bf16 %v4501_v1, %v4500_v28 }
 0x8a5   : > { %12571 = vmatpush3.bf16.msra.mxu0 %v12570_v35  ;;  %v4312_v35 = vsel %vm18938_vm4, %v4296_v17, %v15745_v4 }
 0x8a6   : > { %v4420_v15 = vpop.permute.xlu0 %4419  ;;  %12572 = vmatprep.subr.bf16.mxu0 %v18975_v51  ;;  %v15789_v57 = vpop.permute.xlu1 %4253  ;;  %v4328_v3 = vsel %vm18937_vm5, %v4312_v35, %v15751_v53 }
 0x8a7   : > { %v4439_v20 = vsel %vm1959_vm10, %v4391_v52, %v4420_v15  ;;  %v4344_v34 = vsel %vm18936_vm6, %v4328_v3, %v15575_v19  ;;  %v4502_v19 = vld [vmem:[#allocation3 + $0x3d0] sm:$0xff] }
 0x8a8   : > { %11959 = vmatmul.mubr.msk.f32.vlgmr.msra.gmra.mrb[58].mxu1 %vm2032_vm11, %v4439_v20  ;;  %v4360_v53 = vsel %vm19056_vm0, %v4344_v34, %v15760_v32  ;;  %vm19060_vm0 = vmmov %vm19057_vm1 }
 0x8a9   : > { %12574 = vmatpush3.bf16.msra.mxu0 %v12573_v47  ;;  %12601 = vmatpush3.bf16.msra.mxu1 %v12600_v38  ;;  %v4376_v30 = vsel %vm19057_vm1, %v4360_v53, %v15777_v14  ;;  %v4503_v38 = vld [vmem:[#allocation3 + $0x3d8] sm:$0xff]  ;;  %vm19061_vm1 = vmmov %vm19058_vm8 }
 0x8aa   : > { %v3984_v24 = vpop.permute.xlu0 %3983  ;;  %12587 = vmatprep.subr.bf16.mxu0 %v18975_v51  ;;  %12602 = vmatprep.subr.bf16.mxu1 %v18975_v51  ;;  %v4392_v40 = vsel %vm19058_vm8, %v4376_v30, %v15789_v57  ;;  %v12615_v15 = vpack.c.bf16 %v4503_v38, %v4502_v19  ;;  %vm19062_vm8 = vmmov %vm19059_vm7 }
 0x8ab   : > { %11996 = vmatprep.mubr.msk.f32.mxu1 %vm13632_vm2, %v18977_v44  ;;  %v4313_v4 = vsel %vm18938_vm4, %v4297_v26, %v3984_v24  ;;  %v4507_v24 = vld [vmem:[#allocation3 + $0x3f8] sm:$0xff] }
 0x8ad   : > { %v4418_v16 = vpop.permute.xlu1 %4417  ;;  %12604 = vmatpush3.bf16.msra.mxu1 %v12603_v29 }
 0x8ae   : > { %v4438_v37 = vsel %vm1959_vm10, %v4390_v5, %v4418_v16  ;;  %v4032_v50 = vpop.permute.xlu0 %4031  ;;  %12605 = vmatprep.subr.bf16.mxu1 %v18975_v51 }
 0x8af   : > { %11940 = vmatmul.mubr.msk.f32.vlgmr.msra.gmra.mrb[26].mxu0 %vm2032_vm11, %v4438_v37  ;;  %v4329_v59 = vsel %vm18937_vm5, %v4313_v4, %v4032_v50 }
 0x8b0   : > { %12589 = vmatpush3.bf16.msra.mxu0 %v12588_v0  ;;  %11977 = vmatprep.mubr.msk.f32.mxu0 %vm13632_vm2, %v18977_v44  ;;  %v4345_v6 = vsel %vm18936_vm6, %v4329_v59, %v15624_v60  ;;  %v4504_v60 = vld [vmem:[#allocation3 + $0x3e0] sm:$0xff]  ;;  %v12621_v0 = vpack.c.bf16 %v4507_v24, %v4506_v2 }
 0x8b1   : > { %v3938_v48 = vpop.permute.xlu1 %3937  ;;  %12590 = vmatprep.subr.bf16.mxu0 %v18975_v51  ;;  %12607 = vmatpush3.bf16.msra.mxu1 %v12606_v8  ;;  %v12618_v21 = vpack.c.bf16 %v4505_v12, %v4504_v60 }
 0x8b2   : > { %v4160_v62 = vpop.permute.xlu0 %4159  ;;  %12608 = vmatprep.subr.bf16.mxu1 %v18975_v51  ;;  %v4298_v11 = vsel %vm1808_vm3, %v15614_v7, %v3938_v48 }
 0x8b3   : > { %v4361_v52 = vsel %vm19059_vm7, %v4345_v6, %v4160_v62  ;;  %vm19063_vm7 = vmmov %vm19060_vm0 }
 0x8b4   : > { %12592 = vmatpush3.bf16.msra.mxu0 %v12591_v22 }
 0x8b5   : > { %v3986_v58 = vpop.permute.xlu1 %3985  ;;  %12593 = vmatprep.subr.bf16.mxu0 %v18975_v51  ;;  %12610 = vmatpush3.bf16.msra.mxu1 %v12609_v23 }
 0x8b6   : > { %v4208_v9 = vpop.permute.xlu0 %4207  ;;  %v4314_v56 = vsel %vm18938_vm4, %v4298_v11, %v3986_v58 }
 0x8b7   : > { %v4377_v14 = vsel %vm19060_vm0, %v4361_v52, %v4208_v9  ;;  %vm19064_vm0 = vmmov %vm19061_vm1 }
 0x8b8   : > { %12595 = vmatpush3.bf16.msra.mxu0 %v12594_v31 }
 0x8b9   : > { %v4034_v25 = vpop.permute.xlu1 %4033  ;;  %12596 = vmatprep.subr.bf16.mxu0 %v18975_v51 }
 0x8ba   : > { %v4256_v36 = vpop.permute.xlu0 %4255  ;;  %v4330_v42 = vsel %vm18937_vm5, %v4314_v56, %v4034_v25 }
 0x8bb   : > { %v4393_v46 = vsel %vm19061_vm1, %v4377_v14, %v4256_v36  ;;  %v4346_v16 = vsel %vm18936_vm6, %v4330_v42, %v15656_v61  ;;  %vm19065_vm1 = vcmask 1046534  }
 0x8bc   : > { %12598 = vmatpush3.bf16.msra.mxu0 %v12597_v33 }
 0x8bd   : > { %v4422_v47 = vpop.permute.xlu1 %4421  ;;  %12611 = vmatprep.subr.bf16.mxu0 %v18975_v51 }
 0x8be   : > { %v4440_v32 = vsel %vm1959_vm10, %v4392_v40, %v4422_v47 }
 0x8bf   : > { %11978 = vmatmul.mubr.msk.f32.vlgmr.msra.gmra.mrb[28].mxu0 %vm2032_vm11, %v4440_v32 }
 0x8c0   : > { %12613 = vmatpush3.bf16.msra.mxu0 %v12612_v63  ;;  %12015 = vmatprep.mubr.msk.f32.mxu0 %vm13632_vm2, %v18977_v44 }
 0x8c1   : > { %v4424_v41 = vpop.permute.xlu0 %4423  ;;  %v4162_v20 = vpop.permute.xlu1 %4161  ;;  %12614 = vmatprep.subr.bf16.mxu0 %v18975_v51 }
 0x8c2   : > { %v4441_v57 = vsel %vm1959_vm10, %v4393_v46, %v4424_v41  ;;  %v4362_v55 = vsel %vm19062_vm8, %v4346_v16, %v4162_v20  ;;  %vm19066_vm8 = vmmov %vm19065_vm1 }
 0x8c3   : > { %11997 = vmatmul.mubr.msk.f32.vlgmr.msra.gmra.mrb[80].mxu1 %vm2032_vm11, %v4441_v57 }
 0x8c4   : > { %12616 = vmatpush3.bf16.msra.mxu0 %v12615_v15  ;;  %5456 = vmatprep.mubr.f32.mxu1 %v18977_v44 }
 0x8c5   : > { %v4210_v29 = vpop.permute.xlu1 %4209  ;;  %12617 = vmatprep.subr.bf16.mxu0 %v18975_v51 }
 0x8c6   : > { %v4378_v7 = vsel %vm19063_vm7, %v4362_v55, %v4210_v29  ;;  %vm19067_vm7 = vmmov %vm19065_vm1 }
 0x8c8   : > { %12619 = vmatpush3.bf16.msra.mxu0 %v12618_v21 }
 0x8c9   : > { %v4258_v5 = vpop.permute.xlu1 %4257  ;;  %12620 = vmatprep.subr.bf16.mxu0 %v18975_v51 }
 0x8ca   : > { %v4394_v54 = vsel %vm19064_vm0, %v4378_v7, %v4258_v5  ;;  %vm19068_vm0 = vmmov %vm19065_vm1 }
 0x8cb   : > { %vm19069_vm6 = vmmov %vm19068_vm0 }
 0x8cc   : > { %12622 = vmatpush3.bf16.msra.mxu0 %v12621_v0  ;;  %vm19070_vm5 = vmmov %vm19068_vm0 }
 0x8cd   : > { %v4426_v8 = vpop.permute.xlu1 %4425  ;;  %vm19071_vm4 = vmmov %vm19068_vm0 }
 0x8ce   : > { %v4442_v37 = vsel %vm1959_vm10, %v4394_v54, %v4426_v8 }
 0x8cf   : > { %12016 = vmatmul.mubr.msk.f32.vlgmr.msra.gmra.mrb[30].mxu0 %vm2032_vm11, %v4442_v37 }
 0x946   : > { %v4577_v50 = vpop.f32.mrb[20].mxu0 }
 0x947   : > { %v11884_v39 = vpop.f32.mrb[21].mxu0  ;;  %v5146_v10 = vrot.slane %v4577_v50, 1  ;;  %v5180_v22 = vrot.slane %v4577_v50, 2  ;;  %v5214_v48 = vrot.slane %v4577_v50, 3  ;;  %v5248_v45 = vrot.slane %v4577_v50, 4 }
 0x948   : > { %v5278_v13 = vrot.slane %v4577_v50, 5  ;;  %v5312_v61 = vrot.slane %v4577_v50, 6  ;;  %v5346_v23 = vrot.slane %v4577_v50, 7 }
 0x95f   : > { %v4650_v62 = vpop.f32.mrb[22].mxu0 }
 0x960   : > { %v5116_v31 = vrot.slane %v4650_v62, 7  ;;  %v5181_v17 = vrot.slane %v4650_v62, 1  ;;  %v5215_v58 = vrot.slane %v4650_v62, 2  ;;  %v5249_v18 = vrot.slane %v4650_v62, 3  ;;  %v11903_v27 = vpop.f32.mrb[23].mxu0 }
 0x961   : > { %v5279_v35 = vrot.slane %v4650_v62, 4  ;;  %v5313_v3 = vrot.slane %v4650_v62, 5  ;;  %v5347_v9 = vrot.slane %v4650_v62, 6  ;;  %v12994_v33 = vpack.i.bf16 %v4650_v62, %v4577_v50 }
 0x962   : > { %v5147_v26 = vsel %vm2642_vm12, %v4650_v62, %v5146_v10  ;;  %v5182_v25 = vsel %vm2642_vm12, %v5181_v17, %v5180_v22  ;;  %v5216_v28 = vsel %vm2642_vm12, %v5215_v58, %v5214_v48  ;;  %v5250_v1 = vsel %vm2642_vm12, %v5249_v18, %v5248_v45 }
 0x963   : > { %12995 = vrot.lane.b32.xlu0 %v12994_v33, %s13630_s23  ;;  %v5280_v34 = vsel %vm2642_vm12, %v5279_v35, %v5278_v13  ;;  %v5314_v4 = vsel %vm2642_vm12, %v5313_v3, %v5312_v61  ;;  %v5348_v53 = vsel %vm2642_vm12, %v5347_v9, %v5346_v23  ;;  %v5117_v59 = vsel %vm2642_vm12, %v5116_v31, %v4577_v50 }
 0x96f   : > { %v4723_v30 = vpop.f32.mrb[24].mxu0 }
 0x970   : > { %v5118_v63 = vrot.slane %v4723_v30, 6  ;;  %v5251_v40 = vrot.slane %v4723_v30, 2  ;;  %v11922_v36 = vpop.f32.mrb[25].mxu0  ;;  %v5281_v47 = vrot.slane %v4723_v30, 3  ;;  %v5148_v19 = vrot.slane %v4723_v30, 7 }
 0x971   : > { %v5315_v38 = vrot.slane %v4723_v30, 4  ;;  %v5183_v6 = vsel %vm2645_vm13, %v4723_v30, %v5182_v25  ;;  %v5349_v32 = vrot.slane %v4723_v30, 5  ;;  %v5217_v52 = vrot.slane %v4723_v30, 1 }
 0x972   : > { %v5282_v14 = vsel %vm2645_vm13, %v5281_v47, %v5280_v34  ;;  %v5149_v15 = vsel %vm2645_vm13, %v5148_v19, %v5147_v26  ;;  %v5252_v46 = vsel %vm2645_vm13, %v5251_v40, %v5250_v1  ;;  %v5119_v41 = vsel %vm2645_vm13, %v5118_v63, %v5117_v59 }
 0x973   : > { %v5316_v20 = vsel %vm2645_vm13, %v5315_v38, %v5314_v4  ;;  %v5350_v60 = vsel %vm2645_vm13, %v5349_v32, %v5348_v53  ;;  %v5218_v12 = vsel %vm2645_vm13, %v5217_v52, %v5216_v28 }
 0x97b   : > { %v4869_v57 = vpop.f32.mrb[58].mxu1 }
 0x97c   : > { %v11960_v21 = vpop.f32.mrb[59].mxu1  ;;  %v5285_v11 = vrot.slane %v4869_v57, 1  ;;  %v5152_v29 = vrot.slane %v4869_v57, 5  ;;  %v5319_v24 = vrot.slane %v4869_v57, 2  ;;  %v5186_v56 = vrot.slane %v4869_v57, 6 }
 0x97d   : > { %v5353_v42 = vrot.slane %v4869_v57, 3  ;;  %v5220_v0 = vrot.slane %v4869_v57, 7  ;;  %v5122_v3 = vrot.slane %v4869_v57, 4 }
 0x982   : > { %v4796_v2 = vpop.f32.mrb[26].mxu0 }
 0x983   : > { %v11941_v5 = vpop.f32.mrb[27].mxu0  ;;  %v12999_v16 = vpack.i.bf16 %v4796_v2, %v4723_v30  ;;  %v5283_v55 = vrot.slane %v4796_v2, 2  ;;  %v5150_v7 = vrot.slane %v4796_v2, 6  ;;  %v5317_v54 = vrot.slane %v4796_v2, 3 }
 0x984   : > { %v5184_v8 = vrot.slane %v4796_v2, 7  ;;  %v5351_v37 = vrot.slane %v4796_v2, 4  ;;  %v5219_v50 = vsel %vm2648_vm14, %v4796_v2, %v5218_v12  ;;  %v5253_v39 = vrot.slane %v4796_v2, 1 }
 0x985   : > { %13000 = vrot.lane.b32.xlu1 %v12999_v16, %s13630_s23  ;;  %v5284_v10 = vsel %vm2648_vm14, %v5283_v55, %v5282_v14  ;;  %v5151_v22 = vsel %vm2648_vm14, %v5150_v7, %v5149_v15  ;;  %v5318_v48 = vsel %vm2648_vm14, %v5317_v54, %v5316_v20  ;;  %v5221_v45 = vsel %vm2651_vm15, %v5220_v0, %v5219_v50 }
 0x986   : > { %v5286_v13 = vsel %vm2651_vm15, %v5285_v11, %v5284_v10  ;;  %v5153_v61 = vsel %vm2651_vm15, %v5152_v29, %v5151_v22  ;;  %v5320_v23 = vsel %vm2651_vm15, %v5319_v24, %v5318_v48  ;;  %v5185_v62 = vsel %vm2648_vm14, %v5184_v8, %v5183_v6 }
 0x987   : > { %v5187_v31 = vsel %vm2651_vm15, %v5186_v56, %v5185_v62  ;;  %v5352_v17 = vsel %vm2648_vm14, %v5351_v37, %v5350_v60  ;;  %v5254_v58 = vsel %vm2648_vm14, %v5253_v39, %v5252_v46  ;;  %v5120_v18 = vrot.slane %v4796_v2, 5 }
 0x988   : > { %v5354_v27 = vsel %vm2651_vm15, %v5353_v42, %v5352_v17  ;;  %v5255_v35 = vsel %vm2651_vm15, %v4869_v57, %v5254_v58 }
 0x989   : > { %v5121_v9 = vsel %vm2648_vm14, %v5120_v18, %v5119_v41 }
 0x98a   : > { %v5123_v33 = vsel %vm2651_vm15, %v5122_v3, %v5121_v9 }
 0x992   : > { %v4942_v26 = vpop.f32.mrb[28].mxu0 }
 0x993   : > { %v11979_v25 = vpop.f32.mrb[29].mxu0  ;;  %v13004_v28 = vpack.i.bf16 %v4942_v26, %v4869_v57  ;;  %v5287_v1 = vsel %vm2654_vm9, %v4942_v26, %v5286_v13  ;;  %v5154_v34 = vrot.slane %v4942_v26, 4  ;;  %v5321_v4 = vrot.slane %v4942_v26, 1 }
 0x994   : > { %v5188_v53 = vrot.slane %v4942_v26, 5  ;;  %v5355_v59 = vrot.slane %v4942_v26, 2  ;;  %v5222_v30 = vrot.slane %v4942_v26, 6  ;;  %v5256_v63 = vrot.slane %v4942_v26, 7 }
 0x995   : > { %13005 = vrot.lane.b32.xlu0 %v13004_v28, %s13630_s23  ;;  %v5155_v40 = vsel %vm2654_vm9, %v5154_v34, %v5153_v61  ;;  %v5322_v36 = vsel %vm2654_vm9, %v5321_v4, %v5320_v23  ;;  %v5124_v47 = vrot.slane %v4942_v26, 3 }
 0x996   : > { %v5015_v19 = vpop.f32.mrb[80].mxu1  ;;  %v5189_v38 = vsel %vm2654_vm9, %v5188_v53, %v5187_v31  ;;  %v5356_v6 = vsel %vm2654_vm9, %v5355_v59, %v5354_v27  ;;  %v5223_v32 = vsel %vm2654_vm9, %v5222_v30, %v5221_v45  ;;  %v5257_v52 = vsel %vm2654_vm9, %v5256_v63, %v5255_v35 }
 0x997   : > { %v11998_v14 = vpop.f32.mrb[81].mxu1  ;;  %v5288_v15 = vrot.slane %v5015_v19, 7  ;;  %v5156_v46 = vrot.slane %v5015_v19, 3  ;;  %v5323_v41 = vsel %vm19065_vm1, %v5015_v19, %v5322_v36  ;;  %v5190_v20 = vrot.slane %v5015_v19, 4  ;;  %vm19072_vm1 = vmmov %vm19068_vm0 }
 0x998   : > { %v5357_v60 = vrot.slane %v5015_v19, 1  ;;  %v5224_v12 = vrot.slane %v5015_v19, 5  ;;  %v5258_v57 = vrot.slane %v5015_v19, 6  ;;  %v5125_v21 = vsel %vm2654_vm9, %v5124_v47, %v5123_v33 }
 0x999   : > { %v5289_v11 = vsel %vm19066_vm8, %v5288_v15, %v5287_v1  ;;  %v5157_v29 = vsel %vm19067_vm7, %v5156_v46, %v5155_v40  ;;  %v5191_v2 = vsel %vm19068_vm0, %v5190_v20, %v5189_v38  ;;  %v5126_v24 = vrot.slane %v5015_v19, 2 }
 0x99a   : > { %v5358_v56 = vsel %vm19069_vm6, %v5357_v60, %v5356_v6  ;;  %v5225_v42 = vsel %vm19070_vm5, %v5224_v12, %v5223_v32  ;;  %v5259_v0 = vsel %vm19071_vm4, %v5258_v57, %v5257_v52  ;;  %vm19073_vm8 = vcmask 1047559  }
 0x99b   : > { %v5127_v5 = vsel %vm19072_vm1, %v5126_v24, %v5125_v21  ;;  %vm19074_vm6 = vmmov %vm19073_vm8 }
 0x99c   : > { %vm19075_vm4 = vmmov %vm19074_vm6 }
 0x99d   : > { %vm19076_vm5 = vmmov %vm19075_vm4 }
 0x99e   : > { %vm19077_vm7 = vmmov %vm19075_vm4 }
 0x99f   : > { %vm19078_vm0 = vmmov %vm19075_vm4 }
 0x9a0   : > { %vm19079_vm1 = vmmov %vm19078_vm0 }
 0x9a2   : > { %v5088_v16 = vpop.f32.mrb[30].mxu0 }
 0x9a3   : > { %v12017_v55 = vpop.f32.mrb[31].mxu0  ;;  %v13009_v7 = vpack.i.bf16 %v5088_v16, %v5015_v19  ;;  %v5290_v54 = vrot.slane %v5088_v16, 6  ;;  %v5158_v8 = vrot.slane %v5088_v16, 2  ;;  %v5324_v37 = vrot.slane %v5088_v16, 7 }
 0x9a4   : > { %v5192_v50 = vrot.slane %v5088_v16, 3  ;;  %v15907_v39 = vsel %vm19073_vm8, %v5088_v16, %v5358_v56  ;;  %v5226_v10 = vrot.slane %v5088_v16, 4  ;;  %v5260_v22 = vrot.slane %v5088_v16, 5  ;;  %vm19080_vm8 = vmmov %vm19078_vm0 }
 0x9a5   : > { %13010 = vrot.lane.b32.xlu1 %v13009_v7, %s13630_s23  ;;  %v15911_v48 = vsel %vm19074_vm6, %v5290_v54, %v5289_v11  ;;  %v15914_v45 = vsel %vm19075_vm4, %v5158_v8, %v5157_v29  ;;  %v15917_v13 = vsel %vm19076_vm5, %v5324_v37, %v5323_v41  ;;  %v5128_v61 = vrot.slane %v5088_v16, 1 }
 0x9a6   : > { %v15920_v23 = vsel %vm19077_vm7, %v5192_v50, %v5191_v2  ;;  %v15923_v62 = vsel %vm19078_vm0, %v5226_v10, %v5225_v42  ;;  %v15926_v31 = vsel %vm19079_vm1, %v5260_v22, %v5259_v0  ;;  %vm19081_vm6 = vcmask 1046534   ;;  %vm19084_vm7 = vmmov %vm19078_vm0 }
 0x9a7   : > { %v15929_v17 = vsel %vm19080_vm8, %v5128_v61, %v5127_v5  ;;  %vm19082_vm4 = vmmov %vm19081_vm6 }
 0x9a8   : > { %vm19083_vm5 = vmmov %vm19082_vm4 }
 0x9a9   : > { %vm19085_vm1 = vmmov %vm19082_vm4 }
 0x9aa   : > { %vm19086_vm8 = vmmov %vm19078_vm0 }
 0x9d5   : > { %v12996_v58 = vpop.permute.xlu0 %12995 }
 0x9d6   : > { %v12997_v18 = vunpack.i.l.bf16 %v12996_v58  ;;  %v12998_v27 = vunpack.i.h.bf16 %v12996_v58 }
 0x9d8   : > { %v5262_v35 = vrot.slane %v12997_v18, 4  ;;  %v5263_v3 = vrot.slane %v12998_v27, 3  ;;  %v5130_v9 = vrot.slane %v12998_v27, 7  ;;  %v5292_v47 = vrot.slane %v12997_v18, 5 }
 0x9d9   : > { %v5293_v19 = vrot.slane %v12998_v27, 4  ;;  %v5160_v38 = vrot.slane %v12997_v18, 1  ;;  %v5326_v6 = vrot.slane %v12997_v18, 6  ;;  %v5327_v32 = vrot.slane %v12998_v27, 5 }
 0x9da   : > { %v5264_v33 = vsel %vm2642_vm12, %v5263_v3, %v5262_v35  ;;  %v5131_v26 = vsel %vm2642_vm12, %v5130_v9, %v12997_v18  ;;  %v5194_v52 = vrot.slane %v12997_v18, 2  ;;  %v5195_v14 = vrot.slane %v12998_v27, 1 }
 0x9db   : > { %v5360_v46 = vrot.slane %v12997_v18, 7  ;;  %v5361_v41 = vrot.slane %v12998_v27, 6  ;;  %v5228_v20 = vrot.slane %v12997_v18, 3  ;;  %v5229_v60 = vrot.slane %v12998_v27, 2 }
 0x9dc   : > { %v5294_v12 = vsel %vm2642_vm12, %v5293_v19, %v5292_v47  ;;  %v5161_v2 = vsel %vm2642_vm12, %v12998_v27, %v5160_v38  ;;  %v5328_v24 = vsel %vm2642_vm12, %v5327_v32, %v5326_v6  ;;  %v5196_v42 = vsel %vm2642_vm12, %v5195_v14, %v5194_v52 }
 0x9dd   : > { %v5362_v0 = vsel %vm2642_vm12, %v5361_v41, %v5360_v46  ;;  %v5230_v5 = vsel %vm2642_vm12, %v5229_v60, %v5228_v20 }
 0x9f7   : > { %v13001_v25 = vpop.permute.xlu1 %13000 }
 0x9f8   : > { %v13002_v28 = vunpack.i.l.bf16 %v13001_v25  ;;  %v15933_v1 = vunpack.i.h.bf16 %v13001_v25 }
 0x9fa   : > { %v5265_v34 = vrot.slane %v13002_v28, 2  ;;  %v5267_v4 = vrot.slane %v15933_v1, 1  ;;  %v5132_v53 = vrot.slane %v13002_v28, 6  ;;  %v5134_v59 = vrot.slane %v15933_v1, 5 }
 0x9fb   : > { %v5295_v57 = vrot.slane %v13002_v28, 3  ;;  %v5162_v21 = vrot.slane %v13002_v28, 7  ;;  %v5329_v56 = vrot.slane %v13002_v28, 4  ;;  %v5297_v16 = vrot.slane %v15933_v1, 2 }
 0x9fc   : > { %v5266_v30 = vsel %vm2645_vm13, %v5265_v34, %v5264_v33  ;;  %v5133_v40 = vsel %vm2645_vm13, %v5132_v53, %v5131_v26  ;;  %v5164_v55 = vrot.slane %v15933_v1, 6  ;;  %v5331_v7 = vrot.slane %v15933_v1, 3 }
 0x9fd   : > { %v5268_v63 = vsel %vm2648_vm14, %v5267_v4, %v5266_v30  ;;  %v5135_v36 = vsel %vm2648_vm14, %v5134_v59, %v5133_v40  ;;  %v5197_v54 = vsel %vm2645_vm13, %v13002_v28, %v5196_v42  ;;  %v5296_v8 = vsel %vm2645_vm13, %v5295_v57, %v5294_v12 }
 0x9fe   : > { %v5163_v37 = vsel %vm2645_vm13, %v5162_v21, %v5161_v2  ;;  %v5198_v50 = vrot.slane %v15933_v1, 7  ;;  %v5363_v10 = vrot.slane %v13002_v28, 5  ;;  %v5231_v22 = vrot.slane %v13002_v28, 1 }
 0x9ff   : > { %v5330_v35 = vsel %vm2645_vm13, %v5329_v56, %v5328_v24  ;;  %v5365_v3 = vrot.slane %v15933_v1, 4  ;;  %v5298_v28 = vsel %vm2648_vm14, %v5297_v16, %v5296_v8  ;;  %v5165_v4 = vsel %vm2648_vm14, %v5164_v55, %v5163_v37 }
 0xa00   : > { %v5332_v30 = vsel %vm2648_vm14, %v5331_v7, %v5330_v35  ;;  %v5364_v40 = vsel %vm2645_vm13, %v5363_v10, %v5362_v0  ;;  %v5232_v47 = vsel %vm2645_vm13, %v5231_v22, %v5230_v5 }
 0xa01   : > { %v5366_v60 = vsel %vm2648_vm14, %v5365_v3, %v5364_v40  ;;  %v5233_v57 = vsel %vm2648_vm14, %v15933_v1, %v5232_v47 }
 0xa07   : > { %v13006_v15 = vpop.permute.xlu0 %13005 }
 0xa08   : > { %v15942_v11 = vunpack.i.h.bf16 %v13006_v15  ;;  %v13007_v29 = vunpack.i.l.bf16 %v13006_v15 }
 0xa0a   : > { %v5269_v61 = vsel %vm2651_vm15, %v13007_v29, %v5268_v63  ;;  %v5270_v58 = vrot.slane %v15942_v11, 7  ;;  %v5136_v18 = vrot.slane %v13007_v29, 4  ;;  %v5299_v27 = vrot.slane %v13007_v29, 1 }
 0xa0b   : > { %v5138_v9 = vrot.slane %v15942_v11, 3  ;;  %v5166_v33 = vrot.slane %v13007_v29, 5  ;;  %v5333_v26 = vrot.slane %v13007_v29, 2  ;;  %v5200_v53 = vrot.slane %v13007_v29, 6 }
 0xa0c   : > { %v15962_v25 = vsel %vm2654_vm9, %v5270_v58, %v5269_v61  ;;  %v5137_v34 = vsel %vm2651_vm15, %v5136_v18, %v5135_v36  ;;  %v5199_v63 = vsel %vm2648_vm14, %v5198_v50, %v5197_v54  ;;  %v5300_v19 = vsel %vm2651_vm15, %v5299_v27, %v5298_v28 }
 0xa0d   : > { %v5139_v59 = vsel %vm2654_vm9, %v5138_v9, %v5137_v34  ;;  %v5168_v38 = vrot.slane %v15942_v11, 4  ;;  %v5335_v36 = vrot.slane %v15942_v11, 1  ;;  %v5202_v6 = vrot.slane %v15942_v11, 5 }
 0xa0e   : > { %v5167_v32 = vsel %vm2651_vm15, %v5166_v33, %v5165_v4  ;;  %v5334_v52 = vsel %vm2651_vm15, %v5333_v26, %v5332_v30  ;;  %v5367_v14 = vrot.slane %v13007_v29, 3  ;;  %v5234_v15 = vrot.slane %v13007_v29, 7 }
 0xa0f   : > { %v5201_v46 = vsel %vm2651_vm15, %v5200_v53, %v5199_v63  ;;  %v5301_v20 = vsel %vm2654_vm9, %v15942_v11, %v5300_v19  ;;  %v5369_v12 = vrot.slane %v15942_v11, 2  ;;  %v5169_v24 = vsel %vm2654_vm9, %v5168_v38, %v5167_v32 }
 0xa10   : > { %v5336_v56 = vsel %vm2654_vm9, %v5335_v36, %v5334_v52  ;;  %v5203_v29 = vsel %vm2654_vm9, %v5202_v6, %v5201_v46  ;;  %v5368_v42 = vsel %vm2651_vm15, %v5367_v14, %v5366_v60  ;;  %v5235_v0 = vsel %vm2651_vm15, %v5234_v15, %v5233_v57  ;;  %v13202_v14 = vld [vmem:[%s18901_s5 + $0x214] ss:$8 sps:$4 sm:$0xff]   ;;  %v13203_v15 = vld [vmem:[%s18901_s5 + $0x220] ss:$8 sps:$4 sm:$0xff]   ;;  %v13212_v57 = vld [vmem:[%s18901_s5 + $0x250] ss:$8 sps:$4 sm:$0xff]  }
 0xa11   : > { %v5236_v5 = vrot.slane %v15942_v11, 6  ;;  %v5370_v9 = vsel %vm2654_vm9, %v5369_v12, %v5368_v42  ;;  %v13208_v46 = vld [vmem:[%s18901_s5 + $0x234] ss:$8 sps:$4 sm:$0xff]   ;;  %v13209_v60 = vld [vmem:[%s18901_s5 + $0x240] ss:$8 sps:$4 sm:$0xff]  }
 0xa12   : > { %v13214_v12 = vld [vmem:[%s18901_s5 + $0x254] ss:$8 sps:$4 sm:$0xff]  }
 0xa13   : > { %v5237_v33 = vsel %vm2654_vm9, %v5236_v5, %v5235_v0 }
 0xa17   : > { %v13011_v41 = vpop.permute.xlu1 %13010 }
 0xa18   : > { %v13013_v21 = vunpack.i.h.bf16 %v13011_v41  ;;  %v13012_v2 = vunpack.i.l.bf16 %v13011_v41  ;;  %v13206_v41 = vld [vmem:[%s18901_s5 + $0x230] ss:$8 sps:$4 sm:$0xff]  }
 0xa1a   : > { %v5302_v16 = vrot.slane %v13012_v2, 7  ;;  %v5304_v55 = vrot.slane %v13013_v21, 6  ;;  %v5170_v7 = vrot.slane %v13012_v2, 3  ;;  %v5172_v54 = vrot.slane %v13013_v21, 2 }
 0xa1b   : > { %v5337_v1 = vsel %vm19081_vm6, %v13012_v2, %v5336_v56  ;;  %v5338_v8 = vrot.slane %v13013_v21, 7  ;;  %v5204_v37 = vrot.slane %v13012_v2, 4  ;;  %v5206_v50 = vrot.slane %v13013_v21, 3  ;;  %vm19087_vm6 = vmmov %vm19078_vm0 }
 0xa1c   : > { %v5303_v10 = vsel %vm19082_vm4, %v5302_v16, %v5301_v20  ;;  %v5171_v22 = vsel %vm19083_vm5, %v5170_v7, %v5169_v24  ;;  %v5371_v61 = vrot.slane %v13012_v2, 1  ;;  %v5238_v58 = vrot.slane %v13012_v2, 5  ;;  %vm19088_vm4 = vmmov %vm19085_vm1  ;;  %v13211_v20 = vld [vmem:[%s18901_s5 + $0x244] ss:$8 sps:$4 sm:$0xff]  }
 0xa1d   : > { %v5305_v18 = vsel %vm19084_vm7, %v5304_v55, %v5303_v10  ;;  %v5173_v27 = vsel %vm19078_vm0, %v5172_v54, %v5171_v22  ;;  %v5205_v11 = vsel %vm19085_vm1, %v5204_v37, %v5203_v29  ;;  %v5339_v26 = vsel %vm19086_vm8, %v5338_v8, %v5337_v1  ;;  %vm19089_vm5 = vmmov %vm19085_vm1 }
 0xa1e   : > { %v13014_v35 = vpack.i.bf16 %v5305_v18, %v15911_v48  ;;  %v13019_v3 = vpack.i.bf16 %v5173_v27, %v15914_v45  ;;  %v5207_v34 = vsel %vm19087_vm6, %v5206_v50, %v5205_v11  ;;  %v5372_v28 = vsel %vm19088_vm4, %v5371_v61, %v5370_v9  ;;  %vm19090_vm7 = vmmov %vm19085_vm1 }
 0xa1f   : > { %v5240_v4 = vrot.slane %v13013_v21, 4  ;;  %v5239_v53 = vsel %vm19089_vm5, %v5238_v58, %v5237_v33  ;;  %v5272_v48 = vrot.slane %v13012_v2, 6  ;;  %v5274_v30 = vrot.slane %v13013_v21, 5  ;;  %vm19091_vm0 = vmmov %vm19085_vm1 }
 0xa20   : > { %13015 = vrot.lane.b32.xlu0 %v13014_v35, %s13631_s25  ;;  %13020 = vrot.lane.b32.xlu1 %v13019_v3, %s13631_s25  ;;  %v5140_v45 = vrot.slane %v13012_v2, 2  ;;  %v5142_v63 = vrot.slane %v13013_v21, 1  ;;  %v13024_v40 = vpack.i.bf16 %v5339_v26, %v15917_v13  ;;  %v13034_v47 = vpack.i.bf16 %v5207_v34, %v15920_v23  ;;  %vm19092_vm1 = vmmov %vm19087_vm6  ;;  %v13215_v2 = vld [vmem:[%s18901_s5 + $0x260] ss:$8 sps:$4 sm:$0xff]  }
 0xa21   : > { %v5273_v19 = vsel %vm19090_vm7, %v5272_v48, %v15962_v25  ;;  %v5373_v36 = vsel %vm19092_vm1, %v13013_v21, %v5372_v28  ;;  %vm19093_vm8 = vmmov %vm19092_vm1  ;;  %v13197_v25 = vld [vmem:[%s18901_s5 + $0x200] ss:$8 sps:$4 sm:$0xff]   ;;  %v13217_v21 = vld [vmem:[%s18901_s5 + $0x264] ss:$8 sps:$4 sm:$0xff]   ;;  %vm19096_vm5 = vcmask 785408  }
 0xa22   : > { %v5141_v38 = vsel %vm19091_vm0, %v5140_v45, %v5139_v59  ;;  %v5241_v6 = vsel %vm19093_vm8, %v5240_v4, %v5239_v53  ;;  %vm19094_vm6 = vmmov %vm19092_vm1  ;;  %v13029_v13 = vpack.i.bf16 %v5373_v36, %v15907_v39  ;;  %v13199_v59 = vld [vmem:[%s18901_s5 + $0x204] ss:$8 sps:$4 sm:$0xff]   ;;  %v13200_v39 = vld [vmem:[%s18901_s5 + $0x210] ss:$8 sps:$4 sm:$0xff]   ;;  %vm19100_vm8 = vcmask 130048  }
 0xa23   : > { %v5275_v32 = vsel %vm19094_vm6, %v5274_v30, %v5273_v19  ;;  %vm19095_vm4 = vmmov %vm19092_vm1  ;;  %v13039_v23 = vpack.i.bf16 %v5241_v6, %v15923_v62  ;;  %5907 = vmatprep.subr.bf16.mxu0 %v13199_v59  ;;  %v13205_v62 = vld [vmem:[%s18901_s5 + $0x224] ss:$8 sps:$4 sm:$0xff]   ;;  %v13527_v45 = vld [vmem:[%s18898_s2 + $0x10] sm:$0xff] }
 0xa24   : > { %v5143_v52 = vsel %vm19095_vm4, %v5142_v63, %v5141_v38  ;;  %13025 = vrot.lane.b32.xlu0 %v13024_v40, %s13629_s22  ;;  %13035 = vrot.lane.b32.xlu1 %v13034_v47, %s13629_s22  ;;  %vm19097_vm7 = vmmov %vm19096_vm5  ;;  %v13525_v48 = vld [vmem:[%s18898_s2] sm:$0xff]  ;;  %v13526_v30 = vld [vmem:[%s18898_s2 + $0x8] sm:$0xff] }
 0xa25   : > { %5908 = vmatpush1.bf16.msra.mxu0 %v13197_v25  ;;  %vm19098_vm0 = vmmov %vm19096_vm5  ;;  %v13528_v63 = vld [vmem:[%s18898_s2 + $0x18] sm:$0xff]  ;;  %v13529_v40 = vld [vmem:[%s18898_s2 + $0x20] sm:$0xff] }
 0xa26   : > { %5909 = vmatprep.subr.bf16.mxu0 %v13202_v14  ;;  %vm19099_vm1 = vmmov %vm19098_vm0  ;;  %v13530_v47 = vld [vmem:[%s18898_s2 + $0x28] sm:$0xff]  ;;  %v13531_v19 = vld [vmem:[%s18898_s2 + $0x30] sm:$0xff] }
 0xa27   : > { %vm19101_vm6 = vmmov %vm19100_vm8  ;;  %v13532_v38 = vld [vmem:[%s18898_s2 + $0x38] sm:$0xff]  ;;  %v13533_v36 = vld [vmem:[%s18898_s2 + $0x40] sm:$0xff] }
 0xa28   : > { %13030 = vrot.lane.b32.xlu0 %v13029_v13, %s13630_s23  ;;  %13040 = vrot.lane.b32.xlu1 %v13039_v23, %s13630_s23  ;;  %vm19102_vm4 = vmmov %vm19101_vm6  ;;  %v13220_v6 = vld [vmem:[%s18901_s5 + $0x274] ss:$8 sps:$4 sm:$0xff]   ;;  %v13221_v13 = vld [vmem:[%s18901_s5 + $0x280] ss:$8 sps:$4 sm:$0xff]  }
 0xa29   : > { %5910 = vmatpush1.bf16.msra.mxu0 %v13200_v39  ;;  %v13226_v23 = vld [vmem:[%s18901_s5 + $0x294] ss:$8 sps:$4 sm:$0xff]   ;;  %v13224_v25 = vld [vmem:[%s18901_s5 + $0x290] ss:$8 sps:$4 sm:$0xff]   ;;  %v13229_v59 = vld [vmem:[%s18901_s5 + $0x2a4] ss:$8 sps:$4 sm:$0xff]  }
 0xa2a   : > { %5911 = vmatprep.subr.bf16.mxu0 %v13205_v62  ;;  %v13227_v14 = vld [vmem:[%s18901_s5 + $0x2a0] ss:$8 sps:$4 sm:$0xff]   ;;  %v13232_v39 = vld [vmem:[%s18901_s5 + $0x2b4] ss:$8 sps:$4 sm:$0xff]   ;;  %v13230_v62 = vld [vmem:[%s18901_s5 + $0x2b0] ss:$8 sps:$4 sm:$0xff]  }
 0xa2d   : > { %5912 = vmatpush1.bf16.msra.mxu0 %v13203_v15  ;;  %v13233_v15 = vld [vmem:[%s18901_s5 + $0x2c0] ss:$8 sps:$4 sm:$0xff]  }
 0xa2e   : > { %5913 = vmatprep.subr.bf16.mxu0 %v13208_v46  ;;  %v13235_v46 = vld [vmem:[%s18901_s5 + $0x2c4] ss:$8 sps:$4 sm:$0xff]  }
 0xa31   : > { %5914 = vmatpush1.bf16.msra.mxu0 %v13206_v41  ;;  %v13238_v41 = vld [vmem:[%s18901_s5 + $0x2d4] ss:$8 sps:$4 sm:$0xff]  }
 0xa32   : > { %5915 = vmatprep.subr.bf16.mxu0 %v13211_v20  ;;  %v13236_v20 = vld [vmem:[%s18901_s5 + $0x2d0] ss:$8 sps:$4 sm:$0xff]  }
 0xa35   : > { %5916 = vmatpush1.bf16.msra.mxu0 %v13209_v60  ;;  %v13241_v60 = vld [vmem:[%s18901_s5 + $0x2e4] ss:$8 sps:$4 sm:$0xff]  }
 0xa36   : > { %5917 = vmatprep.subr.bf16.mxu0 %v13214_v12  ;;  %v13239_v12 = vld [vmem:[%s18901_s5 + $0x2e0] ss:$8 sps:$4 sm:$0xff]  }
 0xa39   : > { %5918 = vmatpush1.bf16.msra.mxu0 %v13212_v57  ;;  %v13244_v57 = vld [vmem:[%s18901_s5 + $0x2f4] ss:$8 sps:$4 sm:$0xff]  }
 0xa3a   : > { %5919 = vmatprep.subr.bf16.mxu0 %v13217_v21  ;;  %v13242_v21 = vld [vmem:[%s18901_s5 + $0x2f0] ss:$8 sps:$4 sm:$0xff]  }
 0xa3d   : > { %5920 = vmatpush1.bf16.msra.mxu0 %v13215_v2  ;;  %v11173_v2 = vld [vmem:[%s18902_s6 + $0x2] sm:$0x3] }
 0xa3e   : > { %5921 = vmatprep.subr.bf16.mxu0 %v13220_v6 }
 0xa92   : > { %v13016_v24 = vpop.permute.xlu0 %13015  ;;  %v13021_v56 = vpop.permute.xlu1 %13020 }
 0xa93   : > { %v13018_v29 = vunpack.i.h.bf16 %v13016_v24  ;;  %v13017_v42 = vunpack.i.l.bf16 %v13016_v24  ;;  %v13023_v0 = vunpack.i.h.bf16 %v13021_v56  ;;  %v13022_v5 = vunpack.i.l.bf16 %v13021_v56  ;;  %v19109_v56 = vld [vmem:[#allocation11_spill] sm:$0xff] }
 0xa94   : > { %v16182_v24 = vrot.slane %v11173_v2, %v13930_v43 }
 0xa95   : > { %v5387_v37 = vsel %vm1959_vm10, %v5275_v32, %v13018_v29  ;;  %v5386_v50 = vsel %vm1959_vm10, %v15926_v31, %v13017_v42  ;;  %v5381_v10 = vsel %vm1959_vm10, %v5143_v52, %v13023_v0  ;;  %v5380_v22 = vsel %vm1959_vm10, %v15929_v17, %v13022_v5  ;;  %v13218_v32 = vld [vmem:[%s18901_s5 + $0x270] ss:$8 sps:$4 sm:$0xff]   ;;  %v13223_v52 = vld [vmem:[%s18901_s5 + $0x284] ss:$8 sps:$4 sm:$0xff]  }
 0xa96   : > { %v13026_v16 = vpop.permute.xlu0 %13025  ;;  %v13036_v55 = vpop.permute.xlu1 %13035  ;;  %5922 = vmatpush1.bf16.msra.mxu0 %v13218_v32  ;;  %v16185_v29 = vrot.slane %v11173_v2, %v19109_v56  ;;  %v19110_v42 = vld [vmem:[#allocation29_spill] sm:$0xff]  ;;  %v19111_v5 = vld [vmem:[#allocation28_spill] sm:$0xff] }
 0xa97   : > { %v13028_v7 = vunpack.i.h.bf16 %v13026_v16  ;;  %v13027_v54 = vunpack.i.l.bf16 %v13026_v16  ;;  %v13038_v1 = vunpack.i.h.bf16 %v13036_v55  ;;  %v13037_v8 = vunpack.i.l.bf16 %v13036_v55  ;;  %5923 = vmatprep.subr.bf16.mxu0 %v13223_v52 }
 0xa98   : > { %v3502_v0 = vadd.f32 %v19110_v42, %v16182_v24  ;;  %v3504_v16 = vadd.f32 %v19111_v5, %v16185_v29 }
 0xa99   : > { %v5382_v3 = vsel %vm2032_vm11, %v5380_v22, %v13037_v8  ;;  %v5383_v9 = vsel %vm2032_vm11, %v5381_v10, %v13038_v1  ;;  %v5388_v33 = vsel %vm2032_vm11, %v5386_v50, %v13027_v54  ;;  %v5389_v26 = vsel %vm2032_vm11, %v5387_v37, %v13028_v7  ;;  %v19112_v8 = vld [vmem:[#allocation12_spill] sm:$0xff]  ;;  %v19113_v10 = vld [vmem:[#allocation13_spill] sm:$0xff] }
 0xa9a   : > { %v13031_v61 = vpop.permute.xlu0 %13030  ;;  %v13041_v58 = vpop.permute.xlu1 %13040  ;;  %5924 = vmatpush1.bf16.msra.mxu0 %v13221_v13  ;;  %v3506_v37 = vadd.f32 %v19112_v8, %v16182_v24  ;;  %v3508_v22 = vadd.f32 %v19113_v10, %v16185_v29  ;;  %v19120_v13 = vld [vmem:[#allocation20_spill] sm:$0xff] }
 0xa9b   : > { %v13033_v18 = vunpack.i.h.bf16 %v13031_v61  ;;  %v13032_v27 = vunpack.i.l.bf16 %v13031_v61  ;;  %v13043_v11 = vunpack.i.h.bf16 %v13041_v58  ;;  %v13042_v35 = vunpack.i.l.bf16 %v13041_v58  ;;  %5925 = vmatprep.subr.bf16.mxu0 %v13226_v23 }
 0xa9c   : > { %v3526_v23 = vadd.f32 %v19120_v13, %v16182_v24 }
 0xa9d   : > { %v5384_v31 = vsel %vm19096_vm5, %v5382_v3, %v13042_v35  ;;  %v5385_v34 = vsel %vm19097_vm7, %v5383_v9, %v13043_v11  ;;  %v5390_v17 = vsel %vm19098_vm0, %v5388_v33, %v13032_v27  ;;  %v5391_v28 = vsel %vm19099_vm1, %v5389_v26, %v13033_v18  ;;  %vm19103_vm5 = vmmov %vm19102_vm4  ;;  %v19114_v35 = vld [vmem:[#allocation14_spill] sm:$0xff]  ;;  %v19115_v26 = vld [vmem:[#allocation15_spill] sm:$0xff] }
 0xa9e   : > { %v12623_v4 = vpack.c.bf16 %v5391_v28, %v5390_v17  ;;  %v12625_v53 = vpack.c.bf16 %v5385_v34, %v5384_v31  ;;  %vm19104_vm7 = vmmov %vm19102_vm4  ;;  %5926 = vmatpush1.bf16.msra.mxu0 %v13224_v25  ;;  %v3512_v3 = vadd.f32 %v19114_v35, %v16182_v24  ;;  %v3514_v31 = vadd.f32 %v19115_v26, %v16185_v29  ;;  %v19116_v34 = vld [vmem:[#allocation16_spill] sm:$0xff]  ;;  %v19121_v25 = vld [vmem:[#allocation21_spill] sm:$0xff] }
 0xa9f   : > { %vm19105_vm0 = vmmov %vm19102_vm4  ;;  %5927 = vmatprep.subr.bf16.mxu0 %v13229_v59  ;;  %v3516_v17 = vadd.f32 %v19116_v34, %v16182_v24  ;;  %v3528_v59 = vadd.f32 %v19121_v25, %v16185_v29 }
 0xaa0   : > { %12624 = vmatprep.subr.bf16.mxu1 %v12623_v4  ;;  %vm19106_vm1 = vmmov %vm19105_vm0 }
 0xaa1   : > { %12626 = vmatpush1.bf16.msra.mxu1 %v12625_v53  ;;  %v19117_v53 = vld [vmem:[#allocation17_spill] sm:$0xff] }
 0xaa2   : > { %5928 = vmatpush1.bf16.msra.mxu0 %v13227_v14 }
 0xaa3   : > { %5929 = vmatprep.subr.bf16.mxu0 %v13232_v39 }
 0xaa4   : > { %11216 = vmatmul.mubr.msk.f32.vlgmr.msra.gmra.mrb[82].mxu1 %vm19100_vm8, %v13525_v48  ;;  %vm19107_vm8 = vmmov %vm19105_vm0  ;;  %v3518_v48 = vadd.f32 %v19117_v53, %v16185_v29  ;;  %v19126_v53 = vld [vmem:[#allocation26_spill] sm:$0xff] }
 0xaa5   : > { %5462 = vmatprep.mubr.f32.mxu1 %v18977_v44 }
 0xaa6   : > { %5930 = vmatpush1.bf16.msra.mxu0 %v13230_v62 }
 0xaa7   : > { %5931 = vmatprep.subr.bf16.mxu0 %v13235_v46 }
 0xaa8   : > { %11217 = vmatmul.mubr.msk.f32.gmra.mrb[84].mxu1 %vm19101_vm6, %v13526_v30  ;;  %vm19108_vm6 = vmmov %vm19105_vm0  ;;  %v19118_v30 = vld [vmem:[#allocation18_spill] sm:$0xff] }
 0xaa9   : > { %5468 = vmatprep.mubr.f32.mxu1 %v18977_v44 }
 0xaaa   : > { %5932 = vmatpush1.bf16.msra.mxu0 %v13233_v15 }
 0xaab   : > { %5933 = vmatprep.subr.bf16.mxu0 %v13238_v41 }
 0xaac   : > { %11218 = vmatmul.mubr.msk.f32.gmra.mrb[86].mxu1 %vm19102_vm4, %v13527_v45  ;;  %v3522_v45 = vadd.f32 %v19118_v30, %v16182_v24  ;;  %vm19128_vm4 = vcmask 588800  }
 0xaad   : > { %5474 = vmatprep.mubr.f32.mxu1 %v18977_v44 }
 0xaae   : > { %5934 = vmatpush1.bf16.msra.mxu0 %v13236_v20  ;;  %v19122_v20 = vld [vmem:[#allocation22_spill] sm:$0xff] }
 0xaaf   : > { %5935 = vmatprep.subr.bf16.mxu0 %v13241_v60  ;;  %v16241_v60 = vadd.f32 %v19122_v20, %v16182_v24 }
 0xab0   : > { %11219 = vmatmul.mubr.msk.f32.gmra.mrb[88].mxu1 %vm19103_vm5, %v13528_v63  ;;  %vm19129_vm5 = vmmov %vm19128_vm4 }
 0xab1   : > { %5480 = vmatprep.mubr.f32.mxu1 %v18977_v44 }
 0xab2   : > { %5936 = vmatpush1.bf16.msra.mxu0 %v13239_v12  ;;  %v19123_v12 = vld [vmem:[#allocation23_spill] sm:$0xff] }
 0xab3   : > { %5937 = vmatprep.subr.bf16.mxu0 %v13244_v57  ;;  %v16245_v57 = vadd.f32 %v19123_v12, %v16185_v29 }
 0xab4   : > { %11220 = vmatmul.mubr.msk.f32.gmra.mrb[90].mxu1 %vm19104_vm7, %v13529_v40  ;;  %vm19150_vm7 = vcmask 1041408  }
 0xab5   : > { %5486 = vmatprep.mubr.f32.mxu1 %v18977_v44 }
 0xab6   : > { %5938 = vmatpush1.bf16.msra.mxu0 %v13242_v21 }
 0xab7   : > { %12691 = vmatprep.subr.bf16.mxu0 %v18975_v51 }
 0xab8   : > { %11221 = vmatmul.mubr.msk.f32.gmra.mrb[92].mxu1 %vm19105_vm0, %v13530_v47  ;;  %vm19151_vm0 = vcmask 1042432  }
 0xab9   : > { %5492 = vmatprep.mubr.f32.mxu1 %v18977_v44 }
 0xabc   : > { %11222 = vmatmul.mubr.msk.f32.gmra.mrb[94].mxu1 %vm19106_vm1, %v13531_v19  ;;  %v19119_v19 = vld [vmem:[#allocation19_spill] sm:$0xff]  ;;  %vm19152_vm1 = vcmask 1043456  }
 0xabd   : > { %5498 = vmatprep.mubr.f32.mxu1 %v18977_v44 }
 0xac0   : > { %11223 = vmatmul.mubr.msk.f32.gmra.mrb[96].mxu1 %vm19107_vm8, %v13532_v38  ;;  %v3524_v38 = vadd.f32 %v19119_v19, %v16185_v29  ;;  %vm19153_vm8 = vcmask 1044480  }
 0xac1   : > { %5504 = vmatprep.mubr.f32.mxu1 %v18977_v44 }
 0xac4   : > { %11224 = vmatmul.mubr.msk.f32.gmra.mrb[98].mxu1 %vm19108_vm6, %v13533_v36  ;;  %vm19154_vm6 = vcmask 1045504  }
 0xac5   : > { %6070 = vmatprep.mubr.f32.mxu1 %v18977_v44 }
 0xb77   : > { %v5458_v55 = vpop.f32.mrb[82].mxu1 }
 0xb78   : > { %v16191_v7 = vadd.f32 %v5458_v55, %v3502_v0  ;;  %v5460_v54 = vpop.f32.mrb[83].mxu1 }
 0xb79   : > { %v16193_v1 = vadd.f32 %v5460_v54, %v3504_v16  ;;  %v19124_v54 = vld [vmem:[#allocation24_spill] sm:$0xff] }
 0xb7a   : > { %v5529_v50 = vmul.f32 %v16191_v7, %v16191_v7  ;;  %v16255_v8 = vadd.f32 %v19124_v54, %v16182_v24 }
 0xb7b   : > { %v5530_v61 = vmul.f32 %v16193_v1, %v16193_v1  ;;  %v5464_v58 = vpop.f32.mrb[84].mxu1 }
 0xb7c   : > { %v5547_v18 = vmul.f32 %v5529_v50, %v16191_v7  ;;  %v16204_v27 = vadd.f32 %v5464_v58, %v3506_v37  ;;  %v5466_v11 = vpop.f32.mrb[85].mxu1 }
 0xb7d   : > { %v5548_v9 = vmul.f32 %v5530_v61, %v16193_v1  ;;  %v16209_v33 = vadd.f32 %v5466_v11, %v3508_v22  ;;  %v19125_v11 = vld [vmem:[#allocation25_spill] sm:$0xff] }
 0xb7e   : > { %v5565_v28 = vmul.f32 0.044715, %v5547_v18  ;;  %v5531_v4 = vmul.f32 %v16204_v27, %v16204_v27  ;;  %v16265_v35 = vadd.f32 %v19125_v11, %v16185_v29 }
 0xb7f   : > { %v5566_v63 = vmul.f32 0.044715, %v5548_v9  ;;  %v5532_v40 = vmul.f32 %v16209_v33, %v16209_v33  ;;  %v5470_v47 = vpop.f32.mrb[86].mxu1 }
 0xb80   : > { %v5583_v36 = vadd.f32 %v5565_v28, %v16191_v7  ;;  %v5549_v6 = vmul.f32 %v5531_v4, %v16204_v27  ;;  %v16227_v32 = vadd.f32 %v5470_v47, %v3512_v3  ;;  %v5472_v52 = vpop.f32.mrb[87].mxu1 }
 0xb81   : > { %v5550_v14 = vmul.f32 %v5532_v40, %v16209_v33  ;;  %v16234_v39 = vadd.f32 %v5472_v52, %v3514_v31  ;;  %v5584_v15 = vadd.f32 %v5566_v63, %v16193_v1 }
 0xb82   : > { %v5601_v62 = vmul.f32 0.7978846, %v5583_v36  ;;  %v5567_v46 = vmul.f32 0.044715, %v5549_v6  ;;  %v5533_v41 = vmul.f32 %v16227_v32, %v16227_v32 }
 0xb83   : > { %v5568_v21 = vmul.f32 0.044715, %v5550_v14  ;;  %v5534_v2 = vmul.f32 %v16234_v39, %v16234_v39  ;;  %v5476_v42 = vpop.f32.mrb[88].mxu1  ;;  %v5602_v22 = vmul.f32 0.7978846, %v5584_v15 }
 0xb84   : > { %13377 = vtanh.f32 %v5601_v62  ;;  %v5585_v0 = vadd.f32 %v5567_v46, %v16204_v27  ;;  %v5551_v5 = vmul.f32 %v5533_v41, %v16227_v32  ;;  %v16251_v16 = vadd.f32 %v5476_v42, %v3516_v17  ;;  %v5478_v55 = vpop.f32.mrb[89].mxu1 }
 0xb85   : > { %v5586_v37 = vadd.f32 %v5568_v21, %v16209_v33  ;;  %v5552_v50 = vmul.f32 %v5534_v2, %v16234_v39  ;;  %v16259_v10 = vadd.f32 %v5478_v55, %v3518_v48  ;;  %v16275_v48 = vadd.f32 %v19126_v53, %v16182_v24 }
 0xb86   : > { %v5603_v61 = vmul.f32 0.7978846, %v5585_v0  ;;  %v5569_v58 = vmul.f32 0.044715, %v5551_v5  ;;  %v5535_v18 = vmul.f32 %v16251_v16, %v16251_v16 }
 0xb87   : > { %v5604_v3 = vmul.f32 0.7978846, %v5586_v37  ;;  %v5570_v9 = vmul.f32 0.044715, %v5552_v50  ;;  %v5536_v26 = vmul.f32 %v16259_v10, %v16259_v10  ;;  %v5482_v31 = vpop.f32.mrb[90].mxu1 }
 0xb88   : > { %13379 = vtanh.f32 %v5603_v61  ;;  %v5587_v34 = vadd.f32 %v5569_v58, %v16227_v32  ;;  %v5553_v17 = vmul.f32 %v5535_v18, %v16251_v16  ;;  %v16271_v28 = vadd.f32 %v5482_v31, %v3522_v45  ;;  %v5484_v4 = vpop.f32.mrb[91].mxu1  ;;  %v19127_v45 = vld [vmem:[#allocation27_spill] sm:$0xff] }
 0xb89   : > { %v5588_v30 = vadd.f32 %v5570_v9, %v16234_v39  ;;  %v5554_v63 = vmul.f32 %v5536_v26, %v16259_v10  ;;  %v16279_v40 = vadd.f32 %v5484_v4, %v3524_v38  ;;  %13381 = vtanh.f32 %v5602_v22 }
 0xb8a   : > { %v5605_v47 = vmul.f32 0.7978846, %v5587_v34  ;;  %v5571_v19 = vmul.f32 0.044715, %v5553_v17  ;;  %v5537_v36 = vmul.f32 %v16271_v28, %v16271_v28  ;;  %v16285_v6 = vadd.f32 %v19127_v45, %v16185_v29 }
 0xb8b   : > { %v5606_v52 = vmul.f32 0.7978846, %v5588_v30  ;;  %v5572_v13 = vmul.f32 0.044715, %v5554_v63  ;;  %v5538_v24 = vmul.f32 %v16279_v40, %v16279_v40  ;;  %v5488_v25 = vpop.f32.mrb[92].mxu1  ;;  %13383 = vtanh.f32 %v5604_v3 }
 0xb8c   : > { %v5589_v38 = vadd.f32 %v5571_v19, %v16251_v16  ;;  %v5555_v14 = vmul.f32 %v5537_v36, %v16271_v28  ;;  %v16291_v62 = vadd.f32 %v5488_v25, %v3526_v23  ;;  %v5490_v15 = vpop.f32.mrb[93].mxu1  ;;  %13385 = vtanh.f32 %v5605_v47 }
 0xb8d   : > { %v5590_v46 = vadd.f32 %v5572_v13, %v16259_v10  ;;  %v5556_v29 = vmul.f32 %v5538_v24, %v16279_v40  ;;  %v16295_v41 = vadd.f32 %v5490_v15, %v3528_v59  ;;  %13387 = vtanh.f32 %v5606_v52 }
 0xb8e   : > { %v13378_v20 = vpop.eup %13377  ;;  %v5607_v12 = vmul.f32 0.7978846, %v5589_v38  ;;  %v5573_v21 = vmul.f32 0.044715, %v5555_v14  ;;  %v5539_v2 = vmul.f32 %v16291_v62, %v16291_v62 }
 0xb8f   : > { %v5637_v42 = vadd.f32 1.0, %v13378_v20  ;;  %v5608_v0 = vmul.f32 0.7978846, %v5590_v46  ;;  %v5574_v5 = vmul.f32 0.044715, %v5556_v29  ;;  %v5540_v23 = vmul.f32 %v16295_v41, %v16295_v41  ;;  %v5494_v55 = vpop.f32.mrb[94].mxu1 }
 0xb90   : > { %13389 = vtanh.f32 %v5607_v12  ;;  %v5591_v54 = vadd.f32 %v5573_v21, %v16271_v28  ;;  %v5557_v59 = vmul.f32 %v5539_v2, %v16291_v62  ;;  %v16304_v37 = vadd.f32 %v5494_v55, %v16241_v60  ;;  %v5496_v50 = vpop.f32.mrb[95].mxu1 }
 0xb91   : > { %v5655_v22 = vmul.f32 0.5, %v5637_v42  ;;  %13391 = vtanh.f32 %v5608_v0  ;;  %v5592_v61 = vadd.f32 %v5574_v5, %v16279_v40  ;;  %v5558_v58 = vmul.f32 %v5540_v23, %v16295_v41 }
 0xb92   : > { %v13380_v18 = vpop.eup %13379  ;;  %v5609_v11 = vmul.f32 0.7978846, %v5591_v54  ;;  %v5575_v3 = vmul.f32 0.044715, %v5557_v59  ;;  %v5541_v9 = vmul.f32 %v16304_v37, %v16304_v37  ;;  %v16311_v26 = vadd.f32 %v5496_v50, %v16245_v57 }
 0xb93   : > { %v5673_v31 = vmul.f32 %v5655_v22, %v16191_v7  ;;  %v5639_v60 = vadd.f32 1.0, %v13380_v18  ;;  %v5610_v34 = vmul.f32 0.7978846, %v5592_v61  ;;  %v5576_v17 = vmul.f32 0.044715, %v5558_v58  ;;  %v5500_v4 = vpop.f32.mrb[96].mxu1  ;;  %v13382_v53 = vpop.eup %13381 }
 0xb94   : > { %13393 = vtanh.f32 %v5609_v11  ;;  %v5593_v30 = vadd.f32 %v5575_v3, %v16291_v62  ;;  %v5559_v63 = vmul.f32 %v5541_v9, %v16304_v37  ;;  %v5542_v47 = vmul.f32 %v16311_v26, %v16311_v26  ;;  %v5502_v19 = vpop.f32.mrb[97].mxu1 }
 0xb95   : > { %v5657_v36 = vmul.f32 0.5, %v5639_v60  ;;  %13395 = vtanh.f32 %v5610_v34  ;;  %v5594_v57 = vadd.f32 %v5576_v17, %v16295_v41  ;;  %v16320_v7 = vadd.f32 %v5500_v4, %v16255_v8  ;;  %v13384_v45 = vpop.eup %13383 }
 0xb96   : > { %v5611_v52 = vmul.f32 0.7978846, %v5593_v30  ;;  %v5577_v13 = vmul.f32 0.044715, %v5559_v63  ;;  %v5560_v24 = vmul.f32 %v5542_v47, %v16311_v26  ;;  %v16324_v25 = vadd.f32 %v5502_v19, %v16265_v35  ;;  %v13386_v38 = vpop.eup %13385 }
 0xb97   : > { %v5675_v14 = vmul.f32 %v5657_v36, %v16204_v27  ;;  %v5612_v15 = vmul.f32 0.7978846, %v5594_v57  ;;  %v5543_v46 = vmul.f32 %v16320_v7, %v16320_v7  ;;  %v5506_v29 = vpop.f32.mrb[98].mxu1  ;;  %v5638_v20 = vadd.f32 1.0, %v13382_v53  ;;  %v13388_v12 = vpop.eup %13387 }
 0xb98   : > { %13397 = vtanh.f32 %v5611_v52  ;;  %v5595_v8 = vadd.f32 %v5577_v13, %v16304_v37  ;;  %v5578_v21 = vmul.f32 0.044715, %v5560_v24  ;;  %v5544_v2 = vmul.f32 %v16324_v25, %v16324_v25  ;;  %v5508_v42 = vpop.f32.mrb[99].mxu1 }
 0xb99   : > { %13399 = vtanh.f32 %v5612_v15  ;;  %v5561_v35 = vmul.f32 %v5543_v46, %v16320_v7  ;;  %v16334_v27 = vadd.f32 %v5506_v29, %v16275_v48  ;;  %v16337_v0 = vadd.f32 %v5508_v42, %v16285_v6 }
 0xb9a   : > { %v13390_v5 = vpop.eup %13389  ;;  %v5613_v23 = vmul.f32 0.7978846, %v5595_v8  ;;  %v5596_v55 = vadd.f32 %v5578_v21, %v16311_v26  ;;  %v5562_v54 = vmul.f32 %v5544_v2, %v16324_v25  ;;  %v5640_v59 = vadd.f32 1.0, %v13384_v45 }
 0xb9b   : > { %v13392_v50 = vpop.eup %13391  ;;  %v5579_v22 = vmul.f32 0.044715, %v5561_v35  ;;  %v5545_v61 = vmul.f32 %v16334_v27, %v16334_v27  ;;  %v5546_v58 = vmul.f32 %v16337_v0, %v16337_v0  ;;  %v5656_v48 = vmul.f32 0.5, %v5638_v20 }
 0xb9c   : > { %13401 = vtanh.f32 %v5613_v23  ;;  %v5614_v18 = vmul.f32 0.7978846, %v5596_v55  ;;  %v5580_v6 = vmul.f32 0.044715, %v5562_v54  ;;  %v5658_v11 = vmul.f32 0.5, %v5640_v59 }
 0xb9d   : > { %v5597_v3 = vadd.f32 %v5579_v22, %v16320_v7  ;;  %v5563_v9 = vmul.f32 %v5545_v61, %v16334_v27  ;;  %v5564_v60 = vmul.f32 %v5546_v58, %v16337_v0  ;;  %v5674_v34 = vmul.f32 %v5656_v48, %v16193_v1 }
 0xb9e   : > { %v13394_v17 = vpop.eup %13393  ;;  %13403 = vtanh.f32 %v5614_v18  ;;  %v5598_v4 = vadd.f32 %v5580_v6, %v16324_v25  ;;  %v5676_v53 = vmul.f32 %v5658_v11, %v16209_v33  ;;  %v5691_v30 = vpack.c.bf16 %v5675_v14, %v5673_v31 }
 0xb9f   : > { %v13396_v63 = vpop.eup %13395  ;;  %v5615_v47 = vmul.f32 0.7978846, %v5597_v3  ;;  %v5581_v19 = vmul.f32 0.044715, %v5563_v9  ;;  %v5582_v36 = vmul.f32 0.044715, %v5564_v60 }
 0xba0   : > { %v5616_v57 = vmul.f32 0.7978846, %v5598_v4  ;;  %v5692_v45 = vpack.c.bf16 %v5676_v53, %v5674_v34  ;;  %v5642_v52 = vadd.f32 1.0, %v13388_v12  ;;  %v5644_v13 = vadd.f32 1.0, %v13392_v50 }
 0xba1   : > { %13405 = vtanh.f32 %v5615_v47  ;;  %v5599_v24 = vadd.f32 %v5581_v19, %v16334_v27  ;;  %v5600_v1 = vadd.f32 %v5582_v36, %v16337_v0  ;;  %v5641_v15 = vadd.f32 1.0, %v13386_v38 }
 0xba2   : > { %v13398_v46 = vpop.eup %13397  ;;  %13407 = vtanh.f32 %v5616_v57  ;;  %5939 = vmatprep.mubr.bf16.mxu0 %v5692_v45  ;;  %12628 = vmatprep.subr.bf16.mxu1 %v5692_v45  ;;  %v5660_v33 = vmul.f32 0.5, %v5642_v52  ;;  %v5662_v31 = vmul.f32 0.5, %v5644_v13  ;;  %v5643_v14 = vadd.f32 1.0, %v13390_v5 }
 0xba3   : > { %v13400_v29 = vpop.eup %13399  ;;  %v5617_v20 = vmul.f32 0.7978846, %v5599_v24  ;;  %v5618_v8 = vmul.f32 0.7978846, %v5600_v1  ;;  %5940 = vmatmul.mubr.bf16.vlgmr.msra.gmra.mrb[32].mxu0 %v5691_v30  ;;  %12630 = vmatpush1.bf16.msra.mxu1 %v5691_v30  ;;  %v5659_v12 = vmul.f32 0.5, %v5641_v15  ;;  %v5646_v21 = vadd.f32 1.0, %v13396_v63 }
 0xba4   : > { %v5678_v2 = vmul.f32 %v5660_v33, %v16234_v39  ;;  %v5680_v42 = vmul.f32 %v5662_v31, %v16259_v10  ;;  %v5661_v35 = vmul.f32 0.5, %v5643_v14  ;;  %v5648_v38 = vadd.f32 1.0, %v13400_v29 }
 0xba5   : > { %13409 = vtanh.f32 %v5617_v20  ;;  %v5677_v23 = vmul.f32 %v5659_v12, %v16227_v32  ;;  %v5664_v55 = vmul.f32 0.5, %v5646_v21  ;;  %v5645_v54 = vadd.f32 1.0, %v13394_v17 }
 0xba6   : > { %v13402_v59 = vpop.eup %13401  ;;  %13411 = vtanh.f32 %v5618_v8  ;;  %v5694_v5 = vpack.c.bf16 %v5680_v42, %v5678_v2  ;;  %v5679_v50 = vmul.f32 %v5661_v35, %v16251_v16  ;;  %v5666_v22 = vmul.f32 0.5, %v5648_v38 }
 0xba7   : > { %v5647_v61 = vadd.f32 1.0, %v13398_v46  ;;  %v5663_v58 = vmul.f32 0.5, %v5645_v54  ;;  %v5682_v10 = vmul.f32 %v5664_v55, %v16279_v40  ;;  %v5649_v6 = vadd.f32 1.0, %v13402_v59 }
 0xba8   : > { %v13404_v48 = vpop.eup %13403  ;;  %5949 = vmatprep.mubr.bf16.mxu0 %v5694_v5  ;;  %12632 = vmatprep.subr.bf16.mxu1 %v5694_v5  ;;  %v5693_v39 = vpack.c.bf16 %v5679_v50, %v5677_v23  ;;  %v5684_v18 = vmul.f32 %v5666_v22, %v16295_v41 }
 0xba9   : > { %v5665_v32 = vmul.f32 0.5, %v5647_v61  ;;  %v5650_v11 = vadd.f32 1.0, %v13404_v48  ;;  %v5681_v16 = vmul.f32 %v5663_v58, %v16271_v28  ;;  %v5667_v4 = vmul.f32 0.5, %v5649_v6 }
 0xbaa   : > { %12634 = vmatpush1.bf16.msra.mxu1 %v5693_v39  ;;  %v5696_v3 = vpack.c.bf16 %v5684_v18, %v5682_v10 }
 0xbab   : > { %v13406_v9 = vpop.eup %13405  ;;  %5950 = vmatmul.mubr.bf16.gmra.mrb[36].mxu0 %v5693_v39  ;;  %v5683_v60 = vmul.f32 %v5665_v32, %v16291_v62  ;;  %v5668_v30 = vmul.f32 0.5, %v5650_v11  ;;  %v5685_v57 = vmul.f32 %v5667_v4, %v16304_v37 }
 0xbac   : > { %v13408_v34 = vpop.eup %13407  ;;  %5959 = vmatprep.mubr.bf16.mxu0 %v5696_v3  ;;  %12636 = vmatprep.subr.bf16.mxu1 %v5696_v3  ;;  %v5651_v17 = vadd.f32 1.0, %v13406_v9 }
 0xbad   : > { %v5695_v53 = vpack.c.bf16 %v5683_v60, %v5681_v16  ;;  %v5652_v40 = vadd.f32 1.0, %v13408_v34  ;;  %v5686_v62 = vmul.f32 %v5668_v30, %v16311_v26  ;;  %v13534_v26 = vld [vmem:[%s18957_s19] sm:$0xff] }
 0xbae   : > { %v5669_v41 = vmul.f32 0.5, %v5651_v17 }
 0xbaf   : > { %v13410_v63 = vpop.eup %13409  ;;  %12638 = vmatpush1.bf16.msra.mxu1 %v5695_v53  ;;  %v5670_v47 = vmul.f32 0.5, %v5652_v40 }
 0xbb0   : > { %v13412_v19 = vpop.eup %13411  ;;  %v5653_v36 = vadd.f32 1.0, %v13410_v63  ;;  %v5687_v28 = vmul.f32 %v5669_v41, %v16320_v7 }
 0xbb1   : > { %v5688_v45 = vmul.f32 %v5670_v47, %v16324_v25  ;;  %v5654_v52 = vadd.f32 1.0, %v13412_v19  ;;  %v13535_v25 = vld [vmem:[%s18957_s19 + $0x8] sm:$0xff] }
 0xbb2   : > { %v5671_v13 = vmul.f32 0.5, %v5653_v36  ;;  %v5697_v24 = vpack.c.bf16 %v5687_v28, %v5685_v57 }
 0xbb3   : > { %5960 = vmatmul.mubr.bf16.gmra.mrb[40].mxu0 %v5695_v53  ;;  %v5698_v1 = vpack.c.bf16 %v5688_v45, %v5686_v62  ;;  %v5672_v15 = vmul.f32 0.5, %v5654_v52 }
 0xbb4   : > { %v5689_v46 = vmul.f32 %v5671_v13, %v16334_v27 }
 0xbb5   : > { %5969 = vmatprep.mubr.bf16.mxu0 %v5698_v1  ;;  %12640 = vmatprep.subr.bf16.mxu1 %v5698_v1  ;;  %v5690_v33 = vmul.f32 %v5672_v15, %v16337_v0 }
 0xbb6   : > { %v5699_v31 = vpack.c.bf16 %v5689_v46, %v5689_v46  ;;  %12642 = vmatpush1.bf16.msra.mxu1 %v5697_v24 }
 0xbb7   : > { %v5700_v37 = vpack.c.bf16 %v5690_v33, %v5690_v33 }
 0xbb8   : > { %v6004_v14 = vunpack.c.l.bf16 %v5699_v31 }
 0xbb9   : > { %v6005_v7 = vunpack.c.l.bf16 %v5700_v37 }
 0xbbb   : > { %5970 = vmatmul.mubr.bf16.gmra.mrb[44].mxu0 %v5697_v24  ;;  %6022 = vmatprep.subr.mxu1 %v6005_v7 }
 0xbbc   : > { %5979 = vmatprep.mubr.bf16.mxu0 %v5700_v37  ;;  %6023 = vmatpush1.msra.mxu1 %v6004_v14 }
 0xbbd   : > { %11290 = vmatmul.mubr.msk.f32.vlgmr.msra.gmra.mrb[100].mxu1 %vm19128_vm4, %v13534_v26  ;;  %12643 = vmatprep.subr.bf16.mxu1 %v18975_v51  ;;  %vm19155_vm4 = vcmask 1046528  }
 0xbbe   : > { %6076 = vmatprep.mubr.f32.mxu1 %v18977_v44 }
 0xbc1   : > { %11291 = vmatmul.mubr.msk.f32.gmra.mrb[102].mxu1 %vm19129_vm5, %v13535_v25  ;;  %vm19156_vm5 = vmmov %vm19150_vm7 }
 0xbc2   : > { %12034 = vmatprep.mubr.msk.f32.mxu1 %vm13632_vm2, %v18977_v44 }
 0xbc3   : > { %5980 = vmatmul.mubr.bf16.gmra.mrb[48].mxu0 %v5699_v31 }
 0xbc4   : > { %12110 = vmatprep.mubr.msk.f32.mxu0 %vm13632_vm2, %v18977_v44 }
 0xc76   : > { %v16381_v27 = vpop.f32.mrb[32].mxu0 }
 0xc77   : > { %19130 = vst [vmem:[#allocation31_spill] sm:$0xff] %v16381_v27  ;;  %v16383_v0 = vpop.f32.mrb[33].mxu0 }
 0xc78   : > { %19131 = vst [vmem:[#allocation30_spill] sm:$0xff] %v16383_v0  ;;  %v16385_v29 = vpop.f32.mrb[34].mxu0 }
 0xc79   : > { %19132 = vst [vmem:[#allocation29_spill] sm:$0xff] %v16385_v29  ;;  %v16387_v20 = vpop.f32.mrb[35].mxu0 }
 0xc7a   : > { %19133 = vst [vmem:[#allocation28_spill] sm:$0xff] %v16387_v20 }
 0xc7e   : > { %v16389_v8 = vpop.f32.mrb[36].mxu0 }
 0xc7f   : > { %19134 = vst [vmem:[#allocation12_spill] sm:$0xff] %v16389_v8  ;;  %v16391_v12 = vpop.f32.mrb[37].mxu0 }
 0xc80   : > { %19135 = vst [vmem:[#allocation13_spill] sm:$0xff] %v16391_v12  ;;  %v16393_v21 = vpop.f32.mrb[38].mxu0 }
 0xc81   : > { %19136 = vst [vmem:[#allocation14_spill] sm:$0xff] %v16393_v21  ;;  %v16395_v2 = vpop.f32.mrb[39].mxu0 }
 0xc82   : > { %19137 = vst [vmem:[#allocation15_spill] sm:$0xff] %v16395_v2 }
 0xc86   : > { %v16397_v42 = vpop.f32.mrb[40].mxu0 }
 0xc87   : > { %19138 = vst [vmem:[#allocation16_spill] sm:$0xff] %v16397_v42  ;;  %v16399_v35 = vpop.f32.mrb[41].mxu0 }
 0xc88   : > { %19139 = vst [vmem:[#allocation17_spill] sm:$0xff] %v16399_v35  ;;  %v16401_v38 = vpop.f32.mrb[42].mxu0 }
 0xc89   : > { %19140 = vst [vmem:[#allocation18_spill] sm:$0xff] %v16401_v38  ;;  %v16403_v23 = vpop.f32.mrb[43].mxu0  ;;  %v6890_v38 = vld [vmem:[#allocation3 + $0x430] sm:$0xff] }
 0xc8a   : > { %19141 = vst [vmem:[#allocation19_spill] sm:$0xff] %v16403_v23  ;;  %v6889_v23 = vld [vmem:[#allocation3 + $0x428] sm:$0xff] }
 0xc8e   : > { %v16405_v55 = vpop.f32.mrb[44].mxu0 }
 0xc8f   : > { %19142 = vst [vmem:[#allocation20_spill] sm:$0xff] %v16405_v55  ;;  %v16407_v54 = vpop.f32.mrb[45].mxu0  ;;  %v6888_v55 = vld [vmem:[#allocation3 + $0x420] sm:$0xff] }
 0xc90   : > { %19143 = vst [vmem:[#allocation21_spill] sm:$0xff] %v16407_v54  ;;  %v16409_v59 = vpop.f32.mrb[46].mxu0  ;;  %v16411_v5 = vpop.f32.mrb[100].mxu1  ;;  %v6886_v54 = vld [vmem:[#allocation3 + $0x410] sm:$0xff] }
 0xc91   : > { %19144 = vst [vmem:[#allocation22_spill] sm:$0xff] %v16409_v59  ;;  %v16413_v50 = vpop.f32.mrb[47].mxu0  ;;  %v6092_v22 = vrot.slane %v16411_v5, %v13982_v49  ;;  %v16417_v61 = vpop.f32.mrb[101].mxu1 }
 0xc92   : > { %19145 = vst [vmem:[#allocation23_spill] sm:$0xff] %v16413_v50  ;;  %v6208_v48 = vrot.slane %v16417_v61, %v13982_v49 }
 0xc93   : > { %v16420_v58 = vrot.slane %v6092_v22, %v13982_v49  ;;  %v6100_v16 = vcombine.high %v6092_v22, %v6092_v22 }
 0xc94   : > { %v6078_v39 = vpop.f32.mrb[102].mxu1  ;;  %v6224_v32 = vrot.slane %v6208_v48, %v13982_v49  ;;  %v6216_v53 = vcombine.high %v6208_v48, %v6208_v48 }
 0xc95   : > { %v16424_v10 = vpop.f32.mrb[103].mxu1  ;;  %v6302_v11 = vrot.slane %v16420_v58, %v13930_v43  ;;  %v16442_v34 = vrot.slane %v6100_v16, %v13982_v49  ;;  %v16450_v17 = vcombine.high %v16420_v58, %v16420_v58  ;;  %v6141_v41 = vrot.slane %v6078_v39, %v13982_v49 }
 0xc96   : > { %v16426_v18 = vpop.f32.mrb[48].mxu0  ;;  %v16436_v60 = vrot.slane %v6224_v32, %v13930_v43  ;;  %v16461_v30 = vrot.slane %v6216_v53, %v13982_v49  ;;  %v6246_v63 = vcombine.high %v6224_v32, %v6224_v32  ;;  %v6257_v28 = vrot.slane %v16424_v10, %v13982_v49 }
 0xc97   : > { %19146 = vst [vmem:[#allocation24_spill] sm:$0xff] %v16426_v18  ;;  %v16428_v6 = vpop.f32.mrb[49].mxu0  ;;  %6411 = vrot.lane.b32.xlu1 %v6302_v11, %s13629_s22  ;;  %6363 = vrot.lane.b32.xlu0 %v6302_v11, %s13630_s23  ;;  %v6306_v4 = vrot.slane %v16442_v34, %v13930_v43  ;;  %v6310_v40 = vrot.slane %v16450_v17, %v13930_v43 }
 0xc98   : > { %19147 = vst [vmem:[#allocation25_spill] sm:$0xff] %v16428_v6  ;;  %v5985_v3 = vpop.f32.mrb[50].mxu0  ;;  %v16468_v47 = vrot.slane %v16461_v30, %v13930_v43  ;;  %v16475_v19 = vrot.slane %v6141_v41, %v13982_v49  ;;  %v16478_v36 = vrot.slane %v6246_v63, %v13930_v43  ;;  %v6149_v62 = vcombine.high %v6141_v41, %v6141_v41 }
 0xc99   : > { %v5986_v9 = vpop.f32.mrb[51].mxu0  ;;  %v6273_v45 = vrot.slane %v6257_v28, %v13982_v49  ;;  %v6134_v24 = vcombine.high %v6078_v39, %v6078_v39  ;;  %v6265_v31 = vcombine.high %v6257_v28, %v6257_v28  ;;  %v6250_v25 = vcombine.high %v16424_v10, %v16424_v10 }
 0xc9a   : > { %v6334_v57 = vrot.slane %v16475_v19, %v13930_v43  ;;  %v16495_v52 = vrot.slane %v6149_v62, %v13982_v49  ;;  %v16512_v46 = vcombine.high %v16475_v19, %v16475_v19  ;;  %v6248_v6 = vcombine.high %v16461_v30, %v16461_v30 }
 0xc9b   : > { %6459 = vrot.lane.b32.xlu0 %v6302_v11, %s13631_s25  ;;  %6587 = vrot.lane.b32.xlu1 %v16436_v60, %s13630_s23  ;;  %v16498_v13 = vrot.slane %v6273_v45, %v13930_v43  ;;  %v6148_v15 = vrot.slane %v6134_v24, %v13982_v49  ;;  %v6287_v7 = vrot.slane %v6265_v31, %v13982_v49 }
 0xc9c   : > { %v6338_v1 = vrot.slane %v16495_v52, %v13930_v43  ;;  %v6342_v37 = vrot.slane %v16512_v46, %v13930_v43  ;;  %v6295_v22 = vcombine.high %v6273_v45, %v6273_v45  ;;  %v6264_v48 = vrot.slane %v6250_v25, %v13982_v49 }
 0xc9d   : > { %v16517_v33 = vrot.slane %v6148_v15, %v13982_v49  ;;  %v16529_v26 = vrot.slane %v6287_v7, %v13930_v43  ;;  %v16550_v10 = vcombine.high %v16495_v52, %v16495_v52  ;;  %v6150_v11 = vcombine.high %v6148_v15, %v6148_v15 }
 0xc9e   : > { %v16541_v39 = vrot.slane %v6295_v22, %v13930_v43  ;;  %v6280_v32 = vrot.slane %v6264_v48, %v13982_v49  ;;  %v6266_v41 = vcombine.high %v6264_v48, %v6264_v48  ;;  %v6297_v63 = vcombine.high %v6287_v7, %v6287_v7 }
 0xc9f   : > { %6683 = vrot.lane.b32.xlu0 %v16436_v60, %s13631_s25  ;;  %6635 = vrot.lane.b32.xlu1 %v16436_v60, %s13629_s22  ;;  %v6350_v14 = vrot.slane %v16517_v33, %v13930_v43  ;;  %v6346_v3 = vrot.slane %v16550_v10, %v13930_v43  ;;  %v16565_v16 = vrot.slane %v6150_v11, %v13982_v49 }
 0xca0   : > { %v16559_v9 = vrot.slane %v6280_v32, %v13930_v43  ;;  %v16577_v53 = vcombine.high %v16517_v33, %v16517_v33  ;;  %v16589_v28 = vrot.slane %v6297_v63, %v13930_v43  ;;  %v6296_v15 = vcombine.high %v6280_v32, %v6280_v32  ;;  %v6884_v63 = vld [vmem:[#allocation3 + $0x400] sm:$0xff] }
 0xca1   : > { %v16600_v45 = vcombine.high %v16565_v16, %v16565_v16 }
 0xca3   : > { %6413 = vrot.lane.b32.xlu0 %v6306_v4, %s13629_s22  ;;  %6365 = vrot.lane.b32.xlu1 %v6306_v4, %s13630_s23  ;;  %v6362_v24 = vrot.slane %v16600_v45, %v13930_v43 }
 0xca7   : > { %6367 = vrot.lane.b32.xlu0 %v6310_v40, %s13630_s23  ;;  %6461 = vrot.lane.b32.xlu1 %v6306_v4, %s13631_s25  ;;  %v6354_v4 = vrot.slane %v16565_v16, %v13930_v43 }
 0xcab   : > { %6463 = vrot.lane.b32.xlu0 %v6310_v40, %s13631_s25  ;;  %6415 = vrot.lane.b32.xlu1 %v6310_v40, %s13629_s22  ;;  %v6358_v40 = vrot.slane %v16577_v53, %v13930_v43 }
 0xcaf   : > { %6637 = vrot.lane.b32.xlu0 %v16468_v47, %s13629_s22  ;;  %6589 = vrot.lane.b32.xlu1 %v16468_v47, %s13630_s23 }
 0xcb3   : > { %6639 = vrot.lane.b32.xlu0 %v16478_v36, %s13629_s22  ;;  %6685 = vrot.lane.b32.xlu1 %v16468_v47, %s13631_s25 }
 0xcb7   : > { %6591 = vrot.lane.b32.xlu1 %v16478_v36, %s13630_s23  ;;  %6379 = vrot.lane.b32.xlu0 %v6334_v57, %s13630_s23 }
 0xcbb   : > { %6427 = vrot.lane.b32.xlu1 %v6334_v57, %s13629_s22  ;;  %6475 = vrot.lane.b32.xlu0 %v6334_v57, %s13631_s25  ;;  %v6294_v57 = vrot.slane %v6266_v41, %v13982_v49  ;;  %v16654_v41 = vcombine.high %v16442_v34, %v16442_v34 }
 0xcbd   : > { %v16596_v62 = vrot.slane %v6294_v57, %v13930_v43  ;;  %19148 = vst [vmem:[#allocation26_spill] sm:$0xff] %v16654_v41  ;;  %v6314_v59 = vrot.slane %v16654_v41, %v13930_v43 }
 0xcbf   : > { %6651 = vrot.lane.b32.xlu0 %v16498_v13, %s13629_s22  ;;  %6603 = vrot.lane.b32.xlu1 %v16498_v13, %s13630_s23 }
 0xcc3   : > { %6381 = vrot.lane.b32.xlu0 %v6338_v1, %s13630_s23  ;;  %6699 = vrot.lane.b32.xlu1 %v16498_v13, %s13631_s25 }
 0xcc7   : > { %6477 = vrot.lane.b32.xlu0 %v6338_v1, %s13631_s25  ;;  %6429 = vrot.lane.b32.xlu1 %v6338_v1, %s13629_s22  ;;  %v6298_v1 = vcombine.high %v6294_v57, %v6294_v57  ;;  %v6885_v57 = vld [vmem:[#allocation3 + $0x408] sm:$0xff] }
 0xcc9   : > { %v16612_v31 = vrot.slane %v6298_v1, %v13930_v43  ;;  %v12644_v1 = vpack.c.bf16 %v6885_v57, %v6884_v63  ;;  %v6887_v63 = vld [vmem:[#allocation3 + $0x418] sm:$0xff] }
 0xccb   : > { %6383 = vrot.lane.b32.xlu0 %v6342_v37, %s13630_s23  ;;  %6431 = vrot.lane.b32.xlu1 %v6342_v37, %s13629_s22 }
 0xccc   : > { %12645 = vmatpush3.bf16.msra.mxu1 %v12644_v1  ;;  %v16677_v1 = vrot.slane %v6248_v6, %v13930_v43 }
 0xccd   : > { %12646 = vmatprep.subr.bf16.mxu1 %v18975_v51 }
 0xccf   : > { %6479 = vrot.lane.b32.xlu0 %v6342_v37, %s13631_s25  ;;  %6435 = vrot.lane.b32.xlu1 %v6350_v14, %s13629_s22 }
 0xcd3   : > { %6387 = vrot.lane.b32.xlu0 %v6350_v14, %s13630_s23  ;;  %6605 = vrot.lane.b32.xlu1 %v16529_v26, %s13630_s23 }
 0xcd7   : > { %6483 = vrot.lane.b32.xlu0 %v6350_v14, %s13631_s25  ;;  %6701 = vrot.lane.b32.xlu1 %v16529_v26, %s13631_s25  ;;  %v16623_v14 = vrot.slane %v6296_v15, %v13930_v43  ;;  %v6085_v15 = vcombine.high %v16411_v5, %v16411_v5 }
 0xcd9   : > { %v16670_v57 = vrot.slane %v6085_v15, %v13982_v49 }
 0xcdb   : > { %6653 = vrot.lane.b32.xlu0 %v16529_v26, %s13629_s22  ;;  %6607 = vrot.lane.b32.xlu1 %v16541_v39, %s13630_s23  ;;  %v16684_v15 = vrot.slane %v16670_v57, %v13982_v49 }
 0xcdf   : > { %6655 = vrot.lane.b32.xlu0 %v16541_v39, %s13629_s22  ;;  %6703 = vrot.lane.b32.xlu1 %v16541_v39, %s13631_s25 }
 0xce3   : > { %6385 = vrot.lane.b32.xlu0 %v6346_v3, %s13630_s23  ;;  %6611 = vrot.lane.b32.xlu1 %v16559_v9, %s13630_s23 }
 0xce7   : > { %6481 = vrot.lane.b32.xlu0 %v6346_v3, %s13631_s25  ;;  %6659 = vrot.lane.b32.xlu1 %v16559_v9, %s13629_s22 }
 0xceb   : > { %6389 = vrot.lane.b32.xlu0 %v6354_v4, %s13630_s23  ;;  %6707 = vrot.lane.b32.xlu1 %v16559_v9, %s13631_s25 }
 0xcef   : > { %6485 = vrot.lane.b32.xlu0 %v6354_v4, %s13631_s25  ;;  %6433 = vrot.lane.b32.xlu1 %v6346_v3, %s13629_s22 }
 0xcf3   : > { %6391 = vrot.lane.b32.xlu0 %v6358_v40, %s13630_s23  ;;  %6437 = vrot.lane.b32.xlu1 %v6354_v4, %s13629_s22 }
 0xcf7   : > { %6487 = vrot.lane.b32.xlu0 %v6358_v40, %s13631_s25  ;;  %6439 = vrot.lane.b32.xlu1 %v6358_v40, %s13629_s22 }
 0xcfb   : > { %6657 = vrot.lane.b32.xlu0 %v16589_v28, %s13629_s22  ;;  %6609 = vrot.lane.b32.xlu1 %v16589_v28, %s13630_s23 }
 0xcff   : > { %6705 = vrot.lane.b32.xlu1 %v16589_v28, %s13631_s25  ;;  %6613 = vrot.lane.b32.xlu0 %v16596_v62, %s13630_s23 }
 0xd03   : > { %6441 = vrot.lane.b32.xlu1 %v6362_v24, %s13629_s22  ;;  %6661 = vrot.lane.b32.xlu0 %v16596_v62, %s13629_s22 }
 0xd07   : > { %6709 = vrot.lane.b32.xlu0 %v16596_v62, %s13631_s25  ;;  %6617 = vrot.lane.b32.xlu1 %v16612_v31, %s13630_s23 }
 0xd09   : > { %v16618_v37 = vpop.permute.xlu1 %6411  ;;  %v16620_v7 = vpop.permute.xlu0 %6363 }
 0xd0b   : > { %6615 = vrot.lane.b32.xlu0 %v16623_v14, %s13630_s23  ;;  %6665 = vrot.lane.b32.xlu1 %v16612_v31, %s13629_s22 }
 0xd0d   : > { %v16629_v25 = vpop.permute.xlu0 %6459  ;;  %v16631_v22 = vpop.permute.xlu1 %6587 }
 0xd0f   : > { %6663 = vrot.lane.b32.xlu0 %v16623_v14, %s13629_s22  ;;  %6713 = vrot.lane.b32.xlu1 %v16612_v31, %s13631_s25 }
 0xd11   : > { %v16637_v48 = vpop.permute.xlu0 %6683  ;;  %v16639_v32 = vpop.permute.xlu1 %6635 }
 0xd13   : > { %6711 = vrot.lane.b32.xlu0 %v16623_v14, %s13631_s25 }
 0xd15   : > { %v16643_v11 = vpop.permute.xlu0 %6413  ;;  %v16645_v3 = vpop.permute.xlu1 %6365 }
 0xd17   : > { %6393 = vrot.lane.b32.xlu0 %v6362_v24, %s13630_s23 }
 0xd19   : > { %v16648_v4 = vpop.permute.xlu0 %6367  ;;  %v16650_v40 = vpop.permute.xlu1 %6461 }
 0xd1b   : > { %6489 = vrot.lane.b32.xlu0 %v6362_v24, %s13631_s25  ;;  %v12647_v24 = vpack.c.bf16 %v6887_v63, %v6886_v54  ;;  %v12650_v54 = vpack.c.bf16 %v6889_v23, %v6888_v55  ;;  %v6891_v63 = vld [vmem:[#allocation3 + $0x438] sm:$0xff]  ;;  %v16697_v23 = vrot.slane %v16684_v15, %v13930_v43 }
 0xd1c   : > { %v12653_v6 = vpack.c.bf16 %v6891_v63, %v6890_v38 }
 0xd1d   : > { %v16661_v18 = vpop.permute.xlu0 %6463  ;;  %v16663_v50 = vpop.permute.xlu1 %6415  ;;  %12648 = vmatpush3.bf16.msra.mxu1 %v12647_v24 }
 0xd1e   : > { %12649 = vmatprep.subr.bf16.mxu1 %v18975_v51 }
 0xd1f   : > { %6417 = vrot.lane.b32.xlu0 %v6314_v59, %s13629_s22 }
 0xd21   : > { %v16672_v5 = vpop.permute.xlu0 %6637  ;;  %v16674_v30 = vpop.permute.xlu1 %6589  ;;  %12651 = vmatpush3.bf16.msra.mxu1 %v12650_v54 }
 0xd22   : > { %12652 = vmatprep.subr.bf16.mxu1 %v18975_v51 }
 0xd23   : > { %6593 = vrot.lane.b32.xlu0 %v16677_v1, %s13630_s23 }
 0xd25   : > { %v16686_v35 = vpop.permute.xlu0 %6639  ;;  %v16688_v42 = vpop.permute.xlu1 %6685  ;;  %12654 = vmatpush3.bf16.msra.mxu1 %v12653_v6 }
 0xd26   : > { %19149 = vst [vmem:[#allocation27_spill] sm:$0xff] %v16686_v35  ;;  %12655 = vmatprep.subr.bf16.mxu1 %v18975_v51 }
 0xd27   : > { %6689 = vrot.lane.b32.xlu0 %v16677_v1, %s13631_s25 }
 0xd29   : > { %v16693_v24 = vpop.permute.xlu1 %6591  ;;  %v6380_v2 = vpop.permute.xlu0 %6379 }
 0xd2a   : > { %v6739_v38 = vsel %vm1808_vm3, %v16475_v19, %v6380_v2 }
 0xd2b   : > { %6371 = vrot.lane.b32.xlu0 %v16697_v23, %s13630_s23 }
 0xd2d   : > { %v6428_v55 = vpop.permute.xlu1 %6427  ;;  %v6476_v54 = vpop.permute.xlu0 %6475 }
 0xd2e   : > { %v6755_v63 = vsel %vm19150_vm7, %v6739_v38, %v6428_v55  ;;  %vm19157_vm7 = vmmov %vm19151_vm0 }
 0xd2f   : > { %v6771_v21 = vsel %vm19151_vm0, %v6755_v63, %v6476_v54  ;;  %6419 = vrot.lane.b32.xlu0 %v16697_v23, %s13629_s22  ;;  %vm19158_vm0 = vmmov %vm19156_vm5 }
 0xd30   : > { %v6787_v6 = vsel %vm19152_vm1, %v6771_v21, %v16498_v13 }
 0xd31   : > { %v6652_v12 = vpop.permute.xlu0 %6651  ;;  %v6604_v8 = vpop.permute.xlu1 %6603 }
 0xd32   : > { %v6803_v20 = vsel %vm19153_vm8, %v6787_v6, %v6604_v8  ;;  %vm19159_vm8 = vmmov %vm19157_vm7 }
 0xd33   : > { %v6819_v2 = vsel %vm19154_vm6, %v6803_v20, %v6652_v12  ;;  %vm19160_vm6 = vcmask 1044480  }
 0xd35   : > { %v6382_v29 = vpop.permute.xlu0 %6381  ;;  %v6700_v0 = vpop.permute.xlu1 %6699 }
 0xd36   : > { %v6835_v19 = vsel %vm19155_vm4, %v6819_v2, %v6700_v0  ;;  %v6740_v20 = vsel %vm1808_vm3, %v16495_v52, %v6382_v29  ;;  %vm19161_vm4 = vcmask 1045504  }
 0xd37   : > { %6851 = vrot.lane.b32.xlu1 %v6835_v19, %s13631_s25 }
 0xd39   : > { %v6478_v38 = vpop.permute.xlu0 %6477  ;;  %v6430_v55 = vpop.permute.xlu1 %6429 }
 0xd3a   : > { %v6756_v12 = vsel %vm19156_vm5, %v6740_v20, %v6430_v55  ;;  %vm19162_vm5 = vcmask 1046528   ;;  %v6916_v20 = vld [vmem:[#allocation3 + $0x500] sm:$0xff] }
 0xd3b   : > { %6687 = vrot.lane.b32.xlu1 %v16478_v36, %s13631_s25  ;;  %v6772_v6 = vsel %vm19157_vm7, %v6756_v12, %v6478_v38  ;;  %v6101_v38 = vcombine.high %v16670_v57, %v16670_v57  ;;  %vm19163_vm7 = vmmov %vm19152_vm1 }
 0xd3d   : > { %v6384_v54 = vpop.permute.xlu0 %6383  ;;  %v6432_v63 = vpop.permute.xlu1 %6431  ;;  %v16746_v57 = vrot.slane %v6101_v38, %v13982_v49  ;;  %v6920_v38 = vld [vmem:[#allocation3 + $0x520] sm:$0xff] }
 0xd3e   : > { %v6741_v2 = vsel %vm1808_vm3, %v16512_v46, %v6384_v54  ;;  %v6201_v46 = vcombine.high %v16417_v61, %v16417_v61 }
 0xd3f   : > { %6369 = vrot.lane.b32.xlu1 %v6314_v59, %s13630_s23  ;;  %v6757_v56 = vsel %vm19158_vm0, %v6741_v2, %v6432_v63  ;;  %vm19164_vm0 = vmmov %vm19160_vm6 }
 0xd40   : > { %v6215_v61 = vrot.slane %v6201_v46, %v13982_v49  ;;  %v6921_v46 = vld [vmem:[#allocation3 + $0x528] sm:$0xff] }
 0xd41   : > { %v6480_v21 = vpop.permute.xlu0 %6479  ;;  %v16717_v13 = vpop.permute.xlu1 %6435 }
 0xd42   : > { %v6773_v29 = vsel %vm19159_vm8, %v6757_v56, %v6480_v21  ;;  %vm19166_vm8 = vmmov %vm19162_vm5 }
 0xd43   : > { %6465 = vrot.lane.b32.xlu1 %v6314_v59, %s13631_s25  ;;  %v6788_v59 = vsel %vm19152_vm1, %v6772_v6, %v16529_v26  ;;  %v6789_v63 = vsel %vm19163_vm7, %v6773_v29, %v16541_v39  ;;  %vm19165_vm1 = vmmov %vm19161_vm4  ;;  %v6919_v39 = vld [vmem:[#allocation3 + $0x518] sm:$0xff]  ;;  %v16755_v29 = vrot.slane %v6215_v61, %v13982_v49 }
 0xd45   : > { %v16722_v0 = vpop.permute.xlu0 %6387  ;;  %v6606_v8 = vpop.permute.xlu1 %6605 }
 0xd46   : > { %v6804_v52 = vsel %vm19160_vm6, %v6788_v59, %v6606_v8  ;;  %v6917_v8 = vld [vmem:[#allocation3 + $0x508] sm:$0xff]  ;;  %vm19167_vm6 = vcmask 1041408  }
 0xd47   : > { %v12692_v12 = vpack.c.bf16 %v6917_v8, %v6916_v20 }
 0xd49   : > { %v16728_v19 = vpop.permute.xlu0 %6483  ;;  %v6702_v27 = vpop.permute.xlu1 %6701  ;;  %12693 = vmatpush3.bf16.msra.mxu0 %v12692_v12 }
 0xd4a   : > { %12694 = vmatprep.subr.bf16.mxu0 %v18975_v51 }
 0xd4d   : > { %v6654_v41 = vpop.permute.xlu0 %6653  ;;  %v6608_v35 = vpop.permute.xlu1 %6607 }
 0xd4e   : > { %v6820_v55 = vsel %vm19161_vm4, %v6804_v52, %v6654_v41  ;;  %v6805_v56 = vsel %vm19164_vm0, %v6789_v63, %v6608_v35  ;;  %v6918_v35 = vld [vmem:[#allocation3 + $0x510] sm:$0xff]  ;;  %v6322_v52 = vrot.slane %v16746_v57, %v13930_v43  ;;  %v12698_v63 = vpack.c.bf16 %v6921_v46, %v6920_v38 }
 0xd4f   : > { %v6836_v54 = vsel %vm19162_vm5, %v6820_v55, %v6702_v27  ;;  %v12695_v59 = vpack.c.bf16 %v6919_v39, %v6918_v35  ;;  %vm19168_vm4 = vcmask 1042432   ;;  %vm19169_vm5 = vmmov %vm19167_vm6 }
 0xd50   : > { %6853 = vrot.lane.b32.xlu1 %v6836_v54, %s13631_s25 }
 0xd51   : > { %v6656_v26 = vpop.permute.xlu0 %6655  ;;  %v6704_v21 = vpop.permute.xlu1 %6703  ;;  %12696 = vmatpush3.bf16.msra.mxu0 %v12695_v59  ;;  %v16787_v59 = vcombine.high %v16684_v15, %v16684_v15 }
 0xd52   : > { %v6821_v41 = vsel %vm19165_vm1, %v6805_v56, %v6656_v26  ;;  %v6217_v56 = vcombine.high %v6215_v61, %v6215_v61  ;;  %v16765_v26 = vrot.slane %v16755_v29, %v13930_v43  ;;  %12697 = vmatprep.subr.bf16.mxu0 %v18975_v51  ;;  %v6743_v61 = vsel %vm1808_vm3, %v16517_v33, %v16722_v0 }
 0xd53   : > { %v6837_v27 = vsel %vm19166_vm8, %v6821_v41, %v6704_v21  ;;  %v6922_v21 = vld [vmem:[#allocation3 + $0x530] sm:$0xff]  ;;  %vm19170_vm8 = vmmov %vm19168_vm4 }
 0xd54   : > { %6855 = vrot.lane.b32.xlu0 %v6837_v27, %s13631_s25  ;;  %6641 = vrot.lane.b32.xlu1 %v16677_v1, %s13629_s22  ;;  %v16772_v12 = vrot.slane %v6217_v56, %v13982_v49 }
 0xd55   : > { %v6386_v6 = vpop.permute.xlu0 %6385  ;;  %v6612_v2 = vpop.permute.xlu1 %6611  ;;  %12699 = vmatpush3.bf16.msra.mxu0 %v12698_v63  ;;  %v6326_v63 = vrot.slane %v16787_v59, %v13930_v43 }
 0xd56   : > { %12700 = vmatprep.subr.bf16.mxu0 %v18975_v51  ;;  %v16783_v39 = vrot.slane %v16772_v12, %v13930_v43  ;;  %v6742_v46 = vsel %vm1808_vm3, %v16550_v10, %v6386_v6 }
 0xd58   : > { %6467 = vrot.lane.b32.xlu0 %v16697_v23, %s13631_s25  ;;  %6373 = vrot.lane.b32.xlu1 %v6322_v52, %s13630_s23  ;;  %v6923_v23 = vld [vmem:[#allocation3 + $0x538] sm:$0xff] }
 0xd59   : > { %v6482_v55 = vpop.permute.xlu0 %6481  ;;  %v6660_v54 = vpop.permute.xlu1 %6659  ;;  %v12701_v41 = vpack.c.bf16 %v6923_v23, %v6922_v21 }
 0xd5b   : > { %12702 = vmatpush3.bf16.msra.mxu0 %v12701_v41 }
 0xd5c   : > { %6595 = vrot.lane.b32.xlu0 %v16765_v26, %s13630_s23  ;;  %6421 = vrot.lane.b32.xlu1 %v6322_v52, %s13629_s22 }
 0xd5d   : > { %v6390_v20 = vpop.permute.xlu0 %6389  ;;  %v6708_v8 = vpop.permute.xlu1 %6707  ;;  %12715 = vmatprep.subr.bf16.mxu0 %v18975_v51 }
 0xd60   : > { %6643 = vrot.lane.b32.xlu0 %v16765_v26, %s13629_s22  ;;  %6469 = vrot.lane.b32.xlu1 %v6322_v52, %s13631_s25  ;;  %v6759_v52 = vsel %vm19167_vm6, %v6743_v61, %v16717_v13  ;;  %vm19171_vm6 = vcmask 1046528  }
 0xd61   : > { %v6486_v27 = vpop.permute.xlu0 %6485  ;;  %v6434_v35 = vpop.permute.xlu1 %6433  ;;  %v6775_v33 = vsel %vm19168_vm4, %v6759_v52, %v16728_v19  ;;  %vm19172_vm4 = vmmov %vm19163_vm7 }
 0xd62   : > { %v6758_v56 = vsel %vm19169_vm5, %v6742_v46, %v6434_v35  ;;  %v6791_v13 = vsel %vm19163_vm7, %v6775_v33, %v16559_v9  ;;  %vm19173_vm5 = vmmov %vm19164_vm0  ;;  %v6247_v33 = vcombine.high %v16755_v29, %v16755_v29 }
 0xd63   : > { %v6807_v19 = vsel %vm19164_vm0, %v6791_v13, %v6612_v2  ;;  %v6774_v10 = vsel %vm19170_vm8, %v6758_v56, %v6482_v55  ;;  %vm19174_vm7 = vmmov %vm19165_vm1 }
 0xd64   : > { %6691 = vrot.lane.b32.xlu0 %v16765_v26, %s13631_s25  ;;  %6597 = vrot.lane.b32.xlu1 %v16783_v39, %s13630_s23  ;;  %v6823_v41 = vsel %vm19165_vm1, %v6807_v19, %v6660_v54  ;;  %v6790_v61 = vsel %vm19172_vm4, %v6774_v10, %v16589_v28  ;;  %vm19175_vm0 = vmmov %vm19171_vm6  ;;  %v16832_v13 = vrot.slane %v6247_v33, %v13930_v43  ;;  %vm19176_vm1 = vcmask 1041408  }
 0xd65   : > { %v6392_v0 = vpop.permute.xlu0 %6391  ;;  %v6438_v38 = vpop.permute.xlu1 %6437  ;;  %v6839_v6 = vsel %vm19171_vm6, %v6823_v41, %v6708_v8  ;;  %v16822_v8 = vcombine.high %v16746_v57, %v16746_v57  ;;  %v6744_v19 = vsel %vm1808_vm3, %v16565_v16, %v6390_v20  ;;  %vm19177_vm6 = vmmov %vm19176_vm1 }
 0xd66   : > { %v6760_v29 = vsel %vm19176_vm1, %v6744_v19, %v6438_v38  ;;  %vm19181_vm1 = vcmask 1046528  }
 0xd67   : > { %v6330_v56 = vrot.slane %v16822_v8, %v13930_v43  ;;  %v6776_v10 = vsel %vm19170_vm8, %v6760_v29, %v6486_v27 }
 0xd68   : > { %6375 = vrot.lane.b32.xlu0 %v6326_v63, %s13630_s23  ;;  %6645 = vrot.lane.b32.xlu1 %v16783_v39, %s13629_s22  ;;  %v6792_v16 = vsel %vm19172_vm4, %v6776_v10, %v16596_v62  ;;  %v6731_v10 = vsel %vm1808_vm3, %v16420_v58, %v16620_v7 }
 0xd69   : > { %v6488_v21 = vpop.permute.xlu0 %6487  ;;  %v6440_v23 = vpop.permute.xlu1 %6439 }
 0xd6c   : > { %6859 = vrot.lane.b32.xlu0 %v6839_v6, %s13631_s25  ;;  %6693 = vrot.lane.b32.xlu1 %v16783_v39, %s13631_s25 }
 0xd6d   : > { %v6658_v9 = vpop.permute.xlu0 %6657  ;;  %v6610_v35 = vpop.permute.xlu1 %6609 }
 0xd6e   : > { %v6806_v2 = vsel %vm19173_vm5, %v6790_v61, %v6610_v35  ;;  %vm19178_vm5 = vmmov %vm19170_vm8 }
 0xd6f   : > { %v6822_v54 = vsel %vm19174_vm7, %v6806_v2, %v6658_v9  ;;  %vm19179_vm7 = vcmask 1044480   ;;  %vm19182_vm8 = vmmov %vm19172_vm4 }
 0xd70   : > { %6423 = vrot.lane.b32.xlu0 %v6326_v63, %s13629_s22 }
 0xd71   : > { %v6706_v52 = vpop.permute.xlu1 %6705  ;;  %v6614_v55 = vpop.permute.xlu0 %6613 }
 0xd72   : > { %v6838_v46 = vsel %vm19175_vm0, %v6822_v54, %v6706_v52  ;;  %v6808_v61 = vsel %vm19179_vm7, %v6792_v16, %v6614_v55  ;;  %vm19180_vm0 = vcmask 1045504  }
 0xd73   : > { %6857 = vrot.lane.b32.xlu1 %v6838_v46, %s13631_s25  ;;  %vm19184_vm4 = vmmov %vm19180_vm0 }
 0xd74   : > { %6471 = vrot.lane.b32.xlu0 %v6326_v63, %s13631_s25  ;;  %v6745_v63 = vsel %vm1808_vm3, %v16577_v53, %v6392_v0  ;;  %v6249_v0 = vcombine.high %v16772_v12, %v16772_v12 }
 0xd75   : > { %v6662_v28 = vpop.permute.xlu0 %6661  ;;  %v6761_v6 = vsel %vm19177_vm6, %v6745_v63, %v6440_v23  ;;  %v6442_v20 = vpop.permute.xlu1 %6441  ;;  %vm19183_vm6 = vmmov %vm19179_vm7  ;;  %vm19186_vm7 = vcmask 1041408  }
 0xd76   : > { %v6777_v38 = vsel %vm19178_vm5, %v6761_v6, %v6488_v21  ;;  %v6824_v53 = vsel %vm19180_vm0, %v6808_v61, %v6662_v28  ;;  %v16864_v52 = vrot.slane %v6249_v0, %v13930_v43  ;;  %vm19185_vm5 = vmmov %vm19181_vm1  ;;  %vm19187_vm0 = vcmask 1042432  }
 0xd77   : > { %6377 = vrot.lane.b32.xlu1 %v6330_v56, %s13630_s23  ;;  %v6793_v62 = vsel %vm19182_vm8, %v6777_v38, %v16623_v14  ;;  %v6893_v38 = vld [vmem:[#allocation3 + $0x448] sm:$0xff] }
 0xd78   : > { %6599 = vrot.lane.b32.xlu0 %v16832_v13, %s13630_s23 }
 0xd79   : > { %v6710_v41 = vpop.permute.xlu0 %6709  ;;  %v6618_v35 = vpop.permute.xlu1 %6617 }
 0xd7a   : > { %v6840_v23 = vsel %vm19181_vm1, %v6824_v53, %v6710_v41  ;;  %vm19188_vm1 = vmmov %vm19182_vm8 }
 0xd7b   : > { %6425 = vrot.lane.b32.xlu1 %v6330_v56, %s13629_s22  ;;  %vm19189_vm8 = vmmov %vm19183_vm6 }
 0xd7c   : > { %6647 = vrot.lane.b32.xlu0 %v16832_v13, %s13629_s22 }
 0xd7d   : > { %v6616_v9 = vpop.permute.xlu0 %6615  ;;  %v6666_v33 = vpop.permute.xlu1 %6665 }
 0xd7e   : > { %v6809_v21 = vsel %vm19183_vm6, %v6793_v62, %v6616_v9  ;;  %vm19190_vm6 = vmmov %vm19184_vm4  ;;  %v6898_v62 = vld [vmem:[#allocation3 + $0x470] sm:$0xff] }
 0xd7f   : > { %6473 = vrot.lane.b32.xlu1 %v6330_v56, %s13631_s25 }
 0xd80   : > { %6695 = vrot.lane.b32.xlu0 %v16832_v13, %s13631_s25 }
 0xd81   : > { %v6664_v27 = vpop.permute.xlu0 %6663  ;;  %v6714_v41 = vpop.permute.xlu1 %6713 }
 0xd82   : > { %v6825_v2 = vsel %vm19184_vm4, %v6809_v21, %v6664_v27  ;;  %vm19191_vm4 = vmmov %vm19185_vm5  ;;  %v6895_v27 = vld [vmem:[#allocation3 + $0x458] sm:$0xff] }
 0xd83   : > { %6861 = vrot.lane.b32.xlu1 %v6840_v23, %s13631_s25  ;;  %v6899_v21 = vld [vmem:[#allocation3 + $0x478] sm:$0xff] }
 0xd85   : > { %v6712_v54 = vpop.permute.xlu0 %6711 }
 0xd86   : > { %v6841_v55 = vsel %vm19185_vm5, %v6825_v2, %v6712_v54  ;;  %vm19192_vm5 = vmmov %vm19186_vm7  ;;  %v12665_v2 = vpack.c.bf16 %v6899_v21, %v6898_v62  ;;  %v6732_v54 = vsel %vm1808_vm3, %v16442_v34, %v16645_v3  ;;  %v6911_v21 = vld [vmem:[#allocation3 + $0x4d8] sm:$0xff] }
 0xd87   : > { %6863 = vrot.lane.b32.xlu0 %v6841_v55, %s13631_s25  ;;  %6601 = vrot.lane.b32.xlu1 %v16864_v52, %s13630_s23  ;;  %v6747_v6 = vsel %vm19192_vm5, %v6731_v10, %v16618_v37  ;;  %v6894_v37 = vld [vmem:[#allocation3 + $0x450] sm:$0xff]  ;;  %v6903_v10 = vld [vmem:[#allocation3 + $0x498] sm:$0xff] }
 0xd89   : > { %v6394_v12 = vpop.permute.xlu0 %6393 }
 0xd8a   : > { %v6746_v14 = vsel %vm1808_vm3, %v16600_v45, %v6394_v12 }
 0xd8b   : > { %6649 = vrot.lane.b32.xlu1 %v16864_v52, %s13629_s22  ;;  %v6762_v46 = vsel %vm19186_vm7, %v6746_v14, %v6442_v20  ;;  %vm19193_vm7 = vmmov %vm19187_vm0  ;;  %v6892_v20 = vld [vmem:[#allocation3 + $0x440] sm:$0xff] }
 0xd8c   : > { %v12656_v53 = vpack.c.bf16 %v6893_v38, %v6892_v20 }
 0xd8d   : > { %v6490_v28 = vpop.permute.xlu0 %6489 }
 0xd8e   : > { %v6778_v56 = vsel %vm19187_vm0, %v6762_v46, %v6490_v28  ;;  %vm19194_vm0 = vmmov %vm19188_vm1 }
 0xd8f   : > { %v6794_v19 = vsel %vm19188_vm1, %v6778_v56, %v16612_v31  ;;  %6697 = vrot.lane.b32.xlu1 %v16864_v52, %s13631_s25  ;;  %v6763_v31 = vsel %vm19193_vm7, %v6747_v6, %v16629_v25  ;;  %vm19195_vm1 = vmmov %vm19189_vm8  ;;  %v6900_v56 = vld [vmem:[#allocation3 + $0x480] sm:$0xff] }
 0xd90   : > { %v6810_v29 = vsel %vm19189_vm8, %v6794_v19, %v6618_v35  ;;  %v6779_v9 = vsel %vm19194_vm0, %v6763_v31, %v16436_v60  ;;  %vm19196_vm8 = vmmov %vm19190_vm6  ;;  %v12659_v60 = vpack.c.bf16 %v6895_v27, %v6894_v37  ;;  %v6901_v19 = vld [vmem:[#allocation3 + $0x488] sm:$0xff] }
 0xd91   : > { %v6826_v45 = vsel %vm19190_vm6, %v6810_v29, %v6666_v33  ;;  %v6795_v16 = vsel %vm19195_vm1, %v6779_v9, %v16631_v22  ;;  %vm19197_vm6 = vmmov %vm19191_vm4  ;;  %v16899_v0 = vpop.permute.xlu0 %6417  ;;  %v6896_v22 = vld [vmem:[#allocation3 + $0x460] sm:$0xff]  ;;  %v6905_v9 = vld [vmem:[#allocation3 + $0x4a8] sm:$0xff] }
 0xd92   : > { %v6842_v63 = vsel %vm19191_vm4, %v6826_v45, %v6714_v41  ;;  %v6811_v61 = vsel %vm19196_vm8, %v6795_v16, %v16639_v32  ;;  %v6897_v32 = vld [vmem:[#allocation3 + $0x468] sm:$0xff]  ;;  %vm19198_vm4 = vmmov %vm19192_vm5 }
 0xd93   : > { %6865 = vrot.lane.b32.xlu1 %v6842_v63, %s13631_s25  ;;  %v6827_v58 = vsel %vm19197_vm6, %v6811_v61, %v16637_v48  ;;  %v12662_v48 = vpack.c.bf16 %v6897_v32, %v6896_v22  ;;  %v6748_v14 = vsel %vm19198_vm4, %v6732_v54, %v16643_v11  ;;  %vm19199_vm5 = vmmov %vm19193_vm7  ;;  %v12668_v11 = vpack.c.bf16 %v6901_v19, %v6900_v56  ;;  %v6902_v63 = vld [vmem:[#allocation3 + $0x490] sm:$0xff]  ;;  %v19212_v19 = vld [vmem:[#allocation26_spill] sm:$0xff] }
 0xd94   : > { %v6764_v33 = vsel %vm19199_vm5, %v6748_v14, %v16650_v40  ;;  %vm19200_vm7 = vmmov %vm19194_vm0 }
 0xd95   : > { %v16906_v23 = vpop.permute.xlu0 %6593  ;;  %v6780_v28 = vsel %vm19200_vm7, %v6764_v33, %v16468_v47  ;;  %vm19201_vm0 = vmmov %vm19195_vm1 }
 0xd96   : > { %v6796_v34 = vsel %vm19201_vm0, %v6780_v28, %v16674_v30  ;;  %vm19202_vm1 = vmmov %vm19196_vm8  ;;  %v12671_v30 = vpack.c.bf16 %v6903_v10, %v6902_v63  ;;  %v6912_v28 = vld [vmem:[#allocation3 + $0x4e0] sm:$0xff]  ;;  %v6915_v63 = vld [vmem:[#allocation3 + $0x4f8] sm:$0xff] }
 0xd97   : > { %v6812_v29 = vsel %vm19202_vm1, %v6796_v34, %v16672_v5  ;;  %vm19203_vm8 = vmmov %vm19197_vm6  ;;  %v6733_v5 = vsel %vm1808_vm3, %v16450_v17, %v16648_v4  ;;  %v6906_v17 = vld [vmem:[#allocation3 + $0x4b0] sm:$0xff]  ;;  %v6907_v4 = vld [vmem:[#allocation3 + $0x4b8] sm:$0xff] }
 0xd98   : > { %v6828_v41 = vsel %vm19203_vm8, %v6812_v29, %v16688_v42  ;;  %v6904_v42 = vld [vmem:[#allocation3 + $0x4a0] sm:$0xff]  ;;  %vm19204_vm6 = vmmov %vm19198_vm4  ;;  %v6913_v34 = vld [vmem:[#allocation3 + $0x4e8] sm:$0xff] }
 0xd99   : > { %v16913_v55 = vpop.permute.xlu0 %6689  ;;  %v6749_v16 = vsel %vm19204_vm6, %v6733_v5, %v16663_v50  ;;  %v12674_v20 = vpack.c.bf16 %v6905_v9, %v6904_v42  ;;  %vm19205_vm4 = vmmov %vm19199_vm5  ;;  %v6932_v10 = vld [vmem:[#allocation3 + $0x580] sm:$0xff] }
 0xd9a   : > { %v6765_v38 = vsel %vm19205_vm4, %v6749_v16, %v16661_v18  ;;  %vm19206_vm5 = vmmov %vm19200_vm7  ;;  %v6908_v18 = vld [vmem:[#allocation3 + $0x4c0] sm:$0xff] }
 0xd9b   : > { %vm19207_vm7 = vmmov %vm19201_vm0 }
 0xd9c   : > { %vm19209_vm0 = vmmov %vm19202_vm1 }
 0xd9d   : > { %v6372_v46 = vpop.permute.xlu0 %6371  ;;  %vm19210_vm1 = vmmov %vm19203_vm8 }
 0xd9e   : > { %v6735_v14 = vsel %vm1808_vm3, %v16684_v15, %v6372_v46  ;;  %vm19211_vm8 = vmmov %vm19204_vm6 }
 0xd9f   : > { %vm19213_vm6 = vmmov %vm19205_vm4 }
 0xda0   : > { %vm19214_vm4 = vmmov %vm19211_vm8 }
 0xda1   : > { %v6420_v45 = vpop.permute.xlu0 %6419 }
 0xda2   : > { %v6751_v56 = vsel %vm19211_vm8, %v6735_v14, %v6420_v45  ;;  %v6929_v14 = vld [vmem:[#allocation3 + $0x568] sm:$0xff] }
 0xda9   : > { %v6852_v7 = vpop.permute.xlu1 %6851 }
 0xdaa   : > { %v6875_v25 = vsel %vm1959_vm10, %v6827_v58, %v6852_v7  ;;  %v6781_v58 = vsel %vm19206_vm5, %v6765_v38, %v16478_v36  ;;  %v12677_v7 = vpack.c.bf16 %v6907_v4, %v6906_v17  ;;  %vm19215_vm5 = vmmov %vm19213_vm6  ;;  %v6935_v38 = vld [vmem:[#allocation3 + $0x598] sm:$0xff]  ;;  %v6924_v4 = vld [vmem:[#allocation3 + $0x540] sm:$0xff] }
 0xdab   : > { %12035 = vmatmul.mubr.msk.f32.vlgmr.msra.gmra.mrb[104].mxu1 %vm2032_vm11, %v6875_v25  ;;  %v6797_v50 = vsel %vm19207_vm7, %v6781_v58, %v16693_v24  ;;  %v6909_v25 = vld [vmem:[#allocation3 + $0x4c8] sm:$0xff]  ;;  %v6910_v24 = vld [vmem:[#allocation3 + $0x4d0] sm:$0xff]  ;;  %vm19216_vm7 = vcmask 1043456  }
 0xdac   : > { %12657 = vmatpush3.bf16.msra.mxu1 %v12656_v53  ;;  %12053 = vmatprep.mubr.msk.f32.mxu1 %vm13632_vm2, %v18977_v44  ;;  %v12680_v32 = vpack.c.bf16 %v6909_v25, %v6908_v18  ;;  %v12683_v54 = vpack.c.bf16 %v6911_v21, %v6910_v24  ;;  %vm19219_vm8 = vmmov %vm19216_vm7  ;;  %v6925_v58 = vld [vmem:[#allocation3 + $0x548] sm:$0xff]  ;;  %v6938_v24 = vld [vmem:[#allocation3 + $0x5b0] sm:$0xff] }
 0xdad   : > { %12658 = vmatprep.subr.bf16.mxu1 %v18975_v51  ;;  %v6688_v35 = vpop.permute.xlu1 %6687  ;;  %v6937_v18 = vld [vmem:[#allocation3 + $0x5a8] sm:$0xff]  ;;  %v6939_v21 = vld [vmem:[#allocation3 + $0x5b8] sm:$0xff] }
 0xdb0   : > { %12660 = vmatpush3.bf16.msra.mxu1 %v12659_v60  ;;  %v19208_v60 = vld [vmem:[#allocation27_spill] sm:$0xff] }
 0xdb1   : > { %12661 = vmatprep.subr.bf16.mxu1 %v18975_v51  ;;  %v16915_v12 = vpop.permute.xlu1 %6369  ;;  %v6813_v22 = vsel %vm19209_vm0, %v6797_v50, %v19208_v60  ;;  %vm19217_vm0 = vcmask 1044480  }
 0xdb2   : > { %v6734_v29 = vsel %vm1808_vm3, %v19212_v19, %v16915_v12 }
 0xdb3   : > { %v6750_v15 = vsel %vm19214_vm4, %v6734_v29, %v16899_v0  ;;  %vm19221_vm4 = vmmov %vm19217_vm0  ;;  %v6930_v29 = vld [vmem:[#allocation3 + $0x570] sm:$0xff] }
 0xdb4   : > { %12663 = vmatpush3.bf16.msra.mxu1 %v12662_v48  ;;  %v6829_v48 = vsel %vm19210_vm1, %v6813_v22, %v6688_v35  ;;  %vm19218_vm1 = vcmask 1045504   ;;  %v6926_v22 = vld [vmem:[#allocation3 + $0x550] sm:$0xff] }
 0xdb5   : > { %12664 = vmatprep.subr.bf16.mxu1 %v18975_v51  ;;  %v16926_v3 = vpop.permute.xlu1 %6465 }
 0xdb6   : > { %v6766_v45 = vsel %vm19215_vm5, %v6750_v15, %v16926_v3  ;;  %v6934_v3 = vld [vmem:[#allocation3 + $0x590] sm:$0xff]  ;;  %vm19222_vm5 = vmmov %vm19218_vm1 }
 0xdb7   : > { %v6782_v9 = vsel %vm19219_vm8, %v6766_v45, %v16677_v1  ;;  %v12719_v1 = vpack.c.bf16 %v6935_v38, %v6934_v3 }
 0xdb8   : > { %12666 = vmatpush3.bf16.msra.mxu1 %v12665_v2 }
 0xdb9   : > { %12667 = vmatprep.subr.bf16.mxu1 %v18975_v51 }
 0xdc2   : > { %v6854_v40 = vpop.permute.xlu1 %6853 }
 0xdc3   : > { %v6876_v47 = vsel %vm1959_vm10, %v6828_v41, %v6854_v40  ;;  %v12686_v41 = vpack.c.bf16 %v6913_v34, %v6912_v28  ;;  %v6914_v40 = vld [vmem:[#allocation3 + $0x4f0] sm:$0xff] }
 0xdc4   : > { %12054 = vmatmul.mubr.msk.f32.vlgmr.msra.gmra.mrb[106].mxu1 %vm2032_vm11, %v6876_v47  ;;  %v6933_v47 = vld [vmem:[#allocation3 + $0x588] sm:$0xff]  ;;  %v12689_v0 = vpack.c.bf16 %v6915_v63, %v6914_v40 }
 0xdc5   : > { %12669 = vmatpush3.bf16.msra.mxu1 %v12668_v11  ;;  %12072 = vmatprep.mubr.msk.f32.mxu1 %vm13632_vm2, %v18977_v44  ;;  %v12716_v42 = vpack.c.bf16 %v6933_v47, %v6932_v10  ;;  %v6941_v47 = vld [vmem:[#allocation3 + $0x5c8] sm:$0xff] }
 0xdc6   : > { %v6856_v6 = vpop.permute.xlu0 %6855  ;;  %v16939_v31 = vpop.permute.xlu1 %6641  ;;  %12670 = vmatprep.subr.bf16.mxu1 %v18975_v51 }
 0xdc7   : > { %v6877_v2 = vsel %vm1959_vm10, %v6829_v48, %v6856_v6 }
 0xdc9   : > { %12672 = vmatpush3.bf16.msra.mxu1 %v12671_v30 }
 0xdca   : > { %v6468_v61 = vpop.permute.xlu0 %6467  ;;  %v16946_v53 = vpop.permute.xlu1 %6373  ;;  %12673 = vmatprep.subr.bf16.mxu1 %v18975_v51 }
 0xdcb   : > { %v6767_v11 = vsel %vm19213_vm6, %v6751_v56, %v6468_v61  ;;  %vm19220_vm6 = vcmask 1046528   ;;  %v6798_v61 = vsel %vm19221_vm4, %v6782_v9, %v16906_v23  ;;  %v12704_v23 = vpack.c.bf16 %v6925_v58, %v6924_v4 }
 0xdcc   : > { %v6783_v12 = vsel %vm19216_vm7, %v6767_v11, %v16765_v26  ;;  %vm19223_vm7 = vmmov %vm19220_vm6  ;;  %v6736_v56 = vsel %vm1808_vm3, %v16746_v57, %v16946_v53  ;;  %v6931_v11 = vld [vmem:[#allocation3 + $0x578] sm:$0xff]  ;;  %v6940_v53 = vld [vmem:[#allocation3 + $0x5c0] sm:$0xff] }
 0xdcd   : > { %12675 = vmatpush3.bf16.msra.mxu1 %v12674_v20  ;;  %v12713_v63 = vpack.c.bf16 %v6931_v11, %v6930_v29 }
 0xdce   : > { %v6596_v37 = vpop.permute.xlu0 %6595  ;;  %v16953_v27 = vpop.permute.xlu1 %6421  ;;  %12676 = vmatprep.subr.bf16.mxu1 %v18975_v51 }
 0xdcf   : > { %v6799_v5 = vsel %vm19217_vm0, %v6783_v12, %v6596_v37  ;;  %v6936_v37 = vld [vmem:[#allocation3 + $0x5a0] sm:$0xff]  ;;  %vm19224_vm0 = vcmask 1041408  }
 0xdd0   : > { %v12722_v48 = vpack.c.bf16 %v6937_v18, %v6936_v37 }
 0xdd1   : > { %12678 = vmatpush3.bf16.msra.mxu1 %v12677_v7  ;;  %v6814_v7 = vsel %vm19222_vm5, %v6798_v61, %v16939_v31  ;;  %v6945_v61 = vld [vmem:[#allocation3 + $0x5e8] sm:$0xff] }
 0xdd2   : > { %v6644_v36 = vpop.permute.xlu0 %6643  ;;  %v16959_v62 = vpop.permute.xlu1 %6469  ;;  %12679 = vmatprep.subr.bf16.mxu1 %v18975_v51  ;;  %v6830_v25 = vsel %vm19223_vm7, %v6814_v7, %v16913_v55  ;;  %vm19228_vm7 = vcmask 1045504   ;;  %v6946_v7 = vld [vmem:[#allocation3 + $0x5f0] sm:$0xff] }
 0xdd3   : > { %v6815_v6 = vsel %vm19218_vm1, %v6799_v5, %v6644_v36  ;;  %vm19225_vm1 = vcmask 1042432  }
 0xdd4   : > { %12073 = vmatmul.mubr.msk.f32.vlgmr.msra.gmra.mrb[108].mxu1 %vm2032_vm11, %v6877_v2  ;;  %vm19227_vm5 = vmmov %vm19225_vm1 }
 0xdd5   : > { %12681 = vmatpush3.bf16.msra.mxu1 %v12680_v32  ;;  %12091 = vmatprep.mubr.msk.f32.mxu1 %vm13632_vm2, %v18977_v44  ;;  %v6927_v32 = vld [vmem:[#allocation3 + $0x558] sm:$0xff] }
 0xdd6   : > { %v6692_v35 = vpop.permute.xlu0 %6691  ;;  %v16968_v33 = vpop.permute.xlu1 %6597  ;;  %12682 = vmatprep.subr.bf16.mxu1 %v18975_v51  ;;  %v12707_v2 = vpack.c.bf16 %v6927_v32, %v6926_v22 }
 0xdd7   : > { %v6831_v16 = vsel %vm19220_vm6, %v6815_v6, %v6692_v35  ;;  %v12725_v35 = vpack.c.bf16 %v6939_v21, %v6938_v24  ;;  %vm19226_vm6 = vmmov %vm19224_vm0 }
 0xdd9   : > { %12684 = vmatpush3.bf16.msra.mxu1 %v12683_v54  ;;  %v6928_v54 = vld [vmem:[#allocation3 + $0x560] sm:$0xff] }
 0xdda   : > { %v16978_v46 = vpop.permute.xlu0 %6375  ;;  %12685 = vmatprep.subr.bf16.mxu1 %v18975_v51  ;;  %v16985_v30 = vpop.permute.xlu1 %6645  ;;  %v12710_v34 = vpack.c.bf16 %v6929_v14, %v6928_v54 }
 0xddb   : > { %v6737_v10 = vsel %vm1808_vm3, %v16787_v59, %v16978_v46  ;;  %v12728_v59 = vpack.c.bf16 %v6941_v47, %v6940_v53 }
 0xddd   : > { %12687 = vmatpush3.bf16.msra.mxu1 %v12686_v41  ;;  %v6752_v41 = vsel %vm19224_vm0, %v6736_v56, %v16953_v27  ;;  %vm19229_vm0 = vcmask 1046528  }
 0xdde   : > { %v6860_v20 = vpop.permute.xlu0 %6859  ;;  %12688 = vmatprep.subr.bf16.mxu1 %v18975_v51  ;;  %v16997_v17 = vpop.permute.xlu1 %6693  ;;  %v6768_v40 = vsel %vm19225_vm1, %v6752_v41, %v16959_v62  ;;  %vm19230_vm1 = vmmov %vm19219_vm8 }
 0xddf   : > { %v6879_v26 = vsel %vm1959_vm10, %v6831_v16, %v6860_v20  ;;  %v6784_v45 = vsel %vm19219_vm8, %v6768_v40, %v16783_v39  ;;  %v6942_v39 = vld [vmem:[#allocation3 + $0x5d0] sm:$0xff]  ;;  %vm19231_vm8 = vmmov %vm19221_vm4 }
 0xde0   : > { %12111 = vmatmul.mubr.msk.f32.vlgmr.msra.gmra.mrb[52].mxu0 %vm2032_vm11, %v6879_v26  ;;  %v6800_v62 = vsel %vm19221_vm4, %v6784_v45, %v16968_v33  ;;  %vm19233_vm4 = vmmov %vm19229_vm0 }
 0xde1   : > { %12690 = vmatpush3.bf16.msra.mxu1 %v12689_v0  ;;  %12717 = vmatpush3.bf16.msra.mxu0 %v12716_v42  ;;  %v6816_v5 = vsel %vm19228_vm7, %v6800_v62, %v16985_v30  ;;  %v6943_v42 = vld [vmem:[#allocation3 + $0x5d8] sm:$0xff] }
 0xde2   : > { %v6424_v50 = vpop.permute.xlu0 %6423  ;;  %12703 = vmatprep.subr.bf16.mxu1 %v18975_v51  ;;  %12718 = vmatprep.subr.bf16.mxu0 %v18975_v51  ;;  %v6832_v46 = vsel %vm19229_vm0, %v6816_v5, %v16997_v17  ;;  %v12731_v20 = vpack.c.bf16 %v6943_v42, %v6942_v39  ;;  %vm19236_vm0 = vmmov %vm19230_vm1 }
 0xde3   : > { %12148 = vmatprep.mubr.msk.f32.mxu0 %vm13632_vm2, %v18977_v44  ;;  %v6753_v27 = vsel %vm19226_vm6, %v6737_v10, %v6424_v50  ;;  %vm19232_vm6 = vmmov %vm19228_vm7  ;;  %v6947_v50 = vld [vmem:[#allocation3 + $0x5f8] sm:$0xff]  ;;  %vm19235_vm7 = vcmask 1042432  }
 0xde5   : > { %v6858_v60 = vpop.permute.xlu1 %6857  ;;  %12720 = vmatpush3.bf16.msra.mxu0 %v12719_v1 }
 0xde6   : > { %v6878_v31 = vsel %vm1959_vm10, %v6830_v25, %v6858_v60  ;;  %v6472_v36 = vpop.permute.xlu0 %6471  ;;  %12721 = vmatprep.subr.bf16.mxu0 %v18975_v51 }
 0xde7   : > { %12092 = vmatmul.mubr.msk.f32.vlgmr.msra.gmra.mrb[110].mxu1 %vm2032_vm11, %v6878_v31  ;;  %v6769_v12 = vsel %vm19227_vm5, %v6753_v27, %v6472_v36  ;;  %vm19234_vm5 = vcmask 1041408  }
 0xde8   : > { %12705 = vmatpush3.bf16.msra.mxu1 %v12704_v23  ;;  %12129 = vmatprep.mubr.msk.f32.mxu1 %vm13632_vm2, %v18977_v44  ;;  %v6785_v9 = vsel %vm19230_vm1, %v6769_v12, %v16832_v13  ;;  %v6944_v13 = vld [vmem:[#allocation3 + $0x5e0] sm:$0xff]  ;;  %v12737_v23 = vpack.c.bf16 %v6947_v50, %v6946_v7  ;;  %vm19237_vm1 = vmmov %vm19231_vm8 }
 0xde9   : > { %v6378_v55 = vpop.permute.xlu1 %6377  ;;  %12706 = vmatprep.subr.bf16.mxu1 %v18975_v51  ;;  %12723 = vmatpush3.bf16.msra.mxu0 %v12722_v48  ;;  %v12734_v4 = vpack.c.bf16 %v6945_v61, %v6944_v13 }
 0xdea   : > { %v6600_v28 = vpop.permute.xlu0 %6599  ;;  %12724 = vmatprep.subr.bf16.mxu0 %v18975_v51  ;;  %v6738_v58 = vsel %vm1808_vm3, %v16822_v8, %v6378_v55 }
 0xdeb   : > { %v6801_v16 = vsel %vm19231_vm8, %v6785_v9, %v6600_v28  ;;  %vm19238_vm8 = vmmov %vm19232_vm6 }
 0xdec   : > { %12708 = vmatpush3.bf16.msra.mxu1 %v12707_v2 }
 0xded   : > { %v6426_v19 = vpop.permute.xlu1 %6425  ;;  %12709 = vmatprep.subr.bf16.mxu1 %v18975_v51  ;;  %12726 = vmatpush3.bf16.msra.mxu0 %v12725_v35 }
 0xdee   : > { %v6648_v15 = vpop.permute.xlu0 %6647  ;;  %v6754_v37 = vsel %vm19234_vm5, %v6738_v58, %v6426_v19 }
 0xdef   : > { %v6817_v30 = vsel %vm19232_vm6, %v6801_v16, %v6648_v15  ;;  %vm19239_vm6 = vmmov %vm19233_vm4 }
 0xdf0   : > { %12711 = vmatpush3.bf16.msra.mxu1 %v12710_v34 }
 0xdf1   : > { %v6474_v57 = vpop.permute.xlu1 %6473  ;;  %12712 = vmatprep.subr.bf16.mxu1 %v18975_v51 }
 0xdf2   : > { %v6696_v6 = vpop.permute.xlu0 %6695  ;;  %v6770_v18 = vsel %vm19235_vm7, %v6754_v37, %v6474_v57 }
 0xdf3   : > { %v6833_v3 = vsel %vm19233_vm4, %v6817_v30, %v6696_v6  ;;  %v6786_v60 = vsel %vm19236_vm0, %v6770_v18, %v16864_v52  ;;  %vm19240_vm4 = vcmask 1046534  }
 0xdf4   : > { %12714 = vmatpush3.bf16.msra.mxu1 %v12713_v63  ;;  %vm19241_vm5 = vmmov %vm19240_vm4 }
 0xdf5   : > { %v6862_v0 = vpop.permute.xlu1 %6861  ;;  %12727 = vmatprep.subr.bf16.mxu1 %v18975_v51  ;;  %vm19242_vm7 = vmmov %vm19240_vm4 }
 0xdf6   : > { %v6880_v33 = vsel %vm1959_vm10, %v6832_v46, %v6862_v0  ;;  %vm19243_vm0 = vmmov %vm19240_vm4 }
 0xdf7   : > { %12130 = vmatmul.mubr.msk.f32.vlgmr.msra.gmra.mrb[112].mxu1 %vm2032_vm11, %v6880_v33 }
 0xdf8   : > { %12729 = vmatpush3.bf16.msra.mxu1 %v12728_v59  ;;  %12167 = vmatprep.mubr.msk.f32.mxu1 %vm13632_vm2, %v18977_v44 }
 0xdf9   : > { %v6864_v38 = vpop.permute.xlu0 %6863  ;;  %v6602_v26 = vpop.permute.xlu1 %6601  ;;  %12730 = vmatprep.subr.bf16.mxu1 %v18975_v51 }
 0xdfa   : > { %v6881_v17 = vsel %vm1959_vm10, %v6833_v3, %v6864_v38  ;;  %v6802_v22 = vsel %vm19237_vm1, %v6786_v60, %v6602_v26  ;;  %vm19244_vm1 = vmmov %vm19243_vm0 }
 0xdfb   : > { %12149 = vmatmul.mubr.msk.f32.vlgmr.msra.gmra.mrb[54].mxu0 %vm2032_vm11, %v6881_v17 }
 0xdfc   : > { %12732 = vmatpush3.bf16.msra.mxu1 %v12731_v20  ;;  %7896 = vmatprep.mubr.f32.mxu0 %v18977_v44 }
 0xdfd   : > { %v6650_v1 = vpop.permute.xlu1 %6649  ;;  %12733 = vmatprep.subr.bf16.mxu1 %v18975_v51 }
 0xdfe   : > { %v6818_v8 = vsel %vm19238_vm8, %v6802_v22, %v6650_v1  ;;  %vm19245_vm8 = vmmov %vm19243_vm0 }
 0xe00   : > { %12735 = vmatpush3.bf16.msra.mxu1 %v12734_v4 }
 0xe01   : > { %v6698_v25 = vpop.permute.xlu1 %6697  ;;  %12736 = vmatprep.subr.bf16.mxu1 %v18975_v51 }
 0xe02   : > { %v6834_v32 = vsel %vm19239_vm6, %v6818_v8, %v6698_v25  ;;  %vm19246_vm6 = vmmov %vm19243_vm0 }
 0xe04   : > { %12738 = vmatpush3.bf16.msra.mxu1 %v12737_v23 }
 0xe05   : > { %v6866_v48 = vpop.permute.xlu1 %6865 }
 0xe06   : > { %v6882_v31 = vsel %vm1959_vm10, %v6834_v32, %v6866_v48 }
 0xe07   : > { %12168 = vmatmul.mubr.msk.f32.vlgmr.msra.gmra.mrb[114].mxu1 %vm2032_vm11, %v6882_v31 }
 0xe08   : > { %8223 = vmatprep.mubr.f32.mxu1 %v18977_v44 }
 0xe7e   : > { %v7017_v36 = vpop.f32.mrb[104].mxu1 }
 0xe7f   : > { %v12036_v24 = vpop.f32.mrb[105].mxu1  ;;  %v7586_v21 = vrot.slane %v7017_v36, 1  ;;  %v7620_v2 = vrot.slane %v7017_v36, 2  ;;  %v7654_v55 = vrot.slane %v7017_v36, 3  ;;  %v7688_v52 = vrot.slane %v7017_v36, 4 }
 0xe80   : > { %v7718_v54 = vrot.slane %v7017_v36, 5  ;;  %v7752_v14 = vrot.slane %v7017_v36, 6  ;;  %v7786_v35 = vrot.slane %v7017_v36, 7 }
 0xe97   : > { %v7090_v28 = vpop.f32.mrb[106].mxu1 }
 0xe98   : > { %v7556_v34 = vrot.slane %v7090_v28, 7  ;;  %v7621_v56 = vrot.slane %v7090_v28, 1  ;;  %v7655_v19 = vrot.slane %v7090_v28, 2  ;;  %v7689_v29 = vrot.slane %v7090_v28, 3  ;;  %v12055_v11 = vpop.f32.mrb[107].mxu1 }
 0xe99   : > { %v7719_v41 = vrot.slane %v7090_v28, 4  ;;  %v7753_v40 = vrot.slane %v7090_v28, 5  ;;  %v7787_v15 = vrot.slane %v7090_v28, 6  ;;  %v13044_v63 = vpack.i.bf16 %v7090_v28, %v7017_v36 }
 0xe9a   : > { %v7587_v10 = vsel %vm2642_vm12, %v7090_v28, %v7586_v21  ;;  %v7622_v57 = vsel %vm2642_vm12, %v7621_v56, %v7620_v2  ;;  %v7656_v53 = vsel %vm2642_vm12, %v7655_v19, %v7654_v55  ;;  %v7690_v47 = vsel %vm2642_vm12, %v7689_v29, %v7688_v52 }
 0xe9b   : > { %13045 = vrot.lane.b32.xlu0 %v13044_v63, %s13630_s23  ;;  %v7720_v45 = vsel %vm2642_vm12, %v7719_v41, %v7718_v54  ;;  %v7754_v27 = vsel %vm2642_vm12, %v7753_v40, %v7752_v14  ;;  %v7788_v62 = vsel %vm2642_vm12, %v7787_v15, %v7786_v35  ;;  %v7557_v12 = vsel %vm2642_vm12, %v7556_v34, %v7017_v36 }
 0xea7   : > { %v7163_v5 = vpop.f32.mrb[108].mxu1 }
 0xea8   : > { %v7558_v59 = vrot.slane %v7163_v5, 6  ;;  %v7691_v46 = vrot.slane %v7163_v5, 2  ;;  %v12074_v6 = vpop.f32.mrb[109].mxu1  ;;  %v7721_v0 = vrot.slane %v7163_v5, 3  ;;  %v7588_v39 = vrot.slane %v7163_v5, 7 }
 0xea9   : > { %v7755_v42 = vrot.slane %v7163_v5, 4  ;;  %v7623_v9 = vsel %vm2645_vm13, %v7163_v5, %v7622_v57  ;;  %v7789_v33 = vrot.slane %v7163_v5, 5  ;;  %v7657_v16 = vrot.slane %v7163_v5, 1 }
 0xeaa   : > { %v7722_v30 = vsel %vm2645_vm13, %v7721_v0, %v7720_v45  ;;  %v7589_v20 = vsel %vm2645_vm13, %v7588_v39, %v7587_v10  ;;  %v7692_v3 = vsel %vm2645_vm13, %v7691_v46, %v7690_v47  ;;  %v7559_v38 = vsel %vm2645_vm13, %v7558_v59, %v7557_v12 }
 0xeab   : > { %v7756_v26 = vsel %vm2645_vm13, %v7755_v42, %v7754_v27  ;;  %v7790_v13 = vsel %vm2645_vm13, %v7789_v33, %v7788_v62  ;;  %v7658_v61 = vsel %vm2645_vm13, %v7657_v16, %v7656_v53 }
 0xeb3   : > { %v7309_v17 = vpop.f32.mrb[52].mxu0 }
 0xeb4   : > { %v12112_v4 = vpop.f32.mrb[53].mxu0  ;;  %v7725_v58 = vrot.slane %v7309_v17, 1  ;;  %v7592_v1 = vrot.slane %v7309_v17, 5  ;;  %v7759_v50 = vrot.slane %v7309_v17, 2  ;;  %v7626_v37 = vrot.slane %v7309_v17, 6 }
 0xeb5   : > { %v7793_v18 = vrot.slane %v7309_v17, 3  ;;  %v7660_v23 = vrot.slane %v7309_v17, 7  ;;  %v7562_v40 = vrot.slane %v7309_v17, 4 }
 0xeba   : > { %v7236_v7 = vpop.f32.mrb[110].mxu1 }
 0xebb   : > { %v12093_v25 = vpop.f32.mrb[111].mxu1  ;;  %v13049_v60 = vpack.i.bf16 %v7236_v7, %v7163_v5  ;;  %v7723_v22 = vrot.slane %v7236_v7, 2  ;;  %v7590_v8 = vrot.slane %v7236_v7, 6  ;;  %v7757_v32 = vrot.slane %v7236_v7, 3 }
 0xebc   : > { %v7624_v48 = vrot.slane %v7236_v7, 7  ;;  %v7791_v31 = vrot.slane %v7236_v7, 4  ;;  %v7659_v36 = vsel %vm2648_vm14, %v7236_v7, %v7658_v61  ;;  %v7693_v24 = vrot.slane %v7236_v7, 1 }
 0xebd   : > { %13050 = vrot.lane.b32.xlu1 %v13049_v60, %s13630_s23  ;;  %v7724_v21 = vsel %vm2648_vm14, %v7723_v22, %v7722_v30  ;;  %v7591_v2 = vsel %vm2648_vm14, %v7590_v8, %v7589_v20  ;;  %v7758_v55 = vsel %vm2648_vm14, %v7757_v32, %v7756_v26  ;;  %v7661_v52 = vsel %vm2651_vm15, %v7660_v23, %v7659_v36 }
 0xebe   : > { %v7726_v54 = vsel %vm2651_vm15, %v7725_v58, %v7724_v21  ;;  %v7593_v14 = vsel %vm2651_vm15, %v7592_v1, %v7591_v2  ;;  %v7760_v35 = vsel %vm2651_vm15, %v7759_v50, %v7758_v55  ;;  %v7625_v28 = vsel %vm2648_vm14, %v7624_v48, %v7623_v9 }
 0xebf   : > { %v7627_v34 = vsel %vm2651_vm15, %v7626_v37, %v7625_v28  ;;  %v7792_v56 = vsel %vm2648_vm14, %v7791_v31, %v7790_v13  ;;  %v7694_v19 = vsel %vm2648_vm14, %v7693_v24, %v7692_v3  ;;  %v7560_v29 = vrot.slane %v7236_v7, 5 }
 0xec0   : > { %v7794_v11 = vsel %vm2651_vm15, %v7793_v18, %v7792_v56  ;;  %v7695_v41 = vsel %vm2651_vm15, %v7309_v17, %v7694_v19 }
 0xec1   : > { %v7561_v15 = vsel %vm2648_vm14, %v7560_v29, %v7559_v38 }
 0xec2   : > { %v7563_v63 = vsel %vm2651_vm15, %v7562_v40, %v7561_v15 }
 0xeca   : > { %v7382_v10 = vpop.f32.mrb[112].mxu1 }
 0xecb   : > { %v12131_v57 = vpop.f32.mrb[113].mxu1  ;;  %v13054_v53 = vpack.i.bf16 %v7382_v10, %v7309_v17  ;;  %v7727_v47 = vsel %vm2654_vm9, %v7382_v10, %v7726_v54  ;;  %v7594_v45 = vrot.slane %v7382_v10, 4  ;;  %v7761_v27 = vrot.slane %v7382_v10, 1 }
 0xecc   : > { %v7628_v62 = vrot.slane %v7382_v10, 5  ;;  %v7795_v12 = vrot.slane %v7382_v10, 2  ;;  %v7662_v5 = vrot.slane %v7382_v10, 6  ;;  %v7696_v59 = vrot.slane %v7382_v10, 7 }
 0xecd   : > { %13055 = vrot.lane.b32.xlu0 %v13054_v53, %s13630_s23  ;;  %v7595_v46 = vsel %vm2654_vm9, %v7594_v45, %v7593_v14  ;;  %v7762_v6 = vsel %vm2654_vm9, %v7761_v27, %v7760_v35  ;;  %v7564_v0 = vrot.slane %v7382_v10, 3 }
 0xece   : > { %v7455_v39 = vpop.f32.mrb[54].mxu0  ;;  %v7629_v42 = vsel %vm2654_vm9, %v7628_v62, %v7627_v34  ;;  %v7796_v9 = vsel %vm2654_vm9, %v7795_v12, %v7794_v11  ;;  %v7663_v33 = vsel %vm2654_vm9, %v7662_v5, %v7661_v52  ;;  %v7697_v16 = vsel %vm2654_vm9, %v7696_v59, %v7695_v41 }
 0xecf   : > { %v12150_v30 = vpop.f32.mrb[55].mxu0  ;;  %v7728_v20 = vrot.slane %v7455_v39, 7  ;;  %v7596_v3 = vrot.slane %v7455_v39, 3  ;;  %v7763_v38 = vsel %vm19240_vm4, %v7455_v39, %v7762_v6  ;;  %v7630_v26 = vrot.slane %v7455_v39, 4  ;;  %vm19247_vm4 = vmmov %vm19243_vm0 }
 0xed0   : > { %v7797_v13 = vrot.slane %v7455_v39, 1  ;;  %v7664_v61 = vrot.slane %v7455_v39, 5  ;;  %v7698_v17 = vrot.slane %v7455_v39, 6  ;;  %v7565_v4 = vsel %vm2654_vm9, %v7564_v0, %v7563_v63 }
 0xed1   : > { %v7729_v58 = vsel %vm19241_vm5, %v7728_v20, %v7727_v47  ;;  %v7597_v1 = vsel %vm19242_vm7, %v7596_v3, %v7595_v46  ;;  %v7631_v7 = vsel %vm19243_vm0, %v7630_v26, %v7629_v42  ;;  %v7566_v50 = vrot.slane %v7455_v39, 2 }
 0xed2   : > { %v7798_v37 = vsel %vm19244_vm1, %v7797_v13, %v7796_v9  ;;  %v7665_v18 = vsel %vm19245_vm8, %v7664_v61, %v7663_v33  ;;  %v7699_v23 = vsel %vm19246_vm6, %v7698_v17, %v7697_v16  ;;  %vm19248_vm5 = vcmask 1047559  }
 0xed3   : > { %v7567_v25 = vsel %vm19247_vm4, %v7566_v50, %v7565_v4  ;;  %vm19249_vm7 = vmmov %vm19248_vm5 }
 0xed4   : > { %vm19250_vm0 = vmmov %vm19248_vm5 }
 0xed5   : > { %vm19251_vm1 = vmmov %vm19250_vm0 }
 0xed6   : > { %vm19252_vm8 = vmmov %vm19250_vm0 }
 0xed7   : > { %vm19253_vm6 = vmmov %vm19250_vm0 }
 0xed8   : > { %vm19254_vm4 = vmmov %vm19250_vm0 }
 0xeda   : > { %v7528_v60 = vpop.f32.mrb[114].mxu1 }
 0xedb   : > { %v12169_v22 = vpop.f32.mrb[115].mxu1  ;;  %v13059_v8 = vpack.i.bf16 %v7528_v60, %v7455_v39  ;;  %v7730_v32 = vrot.slane %v7528_v60, 6  ;;  %v7598_v48 = vrot.slane %v7528_v60, 2  ;;  %v7764_v31 = vrot.slane %v7528_v60, 7 }
 0xedc   : > { %v7632_v36 = vrot.slane %v7528_v60, 3  ;;  %v17116_v24 = vsel %vm19248_vm5, %v7528_v60, %v7798_v37  ;;  %v7666_v21 = vrot.slane %v7528_v60, 4  ;;  %v7700_v2 = vrot.slane %v7528_v60, 5  ;;  %vm19255_vm5 = vmmov %vm19250_vm0 }
 0xedd   : > { %13060 = vrot.lane.b32.xlu1 %v13059_v8, %s13630_s23  ;;  %v17120_v55 = vsel %vm19249_vm7, %v7730_v32, %v7729_v58  ;;  %v17123_v52 = vsel %vm19250_vm0, %v7598_v48, %v7597_v1  ;;  %v17126_v54 = vsel %vm19251_vm1, %v7764_v31, %v7763_v38  ;;  %v7568_v14 = vrot.slane %v7528_v60, 1  ;;  %vm19259_vm7 = vmmov %vm19250_vm0 }
 0xede   : > { %v17129_v35 = vsel %vm19252_vm8, %v7632_v36, %v7631_v7  ;;  %v17132_v28 = vsel %vm19253_vm6, %v7666_v21, %v7665_v18  ;;  %v17135_v34 = vsel %vm19254_vm4, %v7700_v2, %v7699_v23  ;;  %vm19262_vm8 = vmmov %vm19251_vm1 }
 0xedf   : > { %v17138_v56 = vsel %vm19255_vm5, %v7568_v14, %v7567_v25 }
 0xf0d   : > { %v13046_v19 = vpop.permute.xlu0 %13045 }
 0xf0e   : > { %v13047_v29 = vunpack.i.l.bf16 %v13046_v19  ;;  %v13048_v11 = vunpack.i.h.bf16 %v13046_v19 }
 0xf10   : > { %v7702_v41 = vrot.slane %v13047_v29, 4  ;;  %v7703_v40 = vrot.slane %v13048_v11, 3  ;;  %v7570_v15 = vrot.slane %v13048_v11, 7  ;;  %v7732_v0 = vrot.slane %v13047_v29, 5 }
 0xf11   : > { %v7733_v39 = vrot.slane %v13048_v11, 4  ;;  %v7600_v42 = vrot.slane %v13047_v29, 1  ;;  %v7766_v9 = vrot.slane %v13047_v29, 6  ;;  %v7767_v33 = vrot.slane %v13048_v11, 5 }
 0xf12   : > { %v7704_v63 = vsel %vm2642_vm12, %v7703_v40, %v7702_v41  ;;  %v7571_v10 = vsel %vm2642_vm12, %v7570_v15, %v13047_v29  ;;  %v7634_v16 = vrot.slane %v13047_v29, 2  ;;  %v7635_v30 = vrot.slane %v13048_v11, 1 }
 0xf13   : > { %v7800_v3 = vrot.slane %v13047_v29, 7  ;;  %v7801_v38 = vrot.slane %v13048_v11, 6  ;;  %v7668_v26 = vrot.slane %v13047_v29, 3  ;;  %v7669_v13 = vrot.slane %v13048_v11, 2 }
 0xf14   : > { %v7734_v61 = vsel %vm2642_vm12, %v7733_v39, %v7732_v0  ;;  %v7601_v7 = vsel %vm2642_vm12, %v13048_v11, %v7600_v42  ;;  %v7768_v50 = vsel %vm2642_vm12, %v7767_v33, %v7766_v9  ;;  %v7636_v18 = vsel %vm2642_vm12, %v7635_v30, %v7634_v16 }
 0xf15   : > { %v7802_v23 = vsel %vm2642_vm12, %v7801_v38, %v7800_v3  ;;  %v7670_v25 = vsel %vm2642_vm12, %v7669_v13, %v7668_v26  ;;  %vm19256_vm12 = vcmask 1046534  }
 0xf2f   : > { %v13051_v57 = vpop.permute.xlu1 %13050 }
 0xf30   : > { %v13052_v53 = vunpack.i.l.bf16 %v13051_v57  ;;  %v17142_v47 = vunpack.i.h.bf16 %v13051_v57 }
 0xf32   : > { %v7705_v45 = vrot.slane %v13052_v53, 2  ;;  %v7707_v27 = vrot.slane %v17142_v47, 1  ;;  %v7572_v62 = vrot.slane %v13052_v53, 6  ;;  %v7574_v12 = vrot.slane %v17142_v47, 5 }
 0xf33   : > { %v7735_v17 = vrot.slane %v13052_v53, 3  ;;  %v7602_v4 = vrot.slane %v13052_v53, 7  ;;  %v7769_v37 = vrot.slane %v13052_v53, 4  ;;  %v7737_v60 = vrot.slane %v17142_v47, 2 }
 0xf34   : > { %v7706_v5 = vsel %vm2645_vm13, %v7705_v45, %v7704_v63  ;;  %v7573_v46 = vsel %vm2645_vm13, %v7572_v62, %v7571_v10  ;;  %v7604_v22 = vrot.slane %v17142_v47, 6  ;;  %v7771_v8 = vrot.slane %v17142_v47, 3 }
 0xf35   : > { %v7708_v59 = vsel %vm2648_vm14, %v7707_v27, %v7706_v5  ;;  %v7575_v6 = vsel %vm2648_vm14, %v7574_v12, %v7573_v46  ;;  %v7637_v32 = vsel %vm2645_vm13, %v13052_v53, %v7636_v18  ;;  %v7736_v48 = vsel %vm2645_vm13, %v7735_v17, %v7734_v61 }
 0xf36   : > { %v7603_v31 = vsel %vm2645_vm13, %v7602_v4, %v7601_v7  ;;  %v7638_v36 = vrot.slane %v17142_v47, 7  ;;  %v7803_v21 = vrot.slane %v13052_v53, 5  ;;  %v7671_v2 = vrot.slane %v13052_v53, 1 }
 0xf37   : > { %v7770_v41 = vsel %vm2645_vm13, %v7769_v37, %v7768_v50  ;;  %v7805_v40 = vrot.slane %v17142_v47, 4  ;;  %v7738_v53 = vsel %vm2648_vm14, %v7737_v60, %v7736_v48  ;;  %v7605_v27 = vsel %vm2648_vm14, %v7604_v22, %v7603_v31 }
 0xf38   : > { %v7772_v5 = vsel %vm2648_vm14, %v7771_v8, %v7770_v41  ;;  %v7804_v46 = vsel %vm2645_vm13, %v7803_v21, %v7802_v23  ;;  %v7672_v0 = vsel %vm2645_vm13, %v7671_v2, %v7670_v25  ;;  %vm19257_vm13 = vmmov %vm19256_vm12 }
 0xf39   : > { %v7806_v13 = vsel %vm2648_vm14, %v7805_v40, %v7804_v46  ;;  %v7673_v17 = vsel %vm2648_vm14, %v17142_v47, %v7672_v0 }
 0xf3f   : > { %v13056_v20 = vpop.permute.xlu0 %13055 }
 0xf40   : > { %v17151_v58 = vunpack.i.h.bf16 %v13056_v20  ;;  %v13057_v1 = vunpack.i.l.bf16 %v13056_v20 }
 0xf42   : > { %v7709_v14 = vsel %vm2651_vm15, %v13057_v1, %v7708_v59  ;;  %v7710_v19 = vrot.slane %v17151_v58, 7  ;;  %v7576_v29 = vrot.slane %v13057_v1, 4  ;;  %v7739_v11 = vrot.slane %v13057_v1, 1 }
 0xf43   : > { %v7578_v15 = vrot.slane %v17151_v58, 3  ;;  %v7606_v63 = vrot.slane %v13057_v1, 5  ;;  %v7773_v10 = vrot.slane %v13057_v1, 2  ;;  %v7640_v62 = vrot.slane %v13057_v1, 6 }
 0xf44   : > { %v17171_v57 = vsel %vm2654_vm9, %v7710_v19, %v7709_v14  ;;  %v7577_v45 = vsel %vm2651_vm15, %v7576_v29, %v7575_v6  ;;  %v7639_v59 = vsel %vm2648_vm14, %v7638_v36, %v7637_v32  ;;  %v7740_v39 = vsel %vm2651_vm15, %v7739_v11, %v7738_v53  ;;  %vm19258_vm14 = vmmov %vm19256_vm12 }
 0xf45   : > { %v7579_v12 = vsel %vm2654_vm9, %v7578_v15, %v7577_v45  ;;  %v7608_v42 = vrot.slane %v17151_v58, 4  ;;  %v7775_v6 = vrot.slane %v17151_v58, 1  ;;  %v7642_v9 = vrot.slane %v17151_v58, 5 }
 0xf46   : > { %v7607_v33 = vsel %vm2651_vm15, %v7606_v63, %v7605_v27  ;;  %v7774_v16 = vsel %vm2651_vm15, %v7773_v10, %v7772_v5  ;;  %v7807_v30 = vrot.slane %v13057_v1, 3  ;;  %v7674_v20 = vrot.slane %v13057_v1, 7 }
 0xf47   : > { %v7641_v3 = vsel %vm2651_vm15, %v7640_v62, %v7639_v59  ;;  %v7741_v26 = vsel %vm2654_vm9, %v17151_v58, %v7740_v39  ;;  %v7809_v61 = vrot.slane %v17151_v58, 2  ;;  %v7609_v50 = vsel %vm2654_vm9, %v7608_v42, %v7607_v33 }
 0xf48   : > { %v7776_v37 = vsel %vm2654_vm9, %v7775_v6, %v7774_v16  ;;  %v7643_v1 = vsel %vm2654_vm9, %v7642_v9, %v7641_v3  ;;  %v7808_v18 = vsel %vm2651_vm15, %v7807_v30, %v7806_v13  ;;  %v7675_v23 = vsel %vm2651_vm15, %v7674_v20, %v7673_v17  ;;  %vm19260_vm15 = vmmov %vm19250_vm0 }
 0xf49   : > { %v7676_v25 = vrot.slane %v17151_v58, 6  ;;  %vm19261_vm0 = vmmov %vm19256_vm12  ;;  %v7810_v15 = vsel %vm2654_vm9, %v7809_v61, %v7808_v18 }
 0xf4a   : > { %vm19263_vm6 = vmmov %vm19261_vm0 }
 0xf4b   : > { %v7677_v63 = vsel %vm2654_vm9, %v7676_v25, %v7675_v23  ;;  %vm19264_vm4 = vmmov %vm19261_vm0 }
 0xf4c   : > { %vm19265_vm9 = vmmov %vm19261_vm0 }
 0xf4d   : > { %vm19266_vm5 = vmmov %vm19261_vm0 }
 0xf4f   : > { %v13061_v38 = vpop.permute.xlu1 %13060 }
 0xf50   : > { %v13063_v4 = vunpack.i.h.bf16 %v13061_v38  ;;  %v13062_v7 = vunpack.i.l.bf16 %v13061_v38 }
 0xf52   : > { %v7742_v60 = vrot.slane %v13062_v7, 7  ;;  %v7744_v22 = vrot.slane %v13063_v4, 6  ;;  %v7610_v8 = vrot.slane %v13062_v7, 3  ;;  %v7612_v32 = vrot.slane %v13063_v4, 2 }
 0xf53   : > { %v7777_v47 = vsel %vm19256_vm12, %v13062_v7, %v7776_v37  ;;  %v7778_v48 = vrot.slane %v13063_v4, 7  ;;  %v7644_v31 = vrot.slane %v13062_v7, 4  ;;  %v7646_v36 = vrot.slane %v13063_v4, 3  ;;  %vm19267_vm12 = vmmov %vm19251_vm1 }
 0xf54   : > { %v7743_v21 = vsel %vm19257_vm13, %v7742_v60, %v7741_v26  ;;  %v7611_v2 = vsel %vm19258_vm14, %v7610_v8, %v7609_v50  ;;  %v7811_v14 = vrot.slane %v13062_v7, 1  ;;  %v7678_v19 = vrot.slane %v13062_v7, 5  ;;  %vm19268_vm13 = vmmov %vm19251_vm1 }
 0xf55   : > { %v7745_v29 = vsel %vm19259_vm7, %v7744_v22, %v7743_v21  ;;  %v7613_v11 = vsel %vm19260_vm15, %v7612_v32, %v7611_v2  ;;  %v7645_v58 = vsel %vm19261_vm0, %v7644_v31, %v7643_v1  ;;  %v7779_v10 = vsel %vm19251_vm1, %v7778_v48, %v7777_v47  ;;  %vm19269_vm14 = vmmov %vm19251_vm1 }
 0xf56   : > { %v13064_v41 = vpack.i.bf16 %v7745_v29, %v17120_v55  ;;  %v13069_v40 = vpack.i.bf16 %v7613_v11, %v17123_v52  ;;  %v7647_v45 = vsel %vm19262_vm8, %v7646_v36, %v7645_v58  ;;  %v7812_v53 = vsel %vm19263_vm6, %v7811_v14, %v7810_v15  ;;  %vm19270_vm7 = vmmov %vm19251_vm1  ;;  %v13536_v14 = vld [vmem:[%s18898_s2] sm:$0xff]  ;;  %v13538_v29 = vld [vmem:[%s18898_s2 + $0x10] sm:$0xff] }
 0xf57   : > { %v7680_v27 = vrot.slane %v13063_v4, 4  ;;  %v7679_v62 = vsel %vm19264_vm4, %v7678_v19, %v7677_v63  ;;  %v7712_v55 = vrot.slane %v13062_v7, 6  ;;  %v7714_v5 = vrot.slane %v13063_v4, 5  ;;  %v13537_v19 = vld [vmem:[%s18898_s2 + $0x8] sm:$0xff]  ;;  %v13539_v11 = vld [vmem:[%s18898_s2 + $0x18] sm:$0xff]  ;;  %v13540_v58 = vld [vmem:[%s18898_s2 + $0x20] sm:$0xff] }
 0xf58   : > { %13065 = vrot.lane.b32.xlu0 %v13064_v41, %s13631_s25  ;;  %13070 = vrot.lane.b32.xlu1 %v13069_v40, %s13631_s25  ;;  %v7580_v52 = vrot.slane %v13062_v7, 2  ;;  %v7582_v59 = vrot.slane %v13063_v4, 1  ;;  %v13074_v46 = vpack.i.bf16 %v7779_v10, %v17126_v54  ;;  %v13084_v0 = vpack.i.bf16 %v7647_v45, %v17129_v35  ;;  %v13541_v41 = vld [vmem:[%s18898_s2 + $0x28] sm:$0xff]  ;;  %v13542_v40 = vld [vmem:[%s18898_s2 + $0x30] sm:$0xff] }
 0xf59   : > { %v7713_v39 = vsel %vm19265_vm9, %v7712_v55, %v17171_v57  ;;  %v7813_v6 = vsel %vm19267_vm12, %v13063_v4, %v7812_v53  ;;  %v7681_v9 = vsel %vm19268_vm13, %v7680_v27, %v7679_v62  ;;  %vm19271_vm15 = vcmask 785408   ;;  %v13543_v15 = vld [vmem:[%s18898_s2 + $0x38] sm:$0xff]  ;;  %v13544_v63 = vld [vmem:[%s18898_s2 + $0x40] sm:$0xff]  ;;  %v19284_v53 = vld [vmem:[#allocation11_spill] sm:$0xff] }
 0xf5a   : > { %v7581_v42 = vsel %vm19266_vm5, %v7580_v52, %v7579_v12  ;;  %v7715_v33 = vsel %vm19269_vm14, %v7714_v5, %v7713_v39  ;;  %v13079_v54 = vpack.i.bf16 %v7813_v6, %v17116_v24  ;;  %v13089_v35 = vpack.i.bf16 %v7681_v9, %v17132_v28  ;;  %vm19272_vm0 = vmmov %vm19271_vm15  ;;  %v11257_v10 = vld [vmem:[%s18902_s6 + $0x4] sm:$0x3]  ;;  %v19285_v62 = vld [vmem:[#allocation31_spill] sm:$0xff] }
 0xf5b   : > { %v7583_v16 = vsel %vm19270_vm7, %v7582_v59, %v7581_v42  ;;  %vm19273_vm1 = vmmov %vm19272_vm0  ;;  %vm19275_vm6 = vcmask 130048   ;;  %v17296_v45 = vrot.slane %v11257_v10, %v13930_v43  ;;  %v17299_v27 = vrot.slane %v11257_v10, %v19284_v53  ;;  %v19286_v5 = vld [vmem:[#allocation30_spill] sm:$0xff]  ;;  %v19287_v42 = vld [vmem:[#allocation29_spill] sm:$0xff] }
 0xf5c   : > { %13075 = vrot.lane.b32.xlu0 %v13074_v46, %s13629_s22  ;;  %13085 = vrot.lane.b32.xlu1 %v13084_v0, %s13629_s22  ;;  %vm19274_vm8 = vmmov %vm19272_vm0 }
 0xf5d   : > { %vm19276_vm4 = vmmov %vm19275_vm6  ;;  %v5942_v55 = vadd.f32 %v19285_v62, %v17296_v45  ;;  %v5944_v52 = vadd.f32 %v19286_v5, %v17299_v27  ;;  %v5946_v6 = vadd.f32 %v19287_v42, %v17296_v45 }
 0xf5e   : > { %vm19277_vm9 = vmmov %vm19276_vm4 }
 0xf5f   : > { %vm19278_vm5 = vmmov %vm19276_vm4 }
 0xf60   : > { %13080 = vrot.lane.b32.xlu0 %v13079_v54, %s13630_s23  ;;  %13090 = vrot.lane.b32.xlu1 %v13089_v35, %s13630_s23  ;;  %vm19279_vm12 = vmmov %vm19276_vm4 }
 0xf61   : > { %vm19280_vm13 = vmmov %vm19276_vm4 }
 0xf62   : > { %vm19281_vm14 = vmmov %vm19276_vm4 }
 0xf63   : > { %vm19282_vm7 = vmmov %vm19276_vm4 }
 0xfca   : > { %v13066_v57 = vpop.permute.xlu0 %13065  ;;  %v13071_v12 = vpop.permute.xlu1 %13070 }
 0xfcb   : > { %v13068_v30 = vunpack.i.h.bf16 %v13066_v57  ;;  %v13067_v20 = vunpack.i.l.bf16 %v13066_v57  ;;  %v13073_v3 = vunpack.i.h.bf16 %v13071_v12  ;;  %v13072_v38 = vunpack.i.l.bf16 %v13071_v12 }
 0xfcd   : > { %v7827_v24 = vsel %vm1959_vm10, %v7715_v33, %v13068_v30  ;;  %v7826_v28 = vsel %vm1959_vm10, %v17135_v34, %v13067_v20  ;;  %v7821_v50 = vsel %vm1959_vm10, %v7583_v16, %v13073_v3  ;;  %v7820_v37 = vsel %vm1959_vm10, %v17138_v56, %v13072_v38  ;;  %v19288_v33 = vld [vmem:[#allocation28_spill] sm:$0xff] }
 0xfce   : > { %v13076_v26 = vpop.permute.xlu0 %13075  ;;  %v13086_v13 = vpop.permute.xlu1 %13085  ;;  %v5948_v16 = vadd.f32 %v19288_v33, %v17299_v27  ;;  %v19289_v38 = vld [vmem:[#allocation12_spill] sm:$0xff] }
 0xfcf   : > { %v13078_v61 = vunpack.i.h.bf16 %v13076_v26  ;;  %v13077_v17 = vunpack.i.l.bf16 %v13076_v26  ;;  %v13088_v4 = vunpack.i.h.bf16 %v13086_v13  ;;  %v13087_v7 = vunpack.i.l.bf16 %v13086_v13  ;;  %v19290_v13 = vld [vmem:[#allocation13_spill] sm:$0xff] }
 0xfd0   : > { %v5952_v26 = vadd.f32 %v19289_v38, %v17296_v45 }
 0xfd1   : > { %v7822_v8 = vsel %vm2032_vm11, %v7820_v37, %v13087_v7  ;;  %v7823_v32 = vsel %vm2032_vm11, %v7821_v50, %v13088_v4  ;;  %v7828_v47 = vsel %vm2032_vm11, %v7826_v28, %v13077_v17  ;;  %v7829_v48 = vsel %vm2032_vm11, %v7827_v24, %v13078_v61  ;;  %v19291_v7 = vld [vmem:[#allocation14_spill] sm:$0xff]  ;;  %v19292_v28 = vld [vmem:[#allocation15_spill] sm:$0xff] }
 0xfd2   : > { %v13081_v1 = vpop.permute.xlu0 %13080  ;;  %v13091_v18 = vpop.permute.xlu1 %13090  ;;  %v5954_v61 = vadd.f32 %v19290_v13, %v17299_v27  ;;  %v5956_v24 = vadd.f32 %v19291_v7, %v17296_v45  ;;  %v5958_v50 = vadd.f32 %v19292_v28, %v17299_v27 }
 0xfd3   : > { %v13083_v23 = vunpack.i.h.bf16 %v13081_v1  ;;  %v13082_v25 = vunpack.i.l.bf16 %v13081_v1  ;;  %v13093_v60 = vunpack.i.h.bf16 %v13091_v18  ;;  %v13092_v22 = vunpack.i.l.bf16 %v13091_v18 }
 0xfd5   : > { %v7824_v34 = vsel %vm19271_vm15, %v7822_v8, %v13092_v22  ;;  %v7825_v31 = vsel %vm19272_vm0, %v7823_v32, %v13093_v60  ;;  %v7830_v56 = vsel %vm19273_vm1, %v7828_v47, %v13082_v25  ;;  %v7831_v36 = vsel %vm19274_vm8, %v7829_v48, %v13083_v23  ;;  %vm19283_vm15 = vmmov %vm19276_vm4  ;;  %v19293_v23 = vld [vmem:[#allocation16_spill] sm:$0xff]  ;;  %v19294_v47 = vld [vmem:[#allocation17_spill] sm:$0xff] }
 0xfd6   : > { %v12739_v21 = vpack.c.bf16 %v7831_v36, %v7830_v56  ;;  %v12741_v2 = vpack.c.bf16 %v7825_v31, %v7824_v34  ;;  %v5962_v25 = vadd.f32 %v19293_v23, %v17296_v45  ;;  %v5964_v48 = vadd.f32 %v19294_v47, %v17299_v27  ;;  %v19295_v34 = vld [vmem:[#allocation18_spill] sm:$0xff] }
 0xfd7   : > { %v5966_v31 = vadd.f32 %v19295_v34, %v17296_v45  ;;  %vm19304_vm0 = vcmask 588800   ;;  %vm19306_vm8 = vcmask 1041408  }
 0xfd8   : > { %12740 = vmatprep.subr.bf16.mxu0 %v12739_v21  ;;  %v19296_v21 = vld [vmem:[#allocation19_spill] sm:$0xff]  ;;  %vm19305_vm1 = vmmov %vm19304_vm0 }
 0xfd9   : > { %12742 = vmatpush1.bf16.msra.mxu0 %v12741_v2  ;;  %v5968_v2 = vadd.f32 %v19296_v21, %v17299_v27 }
 0xfda   : > { %12759 = vmatprep.subr.bf16.mxu0 %v18975_v51 }
 0xfdc   : > { %11300 = vmatmul.mubr.msk.f32.vlgmr.msra.gmra.mrb[56].mxu0 %vm19275_vm6, %v13536_v14  ;;  %vm19307_vm6 = vcmask 1042432  }
 0xfdd   : > { %7902 = vmatprep.mubr.f32.mxu0 %v18977_v44 }
 0xfe0   : > { %11301 = vmatmul.mubr.msk.f32.gmra.mrb[58].mxu0 %vm19276_vm4, %v13537_v19  ;;  %vm19308_vm4 = vcmask 1043456  }
 0xfe1   : > { %7908 = vmatprep.mubr.f32.mxu0 %v18977_v44 }
 0xfe4   : > { %11302 = vmatmul.mubr.msk.f32.gmra.mrb[60].mxu0 %vm19277_vm9, %v13538_v29  ;;  %vm19309_vm9 = vcmask 1044480  }
 0xfe5   : > { %7914 = vmatprep.mubr.f32.mxu0 %v18977_v44 }
 0xfe8   : > { %11303 = vmatmul.mubr.msk.f32.gmra.mrb[62].mxu0 %vm19278_vm5, %v13539_v11  ;;  %v19297_v11 = vld [vmem:[#allocation20_spill] sm:$0xff]  ;;  %vm19310_vm5 = vmmov %vm19306_vm8 }
 0xfe9   : > { %7920 = vmatprep.mubr.f32.mxu0 %v18977_v44 }
 0xfec   : > { %11304 = vmatmul.mubr.msk.f32.gmra.mrb[64].mxu0 %vm19279_vm12, %v13540_v58  ;;  %v17354_v58 = vadd.f32 %v19297_v11, %v17296_v45  ;;  %vm19311_vm12 = vcmask 1045504  }
 0xfed   : > { %7926 = vmatprep.mubr.f32.mxu0 %v18977_v44 }
 0xff0   : > { %11305 = vmatmul.mubr.msk.f32.gmra.mrb[66].mxu0 %vm19280_vm13, %v13541_v41  ;;  %vm19312_vm13 = vmmov %vm19307_vm6 }
 0xff1   : > { %7932 = vmatprep.mubr.f32.mxu0 %v18977_v44 }
 0xff4   : > { %11306 = vmatmul.mubr.msk.f32.gmra.mrb[68].mxu0 %vm19281_vm14, %v13542_v40  ;;  %vm19313_vm14 = vcmask 1046528  }
 0xff5   : > { %7938 = vmatprep.mubr.f32.mxu0 %v18977_v44 }
 0xff8   : > { %11307 = vmatmul.mubr.msk.f32.gmra.mrb[70].mxu0 %vm19282_vm7, %v13543_v15  ;;  %vm19314_vm7 = vmmov %vm19308_vm4 }
 0xff9   : > { %7944 = vmatprep.mubr.f32.mxu0 %v18977_v44 }
 0xffc   : > { %11308 = vmatmul.mubr.msk.f32.gmra.mrb[72].mxu0 %vm19283_vm15, %v13544_v63  ;;  %vm19315_vm15 = vmmov %vm19309_vm9 }
 0xffd   : > { %12186 = vmatprep.mubr.msk.f32.mxu0 %vm13632_vm2, %v18977_v44 }
0x10af   : > { %v7898_v59 = vpop.f32.mrb[56].mxu0 }
0x10b0   : > { %v17305_v46 = vadd.f32 %v7898_v59, %v5942_v55  ;;  %v7900_v0 = vpop.f32.mrb[57].mxu0 }
0x10b1   : > { %v17307_v39 = vadd.f32 %v7900_v0, %v5944_v52  ;;  %v19298_v52 = vld [vmem:[#allocation21_spill] sm:$0xff]  ;;  %v19299_v0 = vld [vmem:[#allocation22_spill] sm:$0xff] }
0x10b2   : > { %v7969_v9 = vmul.f32 %v17305_v46, %v17305_v46  ;;  %v17365_v59 = vadd.f32 %v19298_v52, %v17299_v27  ;;  %v17369_v42 = vadd.f32 %v19299_v0, %v17296_v45 }
0x10b3   : > { %v7970_v54 = vmul.f32 %v17307_v39, %v17307_v39  ;;  %v7904_v35 = vpop.f32.mrb[58].mxu0 }
0x10b4   : > { %v7987_v57 = vmul.f32 %v7969_v9, %v17305_v46  ;;  %v17318_v12 = vadd.f32 %v7904_v35, %v5946_v6  ;;  %v7906_v30 = vpop.f32.mrb[59].mxu0 }
0x10b5   : > { %v7988_v20 = vmul.f32 %v7970_v54, %v17307_v39  ;;  %v17321_v3 = vadd.f32 %v7906_v30, %v5948_v16 }
0x10b6   : > { %v8005_v17 = vmul.f32 0.044715, %v7987_v57  ;;  %v7971_v4 = vmul.f32 %v17318_v12, %v17318_v12  ;;  %v19300_v57 = vld [vmem:[#allocation23_spill] sm:$0xff] }
0x10b7   : > { %v8006_v37 = vmul.f32 0.044715, %v7988_v20  ;;  %v7972_v1 = vmul.f32 %v17321_v3, %v17321_v3  ;;  %v7910_v18 = vpop.f32.mrb[60].mxu0  ;;  %v17379_v30 = vadd.f32 %v19300_v57, %v17299_v27 }
0x10b8   : > { %v8023_v60 = vadd.f32 %v8005_v17, %v17305_v46  ;;  %v7989_v22 = vmul.f32 %v7971_v4, %v17318_v12  ;;  %v17339_v8 = vadd.f32 %v7910_v18, %v5952_v26  ;;  %v7912_v32 = vpop.f32.mrb[61].mxu0 }
0x10b9   : > { %v7990_v56 = vmul.f32 %v7972_v1, %v17321_v3  ;;  %v17346_v36 = vadd.f32 %v7912_v32, %v5954_v61  ;;  %v8024_v41 = vadd.f32 %v8006_v37, %v17307_v39 }
0x10ba   : > { %v8041_v14 = vmul.f32 0.7978846, %v8023_v60  ;;  %v8007_v19 = vmul.f32 0.044715, %v7989_v22  ;;  %v7973_v29 = vmul.f32 %v17339_v8, %v17339_v8 }
0x10bb   : > { %v8008_v40 = vmul.f32 0.044715, %v7990_v56  ;;  %v7974_v15 = vmul.f32 %v17346_v36, %v17346_v36  ;;  %v7916_v63 = vpop.f32.mrb[62].mxu0  ;;  %v8042_v20 = vmul.f32 0.7978846, %v8024_v41 }
0x10bc   : > { %13413 = vtanh.f32 %v8041_v14  ;;  %v8025_v10 = vadd.f32 %v8007_v19, %v17318_v12  ;;  %v7991_v62 = vmul.f32 %v7973_v29, %v17339_v8  ;;  %v17361_v55 = vadd.f32 %v7916_v63, %v5956_v24  ;;  %v7918_v5 = vpop.f32.mrb[63].mxu0  ;;  %v19301_v24 = vld [vmem:[#allocation24_spill] sm:$0xff] }
0x10bd   : > { %v7992_v6 = vmul.f32 %v7974_v15, %v17346_v36  ;;  %v17372_v9 = vadd.f32 %v7918_v5, %v5958_v50  ;;  %v8026_v16 = vadd.f32 %v8008_v40, %v17321_v3  ;;  %v17389_v28 = vadd.f32 %v19301_v24, %v17296_v45 }
0x10be   : > { %v8043_v33 = vmul.f32 0.7978846, %v8025_v10  ;;  %v8009_v54 = vmul.f32 0.044715, %v7991_v62  ;;  %v7975_v35 = vmul.f32 %v17361_v55, %v17361_v55 }
0x10bf   : > { %v8010_v38 = vmul.f32 0.044715, %v7992_v6  ;;  %v7976_v26 = vmul.f32 %v17372_v9, %v17372_v9  ;;  %v7922_v13 = vpop.f32.mrb[64].mxu0  ;;  %v8044_v18 = vmul.f32 0.7978846, %v8026_v16 }
0x10c0   : > { %13415 = vtanh.f32 %v8043_v33  ;;  %v8027_v61 = vadd.f32 %v8009_v54, %v17339_v8  ;;  %v7993_v17 = vmul.f32 %v7975_v35, %v17361_v55  ;;  %v17385_v4 = vadd.f32 %v7922_v13, %v5962_v25  ;;  %v7924_v7 = vpop.f32.mrb[65].mxu0  ;;  %v19302_v25 = vld [vmem:[#allocation25_spill] sm:$0xff] }
0x10c1   : > { %v8028_v50 = vadd.f32 %v8010_v38, %v17346_v36  ;;  %v7994_v37 = vmul.f32 %v7976_v26, %v17372_v9  ;;  %v17393_v1 = vadd.f32 %v7924_v7, %v5964_v48  ;;  %v17399_v32 = vadd.f32 %v19302_v25, %v17299_v27 }
0x10c2   : > { %v8045_v23 = vmul.f32 0.7978846, %v8027_v61  ;;  %v8011_v60 = vmul.f32 0.044715, %v7993_v17  ;;  %v7977_v22 = vmul.f32 %v17385_v4, %v17385_v4  ;;  %13417 = vtanh.f32 %v8042_v20 }
0x10c3   : > { %v8012_v47 = vmul.f32 0.044715, %v7994_v37  ;;  %v7978_v45 = vmul.f32 %v17393_v1, %v17393_v1  ;;  %v7928_v34 = vpop.f32.mrb[66].mxu0  ;;  %v8046_v19 = vmul.f32 0.7978846, %v8028_v50 }
0x10c4   : > { %13419 = vtanh.f32 %v8045_v23  ;;  %v8029_v48 = vadd.f32 %v8011_v60, %v17361_v55  ;;  %v7995_v56 = vmul.f32 %v7977_v22, %v17385_v4  ;;  %v17405_v21 = vadd.f32 %v7928_v34, %v5966_v31  ;;  %v7930_v14 = vpop.f32.mrb[67].mxu0 }
0x10c5   : > { %v8030_v29 = vadd.f32 %v8012_v47, %v17372_v9  ;;  %v7996_v27 = vmul.f32 %v7978_v45, %v17393_v1  ;;  %v17409_v11 = vadd.f32 %v7930_v14, %v5968_v2  ;;  %13421 = vtanh.f32 %v8044_v18 }
0x10c6   : > { %v13414_v41 = vpop.eup %13413  ;;  %v8047_v40 = vmul.f32 0.7978846, %v8029_v48  ;;  %v8013_v15 = vmul.f32 0.044715, %v7995_v56  ;;  %v7979_v63 = vmul.f32 %v17405_v21, %v17405_v21 }
0x10c7   : > { %v8077_v10 = vadd.f32 1.0, %v13414_v41  ;;  %v8048_v62 = vmul.f32 0.7978846, %v8030_v29  ;;  %v8014_v5 = vmul.f32 0.044715, %v7996_v27  ;;  %v7980_v31 = vmul.f32 %v17409_v11, %v17409_v11  ;;  %v7934_v52 = vpop.f32.mrb[68].mxu0 }
0x10c8   : > { %13423 = vtanh.f32 %v8047_v40  ;;  %v8031_v0 = vadd.f32 %v8013_v15, %v17385_v4  ;;  %v7997_v2 = vmul.f32 %v7979_v63, %v17405_v21  ;;  %v17418_v6 = vadd.f32 %v7934_v52, %v17354_v58  ;;  %v7936_v33 = vpop.f32.mrb[69].mxu0 }
0x10c9   : > { %v8095_v16 = vmul.f32 0.5, %v8077_v10  ;;  %13425 = vtanh.f32 %v8046_v19  ;;  %v8032_v54 = vadd.f32 %v8014_v5, %v17393_v1  ;;  %v7998_v35 = vmul.f32 %v7980_v31, %v17409_v11 }
0x10ca   : > { %v13416_v57 = vpop.eup %13415  ;;  %v8049_v20 = vmul.f32 0.7978846, %v8031_v0  ;;  %v8015_v38 = vmul.f32 0.044715, %v7997_v2  ;;  %v7981_v26 = vmul.f32 %v17418_v6, %v17418_v6  ;;  %v17425_v13 = vadd.f32 %v7936_v33, %v17365_v59 }
0x10cb   : > { %v8079_v61 = vadd.f32 1.0, %v13416_v57  ;;  %13427 = vtanh.f32 %v8048_v62  ;;  %v8050_v58 = vmul.f32 0.7978846, %v8032_v54  ;;  %v8016_v17 = vmul.f32 0.044715, %v7998_v35  ;;  %v7940_v7 = vpop.f32.mrb[70].mxu0 }
0x10cc   : > { %13429 = vtanh.f32 %v8049_v20  ;;  %v8033_v24 = vadd.f32 %v8015_v38, %v17405_v21  ;;  %v7999_v50 = vmul.f32 %v7981_v26, %v17418_v6  ;;  %v7982_v37 = vmul.f32 %v17425_v13, %v17425_v13  ;;  %v7942_v18 = vpop.f32.mrb[71].mxu0  ;;  %v13418_v23 = vpop.eup %13417 }
0x10cd   : > { %v8113_v60 = vmul.f32 %v8095_v16, %v17305_v46  ;;  %v8097_v22 = vmul.f32 0.5, %v8079_v61  ;;  %v8034_v59 = vadd.f32 %v8016_v17, %v17409_v11  ;;  %v17434_v25 = vadd.f32 %v7940_v7, %v17369_v42 }
0x10ce   : > { %v13420_v47 = vpop.eup %13419  ;;  %v8051_v45 = vmul.f32 0.7978846, %v8033_v24  ;;  %v8017_v34 = vmul.f32 0.044715, %v7999_v50  ;;  %v8000_v48 = vmul.f32 %v7982_v37, %v17425_v13  ;;  %v17438_v56 = vadd.f32 %v7942_v18, %v17379_v30 }
0x10cf   : > { %v8081_v14 = vadd.f32 1.0, %v13420_v47  ;;  %13431 = vtanh.f32 %v8050_v58  ;;  %v8052_v19 = vmul.f32 0.7978846, %v8034_v59  ;;  %v7983_v46 = vmul.f32 %v17434_v25, %v17434_v25  ;;  %v7946_v29 = vpop.f32.mrb[72].mxu0  ;;  %v13422_v27 = vpop.eup %13421 }
0x10d0   : > { %13433 = vtanh.f32 %v8051_v45  ;;  %v8035_v42 = vadd.f32 %v8017_v34, %v17418_v6  ;;  %v8018_v41 = vmul.f32 0.044715, %v8000_v48  ;;  %v7984_v40 = vmul.f32 %v17438_v56, %v17438_v56  ;;  %v7948_v15 = vpop.f32.mrb[73].mxu0 }
0x10d1   : > { %v8115_v63 = vmul.f32 %v8097_v22, %v17318_v12  ;;  %13435 = vtanh.f32 %v8052_v19  ;;  %v8001_v30 = vmul.f32 %v7983_v46, %v17434_v25  ;;  %v17448_v10 = vadd.f32 %v7946_v29, %v17389_v28 }
0x10d2   : > { %v13424_v62 = vpop.eup %13423  ;;  %v8053_v5 = vmul.f32 0.7978846, %v8035_v42  ;;  %v8036_v31 = vadd.f32 %v8018_v41, %v17425_v13  ;;  %v8002_v52 = vmul.f32 %v7984_v40, %v17438_v56  ;;  %v17453_v0 = vadd.f32 %v7948_v15, %v17399_v32 }
0x10d3   : > { %v13426_v2 = vpop.eup %13425  ;;  %v8099_v33 = vmul.f32 0.5, %v8081_v14  ;;  %v8083_v16 = vadd.f32 1.0, %v13424_v62  ;;  %v8019_v54 = vmul.f32 0.044715, %v8001_v30  ;;  %v7985_v12 = vmul.f32 %v17448_v10, %v17448_v10 }
0x10d4   : > { %13437 = vtanh.f32 %v8053_v5  ;;  %v8054_v35 = vmul.f32 0.7978846, %v8036_v31  ;;  %v8020_v28 = vmul.f32 0.044715, %v8002_v52  ;;  %v7986_v57 = vmul.f32 %v17453_v0, %v17453_v0 }
0x10d5   : > { %v13428_v20 = vpop.eup %13427  ;;  %v8101_v38 = vmul.f32 0.5, %v8083_v16  ;;  %v8037_v26 = vadd.f32 %v8019_v54, %v17434_v25  ;;  %v8003_v32 = vmul.f32 %v7985_v12, %v17448_v10  ;;  %v8078_v61 = vadd.f32 1.0, %v13418_v23 }
0x10d6   : > { %v13430_v58 = vpop.eup %13429  ;;  %13439 = vtanh.f32 %v8054_v35  ;;  %v8038_v17 = vadd.f32 %v8020_v28, %v17438_v56  ;;  %v8004_v7 = vmul.f32 %v7986_v57, %v17453_v0  ;;  %v8080_v24 = vadd.f32 1.0, %v13422_v27 }
0x10d7   : > { %v8119_v50 = vmul.f32 %v8101_v38, %v17361_v55  ;;  %v8085_v37 = vadd.f32 1.0, %v13430_v58  ;;  %v8055_v18 = vmul.f32 0.7978846, %v8037_v26  ;;  %v8021_v22 = vmul.f32 0.044715, %v8003_v32 }
0x10d8   : > { %v8056_v59 = vmul.f32 0.7978846, %v8038_v17  ;;  %v8022_v47 = vmul.f32 0.044715, %v8004_v7  ;;  %v8096_v45 = vmul.f32 0.5, %v8078_v61  ;;  %v8098_v34 = vmul.f32 0.5, %v8080_v24 }
0x10d9   : > { %v13432_v48 = vpop.eup %13431  ;;  %v8117_v14 = vmul.f32 %v8099_v33, %v17339_v8  ;;  %13441 = vtanh.f32 %v8055_v18  ;;  %v8039_v23 = vadd.f32 %v8021_v22, %v17448_v10  ;;  %v17466_v19 = vpack.c.bf16 %v8115_v63, %v8113_v60 }
0x10da   : > { %v13434_v46 = vpop.eup %13433  ;;  %13443 = vtanh.f32 %v8056_v59  ;;  %v8040_v29 = vadd.f32 %v8022_v47, %v17453_v0  ;;  %v8114_v55 = vmul.f32 %v8096_v45, %v17307_v39  ;;  %v8116_v27 = vmul.f32 %v8098_v34, %v17321_v3 }
0x10db   : > { %v13436_v42 = vpop.eup %13435  ;;  %v8103_v41 = vmul.f32 0.5, %v8085_v37  ;;  %v8087_v40 = vadd.f32 1.0, %v13434_v46  ;;  %v8057_v15 = vmul.f32 0.7978846, %v8039_v23  ;;  %v8082_v30 = vadd.f32 1.0, %v13426_v2 }
0x10dc   : > { %v8058_v62 = vmul.f32 0.7978846, %v8040_v29  ;;  %v17471_v8 = vpack.c.bf16 %v8116_v27, %v8114_v55  ;;  %v8084_v5 = vadd.f32 1.0, %v13428_v20  ;;  %v17473_v31 = vpack.c.bf16 %v8119_v50, %v8117_v14 }
0x10dd   : > { %v8105_v60 = vmul.f32 0.5, %v8087_v40  ;;  %13445 = vtanh.f32 %v8057_v15  ;;  %v8100_v63 = vmul.f32 0.5, %v8082_v30  ;;  %v8086_v52 = vadd.f32 1.0, %v13432_v48 }
0x10de   : > { %v13438_v33 = vpop.eup %13437  ;;  %13447 = vtanh.f32 %v8058_v62  ;;  %12744 = vmatprep.subr.bf16.mxu1 %v17471_v8  ;;  %v8102_v39 = vmul.f32 0.5, %v8084_v5  ;;  %v8088_v3 = vadd.f32 1.0, %v13436_v42  ;;  %v8121_v16 = vmul.f32 %v8103_v41, %v17385_v4 }
0x10df   : > { %v8123_v2 = vmul.f32 %v8105_v60, %v17405_v21  ;;  %12746 = vmatpush1.bf16.msra.mxu1 %v17466_v19  ;;  %v8104_v54 = vmul.f32 0.5, %v8086_v52  ;;  %v8089_v35 = vadd.f32 1.0, %v13438_v33  ;;  %v8118_v28 = vmul.f32 %v8100_v63, %v17346_v36 }
0x10e0   : > { %v13440_v12 = vpop.eup %13439  ;;  %v8120_v57 = vmul.f32 %v8102_v39, %v17372_v9  ;;  %v8106_v20 = vmul.f32 0.5, %v8088_v3 }
0x10e1   : > { %v17481_v38 = vpack.c.bf16 %v8123_v2, %v8121_v16  ;;  %v8090_v26 = vadd.f32 1.0, %v13440_v12  ;;  %v8122_v61 = vmul.f32 %v8104_v54, %v17393_v1  ;;  %v8107_v17 = vmul.f32 0.5, %v8089_v35 }
0x10e2   : > { %v17483_v32 = vpack.c.bf16 %v8120_v57, %v8118_v28  ;;  %v8124_v4 = vmul.f32 %v8106_v20, %v17409_v11 }
0x10e3   : > { %v13442_v21 = vpop.eup %13441  ;;  %v8108_v9 = vmul.f32 0.5, %v8090_v26  ;;  %v8125_v11 = vmul.f32 %v8107_v17, %v17418_v6 }
0x10e4   : > { %v13444_v58 = vpop.eup %13443  ;;  %v8091_v7 = vadd.f32 1.0, %v13442_v21  ;;  %12748 = vmatprep.subr.bf16.mxu1 %v17483_v32  ;;  %v17488_v24 = vpack.c.bf16 %v8124_v4, %v8122_v61 }
0x10e5   : > { %12750 = vmatpush1.bf16.msra.mxu1 %v17473_v31  ;;  %v8092_v36 = vadd.f32 1.0, %v13444_v58  ;;  %v8126_v45 = vmul.f32 %v8108_v9, %v17425_v13 }
0x10e6   : > { %v8109_v50 = vmul.f32 0.5, %v8091_v7  ;;  %12752 = vmatprep.subr.bf16.mxu1 %v17488_v24 }
0x10e7   : > { %v13446_v37 = vpop.eup %13445  ;;  %v8110_v18 = vmul.f32 0.5, %v8092_v36 }
0x10e8   : > { %v13448_v1 = vpop.eup %13447  ;;  %v8127_v22 = vmul.f32 %v8109_v50, %v17434_v25  ;;  %v8093_v59 = vadd.f32 1.0, %v13446_v37 }
0x10e9   : > { %v8094_v47 = vadd.f32 1.0, %v13448_v1  ;;  %12754 = vmatpush1.bf16.msra.mxu1 %v17481_v38  ;;  %v8128_v34 = vmul.f32 %v8110_v18, %v17438_v56 }
0x10ea   : > { %v8111_v48 = vmul.f32 0.5, %v8093_v59  ;;  %v17497_v14 = vpack.c.bf16 %v8127_v22, %v8125_v11 }
0x10eb   : > { %v8112_v23 = vmul.f32 0.5, %v8094_v47  ;;  %v17499_v46 = vpack.c.bf16 %v8128_v34, %v8126_v45 }
0x10ec   : > { %v8129_v29 = vmul.f32 %v8111_v48, %v17448_v10  ;;  %v13545_v10 = vld [vmem:[%s18957_s19] sm:$0xff] }
0x10ed   : > { %v8130_v6 = vmul.f32 %v8112_v23, %v17453_v0  ;;  %12756 = vmatprep.subr.bf16.mxu1 %v17499_v46  ;;  %v13546_v0 = vld [vmem:[%s18957_s19 + $0x8] sm:$0xff] }
0x10ee   : > { %v17504_v25 = vpack.c.bf16 %v8129_v29, %v8129_v29  ;;  %12758 = vmatpush1.bf16.msra.mxu1 %v17497_v14 }
0x10ef   : > { %v17507_v55 = vpack.c.bf16 %v8130_v6, %v8130_v6 }
0x10f0   : > { %19303 = vst [vmem:[#allocation27_spill] sm:$0xff] %v17504_v25  ;;  %v8157_v56 = vunpack.c.l.bf16 %v17504_v25 }
0x10f1   : > { %v8158_v13 = vunpack.c.l.bf16 %v17507_v55 }
0x10f3   : > { %8175 = vmatprep.subr.mxu1 %v8158_v13 }
0x10f4   : > { %8176 = vmatpush1.msra.mxu1 %v8157_v56 }
0x10f5   : > { %11309 = vmatmul.mubr.msk.f32.vlgmr.msra.gmra.mrb[116].mxu1 %vm19304_vm0, %v13545_v10  ;;  %12771 = vmatprep.subr.bf16.mxu1 %v18975_v51  ;;  %vm19316_vm0 = vmmov %vm19311_vm12 }
0x10f6   : > { %8229 = vmatprep.mubr.f32.mxu1 %v18977_v44 }
0x10f9   : > { %11310 = vmatmul.mubr.msk.f32.gmra.mrb[118].mxu1 %vm19305_vm1, %v13546_v0  ;;  %vm19317_vm1 = vmmov %vm19310_vm5 }
0x10fa   : > { %12205 = vmatprep.mubr.msk.f32.mxu1 %vm13632_vm2, %v18977_v44 }
0x11c8   : > { %v17523_v27 = vpop.f32.mrb[116].mxu1 }
0x11c9   : > { %v8245_v42 = vrot.slane %v17523_v27, %v13982_v49  ;;  %v17527_v41 = vpop.f32.mrb[117].mxu1 }
0x11ca   : > { %v8361_v15 = vrot.slane %v17527_v41, %v13982_v49 }
0x11cb   : > { %v17530_v40 = vrot.slane %v8245_v42, %v13982_v49  ;;  %v8253_v5 = vcombine.high %v8245_v42, %v8245_v42 }
0x11cc   : > { %v8231_v30 = vpop.f32.mrb[118].mxu1  ;;  %v8377_v60 = vrot.slane %v8361_v15, %v13982_v49  ;;  %v8369_v16 = vcombine.high %v8361_v15, %v8361_v15 }
0x11cd   : > { %v17534_v62 = vpop.f32.mrb[119].mxu1  ;;  %v8455_v63 = vrot.slane %v17530_v40, %v13930_v43  ;;  %v17542_v52 = vrot.slane %v8253_v5, %v13982_v49  ;;  %v17557_v3 = vcombine.high %v17530_v40, %v17530_v40  ;;  %v8294_v54 = vrot.slane %v8231_v30, %v13982_v49 }
0x11ce   : > { %v17545_v33 = vrot.slane %v8377_v60, %v13930_v43  ;;  %v17568_v12 = vrot.slane %v8369_v16, %v13982_v49  ;;  %v8399_v20 = vcombine.high %v8377_v60, %v8377_v60  ;;  %v8410_v17 = vrot.slane %v17534_v62, %v13982_v49 }
0x11cf   : > { %8612 = vrot.lane.b32.xlu0 %v8455_v63, %s13631_s25  ;;  %8516 = vrot.lane.b32.xlu1 %v8455_v63, %s13630_s23  ;;  %v8459_v39 = vrot.slane %v17542_v52, %v13930_v43  ;;  %v8463_v2 = vrot.slane %v17557_v3, %v13930_v43  ;;  %v17573_v35 = vrot.slane %v8294_v54, %v13982_v49 }
0x11d0   : > { %v17577_v28 = vrot.slane %v17568_v12, %v13930_v43  ;;  %v17587_v26 = vcombine.high %v17542_v52, %v17542_v52  ;;  %v17593_v61 = vrot.slane %v8399_v20, %v13930_v43  ;;  %v8302_v21 = vcombine.high %v8294_v54, %v8294_v54 }
0x11d1   : > { %v8487_v57 = vrot.slane %v17573_v35, %v13930_v43  ;;  %v8426_v7 = vrot.slane %v8410_v17, %v13982_v49  ;;  %v8287_v9 = vcombine.high %v8231_v30, %v8231_v30  ;;  %v17624_v18 = vcombine.high %v17573_v35, %v17573_v35 }
0x11d2   : > { %v8467_v4 = vrot.slane %v17587_v26, %v13930_v43  ;;  %v17604_v58 = vrot.slane %v8302_v21, %v13982_v49  ;;  %v8418_v11 = vcombine.high %v8410_v17, %v8410_v17  ;;  %v8403_v13 = vcombine.high %v17534_v62, %v17534_v62 }
0x11d3   : > { %8564 = vrot.lane.b32.xlu1 %v8455_v63, %s13629_s22  ;;  %8740 = vrot.lane.b32.xlu0 %v17545_v33, %s13630_s23  ;;  %v17616_v50 = vrot.slane %v8426_v7, %v13930_v43  ;;  %v8301_v37 = vrot.slane %v8287_v9, %v13982_v49  ;;  %v8495_v22 = vrot.slane %v17624_v18, %v13930_v43 }
0x11d4   : > { %v8491_v36 = vrot.slane %v17604_v58, %v13930_v43  ;;  %v8440_v59 = vrot.slane %v8418_v11, %v13982_v49  ;;  %v17650_v34 = vcombine.high %v17604_v58, %v17604_v58  ;;  %v8448_v29 = vcombine.high %v8426_v7, %v8426_v7 }
0x11d5   : > { %v17630_v1 = vrot.slane %v8301_v37, %v13982_v49  ;;  %v8303_v23 = vcombine.high %v8301_v37, %v8301_v37  ;;  %v8417_v10 = vrot.slane %v8403_v13, %v13982_v49  ;;  %v8401_v60 = vcombine.high %v17568_v12, %v17568_v12 }
0x11d6   : > { %v17643_v45 = vrot.slane %v8440_v59, %v13930_v43  ;;  %v8499_v48 = vrot.slane %v17650_v34, %v13930_v43  ;;  %v17668_v56 = vrot.slane %v8448_v29, %v13930_v43  ;;  %v8450_v62 = vcombine.high %v8440_v59, %v8440_v59 }
0x11d7   : > { %8518 = vrot.lane.b32.xlu1 %v8459_v39, %s13630_s23  ;;  %8788 = vrot.lane.b32.xlu0 %v17545_v33, %s13629_s22  ;;  %v8503_v47 = vrot.slane %v17630_v1, %v13930_v43  ;;  %v17663_v6 = vrot.slane %v8303_v23, %v13982_v49  ;;  %v8433_v42 = vrot.slane %v8417_v10, %v13982_v49 }
0x11d8   : > { %v17688_v30 = vcombine.high %v17630_v1, %v17630_v1  ;;  %v17701_v63 = vrot.slane %v8450_v62, %v13930_v43  ;;  %v17708_v16 = vrot.slane %v8401_v60, %v13930_v43  ;;  %v8238_v7 = vcombine.high %v17523_v27, %v17523_v27 }
0x11d9   : > { %v8507_v0 = vrot.slane %v17663_v6, %v13930_v43  ;;  %v17684_v15 = vrot.slane %v8433_v42, %v13930_v43  ;;  %v17730_v20 = vcombine.high %v17663_v6, %v17663_v6 }
0x11da   : > { %v8511_v5 = vrot.slane %v17688_v30, %v13930_v43  ;;  %v8252_v11 = vrot.slane %v8238_v7, %v13982_v49 }
0x11db   : > { %8566 = vrot.lane.b32.xlu1 %v8459_v39, %s13629_s22  ;;  %8836 = vrot.lane.b32.xlu0 %v17545_v33, %s13631_s25  ;;  %v8515_v17 = vrot.slane %v17730_v20, %v13930_v43 }
0x11dc   : > { %v8254_v27 = vcombine.high %v8252_v11, %v8252_v11  ;;  %v17762_v23 = vrot.slane %v8252_v11, %v13982_v49 }
0x11df   : > { %8614 = vrot.lane.b32.xlu1 %v8459_v39, %s13631_s25  ;;  %8520 = vrot.lane.b32.xlu0 %v8463_v2, %s13630_s23  ;;  %v8419_v39 = vcombine.high %v8417_v10, %v8417_v10 }
0x11e3   : > { %8568 = vrot.lane.b32.xlu1 %v8463_v2, %s13629_s22  ;;  %8616 = vrot.lane.b32.xlu0 %v8463_v2, %s13631_s25  ;;  %v8447_v2 = vrot.slane %v8419_v39, %v13982_v49  ;;  %v8471_v39 = vrot.slane %v17762_v23, %v13930_v43 }
0x11e5   : > { %v17718_v54 = vrot.slane %v8447_v2, %v13930_v43 }
0x11e7   : > { %8790 = vrot.lane.b32.xlu1 %v17577_v28, %s13629_s22  ;;  %8742 = vrot.lane.b32.xlu0 %v17577_v28, %s13630_s23 }
0x11eb   : > { %8838 = vrot.lane.b32.xlu0 %v17577_v28, %s13631_s25  ;;  %8580 = vrot.lane.b32.xlu1 %v8487_v57, %s13629_s22 }
0x11ef   : > { %8744 = vrot.lane.b32.xlu0 %v17593_v61, %s13630_s23  ;;  %8522 = vrot.lane.b32.xlu1 %v8467_v4, %s13630_s23 }
0x11f3   : > { %8792 = vrot.lane.b32.xlu0 %v17593_v61, %s13629_s22  ;;  %8570 = vrot.lane.b32.xlu1 %v8467_v4, %s13629_s22 }
0x11f7   : > { %8618 = vrot.lane.b32.xlu1 %v8467_v4, %s13631_s25  ;;  %8532 = vrot.lane.b32.xlu0 %v8487_v57, %s13630_s23 }
0x11fb   : > { %8628 = vrot.lane.b32.xlu0 %v8487_v57, %s13631_s25  ;;  %8534 = vrot.lane.b32.xlu1 %v8491_v36, %s13630_s23 }
0x11ff   : > { %8582 = vrot.lane.b32.xlu1 %v8491_v36, %s13629_s22  ;;  %8756 = vrot.lane.b32.xlu0 %v17616_v50, %s13630_s23 }
0x1203   : > { %8630 = vrot.lane.b32.xlu1 %v8491_v36, %s13631_s25  ;;  %8804 = vrot.lane.b32.xlu0 %v17616_v50, %s13629_s22  ;;  %v8449_v36 = vcombine.high %v8433_v42, %v8433_v42  ;;  %v17774_v42 = vrot.slane %v8254_v27, %v13982_v49 }
0x1207   : > { %8584 = vrot.lane.b32.xlu1 %v8495_v22, %s13629_s22  ;;  %8852 = vrot.lane.b32.xlu0 %v17616_v50, %s13631_s25 }
0x120b   : > { %8588 = vrot.lane.b32.xlu1 %v8503_v47, %s13629_s22  ;;  %8536 = vrot.lane.b32.xlu0 %v8495_v22, %s13630_s23 }
0x120f   : > { %8632 = vrot.lane.b32.xlu0 %v8495_v22, %s13631_s25  ;;  %8758 = vrot.lane.b32.xlu1 %v17643_v45, %s13630_s23 }
0x1213   : > { %8540 = vrot.lane.b32.xlu0 %v8503_v47, %s13630_s23  ;;  %8854 = vrot.lane.b32.xlu1 %v17643_v45, %s13631_s25 }
0x1217   : > { %8636 = vrot.lane.b32.xlu0 %v8503_v47, %s13631_s25  ;;  %8538 = vrot.lane.b32.xlu1 %v8499_v48, %s13630_s23  ;;  %v17756_v47 = vrot.slane %v8449_v36, %v13930_v43  ;;  %v8475_v36 = vrot.slane %v17774_v42, %v13930_v43 }
0x121b   : > { %8806 = vrot.lane.b32.xlu0 %v17643_v45, %s13629_s22  ;;  %8586 = vrot.lane.b32.xlu1 %v8499_v48, %s13629_s22 }
0x121f   : > { %8760 = vrot.lane.b32.xlu0 %v17668_v56, %s13630_s23  ;;  %8634 = vrot.lane.b32.xlu1 %v8499_v48, %s13631_s25  ;;  %v8451_v48 = vcombine.high %v8447_v2, %v8447_v2 }
0x1221   : > { %v17765_v10 = vrot.slane %v8451_v48, %v13930_v43 }
0x1223   : > { %8808 = vrot.lane.b32.xlu0 %v17668_v56, %s13629_s22  ;;  %8542 = vrot.lane.b32.xlu1 %v8507_v0, %s13630_s23 }
0x1227   : > { %8856 = vrot.lane.b32.xlu0 %v17668_v56, %s13631_s25  ;;  %8590 = vrot.lane.b32.xlu1 %v8507_v0, %s13629_s22 }
0x122b   : > { %8638 = vrot.lane.b32.xlu1 %v8507_v0, %s13631_s25  ;;  %8764 = vrot.lane.b32.xlu0 %v17684_v15, %s13630_s23 }
0x122f   : > { %8592 = vrot.lane.b32.xlu1 %v8511_v5, %s13629_s22  ;;  %8812 = vrot.lane.b32.xlu0 %v17684_v15, %s13629_s22 }
0x1233   : > { %8762 = vrot.lane.b32.xlu1 %v17701_v63, %s13630_s23  ;;  %8860 = vrot.lane.b32.xlu0 %v17684_v15, %s13631_s25 }
0x1237   : > { %8794 = vrot.lane.b32.xlu1 %v17708_v16, %s13629_s22  ;;  %8544 = vrot.lane.b32.xlu0 %v8511_v5, %s13630_s23 }
0x123b   : > { %8858 = vrot.lane.b32.xlu1 %v17701_v63, %s13631_s25  ;;  %8640 = vrot.lane.b32.xlu0 %v8511_v5, %s13631_s25 }
0x123f   : > { %8810 = vrot.lane.b32.xlu0 %v17701_v63, %s13629_s22  ;;  %8766 = vrot.lane.b32.xlu1 %v17718_v54, %s13630_s23 }
0x1241   : > { %v17724_v12 = vpop.permute.xlu0 %8612  ;;  %v17726_v57 = vpop.permute.xlu1 %8516 }
0x1243   : > { %8840 = vrot.lane.b32.xlu0 %v17593_v61, %s13631_s25  ;;  %8862 = vrot.lane.b32.xlu1 %v17718_v54, %s13631_s25 }
0x1245   : > { %v17736_v4 = vpop.permute.xlu1 %8564  ;;  %v17738_v21 = vpop.permute.xlu0 %8740 }
0x1247   : > { %8746 = vrot.lane.b32.xlu0 %v17708_v16, %s13630_s23  ;;  %8546 = vrot.lane.b32.xlu1 %v8515_v17, %s13630_s23 }
0x1249   : > { %v8519_v9 = vpop.permute.xlu1 %8518  ;;  %v17747_v37 = vpop.permute.xlu0 %8788 }
0x124a   : > { %v8885_v0 = vsel %vm1808_vm3, %v17542_v52, %v8519_v9 }
0x124b   : > { %8814 = vrot.lane.b32.xlu0 %v17718_v54, %s13629_s22  ;;  %8594 = vrot.lane.b32.xlu1 %v8515_v17, %s13629_s22 }
0x124d   : > { %v8567_v22 = vpop.permute.xlu1 %8566  ;;  %v17753_v59 = vpop.permute.xlu0 %8836 }
0x124e   : > { %v8901_v62 = vsel %vm19306_vm8, %v8885_v0, %v8567_v22  ;;  %vm19318_vm8 = vmmov %vm19307_vm6 }
0x124f   : > { %8768 = vrot.lane.b32.xlu0 %v17756_v47, %s13630_s23  ;;  %8642 = vrot.lane.b32.xlu1 %v8515_v17, %s13631_s25 }
0x1251   : > { %v8615_v29 = vpop.permute.xlu1 %8614  ;;  %v8521_v13 = vpop.permute.xlu0 %8520 }
0x1252   : > { %v8917_v2 = vsel %vm19307_vm6, %v8901_v62, %v8615_v29  ;;  %v8886_v9 = vsel %vm1808_vm3, %v17557_v3, %v8521_v13  ;;  %v9036_v3 = vld [vmem:[%s18904_s8] sm:$0xff]  ;;  %v9037_v13 = vld [vmem:[%s18904_s8 + $0x8] sm:$0xff]  ;;  %vm19319_vm6 = vmmov %vm19308_vm4 }
0x1253   : > { %8816 = vrot.lane.b32.xlu0 %v17756_v47, %s13629_s22  ;;  %8770 = vrot.lane.b32.xlu1 %v17765_v10, %s13630_s23  ;;  %v8933_v52 = vsel %vm19308_vm4, %v8917_v2, %v17577_v28  ;;  %v12760_v62 = vpack.c.bf16 %v9037_v13, %v9036_v3  ;;  %v9041_v3 = vld [vmem:[%s18904_s8 + $0x28] sm:$0xff]  ;;  %vm19320_vm4 = vmmov %vm19317_vm1 }
0x1255   : > { %v8569_v5 = vpop.permute.xlu1 %8568  ;;  %v8617_v60 = vpop.permute.xlu0 %8616  ;;  %12761 = vmatpush3.bf16.msra.mxu0 %v12760_v62 }
0x1256   : > { %v8902_v22 = vsel %vm19310_vm5, %v8886_v9, %v8569_v5  ;;  %v8354_v5 = vcombine.high %v17527_v41, %v17527_v41  ;;  %12762 = vmatprep.subr.bf16.mxu0 %v18975_v51  ;;  %v9039_v9 = vld [vmem:[%s18904_s8 + $0x18] sm:$0xff]  ;;  %vm19322_vm5 = vmmov %vm19319_vm6 }
0x1257   : > { %8864 = vrot.lane.b32.xlu0 %v17756_v47, %s13631_s25  ;;  %8572 = vrot.lane.b32.xlu1 %v8471_v39, %s13629_s22  ;;  %v8918_v28 = vsel %vm19312_vm13, %v8902_v22, %v8617_v60  ;;  %vm19324_vm13 = vmmov %vm19316_vm0 }
0x1258   : > { %v8934_v60 = vsel %vm19314_vm7, %v8918_v28, %v17593_v61  ;;  %v8368_v61 = vrot.slane %v8354_v5, %v13982_v49  ;;  %vm19325_vm7 = vmmov %vm19317_vm1 }
0x1259   : > { %v8791_v17 = vpop.permute.xlu1 %8790  ;;  %v8743_v7 = vpop.permute.xlu0 %8742 }
0x125a   : > { %v8949_v11 = vsel %vm19309_vm9, %v8933_v52, %v8743_v7  ;;  %v9038_v52 = vld [vmem:[%s18904_s8 + $0x10] sm:$0xff]  ;;  %v17839_v13 = vrot.slane %v8368_v61, %v13982_v49  ;;  %vm19321_vm9 = vmmov %vm19318_vm8 }
0x125b   : > { %8818 = vrot.lane.b32.xlu0 %v17765_v10, %s13629_s22  ;;  %8526 = vrot.lane.b32.xlu1 %v8475_v36, %s13630_s23  ;;  %v8965_v48 = vsel %vm19311_vm12, %v8949_v11, %v8791_v17  ;;  %v12763_v41 = vpack.c.bf16 %v9039_v9, %v9038_v52  ;;  %vm19323_vm12 = vmmov %vm19315_vm15 }
0x125d   : > { %v8839_v27 = vpop.permute.xlu0 %8838  ;;  %v8581_v29 = vpop.permute.xlu1 %8580  ;;  %12764 = vmatpush3.bf16.msra.mxu0 %v12763_v41 }
0x125e   : > { %v17797_v0 = vsel %vm19313_vm14, %v8965_v48, %v8839_v27  ;;  %12765 = vmatprep.subr.bf16.mxu0 %v18975_v51 }
0x125f   : > { %8866 = vrot.lane.b32.xlu0 %v17765_v10, %s13631_s25  ;;  %8574 = vrot.lane.b32.xlu1 %v8475_v36, %s13629_s22 }
0x1261   : > { %v8745_v2 = vpop.permute.xlu0 %8744  ;;  %v8523_v17 = vpop.permute.xlu1 %8522 }
0x1262   : > { %v8950_v7 = vsel %vm19315_vm15, %v8934_v60, %v8745_v2  ;;  %v8887_v11 = vsel %vm1808_vm3, %v17587_v26, %v8523_v17  ;;  %v9042_v2 = vld [vmem:[%s18904_s8 + $0x30] sm:$0xff]  ;;  %v9043_v17 = vld [vmem:[%s18904_s8 + $0x38] sm:$0xff]  ;;  %vm19326_vm15 = vmmov %vm19318_vm8 }
0x1263   : > { %8842 = vrot.lane.b32.xlu0 %v17708_v16, %s13631_s25  ;;  %8622 = vrot.lane.b32.xlu1 %v8475_v36, %s13631_s25  ;;  %v9040_v36 = vld [vmem:[%s18904_s8 + $0x20] sm:$0xff]  ;;  %v12769_v52 = vpack.c.bf16 %v9043_v17, %v9042_v2 }
0x1264   : > { %v12766_v26 = vpack.c.bf16 %v9041_v3, %v9040_v36  ;;  %v9045_v36 = vld [vmem:[%s18904_s8 + $0x48] sm:$0xff] }
0x1265   : > { %v8793_v22 = vpop.permute.xlu0 %8792  ;;  %v8571_v48 = vpop.permute.xlu1 %8570 }
0x1266   : > { %v17827_v27 = vsel %vm19316_vm0, %v8950_v7, %v8793_v22  ;;  %v8903_v28 = vsel %vm19317_vm1, %v8887_v11, %v8571_v48  ;;  %12767 = vmatpush3.bf16.msra.mxu0 %v12766_v26  ;;  %v17856_v11 = vrot.slane %v17839_v13, %v13930_v43  ;;  %v8370_v22 = vcombine.high %v8368_v61, %v8368_v61  ;;  %vm19327_vm0 = vmmov %vm19322_vm5 }
0x1267   : > { %8524 = vrot.lane.b32.xlu0 %v8471_v39, %s13630_s23  ;;  %12768 = vmatprep.subr.bf16.mxu0 %v18975_v51  ;;  %vm19328_vm1 = vmmov %vm19323_vm12 }
0x1269   : > { %v8619_v62 = vpop.permute.xlu1 %8618  ;;  %v8533_v5 = vpop.permute.xlu0 %8532 }
0x126a   : > { %v8919_v60 = vsel %vm19318_vm8, %v8903_v28, %v8619_v62  ;;  %12770 = vmatpush3.bf16.msra.mxu0 %v12769_v52  ;;  %v9044_v28 = vld [vmem:[%s18904_s8 + $0x40] sm:$0xff]  ;;  %vm19329_vm8 = vmmov %vm19324_vm13 }
0x126b   : > { %8620 = vrot.lane.b32.xlu0 %v8471_v39, %s13631_s25  ;;  %v17852_v7 = vsel %vm19319_vm6, %v8919_v60, %v17708_v16  ;;  %12783 = vmatprep.subr.bf16.mxu0 %v18975_v51  ;;  %v8892_v39 = vsel %vm1808_vm3, %v17573_v35, %v8533_v5  ;;  %v12772_v3 = vpack.c.bf16 %v9045_v36, %v9044_v28  ;;  %v9046_v60 = vld [vmem:[%s18904_s8 + $0x50] sm:$0xff]  ;;  %v9048_v28 = vld [vmem:[%s18904_s8 + $0x60] sm:$0xff]  ;;  %vm19330_vm6 = vmmov %vm19313_vm14 }
0x126c   : > { %v8908_v26 = vsel %vm19320_vm4, %v8892_v39, %v8581_v29  ;;  %v17874_v35 = vrot.slane %v8370_v22, %v13982_v49  ;;  %v9047_v29 = vld [vmem:[%s18904_s8 + $0x58] sm:$0xff] }
0x126d   : > { %v8629_v9 = vpop.permute.xlu0 %8628  ;;  %v8535_v41 = vpop.permute.xlu1 %8534  ;;  %12773 = vmatpush3.bf16.msra.mxu1 %v12772_v3  ;;  %v12775_v49 = vpack.c.bf16 %v9047_v29, %v9046_v60  ;;  %v9051_v60 = vld [vmem:[%s18904_s8 + $0x78] sm:$0xff] }
0x126e   : > { %v8924_v62 = vsel %vm19321_vm9, %v8908_v26, %v8629_v9  ;;  %12774 = vmatprep.subr.bf16.mxu1 %v18975_v51  ;;  %v17891_v22 = vrot.slane %v17874_v35, %v13930_v43 }
0x126f   : > { %8748 = vrot.lane.b32.xlu0 %v17856_v11, %s13630_s23  ;;  %v8940_v2 = vsel %vm19322_vm5, %v8924_v62, %v17616_v50  ;;  %v9049_v50 = vld [vmem:[%s18904_s8 + $0x68] sm:$0xff]  ;;  %v17906_v62 = vcombine.high %v17762_v23, %v17762_v23  ;;  %vm19331_vm5 = vmmov %vm19327_vm0 }
0x1271   : > { %v8583_v48 = vpop.permute.xlu1 %8582  ;;  %v8757_v16 = vpop.permute.xlu0 %8756  ;;  %12776 = vmatpush3.bf16.msra.mxu1 %v12775_v49 }
0x1272   : > { %v8956_v17 = vsel %vm19323_vm12, %v8940_v2, %v8757_v16  ;;  %12777 = vmatprep.subr.bf16.mxu1 %v18975_v51  ;;  %v12778_v16 = vpack.c.bf16 %v9049_v50, %v9048_v28  ;;  %v8893_v50 = vsel %vm1808_vm3, %v17604_v58, %v8535_v41  ;;  %vm19332_vm12 = vmmov %vm19328_vm1 }
0x1273   : > { %8796 = vrot.lane.b32.xlu0 %v17856_v11, %s13629_s22 }
0x1275   : > { %v8631_v61 = vpop.permute.xlu1 %8630  ;;  %v8805_v5 = vpop.permute.xlu0 %8804  ;;  %12779 = vmatpush3.bf16.msra.mxu1 %v12778_v16 }
0x1276   : > { %v8972_v52 = vsel %vm19324_vm13, %v8956_v17, %v8805_v5  ;;  %v9050_v5 = vld [vmem:[%s18904_s8 + $0x70] sm:$0xff]  ;;  %12780 = vmatprep.subr.bf16.mxu1 %v18975_v51  ;;  %v17919_v17 = vrot.slane %v17906_v62, %v13930_v43  ;;  %vm19333_vm13 = vmmov %vm19329_vm8 }
0x1277   : > { %8844 = vrot.lane.b32.xlu0 %v17856_v11, %s13631_s25  ;;  %v12781_v29 = vpack.c.bf16 %v9051_v60, %v9050_v5 }
0x1279   : > { %v8585_v9 = vpop.permute.xlu1 %8584  ;;  %v8853_v39 = vpop.permute.xlu0 %8852  ;;  %12782 = vmatpush3.bf16.msra.mxu1 %v12781_v29 }
0x127a   : > { %v8988_v36 = vsel %vm19313_vm14, %v8972_v52, %v8853_v39  ;;  %12795 = vmatprep.subr.bf16.mxu1 %v18975_v51  ;;  %v8400_v52 = vcombine.high %v17839_v13, %v17839_v13  ;;  %vm19334_vm14 = vmmov %vm19330_vm6 }
0x127b   : > { %8750 = vrot.lane.b32.xlu0 %v17891_v22, %s13630_s23  ;;  %9004 = vrot.lane.b32.xlu1 %v8988_v36, %s13631_s25  ;;  %v8909_v36 = vsel %vm19325_vm7, %v8893_v50, %v8583_v48  ;;  %vm19335_vm7 = vmmov %vm19320_vm4 }
0x127c   : > { %v8925_v16 = vsel %vm19326_vm15, %v8909_v36, %v8631_v61  ;;  %v17933_v29 = vrot.slane %v8400_v52, %v13930_v43  ;;  %vm19336_vm15 = vmmov %vm19321_vm9 }
0x127d   : > { %v8589_v3 = vpop.permute.xlu1 %8588  ;;  %v8537_v26 = vpop.permute.xlu0 %8536  ;;  %v8941_v13 = vsel %vm19327_vm0, %v8925_v16, %v17643_v45  ;;  %v8402_v45 = vcombine.high %v17874_v35, %v17874_v35 }
0x127e   : > { %v8894_v61 = vsel %vm1808_vm3, %v17624_v18, %v8537_v26 }
0x127f   : > { %8846 = vrot.lane.b32.xlu0 %v17891_v22, %s13631_s25  ;;  %v17956_v18 = vrot.slane %v8402_v45, %v13930_v43 }
0x1281   : > { %v8633_v2 = vpop.permute.xlu0 %8632  ;;  %v8759_v49 = vpop.permute.xlu1 %8758 }
0x1282   : > { %v8957_v58 = vsel %vm19328_vm1, %v8941_v13, %v8759_v49  ;;  %v8910_v49 = vsel %vm19320_vm4, %v8894_v61, %v8585_v9 }
0x1283   : > { %8528 = vrot.lane.b32.xlu0 %v17919_v17, %s13630_s23  ;;  %v8926_v36 = vsel %vm19321_vm9, %v8910_v49, %v8633_v2 }
0x1284   : > { %v8942_v26 = vsel %vm19331_vm5, %v8926_v36, %v17668_v56  ;;  %vm19337_vm5 = vmmov %vm19327_vm0 }
0x1285   : > { %v8541_v39 = vpop.permute.xlu0 %8540  ;;  %v8855_v28 = vpop.permute.xlu1 %8854 }
0x1287   : > { %8624 = vrot.lane.b32.xlu0 %v17919_v17, %s13631_s25 }
0x1289   : > { %v8637_v5 = vpop.permute.xlu0 %8636  ;;  %v8539_v60 = vpop.permute.xlu1 %8538 }
0x128b   : > { %8752 = vrot.lane.b32.xlu0 %v17933_v29, %s13630_s23 }
0x128d   : > { %v8807_v41 = vpop.permute.xlu0 %8806  ;;  %v8587_v53 = vpop.permute.xlu1 %8586 }
0x128e   : > { %v8973_v25 = vsel %vm19329_vm8, %v8957_v58, %v8807_v41  ;;  %v8896_v58 = vsel %vm1808_vm3, %v17630_v1, %v8541_v39 }
0x128f   : > { %8800 = vrot.lane.b32.xlu0 %v17933_v29, %s13629_s22  ;;  %v8989_v48 = vsel %vm19330_vm6, %v8973_v25, %v8855_v28 }
0x1290   : > { %9006 = vrot.lane.b32.xlu1 %v8989_v48, %s13631_s25  ;;  %v8912_v48 = vsel %vm19335_vm7, %v8896_v58, %v8589_v3  ;;  %v8895_v3 = vsel %vm1808_vm3, %v17650_v34, %v8539_v60  ;;  %vm19341_vm7 = vmmov %vm19330_vm6 }
0x1291   : > { %v8761_v52 = vpop.permute.xlu0 %8760  ;;  %v8635_v50 = vpop.permute.xlu1 %8634  ;;  %v8928_v61 = vsel %vm19336_vm15, %v8912_v48, %v8637_v5  ;;  %v8911_v5 = vsel %vm19320_vm4, %v8895_v3, %v8587_v53  ;;  %vm19342_vm15 = vmmov %vm19320_vm4 }
0x1292   : > { %v8958_v35 = vsel %vm19332_vm12, %v8942_v26, %v8761_v52  ;;  %v8944_v49 = vsel %vm19327_vm0, %v8928_v61, %v17684_v15  ;;  %vm19338_vm12 = vmmov %vm19328_vm1 }
0x1293   : > { %8848 = vrot.lane.b32.xlu0 %v17933_v29, %s13631_s25  ;;  %vm19343_vm0 = vmmov %vm19328_vm1 }
0x1294   : > { %8798 = vrot.lane.b32.xlu1 %v17891_v22, %s13629_s22  ;;  %vm19346_vm4 = vmmov %vm19343_vm0 }
0x1295   : > { %v8809_v25 = vpop.permute.xlu0 %8808  ;;  %v8543_v28 = vpop.permute.xlu1 %8542 }
0x1296   : > { %v8974_v9 = vsel %vm19333_vm13, %v8958_v35, %v8809_v25  ;;  %vm19339_vm13 = vmmov %vm19329_vm8 }
0x1297   : > { %8754 = vrot.lane.b32.xlu0 %v17956_v18, %s13630_s23 }
0x1299   : > { %v8857_v16 = vpop.permute.xlu0 %8856  ;;  %v8591_v2 = vpop.permute.xlu1 %8590 }
0x129a   : > { %v8990_v13 = vsel %vm19334_vm14, %v8974_v9, %v8857_v16  ;;  %v8927_v16 = vsel %vm19321_vm9, %v8911_v5, %v8635_v50  ;;  %vm19340_vm14 = vmmov %vm19330_vm6  ;;  %v17994_v50 = vcombine.high %v17774_v42, %v17774_v42 }
0x129b   : > { %8850 = vrot.lane.b32.xlu0 %v17956_v18, %s13631_s25  ;;  %9008 = vrot.lane.b32.xlu1 %v8990_v13, %s13631_s25  ;;  %v8943_v58 = vsel %vm19337_vm5, %v8927_v16, %v17701_v63  ;;  %v8897_v63 = vsel %vm1808_vm3, %v17663_v6, %v8543_v28 }
0x129d   : > { %v8639_v56 = vpop.permute.xlu1 %8638  ;;  %v8765_v41 = vpop.permute.xlu0 %8764 }
0x129e   : > { %v8960_v36 = vsel %vm19328_vm1, %v8944_v49, %v8765_v41  ;;  %vm19344_vm1 = vmmov %vm19321_vm9 }
0x129f   : > { %vm19347_vm9 = vmmov %vm19329_vm8 }
0x12a1   : > { %v8593_v52 = vpop.permute.xlu1 %8592  ;;  %v8813_v45 = vpop.permute.xlu0 %8812 }
0x12a2   : > { %v8976_v25 = vsel %vm19329_vm8, %v8960_v36, %v8813_v45 }
0x12a5   : > { %v8763_v26 = vpop.permute.xlu1 %8762  ;;  %v8861_v35 = vpop.permute.xlu0 %8860 }
0x12a6   : > { %v8992_v9 = vsel %vm19330_vm6, %v8976_v25, %v8861_v35  ;;  %v8959_v41 = vsel %vm19338_vm12, %v8943_v58, %v8763_v26  ;;  %v8913_v26 = vsel %vm19342_vm15, %v8897_v63, %v8591_v2  ;;  %vm19345_vm6 = vmmov %vm19337_vm5 }
0x12a7   : > { %9012 = vrot.lane.b32.xlu1 %v8992_v9, %s13631_s25  ;;  %v8929_v9 = vsel %vm19344_vm1, %v8913_v26, %v8639_v56  ;;  %vm19348_vm5 = vmmov %vm19341_vm7 }
0x12a8   : > { %v8945_v6 = vsel %vm19345_vm6, %v8929_v9, %v17718_v54  ;;  %vm19349_vm12 = vmmov %vm19342_vm15 }
0x12a9   : > { %v8795_v1 = vpop.permute.xlu1 %8794  ;;  %v8545_v39 = vpop.permute.xlu0 %8544  ;;  %vm19353_vm15 = vmmov %vm19344_vm1 }
0x12ad   : > { %v8859_v15 = vpop.permute.xlu1 %8858  ;;  %v8641_v13 = vpop.permute.xlu0 %8640 }
0x12b1   : > { %v8811_v48 = vpop.permute.xlu0 %8810  ;;  %v8767_v61 = vpop.permute.xlu1 %8766 }
0x12b2   : > { %v8975_v45 = vsel %vm19339_vm13, %v8959_v41, %v8811_v48  ;;  %v8961_v28 = vsel %vm19346_vm4, %v8945_v6, %v8767_v61  ;;  %vm19350_vm13 = vmmov %vm19344_vm1 }
0x12b3   : > { %v8991_v49 = vsel %vm19340_vm14, %v8975_v45, %v8859_v15  ;;  %vm19351_vm14 = vmmov %vm19349_vm12 }
0x12b4   : > { %9010 = vrot.lane.b32.xlu1 %v8991_v49, %s13631_s25  ;;  %vm19354_vm1 = vmmov %vm19329_vm8 }
0x12b5   : > { %v8841_v34 = vpop.permute.xlu0 %8840  ;;  %v8863_v60 = vpop.permute.xlu1 %8862  ;;  %vm19357_vm4 = vmmov %vm19343_vm0 }
0x12b6   : > { %v17990_v53 = vsel %vm19341_vm7, %v17827_v27, %v8841_v34  ;;  %v8483_v27 = vrot.slane %v17994_v50, %v13930_v43  ;;  %vm19352_vm7 = vmmov %vm19345_vm6 }
0x12b8   : > { %8576 = vrot.lane.b32.xlu1 %v17919_v17, %s13629_s22 }
0x12b9   : > { %v8747_v36 = vpop.permute.xlu0 %8746  ;;  %v8547_v25 = vpop.permute.xlu1 %8546 }
0x12ba   : > { %v8951_v35 = vsel %vm19343_vm0, %v17852_v7, %v8747_v36  ;;  %v8899_v45 = vsel %vm1808_vm3, %v17730_v20, %v8547_v25 }
0x12bb   : > { %v18007_v3 = vsel %vm19329_vm8, %v8951_v35, %v8795_v1  ;;  %v8898_v1 = vsel %vm1808_vm3, %v17688_v30, %v8545_v39  ;;  %vm19355_vm8 = vmmov %vm19345_vm6 }
0x12bc   : > { %8530 = vrot.lane.b32.xlu1 %v8483_v27, %s13630_s23  ;;  %v8914_v41 = vsel %vm19349_vm12, %v8898_v1, %v8593_v52  ;;  %vm19356_vm6 = vmmov %vm19348_vm5 }
0x12bd   : > { %v8815_v17 = vpop.permute.xlu0 %8814  ;;  %v8595_v5 = vpop.permute.xlu1 %8594  ;;  %v8930_v54 = vsel %vm19350_vm13, %v8914_v41, %v8641_v13  ;;  %v9058_v41 = vld [vmem:[%s18904_s8 + $0xb0] sm:$0xff] }
0x12be   : > { %v8977_v2 = vsel %vm19347_vm9, %v8961_v28, %v8815_v17  ;;  %v8915_v49 = vsel %vm19351_vm14, %v8899_v45, %v8595_v5  ;;  %v8946_v34 = vsel %vm19352_vm7, %v8930_v54, %v17756_v47  ;;  %vm19358_vm9 = vmmov %vm19354_vm1  ;;  %v8884_v5 = vsel %vm1808_vm3, %v17530_v40, %v17726_v57  ;;  %v9053_v40 = vld [vmem:[%s18904_s8 + $0x88] sm:$0xff]  ;;  %v9059_v54 = vld [vmem:[%s18904_s8 + $0xb8] sm:$0xff] }
0x12bf   : > { %v8993_v56 = vsel %vm19348_vm5, %v8977_v2, %v8863_v60  ;;  %vm19359_vm14 = vmmov %vm19349_vm12  ;;  %v12793_v45 = vpack.c.bf16 %v9059_v54, %v9058_v41  ;;  %v9085_v41 = vld [vmem:[%s18904_s8 + $0x188] sm:$0xff] }
0x12c0   : > { %8578 = vrot.lane.b32.xlu1 %v8483_v27, %s13629_s22  ;;  %v8900_v6 = vsel %vm19359_vm14, %v8884_v5, %v17736_v4  ;;  %vm19360_vm7 = vmmov %vm19350_vm13  ;;  %v9067_v5 = vld [vmem:[%s18904_s8 + $0xf8] sm:$0xff] }
0x12c1   : > { %v8769_v7 = vpop.permute.xlu0 %8768  ;;  %v8643_v16 = vpop.permute.xlu1 %8642 }
0x12c2   : > { %v8931_v30 = vsel %vm19353_vm15, %v8915_v49, %v8643_v16  ;;  %v8962_v52 = vsel %vm19343_vm0, %v8946_v34, %v8769_v7  ;;  %vm19361_vm15 = vmmov %vm19355_vm8  ;;  %v9052_v7 = vld [vmem:[%s18904_s8 + $0x80] sm:$0xff] }
0x12c3   : > { %v8947_v63 = vsel %vm19355_vm8, %v8931_v30, %v17765_v10  ;;  %v12784_v4 = vpack.c.bf16 %v9053_v40, %v9052_v7  ;;  %vm19362_vm8 = vmmov %vm19348_vm5  ;;  %v9060_v34 = vld [vmem:[%s18904_s8 + $0xc0] sm:$0xff]  ;;  %v9061_v30 = vld [vmem:[%s18904_s8 + $0xc8] sm:$0xff] }
0x12c4   : > { %9014 = vrot.lane.b32.xlu1 %v8993_v56, %s13631_s25  ;;  %vm19369_vm14 = vmmov %vm19362_vm8 }
0x12c5   : > { %v8817_v15 = vpop.permute.xlu0 %8816  ;;  %v8771_v58 = vpop.permute.xlu1 %8770 }
0x12c6   : > { %v8978_v60 = vsel %vm19354_vm1, %v8962_v52, %v8817_v15  ;;  %v8963_v36 = vsel %vm19357_vm4, %v8947_v63, %v8771_v58  ;;  %v9057_v15 = vld [vmem:[%s18904_s8 + $0xa8] sm:$0xff]  ;;  %v12796_v52 = vpack.c.bf16 %v9061_v30, %v9060_v34  ;;  %vm19364_vm4 = vmmov %vm19360_vm7 }
0x12c8   : > { %8626 = vrot.lane.b32.xlu1 %v8483_v27, %s13631_s25 }
0x12c9   : > { %v8865_v48 = vpop.permute.xlu0 %8864  ;;  %v18022_v61 = vpop.permute.xlu1 %8572 }
0x12ca   : > { %v8994_v20 = vsel %vm19356_vm6, %v8978_v60, %v8865_v48  ;;  %v9063_v60 = vld [vmem:[%s18904_s8 + $0xd8] sm:$0xff]  ;;  %vm19363_vm6 = vmmov %vm19349_vm12 }
0x12cc   : > { %8802 = vrot.lane.b32.xlu1 %v17956_v18, %s13629_s22 }
0x12cd   : > { %v8819_v39 = vpop.permute.xlu0 %8818  ;;  %v8527_v13 = vpop.permute.xlu1 %8526 }
0x12ce   : > { %v8979_v47 = vsel %vm19358_vm9, %v8963_v36, %v8819_v39  ;;  %v8889_v25 = vsel %vm1808_vm3, %v17774_v42, %v8527_v13  ;;  %v8916_v42 = vsel %vm19360_vm7, %v8900_v6, %v17724_v12  ;;  %v9062_v13 = vld [vmem:[%s18904_s8 + $0xd0] sm:$0xff]  ;;  %vm19365_vm9 = vmmov %vm19361_vm15 }
0x12cf   : > { %v8932_v28 = vsel %vm19361_vm15, %v8916_v42, %v17545_v33  ;;  %v9054_v33 = vld [vmem:[%s18904_s8 + $0x90] sm:$0xff]  ;;  %v12799_v36 = vpack.c.bf16 %v9063_v60, %v9062_v13  ;;  %vm19370_vm7 = vmmov %vm19365_vm9 }
0x12d0   : > { %9016 = vrot.lane.b32.xlu1 %v8994_v20, %s13631_s25  ;;  %v8948_v2 = vsel %vm19343_vm0, %v8932_v28, %v17738_v21  ;;  %v9055_v21 = vld [vmem:[%s18904_s8 + $0x98] sm:$0xff]  ;;  %v9070_v28 = vld [vmem:[%s18904_s8 + $0x110] sm:$0xff]  ;;  %vm19371_vm15 = vmmov %vm19343_vm0 }
0x12d1   : > { %v8867_v26 = vpop.permute.xlu0 %8866  ;;  %v8575_v35 = vpop.permute.xlu1 %8574  ;;  %v8964_v57 = vsel %vm19354_vm1, %v8948_v2, %v17747_v37  ;;  %v12787_v1 = vpack.c.bf16 %v9055_v21, %v9054_v33  ;;  %v9071_v2 = vld [vmem:[%s18904_s8 + $0x118] sm:$0xff] }
0x12d2   : > { %v8995_v27 = vsel %vm19348_vm5, %v8979_v47, %v8867_v26  ;;  %v8905_v9 = vsel %vm19349_vm12, %v8889_v25, %v8575_v35  ;;  %v8980_v12 = vsel %vm19362_vm8, %v8964_v57, %v17753_v59  ;;  %v9056_v59 = vld [vmem:[%s18904_s8 + $0xa0] sm:$0xff]  ;;  %v9065_v25 = vld [vmem:[%s18904_s8 + $0xe8] sm:$0xff]  ;;  %vm19366_vm5 = vmmov %vm19343_vm0 }
0x12d3   : > { %v12790_v58 = vpack.c.bf16 %v9057_v15, %v9056_v59  ;;  %v9064_v47 = vld [vmem:[%s18904_s8 + $0xe0] sm:$0xff]  ;;  %vm19367_vm12 = vmmov %vm19354_vm1 }
0x12d4   : > { %9018 = vrot.lane.b32.xlu1 %v8995_v27, %s13631_s25  ;;  %v9069_v27 = vld [vmem:[%s18904_s8 + $0x108] sm:$0xff]  ;;  %vm19372_vm0 = vmmov %vm19354_vm1 }
0x12d5   : > { %v8623_v10 = vpop.permute.xlu1 %8622  ;;  %v18079_v37 = vpop.permute.xlu0 %8842  ;;  %vm19373_vm1 = vmmov %vm19363_vm6 }
0x12d6   : > { %v18046_v17 = vsel %vm19350_vm13, %v8905_v9, %v8623_v10  ;;  %v12802_v9 = vpack.c.bf16 %v9065_v25, %v9064_v47  ;;  %v9066_v10 = vld [vmem:[%s18904_s8 + $0xf0] sm:$0xff]  ;;  %vm19368_vm13 = vmmov %vm19362_vm8  ;;  %v9077_v47 = vld [vmem:[%s18904_s8 + $0x148] sm:$0xff] }
0x12d7   : > { %v12805_v7 = vpack.c.bf16 %v9067_v5, %v9066_v10  ;;  %v9078_v5 = vld [vmem:[%s18904_s8 + $0x150] sm:$0xff]  ;;  %vm19374_vm8 = vmmov %vm19364_vm4 }
0x12d9   : > { %v8525_v48 = vpop.permute.xlu0 %8524 }
0x12dd   : > { %v8621_v49 = vpop.permute.xlu0 %8620 }
0x12e1   : > { %v8749_v63 = vpop.permute.xlu0 %8748 }
0x12e5   : > { %v8797_v26 = vpop.permute.xlu0 %8796 }
0x12e9   : > { %v8845_v57 = vpop.permute.xlu0 %8844 }
0x12ed   : > { %v9005_v16 = vpop.permute.xlu1 %9004  ;;  %v18158_v21 = vpop.permute.xlu0 %8750 }
0x12ee   : > { %v9028_v56 = vsel %vm1959_vm10, %v8980_v12, %v9005_v16  ;;  %v9072_v12 = vld [vmem:[%s18904_s8 + $0x120] sm:$0xff]  ;;  %v8888_v16 = vsel %vm1808_vm3, %v17762_v23, %v8525_v48 }
0x12ef   : > { %12187 = vmatmul.mubr.msk.f32.vlgmr.msra.gmra.mrb[74].mxu0 %vm2032_vm11, %v9028_v56  ;;  %v9074_v56 = vld [vmem:[%s18904_s8 + $0x130] sm:$0xff]  ;;  %v8904_v59 = vsel %vm19363_vm6, %v8888_v16, %v18022_v61  ;;  %vm19375_vm6 = vmmov %vm19368_vm13 }
0x12f0   : > { %12785 = vmatpush3.bf16.msra.mxu0 %v12784_v4  ;;  %12224 = vmatprep.mubr.msk.f32.mxu0 %vm13632_vm2, %v18977_v44  ;;  %v12811_v4 = vpack.c.bf16 %v9071_v2, %v9070_v28  ;;  %v8920_v15 = vsel %vm19364_vm4, %v8904_v59, %v8621_v49  ;;  %v9082_v16 = vld [vmem:[%s18904_s8 + $0x170] sm:$0xff]  ;;  %vm19376_vm4 = vmmov %vm19370_vm7 }
0x12f1   : > { %12786 = vmatprep.subr.bf16.mxu0 %v18975_v51  ;;  %v8936_v54 = vsel %vm19365_vm9, %v8920_v15, %v17856_v11  ;;  %v18180_v61 = vpop.permute.xlu0 %8846  ;;  %v9087_v11 = vld [vmem:[%s18904_s8 + $0x198] sm:$0xff]  ;;  %vm19377_vm9 = vmmov %vm19373_vm1 }
0x12f2   : > { %v8952_v48 = vsel %vm19366_vm5, %v8936_v54, %v8749_v63  ;;  %v9088_v63 = vld [vmem:[%s18904_s8 + $0x1a0] sm:$0xff]  ;;  %vm19378_vm5 = vmmov %vm19374_vm8 }
0x12f3   : > { %v8968_v49 = vsel %vm19367_vm12, %v8952_v48, %v8797_v26  ;;  %vm19379_vm12 = vmmov %vm19371_vm15 }
0x12f4   : > { %12788 = vmatpush3.bf16.msra.mxu0 %v12787_v1  ;;  %v9075_v1 = vld [vmem:[%s18904_s8 + $0x138] sm:$0xff]  ;;  %v8984_v30 = vsel %vm19368_vm13, %v8968_v49, %v8845_v57  ;;  %v9081_v57 = vld [vmem:[%s18904_s8 + $0x168] sm:$0xff]  ;;  %v9094_v49 = vld [vmem:[%s18904_s8 + $0x1d0] sm:$0xff] }
0x12f5   : > { %12789 = vmatprep.subr.bf16.mxu0 %v18975_v51  ;;  %v12817_v23 = vpack.c.bf16 %v9075_v1, %v9074_v56  ;;  %v8529_v60 = vpop.permute.xlu0 %8528  ;;  %v8937_v56 = vsel %vm19370_vm7, %v18046_v17, %v17891_v22  ;;  %vm19380_vm13 = vmmov %vm19376_vm4 }
0x12f6   : > { %v8953_v59 = vsel %vm19371_vm15, %v8937_v56, %v18158_v21  ;;  %v8890_v15 = vsel %vm1808_vm3, %v17906_v62, %v8529_v60  ;;  %v9096_v60 = vld [vmem:[%s18904_s8 + $0x1e0] sm:$0xff]  ;;  %vm19382_vm7 = vmmov %vm19379_vm12  ;;  %v13257_v56 = vld [vmem:[#allocation5 + $0x28] ss:$16 sps:$4 sm:$0xff]  }
0x12f7   : > { %vm19383_vm15 = vmmov %vm19375_vm6 }
0x12f8   : > { %12791 = vmatpush3.bf16.msra.mxu0 %v12790_v58  ;;  %v9084_v58 = vld [vmem:[%s18904_s8 + $0x180] sm:$0xff] }
0x12f9   : > { %12792 = vmatprep.subr.bf16.mxu0 %v18975_v51  ;;  %v12832_v34 = vpack.c.bf16 %v9085_v41, %v9084_v58  ;;  %v9092_v58 = vld [vmem:[%s18904_s8 + $0x1c0] sm:$0xff]  ;;  %v9093_v41 = vld [vmem:[%s18904_s8 + $0x1c8] sm:$0xff] }
0x12fa   : > { %v12844_v54 = vpack.c.bf16 %v9093_v41, %v9092_v58  ;;  %v13268_v58 = vld [vmem:[#allocation5 + $0x84] ss:$16 sps:$4 sm:$0xff]   ;;  %v13271_v41 = vld [vmem:[#allocation5 + $0x6c] ss:$16 sps:$4 sm:$0xff]  }
0x12fc   : > { %12794 = vmatpush3.bf16.msra.mxu0 %v12793_v45 }
0x12fd   : > { %12807 = vmatprep.subr.bf16.mxu0 %v18975_v51 }
0x1302   : > { %v9007_v39 = vpop.permute.xlu1 %9006 }
0x1303   : > { %v9029_v20 = vsel %vm1959_vm10, %v17797_v0, %v9007_v39  ;;  %v9068_v0 = vld [vmem:[%s18904_s8 + $0x100] sm:$0xff] }
0x1304   : > { %12206 = vmatmul.mubr.msk.f32.vlgmr.msra.gmra.mrb[120].mxu1 %vm2032_vm11, %v9029_v20  ;;  %v12808_v6 = vpack.c.bf16 %v9069_v27, %v9068_v0  ;;  %v9089_v20 = vld [vmem:[%s18904_s8 + $0x1a8] sm:$0xff]  ;;  %v9090_v0 = vld [vmem:[%s18904_s8 + $0x1b0] sm:$0xff]  ;;  %v9091_v27 = vld [vmem:[%s18904_s8 + $0x1b8] sm:$0xff] }
0x1305   : > { %12797 = vmatpush3.bf16.msra.mxu1 %v12796_v52  ;;  %12243 = vmatprep.mubr.msk.f32.mxu1 %vm13632_vm2, %v18977_v44  ;;  %v9086_v52 = vld [vmem:[%s18904_s8 + $0x190] sm:$0xff]  ;;  %v12838_v25 = vpack.c.bf16 %v9089_v20, %v9088_v63  ;;  %v12841_v2 = vpack.c.bf16 %v9091_v27, %v9090_v0 }
0x1306   : > { %12798 = vmatprep.subr.bf16.mxu1 %v18975_v51  ;;  %v18121_v35 = vpop.permute.xlu1 %8798  ;;  %v12835_v13 = vpack.c.bf16 %v9087_v11, %v9086_v52 }
0x1307   : > { %v8969_v17 = vsel %vm19372_vm0, %v8953_v59, %v18121_v35  ;;  %v9095_v35 = vld [vmem:[%s18904_s8 + $0x1d8] sm:$0xff] }
0x1308   : > { %v8985_v48 = vsel %vm19375_vm6, %v8969_v17, %v18180_v61  ;;  %v12847_v11 = vpack.c.bf16 %v9095_v35, %v9094_v49  ;;  %v13265_v59 = vld [vmem:[#allocation5 + $0x4c] ss:$16 sps:$4 sm:$0xff]   ;;  %v13269_v17 = vld [vmem:[#allocation5 + $0x68] ss:$16 sps:$4 sm:$0xff]   ;;  %v13278_v49 = vld [vmem:[#allocation5 + $0xc0] ss:$16 sps:$4 sm:$0xff]  }
0x1309   : > { %12800 = vmatpush3.bf16.msra.mxu1 %v12799_v36  ;;  %v9076_v36 = vld [vmem:[%s18904_s8 + $0x140] sm:$0xff]  ;;  %v13281_v35 = vld [vmem:[#allocation5 + $0xa8] ss:$16 sps:$4 sm:$0xff]  }
0x130a   : > { %12801 = vmatprep.subr.bf16.mxu1 %v18975_v51  ;;  %v12820_v26 = vpack.c.bf16 %v9077_v47, %v9076_v36 }
0x130d   : > { %v9009_v42 = vpop.permute.xlu1 %9008  ;;  %12803 = vmatpush3.bf16.msra.mxu1 %v12802_v9  ;;  %v8983_v9 = vsel %vm19369_vm14, %v18007_v3, %v18079_v37  ;;  %v13247_v3 = vld [vmem:[#allocation5 + $0x4] ss:$16 sps:$4 sm:$0xff]   ;;  %vm19381_vm14 = vmmov %vm19372_vm0 }
0x130e   : > { %v9030_v40 = vsel %vm1959_vm10, %v17990_v53, %v9009_v42  ;;  %12804 = vmatprep.subr.bf16.mxu1 %v18975_v51  ;;  %v9073_v53 = vld [vmem:[%s18904_s8 + $0x128] sm:$0xff]  ;;  %v8625_v42 = vpop.permute.xlu0 %8624 }
0x130f   : > { %12225 = vmatmul.mubr.msk.f32.vlgmr.msra.gmra.mrb[76].mxu0 %vm2032_vm11, %v9030_v40  ;;  %v12814_v33 = vpack.c.bf16 %v9073_v53, %v9072_v12  ;;  %v9080_v40 = vld [vmem:[%s18904_s8 + $0x160] sm:$0xff] }
0x1310   : > { %12809 = vmatpush3.bf16.msra.mxu0 %v12808_v6  ;;  %12262 = vmatprep.mubr.msk.f32.mxu0 %vm13632_vm2, %v18977_v44  ;;  %v9079_v6 = vld [vmem:[%s18904_s8 + $0x158] sm:$0xff]  ;;  %v12826_v12 = vpack.c.bf16 %v9081_v57, %v9080_v40 }
0x1311   : > { %12810 = vmatprep.subr.bf16.mxu0 %v18975_v51  ;;  %12806 = vmatpush3.bf16.msra.mxu1 %v12805_v7  ;;  %v12823_v7 = vpack.c.bf16 %v9079_v6, %v9078_v5  ;;  %v13251_v40 = vld [vmem:[#allocation5 + $0x8] ss:$16 sps:$4 sm:$0xff]  }
0x1312   : > { %12819 = vmatprep.subr.bf16.mxu1 %v18975_v51 }
0x1314   : > { %12812 = vmatpush3.bf16.msra.mxu0 %v12811_v4  ;;  %v8753_v4 = vpop.permute.xlu0 %8752 }
0x1315   : > { %12813 = vmatprep.subr.bf16.mxu0 %v18975_v51 }
0x1318   : > { %12815 = vmatpush3.bf16.msra.mxu0 %v12814_v33  ;;  %v9083_v33 = vld [vmem:[%s18904_s8 + $0x178] sm:$0xff]  ;;  %v8801_v22 = vpop.permute.xlu0 %8800 }
0x1319   : > { %12816 = vmatprep.subr.bf16.mxu0 %v18975_v51  ;;  %v9013_v45 = vpop.permute.xlu1 %9012  ;;  %v12829_v1 = vpack.c.bf16 %v9083_v33, %v9082_v16  ;;  %v13259_v16 = vld [vmem:[#allocation5 + $0x2c] ss:$16 sps:$4 sm:$0xff]   ;;  %v13254_v33 = vld [vmem:[#allocation5 + $0x40] ss:$16 sps:$4 sm:$0xff]  }
0x131a   : > { %v9032_v39 = vsel %vm1959_vm10, %v8984_v30, %v9013_v45 }
0x131c   : > { %12818 = vmatpush3.bf16.msra.mxu0 %v12817_v23  ;;  %v8849_v30 = vpop.permute.xlu0 %8848 }
0x131d   : > { %12831 = vmatprep.subr.bf16.mxu0 %v18975_v51 }
0x131f   : > { %12263 = vmatmul.mubr.msk.f32.vlgmr.msra.gmra.mrb[78].mxu0 %vm2032_vm11, %v9032_v39 }
0x1320   : > { %12833 = vmatpush3.bf16.msra.mxu0 %v12832_v34  ;;  %12300 = vmatprep.mubr.msk.f32.mxu0 %vm13632_vm2, %v18977_v44  ;;  %v8755_v0 = vpop.permute.xlu0 %8754 }
0x1321   : > { %12834 = vmatprep.subr.bf16.mxu0 %v18975_v51 }
0x1324   : > { %12836 = vmatpush3.bf16.msra.mxu0 %v12835_v13 }
0x1325   : > { %12837 = vmatprep.subr.bf16.mxu0 %v18975_v51 }
0x1326   : > { %v9011_v10 = vpop.permute.xlu1 %9010 }
0x1327   : > { %v9031_v28 = vsel %vm1959_vm10, %v8983_v9, %v9011_v10 }
0x1328   : > { %12244 = vmatmul.mubr.msk.f32.vlgmr.msra.gmra.mrb[122].mxu1 %vm2032_vm11, %v9031_v28  ;;  %12839 = vmatpush3.bf16.msra.mxu0 %v12838_v25  ;;  %v9098_v25 = vld [vmem:[%s18904_s8 + $0x1f0] sm:$0xff] }
0x1329   : > { %12821 = vmatpush3.bf16.msra.mxu1 %v12820_v26  ;;  %12281 = vmatprep.mubr.msk.f32.mxu1 %vm13632_vm2, %v18977_v44  ;;  %v9099_v26 = vld [vmem:[%s18904_s8 + $0x1f8] sm:$0xff] }
0x132a   : > { %v8577_v37 = vpop.permute.xlu1 %8576  ;;  %12822 = vmatprep.subr.bf16.mxu1 %v18975_v51  ;;  %12840 = vmatprep.subr.bf16.mxu0 %v18975_v51  ;;  %v12853_v10 = vpack.c.bf16 %v9099_v26, %v9098_v25  ;;  %v13302_v25 = vld [vmem:[#allocation5 + $0x140] ss:$16 sps:$4 sm:$0xff]   ;;  %v13305_v26 = vld [vmem:[#allocation5 + $0x128] ss:$16 sps:$4 sm:$0xff]  }
0x132b   : > { %v8906_v21 = vsel %vm19373_vm1, %v8890_v15, %v8577_v37  ;;  %v13248_v37 = vld [vmem:[#allocation5 + $0x20] ss:$16 sps:$4 sm:$0xff]   ;;  %vm19384_vm1 = vmmov %vm19375_vm6 }
0x132c   : > { %12842 = vmatpush3.bf16.msra.mxu0 %v12841_v2  ;;  %v8922_v62 = vsel %vm19374_vm8, %v8906_v21, %v8625_v42  ;;  %v13250_v42 = vld [vmem:[#allocation5 + $0x24] ss:$16 sps:$4 sm:$0xff]   ;;  %v13260_v15 = vld [vmem:[#allocation5 + $0x60] ss:$16 sps:$4 sm:$0xff]   ;;  %vm19389_vm8 = vmmov %vm19377_vm9 }
0x132d   : > { %12824 = vmatpush3.bf16.msra.mxu1 %v12823_v7  ;;  %10105 = vmatprep.subr.bf16.mxu0 %v13247_v3  ;;  %v8938_v52 = vsel %vm19376_vm4, %v8922_v62, %v17933_v29  ;;  %v9097_v29 = vld [vmem:[%s18904_s8 + $0x1e8] sm:$0xff]  ;;  %v8851_v3 = vpop.permute.xlu0 %8850  ;;  %v13274_v21 = vld [vmem:[#allocation5 + $0xa4] ss:$16 sps:$4 sm:$0xff]   ;;  %vm19390_vm6 = vmmov %vm19378_vm5 }
0x132e   : > { %v8531_v53 = vpop.permute.xlu1 %8530  ;;  %12825 = vmatprep.subr.bf16.mxu1 %v18975_v51  ;;  %v8954_v63 = vsel %vm19379_vm12, %v8938_v52, %v8753_v4  ;;  %v12850_v36 = vpack.c.bf16 %v9097_v29, %v9096_v60  ;;  %v13253_v7 = vld [vmem:[#allocation5 + $0xc] ss:$16 sps:$4 sm:$0xff]   ;;  %v13275_v62 = vld [vmem:[#allocation5 + $0x88] ss:$16 sps:$4 sm:$0xff]   ;;  %v13284_v52 = vld [vmem:[#allocation5 + $0xe0] ss:$16 sps:$4 sm:$0xff]  }
0x132f   : > { %v8891_v61 = vsel %vm1808_vm3, %v17994_v50, %v8531_v53  ;;  %v8970_v27 = vsel %vm19381_vm14, %v8954_v63, %v8801_v22  ;;  %v13266_v22 = vld [vmem:[#allocation5 + $0x80] ss:$16 sps:$4 sm:$0xff]   ;;  %v13293_v60 = vld [vmem:[#allocation5 + $0xe8] ss:$16 sps:$4 sm:$0xff]   ;;  %v13298_v29 = vld [vmem:[#allocation5 + $0x124] ss:$16 sps:$4 sm:$0xff]  }
0x1330   : > { %v8986_v5 = vsel %vm19383_vm15, %v8970_v27, %v8849_v30  ;;  %v13289_v30 = vld [vmem:[#allocation5 + $0xcc] ss:$16 sps:$4 sm:$0xff]   ;;  %v13296_v63 = vld [vmem:[#allocation5 + $0x120] ss:$16 sps:$4 sm:$0xff]   ;;  %vm19393_vm12 = vmmov %vm19384_vm1 }
0x1331   : > { %12827 = vmatpush3.bf16.msra.mxu1 %v12826_v12  ;;  %v13256_v12 = vld [vmem:[#allocation5 + $0x44] ss:$16 sps:$4 sm:$0xff]   ;;  %v13313_v27 = vld [vmem:[#allocation5 + $0x14c] ss:$16 sps:$4 sm:$0xff]  }
0x1332   : > { %v8579_v23 = vpop.permute.xlu1 %8578  ;;  %12828 = vmatprep.subr.bf16.mxu1 %v18975_v51 }
0x1333   : > { %v8907_v39 = vsel %vm19377_vm9, %v8891_v61, %v8579_v23  ;;  %v13263_v23 = vld [vmem:[#allocation5 + $0x48] ss:$16 sps:$4 sm:$0xff]   ;;  %vm19391_vm9 = vmmov %vm19382_vm7 }
0x1334   : > { %v13287_v61 = vld [vmem:[#allocation5 + $0xc8] ss:$16 sps:$4 sm:$0xff]  }
0x1335   : > { %12830 = vmatpush3.bf16.msra.mxu1 %v12829_v1  ;;  %v13262_v1 = vld [vmem:[#allocation5 + $0x64] ss:$16 sps:$4 sm:$0xff]  }
0x1336   : > { %v9015_v45 = vpop.permute.xlu1 %9014  ;;  %12843 = vmatprep.subr.bf16.mxu1 %v18975_v51 }
0x1337   : > { %v9033_v34 = vsel %vm1959_vm10, %v8985_v48, %v9015_v45  ;;  %v13280_v48 = vld [vmem:[#allocation5 + $0xc4] ss:$16 sps:$4 sm:$0xff]   ;;  %v13283_v45 = vld [vmem:[#allocation5 + $0xac] ss:$16 sps:$4 sm:$0xff]  }
0x1338   : > { %12282 = vmatmul.mubr.msk.f32.vlgmr.msra.gmra.mrb[124].mxu1 %vm2032_vm11, %v9033_v34  ;;  %v13286_v34 = vld [vmem:[#allocation5 + $0xe4] ss:$16 sps:$4 sm:$0xff]  }
0x1339   : > { %12845 = vmatpush3.bf16.msra.mxu1 %v12844_v54  ;;  %12319 = vmatprep.mubr.msk.f32.mxu1 %vm13632_vm2, %v18977_v44  ;;  %v13272_v54 = vld [vmem:[#allocation5 + $0xa0] ss:$16 sps:$4 sm:$0xff]  }
0x133a   : > { %v8627_v13 = vpop.permute.xlu1 %8626  ;;  %12846 = vmatprep.subr.bf16.mxu1 %v18975_v51 }
0x133b   : > { %v8923_v50 = vsel %vm19378_vm5, %v8907_v39, %v8627_v13  ;;  %v13295_v39 = vld [vmem:[#allocation5 + $0xec] ss:$16 sps:$4 sm:$0xff]   ;;  %v13290_v13 = vld [vmem:[#allocation5 + $0x100] ss:$16 sps:$4 sm:$0xff]   ;;  %vm19392_vm5 = vmmov %vm19372_vm0 }
0x133c   : > { %v8939_v20 = vsel %vm19380_vm13, %v8923_v50, %v17956_v18  ;;  %v13245_v18 = vld [vmem:[#allocation5] ss:$16 sps:$4 sm:$0xff]   ;;  %v13301_v50 = vld [vmem:[#allocation5 + $0x10c] ss:$16 sps:$4 sm:$0xff]  }
0x133d   : > { %12848 = vmatpush3.bf16.msra.mxu1 %v12847_v11  ;;  %v8955_v9 = vsel %vm19382_vm7, %v8939_v20, %v8755_v0  ;;  %v13292_v11 = vld [vmem:[#allocation5 + $0x104] ss:$16 sps:$4 sm:$0xff]   ;;  %v13299_v20 = vld [vmem:[#allocation5 + $0x108] ss:$16 sps:$4 sm:$0xff]  }
0x133e   : > { %v8803_v47 = vpop.permute.xlu1 %8802  ;;  %12849 = vmatprep.subr.bf16.mxu1 %v18975_v51  ;;  %v13310_v0 = vld [vmem:[#allocation5 + $0x164] ss:$16 sps:$4 sm:$0xff]  }
0x133f   : > { %v8971_v28 = vsel %vm19372_vm0, %v8955_v9, %v8803_v47  ;;  %v13307_v47 = vld [vmem:[#allocation5 + $0x12c] ss:$16 sps:$4 sm:$0xff]   ;;  %v13308_v9 = vld [vmem:[#allocation5 + $0x160] ss:$16 sps:$4 sm:$0xff]  }
0x1340   : > { %v8987_v57 = vsel %vm19384_vm1, %v8971_v28, %v8851_v3  ;;  %v13322_v28 = vld [vmem:[#allocation5 + $0x1a4] ss:$16 sps:$4 sm:$0xff]   ;;  %v13323_v3 = vld [vmem:[#allocation5 + $0x188] ss:$16 sps:$4 sm:$0xff]  }
0x1341   : > { %12851 = vmatpush3.bf16.msra.mxu1 %v12850_v36  ;;  %v13304_v36 = vld [vmem:[#allocation5 + $0x144] ss:$16 sps:$4 sm:$0xff]  }
0x1342   : > { %v9017_v6 = vpop.permute.xlu1 %9016  ;;  %12852 = vmatprep.subr.bf16.mxu1 %v18975_v51 }
0x1343   : > { %v9034_v2 = vsel %vm1959_vm10, %v8986_v5, %v9017_v6  ;;  %v13319_v5 = vld [vmem:[#allocation5 + $0x16c] ss:$16 sps:$4 sm:$0xff]   ;;  %v13314_v6 = vld [vmem:[#allocation5 + $0x180] ss:$16 sps:$4 sm:$0xff]  }
0x1344   : > { %12301 = vmatmul.mubr.msk.f32.vlgmr.msra.gmra.mrb[80].mxu0 %vm2032_vm11, %v9034_v2  ;;  %v13325_v2 = vld [vmem:[#allocation5 + $0x18c] ss:$16 sps:$4 sm:$0xff]  }
0x1345   : > { %12854 = vmatpush3.bf16.msra.mxu1 %v12853_v10  ;;  %10106 = vmatpush1.bf16.msra.mxu0 %v13245_v18  ;;  %v13311_v18 = vld [vmem:[#allocation5 + $0x148] ss:$16 sps:$4 sm:$0xff]   ;;  %v13316_v10 = vld [vmem:[#allocation5 + $0x184] ss:$16 sps:$4 sm:$0xff]  }
0x1346   : > { %10137 = vmatprep.mubr.bf16.mxu0 %v17471_v8  ;;  %v9019_v4 = vpop.permute.xlu1 %9018  ;;  %10107 = vmatprep.subr.bf16.mxu0 %v13250_v42  ;;  %v13317_v42 = vld [vmem:[#allocation5 + $0x168] ss:$16 sps:$4 sm:$0xff]  }
0x1347   : > { %v9035_v53 = vsel %vm1959_vm10, %v8987_v57, %v9019_v4  ;;  %10186 = vmatprep.subr.bf16.mxu1 %v13253_v7  ;;  %v13320_v7 = vld [vmem:[#allocation5 + $0x1a0] ss:$16 sps:$4 sm:$0xff]   ;;  %v13329_v4 = vld [vmem:[#allocation5 + $0x1a8] ss:$16 sps:$4 sm:$0xff]  }
0x1348   : > { %12320 = vmatmul.mubr.msk.f32.vlgmr.msra.gmra.mrb[126].mxu1 %vm2032_vm11, %v9035_v53  ;;  %v13326_v57 = vld [vmem:[#allocation5 + $0x1c0] ss:$16 sps:$4 sm:$0xff]   ;;  %v13337_v53 = vld [vmem:[#allocation5 + $0x1cc] ss:$16 sps:$4 sm:$0xff]  }
0x1349   : > { %10108 = vmatpush1.bf16.msra.mxu0 %v13248_v37  ;;  %10187 = vmatpush1.bf16.msra.mxu1 %v13251_v40  ;;  %v13328_v37 = vld [vmem:[#allocation5 + $0x1c4] ss:$16 sps:$4 sm:$0xff]   ;;  %v13331_v40 = vld [vmem:[#allocation5 + $0x1ac] ss:$16 sps:$4 sm:$0xff]  }
0x134a   : > { %10218 = vmatprep.mubr.bf16.mxu1 %v17471_v8  ;;  %10109 = vmatprep.subr.bf16.mxu0 %v13256_v12  ;;  %v13277_v8 = vld [vmem:[#allocation5 + $0x8c] ss:$16 sps:$4 sm:$0xff]   ;;  %v13334_v12 = vld [vmem:[#allocation5 + $0x1e4] ss:$16 sps:$4 sm:$0xff]  }
0x134b   : > { %10188 = vmatprep.subr.bf16.mxu1 %v13259_v16  ;;  %v13332_v16 = vld [vmem:[#allocation5 + $0x1e0] ss:$16 sps:$4 sm:$0xff]  }
0x134d   : > { %10110 = vmatpush1.bf16.msra.mxu0 %v13254_v33  ;;  %10189 = vmatpush1.bf16.msra.mxu1 %v13257_v56  ;;  %v13335_v33 = vld [vmem:[#allocation5 + $0x1c8] ss:$16 sps:$4 sm:$0xff]   ;;  %v13340_v56 = vld [vmem:[#allocation5 + $0x1ec] ss:$16 sps:$4 sm:$0xff]  }
0x134e   : > { %10111 = vmatprep.subr.bf16.mxu0 %v13262_v1  ;;  %10190 = vmatprep.subr.bf16.mxu1 %v13265_v59  ;;  %v13338_v1 = vld [vmem:[#allocation5 + $0x1e8] ss:$16 sps:$4 sm:$0xff]  }
0x1351   : > { %10112 = vmatpush1.bf16.msra.mxu0 %v13260_v15  ;;  %10191 = vmatpush1.bf16.msra.mxu1 %v13263_v23 }
0x1352   : > { %10113 = vmatprep.subr.bf16.mxu0 %v13268_v58  ;;  %10192 = vmatprep.subr.bf16.mxu1 %v13271_v41 }
0x1355   : > { %10114 = vmatpush1.bf16.msra.mxu0 %v13266_v22  ;;  %10193 = vmatpush1.bf16.msra.mxu1 %v13269_v17 }
0x1356   : > { %10115 = vmatprep.subr.bf16.mxu0 %v13274_v21  ;;  %10194 = vmatprep.subr.bf16.mxu1 %v13277_v8 }
0x1359   : > { %10116 = vmatpush1.bf16.msra.mxu0 %v13272_v54  ;;  %10195 = vmatpush1.bf16.msra.mxu1 %v13275_v62 }
0x135a   : > { %10117 = vmatprep.subr.bf16.mxu0 %v13280_v48  ;;  %10196 = vmatprep.subr.bf16.mxu1 %v13283_v45 }
0x135d   : > { %10118 = vmatpush1.bf16.msra.mxu0 %v13278_v49  ;;  %10197 = vmatpush1.bf16.msra.mxu1 %v13281_v35 }
0x135e   : > { %10119 = vmatprep.subr.bf16.mxu0 %v13286_v34  ;;  %10198 = vmatprep.subr.bf16.mxu1 %v13289_v30 }
0x1361   : > { %10120 = vmatpush1.bf16.msra.mxu0 %v13284_v52  ;;  %10199 = vmatpush1.bf16.msra.mxu1 %v13287_v61 }
0x1362   : > { %10121 = vmatprep.subr.bf16.mxu0 %v13292_v11  ;;  %10200 = vmatprep.subr.bf16.mxu1 %v13295_v39 }
0x1365   : > { %10122 = vmatpush1.bf16.msra.mxu0 %v13290_v13  ;;  %10201 = vmatpush1.bf16.msra.mxu1 %v13293_v60 }
0x1366   : > { %10123 = vmatprep.subr.bf16.mxu0 %v13298_v29  ;;  %10202 = vmatprep.subr.bf16.mxu1 %v13301_v50  ;;  %v9763_v50 = vld [vmem:[%s18906_s10] sm:$0xf] }
0x1369   : > { %10124 = vmatpush1.bf16.msra.mxu0 %v13296_v63  ;;  %10203 = vmatpush1.bf16.msra.mxu1 %v13299_v20  ;;  %v18347_v63 = vrot.slane %v9763_v50, %v13930_v43  ;;  %v19387_v20 = vld [vmem:[#allocation10_spill] sm:$0xff] }
0x136a   : > { %10125 = vmatprep.subr.bf16.mxu0 %v13304_v36  ;;  %10204 = vmatprep.subr.bf16.mxu1 %v13307_v47  ;;  %v9775_v36 = vsub.s32 2, %v19387_v20  ;;  %v19388_v47 = vld [vmem:[#allocation11_spill] sm:$0xff] }
0x136d   : > { %10126 = vmatpush1.bf16.msra.mxu0 %v13302_v25  ;;  %10205 = vmatpush1.bf16.msra.mxu1 %v13305_v26  ;;  %v18351_v25 = vrot.slane %v9763_v50, %v19388_v47  ;;  %v9779_v26 = vsub.s32 3, %v19387_v20 }
0x136e   : > { %10127 = vmatprep.subr.bf16.mxu0 %v13310_v0  ;;  %10206 = vmatprep.subr.bf16.mxu1 %v13313_v27 }
0x136f   : > { %v18362_v43 = vrot.slane %v9763_v50, %v9779_v26 }
0x1371   : > { %10128 = vmatpush1.bf16.msra.mxu0 %v13308_v9  ;;  %10207 = vmatpush1.bf16.msra.mxu1 %v13311_v18  ;;  %v18357_v18 = vrot.slane %v9763_v50, %v9775_v36 }
0x1372   : > { %10129 = vmatprep.subr.bf16.mxu0 %v13316_v10  ;;  %10208 = vmatprep.subr.bf16.mxu1 %v13319_v5 }
0x1375   : > { %10130 = vmatpush1.bf16.msra.mxu0 %v13314_v6  ;;  %10209 = vmatpush1.bf16.msra.mxu1 %v13317_v42 }
0x1376   : > { %10131 = vmatprep.subr.bf16.mxu0 %v13322_v28  ;;  %10210 = vmatprep.subr.bf16.mxu1 %v13325_v2 }
0x1379   : > { %10132 = vmatpush1.bf16.msra.mxu0 %v13320_v7  ;;  %10211 = vmatpush1.bf16.msra.mxu1 %v13323_v3 }
0x137a   : > { %10133 = vmatprep.subr.bf16.mxu0 %v13328_v37  ;;  %10212 = vmatprep.subr.bf16.mxu1 %v13331_v40 }
0x137d   : > { %10134 = vmatpush1.bf16.msra.mxu0 %v13326_v57  ;;  %10213 = vmatpush1.bf16.msra.mxu1 %v13329_v4 }
0x137e   : > { %10135 = vmatprep.subr.bf16.mxu0 %v13334_v12  ;;  %10214 = vmatprep.subr.bf16.mxu1 %v13337_v53  ;;  %v10708_v12 = vld [vmem:[%s18907_s11] sm:$0xff]  ;;  %v10709_v53 = vld [vmem:[%s18907_s11 + $0x8] sm:$0xff] }
0x1381   : > { %10136 = vmatpush1.bf16.msra.mxu0 %v13332_v16  ;;  %10215 = vmatpush1.bf16.msra.mxu1 %v13335_v33 }
0x1382   : > { %10216 = vmatprep.subr.bf16.mxu1 %v13340_v56  ;;  %12855 = vmatprep.subr.bf16.mxu0 %v18975_v51 }
0x1384   : > { %10138 = vmatmul.mubr.bf16.vlgmr.msra.gmra.mrb[84].mxu0 %v17466_v19 }
0x1385   : > { %10147 = vmatprep.mubr.bf16.mxu0 %v17483_v32  ;;  %10217 = vmatpush1.bf16.msra.mxu1 %v13338_v1 }
0x1386   : > { %12867 = vmatprep.subr.bf16.mxu1 %v18975_v51 }
0x1388   : > { %10219 = vmatmul.mubr.bf16.vlgmr.msra.gmra.mrb[128].mxu1 %v17466_v19  ;;  %v19385_v19 = vld [vmem:[#allocation27_spill] sm:$0xff] }
0x1389   : > { %10228 = vmatprep.mubr.bf16.mxu1 %v17483_v32 }
0x138c   : > { %10148 = vmatmul.mubr.bf16.gmra.mrb[88].mxu0 %v17473_v31 }
0x138d   : > { %10157 = vmatprep.mubr.bf16.mxu0 %v17488_v24 }
0x1390   : > { %10229 = vmatmul.mubr.bf16.gmra.mrb[132].mxu1 %v17473_v31 }
0x1391   : > { %10238 = vmatprep.mubr.bf16.mxu1 %v17488_v24 }
0x1394   : > { %10158 = vmatmul.mubr.bf16.gmra.mrb[92].mxu0 %v17481_v38 }
0x1395   : > { %10167 = vmatprep.mubr.bf16.mxu0 %v17499_v46 }
0x1398   : > { %10239 = vmatmul.mubr.bf16.gmra.mrb[136].mxu1 %v17481_v38 }
0x1399   : > { %10248 = vmatprep.mubr.bf16.mxu1 %v17499_v46 }
0x139c   : > { %10168 = vmatmul.mubr.bf16.gmra.mrb[96].mxu0 %v17497_v14 }
0x139d   : > { %10177 = vmatprep.mubr.bf16.mxu0 %v17507_v55 }
0x13a0   : > { %10249 = vmatmul.mubr.bf16.gmra.mrb[140].mxu1 %v17497_v14 }
0x13a1   : > { %10258 = vmatprep.mubr.bf16.mxu1 %v17507_v55 }
0x13a4   : > { %10178 = vmatmul.mubr.bf16.gmra.mrb[100].mxu0 %v19385_v19 }
0x13a5   : > { %12338 = vmatprep.mubr.msk.f32.mxu0 %vm13632_vm2, %v18977_v44 }
0x13a8   : > { %10259 = vmatmul.mubr.bf16.gmra.mrb[144].mxu1 %v19385_v19  ;;  %v12856_v19 = vpack.c.bf16 %v10709_v53, %v10708_v12 }
0x13a9   : > { %12357 = vmatprep.mubr.msk.f32.mxu1 %vm13632_vm2, %v18977_v44 }
0x13aa   : > { %12857 = vmatpush3.bf16.msra.mxu0 %v12856_v19 }
0x13ab   : > { %12858 = vmatprep.subr.bf16.mxu0 %v18975_v51 }
0x13c2   : > { %v9169_v31 = vpop.f32.mrb[74].mxu0 }
0x13c3   : > { %v12188_v38 = vpop.f32.mrb[75].mxu0  ;;  %v9684_v24 = vsel %vm1959_vm10, %v9169_v31, 0.0 }
0x13d7   : > { %v9242_v32 = vpop.f32.mrb[120].mxu1 }
0x13d8   : > { %v9685_v46 = vsel %vm1959_vm10, %v9242_v32, 0.0  ;;  %v12207_v14 = vpop.f32.mrb[121].mxu1 }
0x13d9   : > { %v9686_v59 = vadd.f32 %v9685_v46, %v9684_v24 }
0x13e2   : > { %v9315_v55 = vpop.f32.mrb[76].mxu0 }
0x13e3   : > { %v9687_v15 = vsel %vm1959_vm10, %v9315_v55, 0.0  ;;  %v12226_v23 = vpop.f32.mrb[77].mxu0 }
0x13e4   : > { %v9688_v58 = vadd.f32 %v9687_v15, %v9686_v59 }
0x13f2   : > { %v9461_v41 = vpop.f32.mrb[78].mxu0 }
0x13f3   : > { %v12264_v22 = vpop.f32.mrb[79].mxu0  ;;  %v9691_v62 = vsel %vm1959_vm10, %v9461_v41, 0.0 }
0x13fb   : > { %v9388_v17 = vpop.f32.mrb[122].mxu1 }
0x13fc   : > { %v9689_v21 = vsel %vm1959_vm10, %v9388_v17, 0.0  ;;  %v12245_v8 = vpop.f32.mrb[123].mxu1 }
0x13fd   : > { %v9690_v54 = vadd.f32 %v9689_v21, %v9688_v58 }
0x13ff   : > { %v9692_v48 = vadd.f32 %v9691_v62, %v9690_v54 }
0x140b   : > { %v9534_v45 = vpop.f32.mrb[124].mxu1 }
0x140c   : > { %v9693_v49 = vsel %vm1959_vm10, %v9534_v45, 0.0  ;;  %v12283_v35 = vpop.f32.mrb[125].mxu1 }
0x140d   : > { %v9694_v34 = vadd.f32 %v9693_v49, %v9692_v48 }
0x1417   : > { %v9607_v30 = vpop.f32.mrb[80].mxu0 }
0x1418   : > { %v9695_v52 = vsel %vm1959_vm10, %v9607_v30, 0.0  ;;  %v12302_v61 = vpop.f32.mrb[81].mxu0 }
0x1419   : > { %v9696_v11 = vadd.f32 %v9695_v52, %v9694_v34 }
0x141b   : > { %v9680_v39 = vpop.f32.mrb[126].mxu1 }
0x141c   : > { %v9697_v13 = vsel %vm1959_vm10, %v9680_v39, 0.0  ;;  %v12321_v60 = vpop.f32.mrb[127].mxu1 }
0x141d   : > { %v18341_v29 = vadd.f32 %v9697_v13, %v9696_v11 }
0x141f   : > { %19386 = vst [vmem:[#allocation26_spill] sm:$0xff] %v18341_v29 }
0x1457   : > { %v10139_v0 = vpop.f32.mrb[84].mxu0 }
0x1458   : > { %v18355_v27 = vadd.f32 %v10139_v0, %v18347_v63  ;;  %v10141_v9 = vpop.f32.mrb[85].mxu0 }
0x1459   : > { %v18360_v10 = vadd.f32 %v10141_v9, %v18351_v25  ;;  %v10143_v5 = vpop.f32.mrb[86].mxu0 }
0x145a   : > { %v10267_v6 = vmul.f32 %v18355_v27, %v18355_v27  ;;  %v18367_v42 = vadd.f32 %v10143_v5, %v18347_v63  ;;  %v10145_v28 = vpop.f32.mrb[87].mxu0 }
0x145b   : > { %v10268_v2 = vmul.f32 %v18360_v10, %v18360_v10  ;;  %v18372_v7 = vadd.f32 %v10145_v28, %v18351_v25  ;;  %v10220_v3 = vpop.f32.mrb[128].mxu1 }
0x145c   : > { %v10303_v37 = vmul.f32 %v10267_v6, %v18355_v27  ;;  %v10271_v40 = vmul.f32 %v18367_v42, %v18367_v42  ;;  %v18378_v57 = vadd.f32 %v10220_v3, %v18357_v18  ;;  %v10222_v4 = vpop.f32.mrb[129].mxu1 }
0x145d   : > { %v10304_v16 = vmul.f32 %v10268_v2, %v18360_v10  ;;  %v10272_v33 = vmul.f32 %v18372_v7, %v18372_v7  ;;  %v18390_v56 = vadd.f32 %v10222_v4, %v18362_v43  ;;  %v10224_v1 = vpop.f32.mrb[130].mxu1 }
0x145e   : > { %v10339_v31 = vmul.f32 0.044715, %v10303_v37  ;;  %v10307_v38 = vmul.f32 %v10271_v40, %v18367_v42  ;;  %v10269_v32 = vmul.f32 %v18378_v57, %v18378_v57  ;;  %v18396_v24 = vadd.f32 %v10224_v1, %v18357_v18  ;;  %v10226_v46 = vpop.f32.mrb[131].mxu1 }
0x145f   : > { %v10340_v14 = vmul.f32 0.044715, %v10304_v16  ;;  %v10308_v59 = vmul.f32 %v10272_v33, %v18372_v7  ;;  %v10270_v55 = vmul.f32 %v18390_v56, %v18390_v56  ;;  %v18402_v15 = vadd.f32 %v10226_v46, %v18362_v43  ;;  %v10149_v23 = vpop.f32.mrb[88].mxu0 }
0x1460   : > { %v10375_v58 = vadd.f32 %v10339_v31, %v18355_v27  ;;  %v10343_v41 = vmul.f32 0.044715, %v10307_v38  ;;  %v10305_v22 = vmul.f32 %v10269_v32, %v18378_v57  ;;  %v10273_v17 = vmul.f32 %v18396_v24, %v18396_v24  ;;  %v10151_v21 = vpop.f32.mrb[89].mxu0 }
0x1461   : > { %v10376_v8 = vadd.f32 %v10340_v14, %v18360_v10  ;;  %v10344_v54 = vmul.f32 0.044715, %v10308_v59  ;;  %v10306_v62 = vmul.f32 %v10270_v55, %v18390_v56  ;;  %v10274_v48 = vmul.f32 %v18402_v15, %v18402_v15  ;;  %v10153_v45 = vpop.f32.mrb[90].mxu0 }
0x1462   : > { %v10411_v49 = vmul.f32 0.7978846, %v10375_v58  ;;  %v10379_v35 = vadd.f32 %v10343_v41, %v18367_v42  ;;  %v10341_v34 = vmul.f32 0.044715, %v10305_v22  ;;  %v10309_v30 = vmul.f32 %v10273_v17, %v18396_v24  ;;  %v10155_v52 = vpop.f32.mrb[91].mxu0 }
0x1463   : > { %v10412_v61 = vmul.f32 0.7978846, %v10376_v8  ;;  %v10380_v11 = vadd.f32 %v10344_v54, %v18372_v7  ;;  %v10342_v39 = vmul.f32 0.044715, %v10306_v62  ;;  %v10310_v13 = vmul.f32 %v10274_v48, %v18402_v15  ;;  %v10230_v60 = vpop.f32.mrb[132].mxu1 }
0x1464   : > { %13449 = vtanh.f32 %v10411_v49  ;;  %v10415_v50 = vmul.f32 0.7978846, %v10379_v35  ;;  %v10377_v20 = vadd.f32 %v10341_v34, %v18378_v57  ;;  %v10345_v36 = vmul.f32 0.044715, %v10309_v30  ;;  %v10232_v47 = vpop.f32.mrb[133].mxu1 }
0x1465   : > { %13451 = vtanh.f32 %v10412_v61  ;;  %v10416_v26 = vmul.f32 0.7978846, %v10380_v11  ;;  %v10378_v0 = vadd.f32 %v10342_v39, %v18390_v56  ;;  %v10346_v9 = vmul.f32 0.044715, %v10310_v13  ;;  %v10234_v5 = vpop.f32.mrb[134].mxu1 }
0x1466   : > { %13453 = vtanh.f32 %v10415_v50  ;;  %v10413_v6 = vmul.f32 0.7978846, %v10377_v20  ;;  %v10381_v28 = vadd.f32 %v10345_v36, %v18396_v24  ;;  %v18421_v2 = vadd.f32 %v10149_v23, %v18347_v63  ;;  %v10236_v3 = vpop.f32.mrb[135].mxu1 }
0x1467   : > { %13455 = vtanh.f32 %v10416_v26  ;;  %v10414_v37 = vmul.f32 0.7978846, %v10378_v0  ;;  %v10382_v40 = vadd.f32 %v10346_v9, %v18402_v15  ;;  %v18425_v4 = vadd.f32 %v10151_v21, %v18351_v25  ;;  %v18427_v12 = vpop.f32.mrb[92].mxu0 }
0x1468   : > { %13457 = vtanh.f32 %v10413_v6  ;;  %v10417_v53 = vmul.f32 0.7978846, %v10381_v28  ;;  %v10275_v16 = vmul.f32 %v18421_v2, %v18421_v2  ;;  %v18432_v33 = vadd.f32 %v10153_v45, %v18347_v63  ;;  %v18434_v1 = vpop.f32.mrb[93].mxu0 }
0x1469   : > { %13459 = vtanh.f32 %v10414_v37  ;;  %v10418_v19 = vmul.f32 0.7978846, %v10382_v40  ;;  %v10276_v31 = vmul.f32 %v18425_v4, %v18425_v4  ;;  %v18439_v38 = vadd.f32 %v10155_v52, %v18351_v25  ;;  %v18441_v32 = vpop.f32.mrb[94].mxu0 }
0x146a   : > { %13461 = vtanh.f32 %v10417_v53  ;;  %v10311_v46 = vmul.f32 %v10275_v16, %v18421_v2  ;;  %v10279_v14 = vmul.f32 %v18432_v33, %v18432_v33  ;;  %v18447_v59 = vadd.f32 %v10230_v60, %v18357_v18  ;;  %v18449_v55 = vpop.f32.mrb[95].mxu0 }
0x146b   : > { %13463 = vtanh.f32 %v10418_v19  ;;  %v10312_v23 = vmul.f32 %v10276_v31, %v18425_v4  ;;  %v10280_v58 = vmul.f32 %v18439_v38, %v18439_v38  ;;  %v18455_v41 = vadd.f32 %v10232_v47, %v18362_v43  ;;  %v18457_v22 = vpop.f32.mrb[136].mxu1 }
0x146c   : > { %v10347_v17 = vmul.f32 0.044715, %v10311_v46  ;;  %v10315_v21 = vmul.f32 %v10279_v14, %v18432_v33  ;;  %v10277_v8 = vmul.f32 %v18447_v59, %v18447_v59  ;;  %v18463_v54 = vadd.f32 %v10234_v5, %v18357_v18  ;;  %v18465_v62 = vpop.f32.mrb[137].mxu1 }
0x146d   : > { %v10348_v48 = vmul.f32 0.044715, %v10312_v23  ;;  %v10316_v45 = vmul.f32 %v10280_v58, %v18439_v38  ;;  %v10278_v49 = vmul.f32 %v18455_v41, %v18455_v41  ;;  %v18471_v35 = vadd.f32 %v10236_v3, %v18362_v43  ;;  %v18473_v34 = vpop.f32.mrb[138].mxu1 }
0x146e   : > { %v13450_v30 = vpop.eup %13449  ;;  %v10383_v52 = vadd.f32 %v10347_v17, %v18421_v2  ;;  %v10351_v61 = vmul.f32 0.044715, %v10315_v21  ;;  %v10313_v11 = vmul.f32 %v10277_v8, %v18447_v59  ;;  %v10281_v39 = vmul.f32 %v18463_v54, %v18463_v54  ;;  %v18479_v13 = vpop.f32.mrb[139].mxu1 }
0x146f   : > { %v13452_v60 = vpop.eup %13451  ;;  %v10483_v50 = vadd.f32 1.0, %v13450_v30  ;;  %v10384_v20 = vadd.f32 %v10348_v48, %v18425_v4  ;;  %v10352_v36 = vmul.f32 0.044715, %v10316_v45  ;;  %v10314_v47 = vmul.f32 %v10278_v49, %v18455_v41  ;;  %v18483_v26 = vpop.f32.mrb[96].mxu0 }
0x1470   : > { %v13454_v0 = vpop.eup %13453  ;;  %v10484_v9 = vadd.f32 1.0, %v13452_v60  ;;  %v10419_v5 = vmul.f32 0.7978846, %v10383_v52  ;;  %v10387_v6 = vadd.f32 %v10351_v61, %v18432_v33  ;;  %v10349_v28 = vmul.f32 0.044715, %v10313_v11  ;;  %v18486_v3 = vpop.f32.mrb[97].mxu0 }
0x1471   : > { %v13456_v37 = vpop.eup %13455  ;;  %v10519_v40 = vmul.f32 0.5, %v10483_v50  ;;  %v10487_v53 = vadd.f32 1.0, %v13454_v0  ;;  %v10420_v16 = vmul.f32 0.7978846, %v10384_v20  ;;  %v10388_v19 = vadd.f32 %v10352_v36, %v18439_v38  ;;  %v18489_v31 = vpop.f32.mrb[98].mxu0 }
0x1472   : > { %v13458_v46 = vpop.eup %13457  ;;  %v10520_v14 = vmul.f32 0.5, %v10484_v9  ;;  %v10488_v23 = vadd.f32 1.0, %v13456_v37  ;;  %13465 = vtanh.f32 %v10419_v5  ;;  %v10423_v58 = vmul.f32 0.7978846, %v10387_v6  ;;  %v18491_v17 = vpop.f32.mrb[99].mxu0 }
0x1473   : > { %v13460_v21 = vpop.eup %13459  ;;  %v18494_v8 = vmul.f32 %v10519_v40, %v18355_v27  ;;  %v10523_v48 = vmul.f32 0.5, %v10487_v53  ;;  %v10485_v45 = vadd.f32 1.0, %v13458_v46  ;;  %13467 = vtanh.f32 %v10420_v16  ;;  %v18496_v49 = vpop.f32.mrb[140].mxu1 }
0x1474   : > { %v13462_v30 = vpop.eup %13461  ;;  %v18499_v52 = vmul.f32 %v10520_v14, %v18360_v10  ;;  %v10524_v61 = vmul.f32 0.5, %v10488_v23  ;;  %v10486_v11 = vadd.f32 1.0, %v13460_v21  ;;  %13469 = vtanh.f32 %v10423_v58  ;;  %v18501_v60 = vpop.f32.mrb[141].mxu1 }
0x1475   : > { %v13464_v50 = vpop.eup %13463  ;;  %v10559_v20 = vmul.f32 %v10523_v48, %v18367_v42  ;;  %v10521_v36 = vmul.f32 0.5, %v10485_v45  ;;  %v10489_v27 = vadd.f32 1.0, %v13462_v30  ;;  %v10424_v0 = vmul.f32 0.7978846, %v10388_v19  ;;  %v18504_v9 = vpop.f32.mrb[142].mxu1 }
0x1476   : > { %v10560_v5 = vmul.f32 %v10524_v61, %v18372_v7  ;;  %v10522_v6 = vmul.f32 0.5, %v10486_v11  ;;  %v10490_v37 = vadd.f32 1.0, %v13464_v50  ;;  %v10385_v10 = vadd.f32 %v10349_v28, %v18447_v59  ;;  %v18508_v40 = vpop.f32.mrb[143].mxu1 }
0x1477   : > { %v10591_v53 = vadd.f32 %v10559_v20, %v18494_v8  ;;  %v18512_v16 = vmul.f32 %v10521_v36, %v18378_v57  ;;  %v10525_v46 = vmul.f32 0.5, %v10489_v27  ;;  %13471 = vtanh.f32 %v10424_v0  ;;  %v18514_v42 = vpop.f32.mrb[100].mxu0 }
0x1478   : > { %v10605_v19 = vadd.f32 %v10560_v5, %v18499_v52  ;;  %v18518_v14 = vmul.f32 %v10522_v6, %v18390_v56  ;;  %v10526_v7 = vmul.f32 0.5, %v10490_v37  ;;  %v10421_v23 = vmul.f32 0.7978846, %v10385_v10  ;;  %v18520_v58 = vpop.f32.mrb[101].mxu0 }
0x1479   : > { %v10561_v28 = vmul.f32 %v10525_v46, %v18396_v24  ;;  %v10350_v21 = vmul.f32 0.044715, %v10314_v47  ;;  %v10317_v48 = vmul.f32 %v10281_v39, %v18463_v54  ;;  %v10282_v57 = vmul.f32 %v18471_v35, %v18471_v35  ;;  %v10183_v45 = vpop.f32.mrb[102].mxu0 }
0x147a   : > { %v10562_v30 = vmul.f32 %v10526_v7, %v18402_v15  ;;  %13473 = vtanh.f32 %v10421_v23  ;;  %v18529_v56 = vadd.f32 %v18427_v12, %v18347_v63  ;;  %v18533_v61 = vadd.f32 %v18434_v1, %v18351_v25  ;;  %v10184_v11 = vpop.f32.mrb[103].mxu0 }
0x147b   : > { %v18536_v24 = vadd.f32 %v10561_v28, %v18512_v16  ;;  %v10386_v39 = vadd.f32 %v10350_v21, %v18455_v41  ;;  %v10353_v47 = vmul.f32 0.044715, %v10317_v48  ;;  %v10318_v50 = vmul.f32 %v10282_v57, %v18471_v35  ;;  %v18540_v20 = vpop.f32.mrb[144].mxu1 }
0x147c   : > { %v13466_v15 = vpop.eup %13465  ;;  %v18543_v36 = vadd.f32 %v10562_v30, %v18518_v14  ;;  %v10283_v12 = vmul.f32 %v18529_v56, %v18529_v56  ;;  %v10284_v1 = vmul.f32 %v18533_v61, %v18533_v61  ;;  %v18551_v27 = vadd.f32 %v18441_v32, %v18347_v63  ;;  %v18553_v0 = vpop.f32.mrb[145].mxu1 }
0x147d   : > { %v13468_v5 = vpop.eup %13467  ;;  %v10491_v6 = vadd.f32 1.0, %v13466_v15  ;;  %v10422_v37 = vmul.f32 0.7978846, %v10386_v39  ;;  %v10389_v10 = vadd.f32 %v10353_v47, %v18463_v54  ;;  %v10354_v46 = vmul.f32 0.044715, %v10318_v50  ;;  %v10264_v7 = vpop.f32.mrb[146].mxu1 }
0x147e   : > { %v13470_v23 = vpop.eup %13469  ;;  %v10492_v28 = vadd.f32 1.0, %v13468_v5  ;;  %v10319_v21 = vmul.f32 %v10283_v12, %v18529_v56  ;;  %v10320_v48 = vmul.f32 %v10284_v1, %v18533_v61  ;;  %v10287_v57 = vmul.f32 %v18551_v27, %v18551_v27  ;;  %v10265_v32 = vpop.f32.mrb[147].mxu1 }
0x147f   : > { %v10527_v45 = vmul.f32 0.5, %v10491_v6  ;;  %v10495_v30 = vadd.f32 1.0, %v13470_v23  ;;  %13475 = vtanh.f32 %v10422_v37  ;;  %v10425_v11 = vmul.f32 0.7978846, %v10389_v10 }
0x1480   : > { %v10528_v15 = vmul.f32 0.5, %v10492_v28  ;;  %v10390_v39 = vadd.f32 %v10354_v46, %v18471_v35  ;;  %v10355_v47 = vmul.f32 0.044715, %v10319_v21  ;;  %v10356_v50 = vmul.f32 0.044715, %v10320_v48 }
0x1481   : > { %v13472_v7 = vpop.eup %13471  ;;  %v10563_v5 = vmul.f32 %v10527_v45, %v18421_v2  ;;  %v10531_v29 = vmul.f32 0.5, %v10495_v30  ;;  %13477 = vtanh.f32 %v10425_v11  ;;  %v10323_v12 = vmul.f32 %v10287_v57, %v18551_v27 }
0x1482   : > { %v10564_v1 = vmul.f32 %v10528_v15, %v18425_v4  ;;  %v10496_v44 = vadd.f32 1.0, %v13472_v7  ;;  %v10426_v32 = vmul.f32 0.7978846, %v10390_v39  ;;  %v10391_v6 = vadd.f32 %v10355_v47, %v18529_v56 }
0x1483   : > { %v10592_v37 = vadd.f32 %v10591_v53, %v10563_v5  ;;  %v10567_v10 = vmul.f32 %v10531_v29, %v18432_v33  ;;  %v10392_v46 = vadd.f32 %v10356_v50, %v18533_v61  ;;  %v10359_v23 = vmul.f32 0.044715, %v10323_v12 }
0x1484   : > { %v13474_v28 = vpop.eup %13473  ;;  %v10606_v21 = vadd.f32 %v10605_v19, %v10564_v1  ;;  %v10532_v48 = vmul.f32 0.5, %v10496_v44  ;;  %13479 = vtanh.f32 %v10426_v32  ;;  %v10427_v2 = vmul.f32 0.7978846, %v10391_v6 }
0x1485   : > { %v18567_v45 = vadd.f32 %v10592_v37, %v10567_v10  ;;  %v10493_v57 = vadd.f32 1.0, %v13474_v28  ;;  %v10428_v30 = vmul.f32 0.7978846, %v10392_v46  ;;  %v10395_v4 = vadd.f32 %v10359_v23, %v18551_v27 }
0x1486   : > { %v10568_v11 = vmul.f32 %v10532_v48, %v18439_v38  ;;  %13481 = vtanh.f32 %v10427_v2  ;;  %v18573_v29 = vadd.f32 %v18449_v55, %v18351_v25  ;;  %v18577_v33 = vadd.f32 %v18457_v22, %v18357_v18 }
0x1487   : > { %v10529_v44 = vmul.f32 0.5, %v10493_v57  ;;  %13483 = vtanh.f32 %v10428_v30  ;;  %v10431_v53 = vmul.f32 0.7978846, %v10395_v4  ;;  %v18581_v19 = vadd.f32 %v18465_v62, %v18362_v43 }
0x1488   : > { %v18583_v15 = vadd.f32 %v10606_v21, %v10568_v11  ;;  %v10288_v38 = vmul.f32 %v18573_v29, %v18573_v29  ;;  %v10285_v55 = vmul.f32 %v18577_v33, %v18577_v33  ;;  %v18591_v39 = vadd.f32 %v18473_v34, %v18357_v18 }
0x1489   : > { %v13476_v22 = vpop.eup %13475  ;;  %v10565_v47 = vmul.f32 %v10529_v44, %v18447_v59  ;;  %13485 = vtanh.f32 %v10431_v53  ;;  %v10286_v62 = vmul.f32 %v18581_v19, %v18581_v19  ;;  %v18598_v50 = vadd.f32 %v18479_v13, %v18362_v43 }
0x148a   : > { %v10494_v7 = vadd.f32 1.0, %v13476_v22  ;;  %v10324_v5 = vmul.f32 %v10288_v38, %v18573_v29  ;;  %v10321_v12 = vmul.f32 %v10285_v55, %v18577_v33  ;;  %v10289_v34 = vmul.f32 %v18591_v39, %v18591_v39 }
0x148b   : > { %v13478_v1 = vpop.eup %13477  ;;  %v10620_v32 = vadd.f32 %v18536_v24, %v10565_v47  ;;  %v10322_v59 = vmul.f32 %v10286_v62, %v18581_v19  ;;  %v10290_v6 = vmul.f32 %v18598_v50, %v18598_v50  ;;  %v18610_v13 = vadd.f32 %v18483_v26, %v18347_v63 }
0x148c   : > { %v10530_v37 = vmul.f32 0.5, %v10494_v7  ;;  %v10497_v10 = vadd.f32 1.0, %v13478_v1  ;;  %v10360_v46 = vmul.f32 0.044715, %v10324_v5  ;;  %v10357_v23 = vmul.f32 0.044715, %v10321_v12 }
0x148d   : > { %v10358_v28 = vmul.f32 0.044715, %v10322_v59  ;;  %v10325_v21 = vmul.f32 %v10289_v34, %v18591_v39  ;;  %v10326_v48 = vmul.f32 %v10290_v6, %v18598_v50  ;;  %v10291_v24 = vmul.f32 %v18610_v13, %v18610_v13 }
0x148e   : > { %v13480_v2 = vpop.eup %13479  ;;  %v10566_v57 = vmul.f32 %v10530_v37, %v18455_v41  ;;  %v10533_v30 = vmul.f32 0.5, %v10497_v10  ;;  %v10396_v4 = vadd.f32 %v10360_v46, %v18573_v29  ;;  %v10393_v26 = vadd.f32 %v10357_v23, %v18577_v33 }
0x148f   : > { %v10498_v11 = vadd.f32 1.0, %v13480_v2  ;;  %v10394_v44 = vadd.f32 %v10358_v28, %v18581_v19  ;;  %v10361_v53 = vmul.f32 0.044715, %v10325_v21  ;;  %v10362_v38 = vmul.f32 0.044715, %v10326_v48 }
0x1490   : > { %v13482_v55 = vpop.eup %13481  ;;  %v10634_v22 = vadd.f32 %v18543_v36, %v10566_v57  ;;  %v10569_v47 = vmul.f32 %v10533_v30, %v18463_v54  ;;  %v10432_v62 = vmul.f32 0.7978846, %v10396_v4  ;;  %v10429_v7 = vmul.f32 0.7978846, %v10393_v26 }
0x1491   : > { %v13484_v5 = vpop.eup %13483  ;;  %v10534_v12 = vmul.f32 0.5, %v10498_v11  ;;  %v10499_v41 = vadd.f32 1.0, %v13482_v55  ;;  %v10430_v34 = vmul.f32 0.7978846, %v10394_v44  ;;  %v10397_v1 = vadd.f32 %v10361_v53, %v18591_v39 }
0x1492   : > { %v18623_v59 = vadd.f32 %v10620_v32, %v10569_v47  ;;  %v10500_v6 = vadd.f32 1.0, %v13484_v5  ;;  %13487 = vtanh.f32 %v10432_v62  ;;  %v10398_v37 = vadd.f32 %v10362_v38, %v18598_v50 }
0x1493   : > { %v13486_v10 = vpop.eup %13485  ;;  %v10570_v46 = vmul.f32 %v10534_v12, %v18471_v35  ;;  %v10535_v36 = vmul.f32 0.5, %v10499_v41  ;;  %13489 = vtanh.f32 %v10429_v7  ;;  %v10433_v54 = vmul.f32 0.7978846, %v10397_v1 }
0x1494   : > { %v10536_v23 = vmul.f32 0.5, %v10500_v6  ;;  %v10503_v28 = vadd.f32 1.0, %v13486_v10  ;;  %13491 = vtanh.f32 %v10430_v34  ;;  %v10434_v21 = vmul.f32 0.7978846, %v10398_v37 }
0x1495   : > { %v18627_v48 = vadd.f32 %v10634_v22, %v10570_v46  ;;  %v10571_v2 = vmul.f32 %v10535_v36, %v18529_v56  ;;  %13493 = vtanh.f32 %v10433_v54  ;;  %v10327_v32 = vmul.f32 %v10291_v24, %v18610_v13 }
0x1496   : > { %v10572_v57 = vmul.f32 %v10536_v23, %v18533_v61  ;;  %v10539_v30 = vmul.f32 0.5, %v10503_v28  ;;  %13495 = vtanh.f32 %v10434_v21  ;;  %v18634_v35 = vadd.f32 %v18486_v3, %v18351_v25 }
0x1497   : > { %v10594_v4 = vadd.f32 %v18567_v45, %v10571_v2  ;;  %v10363_v26 = vmul.f32 0.044715, %v10327_v32  ;;  %v18639_v11 = vadd.f32 %v18489_v31, %v18347_v63  ;;  %v18643_v56 = vadd.f32 %v18491_v17, %v18351_v25 }
0x1498   : > { %v10608_v24 = vadd.f32 %v18583_v15, %v10572_v57  ;;  %v10575_v61 = vmul.f32 %v10539_v30, %v18551_v27  ;;  %v10292_v44 = vmul.f32 %v18634_v35, %v18634_v35  ;;  %v18651_v3 = vadd.f32 %v18496_v49, %v18357_v18 }
0x1499   : > { %v10399_v45 = vadd.f32 %v10363_v26, %v18610_v13  ;;  %v10295_v31 = vmul.f32 %v18639_v11, %v18639_v11  ;;  %v10296_v17 = vmul.f32 %v18643_v56, %v18643_v56  ;;  %v18660_v15 = vadd.f32 %v18501_v60, %v18362_v43 }
0x149a   : > { %v18662_v27 = vadd.f32 %v10594_v4, %v10575_v61  ;;  %v10328_v53 = vmul.f32 %v10292_v44, %v18634_v35  ;;  %v10293_v49 = vmul.f32 %v18651_v3, %v18651_v3  ;;  %v18669_v38 = vadd.f32 %v18504_v9, %v18357_v18 }
0x149b   : > { %v10435_v55 = vmul.f32 0.7978846, %v10399_v45  ;;  %v10331_v22 = vmul.f32 %v10295_v31, %v18639_v11  ;;  %v10332_v47 = vmul.f32 %v10296_v17, %v18643_v56  ;;  %v10294_v60 = vmul.f32 %v18660_v15, %v18660_v15 }
0x149c   : > { %v13488_v62 = vpop.eup %13487  ;;  %v10364_v7 = vmul.f32 0.044715, %v10328_v53  ;;  %v10329_v5 = vmul.f32 %v10293_v49, %v18651_v3  ;;  %v10297_v12 = vmul.f32 %v18669_v38, %v18669_v38  ;;  %v18680_v41 = vadd.f32 %v18508_v40, %v18362_v43 }
0x149d   : > { %v13490_v9 = vpop.eup %13489  ;;  %v10504_v34 = vadd.f32 1.0, %v13488_v62  ;;  %13497 = vtanh.f32 %v10435_v55  ;;  %v10367_v1 = vmul.f32 0.044715, %v10331_v22  ;;  %v10368_v6 = vmul.f32 0.044715, %v10332_v47 }
0x149e   : > { %v13492_v37 = vpop.eup %13491  ;;  %v10501_v10 = vadd.f32 1.0, %v13490_v9  ;;  %v10400_v46 = vadd.f32 %v10364_v7, %v18634_v35  ;;  %v10365_v36 = vmul.f32 0.044715, %v10329_v5  ;;  %v10330_v54 = vmul.f32 %v10294_v60, %v18660_v15 }
0x149f   : > { %v13494_v23 = vpop.eup %13493  ;;  %v10540_v28 = vmul.f32 0.5, %v10504_v34  ;;  %v10502_v21 = vadd.f32 1.0, %v13492_v37  ;;  %v10403_v2 = vadd.f32 %v10367_v1, %v18639_v11  ;;  %v10404_v40 = vadd.f32 %v10368_v6, %v18643_v56 }
0x14a0   : > { %v13496_v32 = vpop.eup %13495  ;;  %v10537_v57 = vmul.f32 0.5, %v10501_v10  ;;  %v10505_v30 = vadd.f32 1.0, %v13494_v23  ;;  %v10436_v4 = vmul.f32 0.7978846, %v10400_v46  ;;  %v10401_v26 = vadd.f32 %v10365_v36, %v18651_v3 }
0x14a1   : > { %v10576_v61 = vmul.f32 %v10540_v28, %v18573_v29  ;;  %v10538_v44 = vmul.f32 0.5, %v10502_v21  ;;  %v10506_v45 = vadd.f32 1.0, %v13496_v32  ;;  %v10439_v31 = vmul.f32 0.7978846, %v10403_v2 }
0x14a2   : > { %v10573_v17 = vmul.f32 %v10537_v57, %v18577_v33  ;;  %v10541_v53 = vmul.f32 0.5, %v10505_v30  ;;  %13499 = vtanh.f32 %v10436_v4  ;;  %v10440_v49 = vmul.f32 0.7978846, %v10404_v40 }
0x14a3   : > { %v18689_v55 = vadd.f32 %v10608_v24, %v10576_v61  ;;  %v10574_v22 = vmul.f32 %v10538_v44, %v18581_v19  ;;  %v10542_v47 = vmul.f32 0.5, %v10506_v45  ;;  %13501 = vtanh.f32 %v10439_v31 }
0x14a4   : > { %v10622_v60 = vadd.f32 %v18623_v59, %v10573_v17  ;;  %v10577_v62 = vmul.f32 %v10541_v53, %v18591_v39  ;;  %13503 = vtanh.f32 %v10440_v49  ;;  %v10437_v29 = vmul.f32 0.7978846, %v10401_v26 }
0x14a5   : > { %v10636_v7 = vadd.f32 %v18627_v48, %v10574_v22  ;;  %v10578_v5 = vmul.f32 %v10542_v47, %v18598_v50  ;;  %v10366_v33 = vmul.f32 0.044715, %v10330_v54  ;;  %v10333_v9 = vmul.f32 %v10297_v12, %v18669_v38 }
0x14a6   : > { %v18697_v34 = vadd.f32 %v10622_v60, %v10577_v62  ;;  %13505 = vtanh.f32 %v10437_v29  ;;  %v10298_v19 = vmul.f32 %v18680_v41, %v18680_v41  ;;  %v18703_v59 = vadd.f32 %v18514_v42, %v18347_v63 }
0x14a7   : > { %v13498_v39 = vpop.eup %13497  ;;  %v18705_v24 = vadd.f32 %v10636_v7, %v10578_v5  ;;  %v10402_v48 = vadd.f32 %v10366_v33, %v18660_v15  ;;  %v10369_v1 = vmul.f32 0.044715, %v10333_v9  ;;  %v18710_v50 = vadd.f32 %v18520_v58, %v18351_v25  ;;  %v10711_v9 = vld [vmem:[%s18907_s11 + $0x18] sm:$0xff] }
0x14a8   : > { %v10507_v12 = vadd.f32 1.0, %v13498_v39  ;;  %v10334_v6 = vmul.f32 %v10298_v19, %v18680_v41  ;;  %v10299_v37 = vmul.f32 %v18703_v59, %v18703_v59  ;;  %v18717_v63 = vadd.f32 %v18540_v20, %v18357_v18 }
0x14a9   : > { %v10438_v42 = vmul.f32 0.7978846, %v10402_v48  ;;  %v10405_v10 = vadd.f32 %v10369_v1, %v18669_v38  ;;  %v10300_v46 = vmul.f32 %v18710_v50, %v18710_v50  ;;  %v18724_v25 = vadd.f32 %v18553_v0, %v18362_v43 }
0x14aa   : > { %v10543_v58 = vmul.f32 0.5, %v10507_v12  ;;  %v10370_v36 = vmul.f32 0.044715, %v10334_v6  ;;  %v10335_v54 = vmul.f32 %v10299_v37, %v18703_v59  ;;  %v10301_v23 = vmul.f32 %v18717_v63, %v18717_v63  ;;  %v10712_v6 = vld [vmem:[%s18907_s11 + $0x20] sm:$0xff]  ;;  %v10713_v37 = vld [vmem:[%s18907_s11 + $0x28] sm:$0xff] }
0x14ab   : > { %13507 = vtanh.f32 %v10438_v42  ;;  %v10441_v18 = vmul.f32 0.7978846, %v10405_v10  ;;  %v10336_v20 = vmul.f32 %v10300_v46, %v18710_v50  ;;  %v10302_v28 = vmul.f32 %v18724_v25, %v18724_v25 }
0x14ac   : > { %v13500_v21 = vpop.eup %13499  ;;  %v10579_v2 = vmul.f32 %v10543_v58, %v18610_v13  ;;  %v10406_v43 = vadd.f32 %v10370_v36, %v18680_v41  ;;  %v10371_v0 = vmul.f32 0.044715, %v10335_v54  ;;  %v10337_v40 = vmul.f32 %v10301_v23, %v18717_v63 }
0x14ad   : > { %v13502_v32 = vpop.eup %13501  ;;  %v10508_v57 = vadd.f32 1.0, %v13500_v21  ;;  %13509 = vtanh.f32 %v10441_v18  ;;  %v10372_v30 = vmul.f32 0.044715, %v10336_v20  ;;  %v10338_v4 = vmul.f32 %v10302_v28, %v18724_v25 }
0x14ae   : > { %v13504_v26 = vpop.eup %13503  ;;  %v10596_v61 = vadd.f32 %v18662_v27, %v10579_v2  ;;  %v10511_v44 = vadd.f32 1.0, %v13502_v32  ;;  %v10442_v45 = vmul.f32 0.7978846, %v10406_v43  ;;  %v10407_v31 = vadd.f32 %v10371_v0, %v18703_v59  ;;  %v10710_v27 = vld [vmem:[%s18907_s11 + $0x10] sm:$0xff] }
0x14af   : > { %v10544_v17 = vmul.f32 0.5, %v10508_v57  ;;  %v10512_v13 = vadd.f32 1.0, %v13504_v26  ;;  %v10408_v53 = vadd.f32 %v10372_v30, %v18710_v50  ;;  %v10373_v49 = vmul.f32 0.044715, %v10337_v40 }
0x14b0   : > { %v13506_v22 = vpop.eup %13505  ;;  %v10547_v47 = vmul.f32 0.5, %v10511_v44  ;;  %13511 = vtanh.f32 %v10442_v45  ;;  %v10443_v60 = vmul.f32 0.7978846, %v10407_v31  ;;  %v10374_v62 = vmul.f32 0.044715, %v10338_v4 }
0x14b1   : > { %v10580_v29 = vmul.f32 %v10544_v17, %v18634_v35  ;;  %v10548_v7 = vmul.f32 0.5, %v10512_v13  ;;  %v10509_v5 = vadd.f32 1.0, %v13506_v22  ;;  %v10444_v33 = vmul.f32 0.7978846, %v10408_v53 }
0x14b2   : > { %v10583_v19 = vmul.f32 %v10547_v47, %v18639_v11  ;;  %13513 = vtanh.f32 %v10443_v60  ;;  %v10409_v39 = vadd.f32 %v10373_v49, %v18717_v63  ;;  %v10410_v48 = vadd.f32 %v10374_v62, %v18724_v25 }
0x14b3   : > { %v10610_v35 = vadd.f32 %v18689_v55, %v10580_v29  ;;  %v10584_v1 = vmul.f32 %v10548_v7, %v18643_v56  ;;  %v10545_v12 = vmul.f32 0.5, %v10509_v5  ;;  %13515 = vtanh.f32 %v10444_v33 }
0x14b4   : > { %v10597_v11 = vadd.f32 %v10596_v61, %v10583_v19  ;;  %v10445_v42 = vmul.f32 0.7978846, %v10409_v39  ;;  %v10446_v10 = vmul.f32 0.7978846, %v10410_v48  ;;  %v12859_v46 = vpack.c.bf16 %v10711_v9, %v10710_v27 }
0x14b5   : > { %v13508_v58 = vpop.eup %13507  ;;  %v10611_v36 = vadd.f32 %v10610_v35, %v10584_v1  ;;  %v10581_v55 = vmul.f32 %v10545_v12, %v18651_v3  ;;  %v12862_v56 = vpack.c.bf16 %v10713_v37, %v10712_v6 }
0x14b6   : > { %v10510_v54 = vadd.f32 1.0, %v13508_v58  ;;  %13517 = vtanh.f32 %v10445_v42  ;;  %12860 = vmatpush3.bf16.msra.mxu0 %v12859_v46 }
0x14b7   : > { %v13510_v23 = vpop.eup %13509  ;;  %v10624_v18 = vadd.f32 %v18697_v34, %v10581_v55  ;;  %13519 = vtanh.f32 %v10446_v10  ;;  %12861 = vmatprep.subr.bf16.mxu0 %v18975_v51 }
0x14b8   : > { %v10546_v20 = vmul.f32 0.5, %v10510_v54  ;;  %v10513_v28 = vadd.f32 1.0, %v13510_v23 }
0x14ba   : > { %v13512_v21 = vpop.eup %13511  ;;  %v10582_v2 = vmul.f32 %v10546_v20, %v18660_v15  ;;  %v10549_v43 = vmul.f32 0.5, %v10513_v28  ;;  %12863 = vmatpush3.bf16.msra.mxu0 %v12862_v56 }
0x14bb   : > { %v10514_v0 = vadd.f32 1.0, %v13512_v21  ;;  %12864 = vmatprep.subr.bf16.mxu0 %v18975_v51 }
0x14bc   : > { %v13514_v3 = vpop.eup %13513  ;;  %v10638_v40 = vadd.f32 %v18705_v24, %v10582_v2  ;;  %v10585_v32 = vmul.f32 %v10549_v43, %v18669_v38 }
0x14bd   : > { %v13516_v57 = vpop.eup %13515  ;;  %v10550_v34 = vmul.f32 0.5, %v10514_v0  ;;  %v10515_v30 = vadd.f32 1.0, %v13514_v3 }
0x14be   : > { %v10625_v4 = vadd.f32 %v10624_v18, %v10585_v32  ;;  %v10516_v26 = vadd.f32 1.0, %v13516_v57 }
0x14bf   : > { %v10586_v61 = vmul.f32 %v10550_v34, %v18680_v41  ;;  %v10551_v44 = vmul.f32 0.5, %v10515_v30 }
0x14c0   : > { %v13518_v45 = vpop.eup %13517  ;;  %v10552_v15 = vmul.f32 0.5, %v10516_v26 }
0x14c1   : > { %v13520_v31 = vpop.eup %13519  ;;  %v10639_v17 = vadd.f32 %v10638_v40, %v10586_v61  ;;  %v10587_v13 = vmul.f32 %v10551_v44, %v18703_v59  ;;  %v10517_v53 = vadd.f32 1.0, %v13518_v45 }
0x14c2   : > { %v10588_v49 = vmul.f32 %v10552_v15, %v18710_v50  ;;  %v10518_v24 = vadd.f32 1.0, %v13520_v31 }
0x14c3   : > { %v10598_v22 = vadd.f32 %v10597_v11, %v10587_v13  ;;  %v10651_v38 = vrot.slane %v10587_v13, 7  ;;  %v10553_v47 = vmul.f32 0.5, %v10517_v53 }
0x14c4   : > { %v10612_v60 = vadd.f32 %v10611_v36, %v10588_v49  ;;  %v10652_v62 = vrot.slane %v10588_v49, 7  ;;  %v10554_v29 = vmul.f32 0.5, %v10518_v24 }
0x14c5   : > { %v10599_v7 = vrot.slane %v10598_v22, 4  ;;  %v10589_v41 = vmul.f32 %v10553_v47, %v18717_v63  ;;  %v10659_v5 = vadd.f32 %v10651_v38, %v18494_v8 }
0x14c6   : > { %v10613_v33 = vrot.slane %v10612_v60, 4  ;;  %v10590_v27 = vmul.f32 %v10554_v29, %v18724_v25  ;;  %v10660_v59 = vadd.f32 %v10652_v62, %v18499_v52  ;;  %v10714_v52 = vld [vmem:[%s18907_s11 + $0x30] sm:$0xff]  ;;  %v10715_v25 = vld [vmem:[%s18907_s11 + $0x38] sm:$0xff] }
0x14c7   : > { %v10600_v9 = vadd.f32 %v10599_v7, %v10598_v22  ;;  %v10626_v19 = vadd.f32 %v10625_v4, %v10589_v41  ;;  %v10653_v50 = vrot.slane %v10589_v41, 7  ;;  %v12865_v58 = vpack.c.bf16 %v10715_v25, %v10714_v52  ;;  %v11383_v52 = vld [vmem:[%s18908_s12] ss:$0 sm:$0xff] }
0x14c8   : > { %v10614_v39 = vadd.f32 %v10613_v33, %v10612_v60  ;;  %v10640_v48 = vadd.f32 %v10639_v17, %v10590_v27  ;;  %v10654_v35 = vrot.slane %v10590_v27, 7  ;;  %v10664_v20 = vmul.f32 0.5, %v10660_v59  ;;  %v10801_v59 = vld [vmem:[%s18909_s13] sm:$0xff] }
0x14c9   : > { %v10601_v1 = vrot.slane %v10600_v9, 2  ;;  %v10627_v12 = vrot.slane %v10626_v19, 4  ;;  %v10661_v6 = vadd.f32 %v10653_v50, %v18512_v16  ;;  %12866 = vmatpush3.bf16.msra.mxu0 %v12865_v58  ;;  %v19394_v27 = vmov 0.0  }
0x14ca   : > { %v10615_v37 = vrot.slane %v10614_v39, 2  ;;  %v10641_v11 = vrot.slane %v10640_v48, 4  ;;  %v10662_v63 = vadd.f32 %v10654_v35, %v18518_v14  ;;  %v10663_v14 = vmul.f32 0.5, %v10659_v5  ;;  %12879 = vmatprep.subr.bf16.mxu0 %v18975_v51  ;;  %v10805_v35 = vld [vmem:[%s18909_s13 + $0x20] sm:$0xff] }
0x14cb   : > { %v10628_v8 = vadd.f32 %v10627_v12, %v10626_v19  ;;  %v10602_v42 = vadd.f32 %v10601_v1, %v10600_v9  ;;  %v10665_v32 = vmul.f32 0.5, %v10661_v6  ;;  %v10802_v9 = vld [vmem:[%s18909_s13 + $0x8] sm:$0xff]  ;;  %v10803_v19 = vld [vmem:[%s18909_s13 + $0x10] sm:$0xff] }
0x14cc   : > { %v10642_v10 = vadd.f32 %v10641_v11, %v10640_v48  ;;  %v10616_v46 = vadd.f32 %v10615_v37, %v10614_v39  ;;  %v10666_v30 = vmul.f32 0.5, %v10662_v63  ;;  %v12868_v50 = vpack.c.bf16 %v10802_v9, %v10801_v59  ;;  %v10804_v39 = vld [vmem:[%s18909_s13 + $0x18] sm:$0xff]  ;;  %v10806_v1 = vld [vmem:[%s18909_s13 + $0x28] sm:$0xff]  ;;  %v10807_v6 = vld [vmem:[%s18909_s13 + $0x30] sm:$0xff] }
0x14cd   : > { %v10629_v36 = vrot.slane %v10628_v8, 2  ;;  %v10603_v55 = vrot.slane %v10602_v42, 1  ;;  %v12871_v48 = vpack.c.bf16 %v10804_v39, %v10803_v19  ;;  %v12874_v12 = vpack.c.bf16 %v10806_v1, %v10805_v35  ;;  %v10808_v37 = vld [vmem:[%s18909_s13 + $0x38] sm:$0xff]  ;;  %v10898_v63 = vld [vmem:[%s18911_s15] sm:$0xff] }
0x14ce   : > { %v10643_v16 = vrot.slane %v10642_v10, 2  ;;  %v10617_v54 = vrot.slane %v10616_v46, 1  ;;  %12869 = vmatpush3.bf16.msra.mxu1 %v12868_v50  ;;  %v12877_v11 = vpack.c.bf16 %v10808_v37, %v10807_v6 }
0x14cf   : > { %v10604_v56 = vadd.f32 %v10603_v55, %v10602_v42  ;;  %v10630_v23 = vadd.f32 %v10629_v36, %v10628_v8  ;;  %12870 = vmatprep.subr.bf16.mxu1 %v18975_v51  ;;  %v10899_v8 = vld [vmem:[%s18911_s15 + $0x8] sm:$0xff]  ;;  %v19395_v36 = vld [vmem:[#allocation26_spill] sm:$0xff] }
0x14d0   : > { %v10618_v18 = vadd.f32 %v10617_v54, %v10616_v46  ;;  %v10644_v28 = vadd.f32 %v10643_v16, %v10642_v10  ;;  %v12880_v42 = vpack.c.bf16 %v10899_v8, %v10898_v63  ;;  %v10900_v16 = vld [vmem:[%s18911_s15 + $0x10] sm:$0xff]  ;;  %v10901_v54 = vld [vmem:[%s18911_s15 + $0x18] sm:$0xff] }
0x14d1   : > { %v10667_v21 = vsub.f32 %v10604_v56, %v10663_v14  ;;  %v10631_v2 = vrot.slane %v10630_v23, 1  ;;  %v12883_v56 = vpack.c.bf16 %v10901_v54, %v10900_v16  ;;  %v10902_v14 = vld [vmem:[%s18911_s15 + $0x20] sm:$0xff] }
0x14d2   : > { %v10668_v43 = vsub.f32 %v10618_v18, %v10664_v20  ;;  %v10645_v0 = vrot.slane %v10644_v28, 1  ;;  %12872 = vmatpush3.bf16.msra.mxu1 %v12871_v48  ;;  %v10904_v20 = vld [vmem:[%s18911_s15 + $0x30] sm:$0xff] }
0x14d3   : > { %v10671_v3 = vmul.f32 0.013888889, %v10667_v21  ;;  %v10632_v40 = vadd.f32 %v10631_v2, %v10630_v23  ;;  %12873 = vmatprep.subr.bf16.mxu1 %v18975_v51  ;;  %v10903_v23 = vld [vmem:[%s18911_s15 + $0x28] sm:$0xff]  ;;  %v10906_v2 = vld [vmem:[%s18911_s15 + $0x40] sm:$0xff] }
0x14d4   : > { %v10672_v57 = vmul.f32 0.013888889, %v10668_v43  ;;  %v10646_v34 = vadd.f32 %v10645_v0, %v10644_v28  ;;  %v12886_v18 = vpack.c.bf16 %v10903_v23, %v10902_v14  ;;  %v10905_v28 = vld [vmem:[%s18911_s15 + $0x38] sm:$0xff]  ;;  %v10907_v43 = vld [vmem:[%s18911_s15 + $0x48] sm:$0xff] }
0x14d5   : > { %v10676_v4 = vrot.slane %v10671_v3, 7  ;;  %v10669_v26 = vsub.f32 %v10632_v40, %v10665_v32  ;;  %v12889_v21 = vpack.c.bf16 %v10905_v28, %v10904_v20  ;;  %v12892_v0 = vpack.c.bf16 %v10907_v43, %v10906_v2  ;;  %v10909_v40 = vld [vmem:[%s18911_s15 + $0x58] sm:$0xff] }
0x14d6   : > { %v10683_v61 = vrot.slane %v10672_v57, 5  ;;  %v10670_v44 = vsub.f32 %v10646_v34, %v10666_v30  ;;  %v10681_v53 = vrot.slane %v10672_v57, 6  ;;  %12875 = vmatpush3.bf16.msra.mxu1 %v12874_v12  ;;  %v10910_v57 = vld [vmem:[%s18911_s15 + $0x60] sm:$0xff]  ;;  %v10911_v34 = vld [vmem:[%s18911_s15 + $0x68] sm:$0xff] }
0x14d7   : > { %10677 = vrot.lane.b32.xlu0 %v10676_v4, %s13629_s22  ;;  %v10673_v45 = vmul.f32 0.013888889, %v10669_v26  ;;  %12876 = vmatprep.subr.bf16.mxu1 %v18975_v51  ;;  %v12898_v30 = vpack.c.bf16 %v10911_v34, %v10910_v57  ;;  %v10912_v4 = vld [vmem:[%s18911_s15 + $0x70] sm:$0xff]  ;;  %v10913_v26 = vld [vmem:[%s18911_s15 + $0x78] sm:$0xff] }
0x14d8   : > { %10684 = vrot.lane.b32.xlu1 %v10683_v61, %s13629_s22  ;;  %v10674_v15 = vmul.f32 0.013888889, %v10670_v44  ;;  %v12901_v61 = vpack.c.bf16 %v10913_v26, %v10912_v4  ;;  %v11385_v44 = vld [vmem:[%s18910_s14] ss:$0 sm:$0xff] }
0x14d9   : > { %v10690_v31 = vrot.slane %v10673_v45, 3  ;;  %v10688_v38 = vrot.slane %v10673_v45, 4 }
0x14da   : > { %v10697_v17 = vrot.slane %v10674_v15, 1  ;;  %v10695_v29 = vrot.slane %v10674_v15, 2  ;;  %12878 = vmatpush3.bf16.msra.mxu1 %v12877_v11 }
0x14db   : > { %10691 = vrot.lane.b32.xlu0 %v10690_v31, %s13629_s22 }
0x14dc   : > { %10698 = vrot.lane.b32.xlu1 %v10697_v17, %s13629_s22 }
0x1549   : > { %v10678_v13 = vpop.permute.xlu0 %10677 }
0x154a   : > { %v10701_v49 = vsel %vm1808_vm3, %v10671_v3, %v10678_v13  ;;  %v10685_v24 = vpop.permute.xlu1 %10684  ;;  %v10908_v3 = vld [vmem:[%s18911_s15 + $0x50] sm:$0xff] }
0x154b   : > { %v10702_v22 = vsel %vm19389_vm8, %v10701_v49, %v10681_v53  ;;  %v12895_v32 = vpack.c.bf16 %v10909_v40, %v10908_v3 }
0x154c   : > { %v10703_v47 = vsel %vm19390_vm6, %v10702_v22, %v10685_v24 }
0x154d   : > { %v10692_v60 = vpop.permute.xlu0 %10691  ;;  %v10704_v62 = vsel %vm19376_vm4, %v10703_v47, %v10688_v38 }
0x154e   : > { %v10705_v7 = vsel %vm19391_vm9, %v10704_v62, %v10692_v60  ;;  %v10699_v41 = vpop.permute.xlu1 %10698 }
0x154f   : > { %v10706_v5 = vsel %vm19392_vm5, %v10705_v7, %v10695_v29 }
0x1550   : > { %v10707_v33 = vsel %vm19393_vm12, %v10706_v5, %v10699_v41 }
0x1551   : > { %12339 = vmatmul.mubr.msk.f32.vlgmr.msra.gmra.mrb[82].mxu0 %vm2032_vm11, %v10707_v33 }
0x1552   : > { %12392 = vmatprep.mubr.msk.f32.mxu0 %vm13632_vm2, %v19394_v27  ;;  %12881 = vmatpush3.bf16.msra.mxu0 %v12880_v42  ;;  %vm10991_vm2 = vcmask 23552  }
0x1553   : > { %12882 = vmatprep.subr.bf16.mxu0 %v18975_v51 }
0x1556   : > { %12884 = vmatpush3.bf16.msra.mxu0 %v12883_v56 }
0x1557   : > { %12885 = vmatprep.subr.bf16.mxu0 %v18975_v51 }
0x155a   : > { %12887 = vmatpush3.bf16.msra.mxu0 %v12886_v18 }
0x155b   : > { %12888 = vmatprep.subr.bf16.mxu0 %v18975_v51 }
0x155e   : > { %12890 = vmatpush3.bf16.msra.mxu0 %v12889_v21 }
0x155f   : > { %12891 = vmatprep.subr.bf16.mxu0 %v18975_v51 }
0x1562   : > { %12893 = vmatpush3.bf16.msra.mxu0 %v12892_v0 }
0x1563   : > { %12894 = vmatprep.subr.bf16.mxu0 %v18975_v51 }
0x1566   : > { %12896 = vmatpush3.bf16.msra.mxu0 %v12895_v32 }
0x1567   : > { %12897 = vmatprep.subr.bf16.mxu0 %v18975_v51 }
0x156a   : > { %12899 = vmatpush3.bf16.msra.mxu0 %v12898_v30 }
0x156b   : > { %12900 = vmatprep.subr.bf16.mxu0 %v18975_v51  ;;  %v11387_v51 = vld [vmem:[%s18912_s16] ss:$0 sm:$0xff] }
0x156e   : > { %12902 = vmatpush3.bf16.msra.mxu0 %v12901_v61 }
0x1624   : > { %v10792_v25 = vpop.f32.mrb[82].mxu0 }
0x1625   : > { %v10793_v10 = vadd.f32 %v11383_v52, %v10792_v25  ;;  %v12340_v46 = vpop.f32.mrb[83].mxu0 }
0x1627   : > { %10797 = vrot.lane.b32.xlu0 %v10793_v10, %s13631_s25 }
0x1699   : > { %v10798_v58 = vpop.permute.xlu0 %10797 }
0x169a   : > { %v10800_v55 = vsel %vm1959_vm10, %v19395_v36, %v10798_v58 }
0x169b   : > { %12358 = vmatmul.mubr.msk.f32.vlgmr.msra.gmra.mrb[148].mxu1 %vm2032_vm11, %v10800_v55 }
0x176e   : > { %v10885_v45 = vpop.f32.mrb[148].mxu1 }
0x176f   : > { %v10886_v15 = vadd.f32 %v11385_v44, %v10885_v45  ;;  %v12359_v31 = vpop.f32.mrb[149].mxu1 }
0x1771   : > { %v10889_v17 = vmul.f32 %v10886_v15, %v10886_v15 }
0x1773   : > { %v10890_v13 = vmul.f32 %v10889_v17, %v10886_v15 }
0x1775   : > { %v10891_v53 = vmul.f32 0.044715, %v10890_v13 }
0x1777   : > { %v10892_v49 = vadd.f32 %v10891_v53, %v10886_v15 }
0x1779   : > { %v10893_v24 = vmul.f32 0.7978846, %v10892_v49 }
0x177b   : > { %13521 = vtanh.f32 %v10893_v24 }
0x1785   : > { %v13522_v22 = vpop.eup %13521 }
0x1786   : > { %v10895_v38 = vadd.f32 1.0, %v13522_v22 }
0x1788   : > { %v10896_v47 = vmul.f32 0.5, %v10895_v38 }
0x178a   : > { %v10897_v60 = vmul.f32 %v10896_v47, %v10886_v15 }
0x178c   : > { %12393 = vmatmul.mubr.f32.vlgmr.msra.gmra.mrb[104].mxu0 %v10897_v60 }
0x185f   : > { %v10987_v62 = vpop.f32.mrb[104].mxu0 }
0x1860   : > { %v10988_v29 = vadd.f32 %v11387_v51, %v10987_v62  ;;  %v12394_v7 = vpop.f32.mrb[105].mxu0 }
0x1862   : > { %10992 = vst.msk [vmem:[%s576_s30] sm:$0xff] %vm10991_vm2, %v10988_v29 }
0x1863 PF: > { %s19397_s20 = sld [smem:[#allocation9_spill]] }
0x1869   : > { %s29_s24 = sadd.s32 1, %s19397_s20  }
0x186a   : > { %p26_p5 = scmp.ge.s32.totalorder %s29_s24, 4  }
0x186c   :  { %28 = sbr.rel (!%p26_p5) target bundleno = 6 (0x6), region = 133 }
0x1873   :  { %11012 = vsyncpa [#allocation4], 1 }
0x1874   :  { %11014 = vsyncpa [#allocation4 + $0x1], 1 }
0x1875   :  { %11015 = vsyncpa [#allocation6], 1 }

</bundles_post_ra>
